<compile_context>
chip_gen: v6e
topology: v6e:2x2x1
jax: 0.10.0
libtpu: 0.0.40
codegen_flags: <defaults>
</compile_context>

<pallas_src>
import functools

import jax
import jax.numpy as jnp
from jax.experimental import pallas as pl
from jax.experimental.pallas import tpu as pltpu


# ---------------------------------------------------------------------------
# Model dimensions (EfficientNet-b0 head feature size + the exact regressor).
# ---------------------------------------------------------------------------
FC_FEATURES = 1280   # EfficientNet-b0 ._fc.in_features
HIDDEN = 1024        # nn.Linear(fc_features, 1024)
NUM_OUTPUTS = 5      # nn.Linear(1024, num_outputs)
OUT_PAD = 128        # lane-dense padded output width (sliced back to 5)
HW_TILE_MAX = 1024   # v7x-safe (64 MiB VMEM); could go 1568/3136 on v5e/v6e


def _round_up(n, m):
    return ((n + m - 1) // m) * m


# ---------------------------------------------------------------------------
# Fused kernel: stand-in backbone head (1x1 conv + swish) + GAP + regressor.
# Grid = (batch tiles ["parallel"], hw tiles ["arbitrary" / reduction]).
# NOTE: the hw (reduction) axis MUST stay the LAST grid axis — the output /
# accumulator block index is constant along it, so accumulate-then-finalize
# relies on consecutive hw steps revisiting the same block.
# ---------------------------------------------------------------------------
def _fused_kernel(x_ref, whT_ref, bh_ref, w1_ref, b1_ref, w2_ref, b2_ref,
                  o_ref, acc_ref, *, b_tile, hw_tile, hw_true, compute_dtype):
    """x_ref  : [b_tile, C, hw_tile]  pixels; HW on the lane axis (no transpose)
       whT_ref: [C, F]                stand-in 1x1 head-conv weight (transposed)
       bh_ref : [1, F]
       w1_ref : [F, HIDDEN]   b1_ref: [1, HIDDEN]
       w2_ref : [HIDDEN, OUT_PAD]  b2_ref: [1, OUT_PAD]   (zero-padded cols 5..127)
       o_ref  : [1, b_tile, OUT_PAD]
       acc_ref: [b_tile, F] f32       running GAP accumulator (F lane-dense)
    """
    hi = pl.program_id(1)

    @pl.when(hi == 0)
    def _init():
        acc_ref[...] = jnp.zeros_like(acc_ref)

    # GAP as a (1/HW)-scaled, tail-masked ones-row matmul: the HW reduction
    # rides the MXU (K = hw_tile, N = 1280) and the [1, F] partial lands
    # lane-dense in the accumulator.  Padded pixel columns (>= hw_true) get a
    # zero weight so they never contribute.  Hoisted out of the per-image loop.
    col = jax.lax.broadcasted_iota(jnp.int32, (1, hw_tile), 1) + hi * hw_tile
    scale_row = jnp.where(col < hw_true, 1.0 / hw_true, 0.0).astype(compute_dtype)
    bias = bh_ref[...]                                   # hoisted (no re-broadcast)

    for b in range(b_tile):                              # small static unroll
        xb = x_ref[b]                                    # [C, hw_tile]
        # Contract C (dim 0 of both operands): h is [hw_tile, F], F lane-dense.
        # (K=3 is tiny on the MXU but the head is EUP/store-bound, not MXU-bound.)
        h = jax.lax.dot_general(
            xb, whT_ref[...],
            dimension_numbers=(((0,), (0,)), ((), ())),
            preferred_element_type=jnp.float32)
        h = (h + bias).astype(compute_dtype)
        h = h * jax.nn.sigmoid(h)                        # swish (EUP)
        part = jnp.dot(scale_row, h,
                       preferred_element_type=jnp.float32)    # [1, F]
        acc_ref[b:b + 1, :] += part                      # lane-dense update

    @pl.when(hi == pl.num_programs(1) - 1)
    def _finalize():
        # Fused regressor: Linear(1280,1024) -> ReLU -> Linear(1024,5 pad 128).
        feat = acc_ref[...].astype(compute_dtype)        # [b_tile, F]
        z = jnp.dot(feat, w1_ref[...],
                    preferred_element_type=jnp.float32) + b1_ref[...]
        z = jnp.maximum(z, 0.0).astype(compute_dtype)    # [b_tile, HIDDEN]
        out = jnp.dot(z, w2_ref[...],
                      preferred_element_type=jnp.float32) + b2_ref[...]
        o_ref[0] = out.astype(o_ref.dtype)               # [b_tile, OUT_PAD]


# ---------------------------------------------------------------------------
# Wrapper
# ---------------------------------------------------------------------------
def nutrient_predictor(x_nchw, params, *, use_bf16=False):
    """x_nchw: [B, C, H, W] float32 -> [B, NUM_OUTPUTS] float32.

    use_bf16: on v6e/v7x cast the swish intermediate and matmul operands to
    bfloat16 (f32 accumulation kept).  Default False so validation against the
    f32 reference stays tight; keep False on v5e (no bf16 VPU/EUP).
    """
    B, C, H, W = x_nchw.shape
    HW = H * W
    x = x_nchw.reshape(B, C, HW)        # plain reshape; HW stays on the lane axis

    # Batch tiling: 2 images/step only when that still leaves an even number of
    # (>= 2) parallel grid steps, so the v7x megacore stays load-balanced.
    b_tile = 2 if (B >= 4 and B % 2 == 0 and (B // 2) % 2 == 0) else 1
    nb = B // b_tile

    # HW tiling: lane-multiple tile, capped for v7x's 64 MiB VMEM.  If HW does
    # not divide the tile, zero-pad the pixel axis (masked out of the GAP).
    hw_tile = min(HW_TILE_MAX, _round_up(HW, 128))
    hw_pad = _round_up(HW, hw_tile)
    n_hw = hw_pad // hw_tile
    if hw_pad != HW:
        x = jnp.pad(x, ((0, 0), (0, 0), (0, hw_pad - HW)))

    compute_dtype = jnp.bfloat16 if use_bf16 else jnp.float32

    # Parameter prep (tiny XLA ops).  wh passed as [C, F]: lane-dense, only
    # sublane-padded 3->8 instead of lane-padded 3->128.
    whT = jnp.transpose(params["wh"]).astype(jnp.float32)             # [C, F]
    bh = params["bh"].reshape(1, FC_FEATURES).astype(jnp.float32)
    w1 = params["w1"].astype(compute_dtype)                           # [F, HIDDEN]
    b1 = params["b1"].reshape(1, HIDDEN).astype(jnp.float32)
    w2p = jnp.zeros((HIDDEN, OUT_PAD), compute_dtype).at[:, :NUM_OUTPUTS].set(
        params["w2"].astype(compute_dtype))
    b2p = jnp.zeros((1, OUT_PAD), jnp.float32).at[:, :NUM_OUTPUTS].set(
        params["b2"].reshape(1, NUM_OUTPUTS).astype(jnp.float32))

    kernel = functools.partial(_fused_kernel, b_tile=b_tile, hw_tile=hw_tile,
                               hw_true=HW, compute_dtype=compute_dtype)

    out_pad = pl.pallas_call(
        kernel,
        out_shape=jax.ShapeDtypeStruct((nb, b_tile, OUT_PAD), jnp.float32),
        grid=(nb, n_hw),
        in_specs=[
            pl.BlockSpec((b_tile, C, hw_tile), lambda bi, hi: (bi, 0, hi)),
            pl.BlockSpec((C, FC_FEATURES), lambda bi, hi: (0, 0)),
            pl.BlockSpec((1, FC_FEATURES), lambda bi, hi: (0, 0)),
            pl.BlockSpec((FC_FEATURES, HIDDEN), lambda bi, hi: (0, 0)),
            pl.BlockSpec((1, HIDDEN), lambda bi, hi: (0, 0)),
            pl.BlockSpec((HIDDEN, OUT_PAD), lambda bi, hi: (0, 0)),
            pl.BlockSpec((1, OUT_PAD), lambda bi, hi: (0, 0)),
        ],
        out_specs=pl.BlockSpec((1, b_tile, OUT_PAD), lambda bi, hi: (bi, 0, 0)),
        scratch_shapes=[pltpu.VMEM((b_tile, FC_FEATURES), jnp.float32)],
        compiler_params=pltpu.CompilerParams(
            dimension_semantics=("parallel", "arbitrary"),
            vmem_limit_bytes=48 << 20,   # headroom under v7x's 64 MiB VMEM
        ),
    )(x, whT, bh, w1, b1, w2p, b2p)

    return out_pad.reshape(B, OUT_PAD)[:, :NUM_OUTPUTS]


def init_params(key, in_channels):
    """Deterministic synthetic parameters (shapes dictated by the module)."""
    ks = jax.random.split(key, 6)
    s = 0.02
    return {
        "wh": s * jax.random.normal(ks[0], (FC_FEATURES, in_channels),
                                    jnp.float32),
        "bh": s * jax.random.normal(ks[1], (FC_FEATURES, 1), jnp.float32),
        "w1": s * jax.random.normal(ks[2], (FC_FEATURES, HIDDEN), jnp.float32),
        "b1": s * jax.random.normal(ks[3], (1, HIDDEN), jnp.float32),
        "w2": s * jax.random.normal(ks[4], (HIDDEN, NUM_OUTPUTS), jnp.float32),
        "b2": s * jax.random.normal(ks[5], (1, NUM_OUTPUTS), jnp.float32),
    }


def _reference(x_nchw, params):
    """Pure-JAX reference for a sanity check."""
    B, C, H, W = x_nchw.shape
    x = x_nchw.reshape(B, C, H * W)
    h = jnp.einsum("fc,bcp->bfp", params["wh"], x) + params["bh"][None, :, :]
    h = h * jax.nn.sigmoid(h)                        # swish
    feat = jnp.mean(h, axis=2)                       # [B, F]
    z = jnp.maximum(feat @ params["w1"] + params["b1"], 0.0)
    return z @ params["w2"] + params["b2"]


if __name__ == "__main__":
    key = jax.random.PRNGKey(0)
    k_x, k_p, k_x2 = jax.random.split(key, 3)

    # Test 1: baseline small shape (b_tile=1, exact HW tiling).
    B, C, H, W = 2, 3, 16, 16
    x = jax.random.normal(k_x, (B, C, H, W), jnp.float32)
    params = init_params(k_p, C)

    out = jax.block_until_ready(nutrient_predictor(x, params))
    assert out.shape == (B, NUM_OUTPUTS), out.shape
    ref = jax.block_until_ready(_reference(x, params))
    assert jnp.allclose(out, ref, atol=1e-4, rtol=1e-3), (out, ref)

    # Test 2: exercises the b_tile=2 unroll and the HW-padding + GAP-mask path
    # (15*15 = 225 pixels, padded to a 256-wide tile).
    B2, H2, W2 = 4, 15, 15
    x2 = jax.random.normal(k_x2, (B2, C, H2, W2), jnp.float32)
    out2 = jax.block_until_ready(nutrient_predictor(x2, params))
    assert out2.shape == (B2, NUM_OUTPUTS), out2.shape
    ref2 = jax.block_until_ready(_reference(x2, params))
    assert jnp.allclose(out2, ref2, atol=1e-4, rtol=1e-3), (out2, ref2)

    print("KERNEL_OK")
</pallas_src>

<mosaic_0001>
module attributes {stable_mosaic.version = 11 : i64} {
  func.func @_fused_kernel(%arg0: i32, %arg1: i32, %arg2: memref<1x3x256xf32, #tpu.memory_space<vmem>>, %arg3: memref<3x1280xf32, #tpu.memory_space<vmem>>, %arg4: memref<1x1280xf32, #tpu.memory_space<vmem>>, %arg5: memref<1280x1024xf32, #tpu.memory_space<vmem>>, %arg6: memref<1x1024xf32, #tpu.memory_space<vmem>>, %arg7: memref<1024x128xf32, #tpu.memory_space<vmem>>, %arg8: memref<1x128xf32, #tpu.memory_space<vmem>>, %arg9: memref<1x1x128xf32, #tpu.memory_space<vmem>>, %arg10: memref<1x1280xf32, #tpu.memory_space<vmem>>) attributes {dimension_semantics = [#tpu.dimension_semantics<parallel>, #tpu.dimension_semantics<arbitrary>], iteration_bounds = array<i64: 2, 1>, scalar_prefetch = 0 : i64, scratch_operands = 1 : i64, tpu.core_type = #tpu.core_type<tc>, window_params = [{transform_indices = @transform_0, window_bounds = array<i64: 1, 3, 256>}, {pipeline_mode = #tpu.pipeline_mode<synchronous>, transform_indices = @transform_1, window_bounds = array<i64: 3, 1280>}, {pipeline_mode = #tpu.pipeline_mode<synchronous>, transform_indices = @transform_2, window_bounds = array<i64: 1, 1280>}, {pipeline_mode = #tpu.pipeline_mode<synchronous>, transform_indices = @transform_3, window_bounds = array<i64: 1280, 1024>}, {pipeline_mode = #tpu.pipeline_mode<synchronous>, transform_indices = @transform_4, window_bounds = array<i64: 1, 1024>}, {pipeline_mode = #tpu.pipeline_mode<synchronous>, transform_indices = @transform_5, window_bounds = array<i64: 1024, 128>}, {pipeline_mode = #tpu.pipeline_mode<synchronous>, transform_indices = @transform_6, window_bounds = array<i64: 1, 128>}, {transform_indices = @transform_7, window_bounds = array<i64: 1, 1, 128>}]} {
    %c0_i32 = arith.constant 0 : i32
    %0 = arith.cmpi eq, %arg1, %c0_i32 : i32
    %1 = arith.extui %0 : i1 to i32
    %c0_i32_0 = arith.constant 0 : i32
    %2 = arith.cmpi ne, %1, %c0_i32_0 : i32
    scf.if %2 {
      %cst_18 = arith.constant 0.000000e+00 : f32
      %32 = vector.broadcast %cst_18 : f32 to vector<1x1280xf32>
      %c0_19 = arith.constant 0 : index
      %c0_20 = arith.constant 0 : index
      %33 = vector.load %arg10[%c0_19, %c0_20] : memref<1x1280xf32, #tpu.memory_space<vmem>>, vector<1x1280xf32>
      tpu.vector_store %arg10[%c0_19, %c0_20], %32 {strides = array<i32>} : memref<1x1280xf32, #tpu.memory_space<vmem>>, vector<1x1280xf32>,
    } else {
    }
    %3 = tpu.iota {dimensions = array<i32: 1>} : vector<1x256xi32>
    %c256_i32 = arith.constant 256 : i32
    %4 = arith.muli %arg1, %c256_i32 : i32
    %5 = vector.broadcast %4 : i32 to vector<1x256xi32>
    %6 = arith.addi %3, %5 : vector<1x256xi32>
    %c256_i32_1 = arith.constant 256 : i32
    %7 = vector.broadcast %c256_i32_1 : i32 to vector<1x256xi32>
    %8 = arith.cmpi slt, %6, %7 : vector<1x256xi32>
    %cst = arith.constant 3.906250e-03 : f32
    %cst_2 = arith.constant 0.000000e+00 : f32
    %9 = vector.broadcast %cst : f32 to vector<1x256xf32>
    %10 = vector.broadcast %cst_2 : f32 to vector<1x256xf32>
    %11 = arith.select %8, %9, %10 : vector<1x256xi1>, vector<1x256xf32>
    %c0 = arith.constant 0 : index
    %c0_3 = arith.constant 0 : index
    %12 = vector.load %arg4[%c0, %c0_3] : memref<1x1280xf32, #tpu.memory_space<vmem>>, vector<1x1280xf32>
    %c0_4 = arith.constant 0 : index
    %c0_5 = arith.constant 0 : index
    %c0_6 = arith.constant 0 : index
    %13 = vector.load %arg2[%c0_4, %c0_5, %c0_6] : memref<1x3x256xf32, #tpu.memory_space<vmem>>, vector<1x3x256xf32>
    %14 = vector.shape_cast %13 : vector<1x3x256xf32> to vector<3x256xf32>
    %c0_7 = arith.constant 0 : index
    %c0_8 = arith.constant 0 : index
    %15 = vector.load %arg3[%c0_7, %c0_8] : memref<3x1280xf32, #tpu.memory_space<vmem>>, vector<3x1280xf32>
    %cst_9 = arith.constant dense<0.000000e+00> : vector<256x1280xf32>
    %16 = tpu.matmul %14, %15, %cst_9 {dimension_numbers = #tpu.dot_dimension_numbers<[0], [0], [1], [1], [0, 1, 1, 1], [], []>} : vector<3x256xf32>, vector<3x1280xf32>, vector<256x1280xf32> -> vector<256x1280xf32>
    %17 = vector.broadcast %12 : vector<1x1280xf32> to vector<256x1280xf32>
    %18 = arith.addf %16, %17 : vector<256x1280xf32>
    %19 = arith.negf %18 : vector<256x1280xf32>
    %20 = math.exp %19 : vector<256x1280xf32>
    %cst_10 = arith.constant 1.000000e+00 : f32
    %21 = vector.broadcast %cst_10 : f32 to vector<256x1280xf32>
    %22 = arith.addf %21, %20 : vector<256x1280xf32>
    %23 = arith.divf %21, %22 : vector<256x1280xf32>
    %24 = arith.mulf %18, %23 : vector<256x1280xf32>
    %cst_11 = arith.constant dense<0.000000e+00> : vector<1x1280xf32>
    %25 = tpu.matmul %11, %24, %cst_11 {dimension_numbers = #tpu.dot_dimension_numbers<[1], [0], [0], [1], [0, 0, 1, 1], [], []>} : vector<1x256xf32>, vector<256x1280xf32>, vector<1x1280xf32> -> vector<1x1280xf32>
    %c0_12 = arith.constant 0 : index
    %c0_13 = arith.constant 0 : index
    %26 = vector.load %arg10[%c0_12, %c0_13] : memref<1x1280xf32, #tpu.memory_space<vmem>>, vector<1x1280xf32>
    %27 = arith.addf %26, %25 : vector<1x1280xf32>
    %c0_14 = arith.constant 0 : index
    %c0_15 = arith.constant 0 : index
    %28 = vector.load %arg10[%c0_14, %c0_15] : memref<1x1280xf32, #tpu.memory_space<vmem>>, vector<1x1280xf32>
    tpu.vector_store %arg10[%c0_14, %c0_15], %27 {strides = array<i32>} : memref<1x1280xf32, #tpu.memory_space<vmem>>, vector<1x1280xf32>,
    %c0_i32_16 = arith.constant 0 : i32
    %29 = arith.cmpi eq, %arg1, %c0_i32_16 : i32
    %30 = arith.extui %29 : i1 to i32
    %c0_i32_17 = arith.constant 0 : i32
    %31 = arith.cmpi ne, %30, %c0_i32_17 : i32
    scf.if %31 {
      %c0_18 = arith.constant 0 : index
      %c0_19 = arith.constant 0 : index
      %32 = vector.load %arg10[%c0_18, %c0_19] : memref<1x1280xf32, #tpu.memory_space<vmem>>, vector<1x1280xf32>
      %c0_20 = arith.constant 0 : index
      %c0_21 = arith.constant 0 : index
      %33 = vector.load %arg5[%c0_20, %c0_21] : memref<1280x1024xf32, #tpu.memory_space<vmem>>, vector<1280x1024xf32>
      %cst_22 = arith.constant dense<0.000000e+00> : vector<1x1024xf32>
      %34 = tpu.matmul %32, %33, %cst_22 {dimension_numbers = #tpu.dot_dimension_numbers<[1], [0], [0], [1], [0, 0, 1, 1], [], []>} : vector<1x1280xf32>, vector<1280x1024xf32>, vector<1x1024xf32> -> vector<1x1024xf32>
      %c0_23 = arith.constant 0 : index
      %c0_24 = arith.constant 0 : index
      %35 = vector.load %arg6[%c0_23, %c0_24] : memref<1x1024xf32, #tpu.memory_space<vmem>>, vector<1x1024xf32>
      %36 = arith.addf %34, %35 : vector<1x1024xf32>
      %cst_25 = arith.constant 0.000000e+00 : f32
      %37 = vector.broadcast %cst_25 : f32 to vector<1x1024xf32>
      %38 = arith.maximumf %36, %37 : vector<1x1024xf32>
      %c0_26 = arith.constant 0 : index
      %c0_27 = arith.constant 0 : index
      %39 = vector.load %arg7[%c0_26, %c0_27] : memref<1024x128xf32, #tpu.memory_space<vmem>>, vector<1024x128xf32>
      %cst_28 = arith.constant dense<0.000000e+00> : vector<1x128xf32>
      %40 = tpu.matmul %38, %39, %cst_28 {dimension_numbers = #tpu.dot_dimension_numbers<[1], [0], [0], [1], [0, 0, 1, 1], [], []>} : vector<1x1024xf32>, vector<1024x128xf32>, vector<1x128xf32> -> vector<1x128xf32>
      %c0_29 = arith.constant 0 : index
      %c0_30 = arith.constant 0 : index
      %41 = vector.load %arg8[%c0_29, %c0_30] : memref<1x128xf32, #tpu.memory_space<vmem>>, vector<1x128xf32>
      %42 = arith.addf %40, %41 : vector<1x128xf32>
      %c0_31 = arith.constant 0 : index
      %c0_32 = arith.constant 0 : index
      %c0_33 = arith.constant 0 : index
      %43 = vector.load %arg9[%c0_31, %c0_32, %c0_33] : memref<1x1x128xf32, #tpu.memory_space<vmem>>, vector<1x1x128xf32>
      %44 = vector.shape_cast %43 : vector<1x1x128xf32> to vector<1x128xf32>
      %45 = vector.shape_cast %42 : vector<1x128xf32> to vector<1x1x128xf32>
      tpu.vector_store %arg9[%c0_31, %c0_32, %c0_33], %45 {strides = array<i32>} : memref<1x1x128xf32, #tpu.memory_space<vmem>>, vector<1x1x128xf32>,
    } else {
    }
    return
  }
  func.func @transform_0(%arg0: i32, %arg1: i32) -> (i32, i32, i32) {
    %c0_i32 = arith.constant 0 : i32
    %c0_i32_0 = arith.constant 0 : i32
    return %arg0, %c0_i32, %arg1 : i32, i32, i32
  }
  func.func @transform_1(%arg0: i32, %arg1: i32) -> (i32, i32) {
    %c0_i32 = arith.constant 0 : i32
    %c0_i32_0 = arith.constant 0 : i32
    %c0_i32_1 = arith.constant 0 : i32
    return %c0_i32, %c0_i32_0 : i32, i32
  }
  func.func @transform_2(%arg0: i32, %arg1: i32) -> (i32, i32) {
    %c0_i32 = arith.constant 0 : i32
    %c0_i32_0 = arith.constant 0 : i32
    %c0_i32_1 = arith.constant 0 : i32
    return %c0_i32, %c0_i32_0 : i32, i32
  }
  func.func @transform_3(%arg0: i32, %arg1: i32) -> (i32, i32) {
    %c0_i32 = arith.constant 0 : i32
    %c0_i32_0 = arith.constant 0 : i32
    %c0_i32_1 = arith.constant 0 : i32
    return %c0_i32, %c0_i32_0 : i32, i32
  }
  func.func @transform_4(%arg0: i32, %arg1: i32) -> (i32, i32) {
    %c0_i32 = arith.constant 0 : i32
    %c0_i32_0 = arith.constant 0 : i32
    %c0_i32_1 = arith.constant 0 : i32
    return %c0_i32, %c0_i32_0 : i32, i32
  }
  func.func @transform_5(%arg0: i32, %arg1: i32) -> (i32, i32) {
    %c0_i32 = arith.constant 0 : i32
    %c0_i32_0 = arith.constant 0 : i32
    %c0_i32_1 = arith.constant 0 : i32
    return %c0_i32, %c0_i32_0 : i32, i32
  }
  func.func @transform_6(%arg0: i32, %arg1: i32) -> (i32, i32) {
    %c0_i32 = arith.constant 0 : i32
    %c0_i32_0 = arith.constant 0 : i32
    %c0_i32_1 = arith.constant 0 : i32
    return %c0_i32, %c0_i32_0 : i32, i32
  }
  func.func @transform_7(%arg0: i32, %arg1: i32) -> (i32, i32, i32) {
    %c0_i32 = arith.constant 0 : i32
    %c0_i32_0 = arith.constant 0 : i32
    %c0_i32_1 = arith.constant 0 : i32
    return %arg0, %c0_i32, %c0_i32_0 : i32, i32, i32
  }
}

</mosaic_0001>

<bundles_post_ra>
// kernel: tpu_custom_call.1
= control target key start
LH: loop header
LB: loop body
LE: loop exit
PB: predicated region body
PF: predicated region fallthrough
CT: control target
= control target key end

     0   :  { %s14627_s0 = inlined_call_operand.vmem [shape: f32[2,3,256], index: 0, kind: input, shape index: {}]   ;;  %s14628_s1 = inlined_call_operand.hbm [shape: f32[3,1280], index: 1, kind: input, shape index: {}]   ;;  %s14629_s2 = inlined_call_operand.hbm [shape: f32[1,1280], index: 2, kind: input, shape index: {}]   ;;  %s14630_s3 = inlined_call_operand.hbm [shape: f32[1280,1024], index: 3, kind: input, shape index: {}]   ;;  %s14631_s4 = inlined_call_operand.hbm [shape: f32[1,1024], index: 4, kind: input, shape index: {}]   ;;  %s14632_s5 = inlined_call_operand.hbm [shape: f32[1024,128], index: 5, kind: input, shape index: {}]   ;;  %s14633_s6 = inlined_call_operand.hbm [shape: f32[1,128], index: 6, kind: input, shape index: {}]   ;;  %s14634_s7 = inlined_call_operand.hbm [shape: f32[2,1,128], index: 7, kind: output, shape index: {}]  }
   0x1   :  { %14885 = sst [smem:[#allocation221_spill]] %s14628_s1 }
   0x2   :  { %14886 = sst [smem:[#allocation222_spill]] %s14629_s2 }
   0x3   :  { %12 = vsyncpa [#allocation4], 0 }
   0x4   :  { %13 = vsyncpa [#allocation7], 0 }
   0x5   :  { %14 = vsyncpa [#allocation10], 0 }
   0x6   :  { %15 = vsyncpa [#allocation13], 0 }
   0x7   :  { %16 = vsyncpa [#allocation5], 0 }
   0x8   :  { %18 = vsyncpa [#allocation5 + $0x1], 0  ;;  %s10352_s24 = smov 0   ;;  %s10354_s25 = smov 0  }
   0x9   :  { %s10356_s26 = smov 0   ;;  %s10358_s27 = smov 0  }
   0xa   :  { %s10360_s28 = smov 0   ;;  %s10362_s29 = smov 0  }
   0xb LB: > { %s7985_s30 = sadd.s32 4294967295, %s10296_s29   ;;  %s7986_s8 = sadd.s32 4294967294, %s10296_s29   ;;  %s10296_s29 = sphi %s10362_s29, %s24_s29   ;;  %s10292_s28 = sphi %s10360_s28, %s15918_s28   ;;  %s10288_s27 = sphi %s10358_s27, %s15917_s27   ;;  %s10284_s26 = sphi %s10356_s26, %s15916_s26   ;;  %s10280_s25 = sphi %s10354_s25, %s15915_s25   ;;  %s10276_s24 = sphi %s10352_s24, %s15914_s24  }
   0xc   : > { %s36_s9 = sadd.s32 1, %s10292_s28  ;;  %s197_s10 = sadd.s32 1, %s10284_s26 }
   0xd   : > { %p38_p0 = scmp.ge.s32.totalorder %s36_s9, 2  ;;  %p207_p1 = scmp.ne.s32.totalorder %s10284_s26, %s10280_s25 }
   0xe   : > { %p208_p2 = scmp.eq.s32.totalorder %s7985_s30, 1  ;;  %p213_p3 = scmp.ne.s32.totalorder %s10280_s25, %s10276_s24 }
   0xf   : > { %s15920_s9 = smov (%p38_p0, %s36_s9), 0  ;;  %p214_p5 = scmp.eq.s32.totalorder %s7986_s8, 1 }
  0x10   : > { %p10392_p4 = por %p208_p2, %p207_p1  ;;  %s194_s12 = ssub.s32 %s10292_s28, %s15920_s9 }
  0x11   : > { %p7987_p6 = scmp.ge.s32.totalorder %s10296_s29, 1  ;;  %p195_p7 = scmp.eq.s32.totalorder %s194_s12, 0 }
  0x12   : > { %s14887_s11 = scalar_select %p10392_p4, 1, 0 }
  0x13   : > { %p10399_p8 = por %p214_p5, %p213_p3  ;;  %p221_p9 = scmp.lt.s32.totalorder %s10296_s29, 3 }
  0x14   : > { %s10405_s14 = scalar_select %p195_p7, %s10284_s26, %s197_s10  }
  0x15   : > { %s14888_s13 = scalar_select %p10399_p8, 1, 0 }
  0x16   : > { %p10407_p10 = pnand %p7987_p6, %p221_p9  ;;  %p10411_p11 = scmp.eq.s32.totalorder %s7985_s30, 0 }
  0x17   : > { %s10298_s17 = smov [#allocation6]   ;;  %s10299_s19 = smov [#allocation9]  }
  0x18   : > { %s14889_s15 = scalar_select %p10407_p10, 1, 0 }
  0x19   : > { %s14890_s16 = scalar_select %p10411_p11, 1, 0 }
  0x1a   : > { %p8664_p12 = pneg %p10407_p10  ;;  %s245_s18 = sshll.u32 %s10298_s17, 4  ;;  %s246_s18 = int_to_ptr.vmem [resolvable:$true] %s245_s18 }
  0x1b   : > { %s269_s20 = sshll.u32 %s10299_s19, 4  ;;  %s10059_s23 = scalar_lea.vmem %s246_s18, 160  ;;  %s270_s20 = int_to_ptr.vmem [resolvable:$true] %s269_s20 }
  0x1c   : > { %p10419_p13 = pnand %p10411_p11, %p8664_p12  ;;  %p10060_p1 = scmp.ne.s32.totalorder %s246_s18, %s10059_s23 }
  0x1d   : > { %p10067_p5 = scmp.lt.s32.totalorder %s246_s18, %s246_s18  ;;  %p10068_p6 = scmp.lt.s32.totalorder %s10059_s23, %s10059_s23 }
  0x1e   : > { %p10425_p0 = pneg %p10419_p13 }
  0x1f   : > { %p10069_p7 = por %p10068_p6, %p10067_p5 }
  0x20   : > { %p10062_p2 = pnand %p10060_p1, %p10425_p0 }
  0x22   : > { %p10063_p3 = pneg %p10062_p2 }
  0x24   : > { %p10070_p9 = pnand %p10069_p7, %p10063_p3 }
  0x26   : > { %10073 = shalt.err (!%p10070_p9)
}
  0x27   : > { %s14893_s2 = sld [smem:[#allocation222_spill]]  ;;  %s10085_s10 = scalar_lea.vmem %s270_s20, 128 }
  0x28   : > { %p10086_p12 = scmp.ne.s32.totalorder %s270_s20, %s10085_s10  ;;  %p10093_p11 = scmp.lt.s32.totalorder %s270_s20, %s270_s20 }
  0x29   : > { %p10094_p1 = scmp.lt.s32.totalorder %s10085_s10, %s10085_s10 }
  0x2a   : > { %p10088_p8 = pnand %p10086_p12, %p10425_p0 }
  0x2b   : > { %p10095_p2 = por %p10094_p1, %p10093_p11 }
  0x2c   : > { %p10089_p4 = pneg %p10088_p8 }
  0x2d   : > { %8670 = dma.hbm_to_vmem [thread:$0]  (!%p10419_p13), %s14893_s2, 160, %s246_s18, [#allocation7]  }
  0x2e   : > { %p10096_p10 = pnand %p10095_p2, %p10089_p4 }
  0x30   : > { %10099 = shalt.err (!%p10096_p10)
}
  0x31   : > { %8676 = dma.hbm_to_vmem [thread:$0]  (!%p10419_p13), %s14631_s4, 128, %s270_s20, [#allocation10]  }
  0x32   : > { %s10300_s19 = smov [#allocation3]   ;;  %s10301_s18 = smov [#allocation8]  }
  0x33   : > { %s234_s23 = sshll.u32 %s10300_s19, 4  ;;  %s255_s30 = sshll.u32 %s10301_s18, 4  ;;  %s235_s23 = int_to_ptr.vmem [resolvable:$true] %s234_s23  ;;  %s256_s30 = int_to_ptr.vmem [resolvable:$true] %s255_s30 }
  0x34   : > { %s10111_s8 = scalar_lea.vmem %s235_s23, 640  ;;  %p10119_p11 = scmp.lt.s32.totalorder %s235_s23, %s235_s23 }
  0x35   : > { %p10112_p3 = scmp.ne.s32.totalorder %s235_s23, %s10111_s8  ;;  %p10120_p4 = scmp.lt.s32.totalorder %s10111_s8, %s10111_s8 }
  0x37   : > { %p10114_p8 = pnand %p10112_p3, %p10425_p0  ;;  %p10121_p10 = por %p10120_p4, %p10119_p11 }
  0x39   : > { %p10115_p5 = pneg %p10114_p8 }
  0x3b   : > { %p10122_p6 = pnand %p10121_p10, %p10115_p5 }
  0x3d   : > { %10125 = shalt.err (!%p10122_p6)
}
  0x3e   : > { %s14894_s1 = sld [smem:[#allocation221_spill]]  ;;  %s10137_s20 = scalar_lea.vmem %s256_s30, 163840 }
  0x3f   : > { %p10138_p7 = scmp.ne.s32.totalorder %s256_s30, %s10137_s20  ;;  %p10145_p1 = scmp.lt.s32.totalorder %s256_s30, %s256_s30 }
  0x40   : > { %p10146_p2 = scmp.lt.s32.totalorder %s10137_s20, %s10137_s20 }
  0x41   : > { %p10140_p9 = pnand %p10138_p7, %p10425_p0 }
  0x42   : > { %p10147_p3 = por %p10146_p2, %p10145_p1 }
  0x43   : > { %p10141_p12 = pneg %p10140_p9 }
  0x44   : > { %8667 = dma.hbm_to_vmem [thread:$0]  (!%p10419_p13), %s14894_s1, 640, %s235_s23, [#allocation4]  }
  0x45   : > { %p10148_p8 = pnand %p10147_p3, %p10141_p12 }
  0x47   : > { %10151 = shalt.err (!%p10148_p8)
}
  0x48   : > { %s10302_s17 = smov 1024   ;;  %s10303_s19 = smov 64  }
  0x49   : > { %8673 = dma.hbm_to_vmem [thread:$0]  (!%p10419_p13), %s14630_s3, 163840, %s256_s30, [#allocation7], %s10302_s17, %s10302_s17, %s10303_s19  }
  0x4a   : > { %s10304_s23 = smov [#allocation11]  }
  0x4b   : > { %s279_s10 = sshll.u32 %s10304_s23, 4  ;;  %s280_s10 = int_to_ptr.vmem [resolvable:$true] %s279_s10 }
  0x4c   : > { %s10163_s12 = scalar_lea.vmem %s280_s10, 16384  ;;  %p10171_p10 = scmp.lt.s32.totalorder %s280_s10, %s280_s10 }
  0x4d   : > { %p10164_p5 = scmp.ne.s32.totalorder %s280_s10, %s10163_s12  ;;  %p10172_p6 = scmp.lt.s32.totalorder %s10163_s12, %s10163_s12 }
  0x4f   : > { %p10166_p11 = pnand %p10164_p5, %p10425_p0  ;;  %p10173_p7 = por %p10172_p6, %p10171_p10 }
  0x51   : > { %p10167_p4 = pneg %p10166_p11 }
  0x53   : > { %p10174_p9 = pnand %p10173_p7, %p10167_p4 }
  0x55   : > { %10177 = shalt.err (!%p10174_p9)
}
  0x56   : > { %s10305_s20 = smov 128   ;;  %s10306_s1 = smov 8  }
  0x57   : > { %8679 = dma.hbm_to_vmem [thread:$0]  (!%p10419_p13), %s14632_s5, 16384, %s280_s10, [#allocation10], %s10305_s20, %s10305_s20, %s10306_s1  }
  0x58   : > { %s10307_s17 = smov [#allocation12]  }
  0x59   : > { %s293_s19 = sshll.u32 %s10307_s17, 4  ;;  %s294_s19 = int_to_ptr.vmem [resolvable:$true] %s293_s19 }
  0x5a   : > { %s10189_s8 = scalar_lea.vmem %s294_s19, 16  ;;  %s10196_s23 = scalar_lea.vmem %s294_s19, 32 }
  0x5b   : > { %p10190_p12 = scmp.ne.s32.totalorder %s294_s19, %s10189_s8  ;;  %p10197_p3 = scmp.lt.s32.totalorder %s294_s19, %s294_s19 }
  0x5c   : > { %p10198_p8 = scmp.lt.s32.totalorder %s10196_s23, %s10189_s8 }
  0x5d   : > { %p10192_p1 = pnand %p10190_p12, %p10425_p0 }
  0x5e   : > { %p10199_p5 = por %p10198_p8, %p10197_p3 }
  0x5f   : > { %p10193_p2 = pneg %p10192_p1 }
  0x61   : > { %p10200_p11 = pnand %p10199_p5, %p10193_p2 }
  0x63   : > { %10203 = shalt.err (!%p10200_p11)
}
  0x64   : > { %8682 = dma.hbm_to_vmem [thread:$0]  (!%p10419_p13), %s14633_s6, 16, %s294_s19, [#allocation13]  }
  0x65   : > { %p14895_p4 = scmp.ne.s32.totalorder %s14889_s15, 0 }
  0x67   : > { %319 = sbr.rel (%p14895_p4) target bundleno = 2221 (0x8ad), region = 48 }
  0x6c   : > { %p14896_p10 = scmp.ne.s32.totalorder %s14890_s16, 0 }
  0x6e   : > { %10255 = dma.done.wait (%p14896_p10), [#allocation4], 640  }
  0x6f   : > { %10257 = vsyncadd (%p14896_p10), [#allocation4], 4294966656 }
  0x70   : > { %10259 = dma.done.wait (%p14896_p10), [#allocation7], 164000  }
  0x71   : > { %10261 = vsyncadd (%p14896_p10), [#allocation7], 4294803296 }
  0x72   : > { %10263 = dma.done.wait (%p14896_p10), [#allocation10], 16512  }
  0x73   : > { %10265 = vsyncadd (%p14896_p10), [#allocation10], 4294950784 }
  0x74   : > { %10267 = dma.done.wait (%p14896_p10), [#allocation13], 16  }
  0x75   : > { %10269 = vsyncadd (%p14896_p10), [#allocation13], 4294967280  ;;  %p375_p13 = scmp.lt.s32.totalorder %s10288_s27, 1  ;;  %v14646_v0 = vmov 0.0   ;;  %vm639_vm0 = vcmask 1042432   ;;  %vm542_vm1 = vcmask 23552   ;;  %v14639_v47 = vlaneseq }
  0x76   : > { %724 = vmatprep.mubr.f32.mxu0 %v14646_v0  ;;  %981 = vmatprep.mubr.f32.mxu1 %v14646_v0  ;;  %v408_v2 = vld [vmem:[#allocation3] sm:$0x77]  ;;  %v409_v3 = vld [vmem:[#allocation3 + $0x8] sm:$0x77]  ;;  %v410_v6 = vld [vmem:[#allocation3 + $0x10] sm:$0x77] }
  0x77   : > { %s376_s1 = scalar_select %p375_p13, %s10288_s27, 1  ;;  %v537_v4 = vcombine.high %v408_v2, %v408_v2  ;;  %v538_v5 = vcombine.high %v409_v3, %v409_v3  ;;  %v411_v7 = vld [vmem:[#allocation3 + $0x18] sm:$0x77]  ;;  %v539_v8 = vcombine.high %v410_v6, %v410_v6  ;;  %v10582_v21 = vld [vmem:[#allocation3 + $0x20] sm:$0x77]  ;;  %v10874_v52 = vshrl.u32 %v14639_v47, 7 }
  0x78   : > { %v540_v9 = vcombine.high %v411_v7, %v411_v7  ;;  %v541_v22 = vcombine.high %v10582_v21, %v10582_v21  ;;  %v405_v58 = vld [vmem:[#allocation6] sm:$0xff]  ;;  %s372_s16 = sand.u32 1, %s10280_s25   ;;  %s8494_s10 = sshll.u32 %s10288_s27, 4 }
  0x79   : > { %s8497_s2 = sshll.u32 %s376_s1, 3  ;;  %8004 = vmatprep.subr.msk.mxu0 %vm639_vm0, %v537_v4  ;;  %8038 = vmatprep.subr.msk.mxu1 %vm639_vm0, %v538_v5  ;;  %14915 = vst [vmem:[#allocation38_spill] sm:$0xff] %v10874_v52  ;;  %v10883_v57 = vsub.s32 0, %v10874_v52  ;;  %v10888_v59 = vsub.s32 2, %v10874_v52  ;;  %v10891_v62 = vsub.s32 1, %v10874_v52  ;;  %v10894_v63 = vsub.s32 3, %v10874_v52  ;;  %s7854_s19 = scalar_lea.hbm %s14634_s7, %s8494_s10 }
  0x7a   : > { %s382_s22 = scalar_lea.vmem %s14627_s0, %s8497_s2  ;;  %8005 = vmatpush1.msk.msra.mxu0 %vm639_vm0, %v408_v2  ;;  %8039 = vmatpush1.msk.msra.mxu1 %vm639_vm0, %v409_v3  ;;  %s373_s20 = scalar_lea.vmem [#allocation14], %s372_s16 }
  0x7b   : > { %v407_v1 = vld [vmem:[%s382_s22] sm:$0x77]  ;;  %8072 = vmatprep.subr.msk.mxu0 %vm639_vm0, %v539_v8  ;;  %8106 = vmatprep.subr.msk.mxu1 %vm639_vm0, %v540_v9  ;;  %14916 = vst [vmem:[#allocation39_spill] sm:$0xff] %v10883_v57  ;;  %14917 = vst [vmem:[#allocation40_spill] sm:$0xff] %v10888_v59  ;;  %v10905_v3 = vrot.slane %v405_v58, %v10883_v57  ;;  %v10910_v4 = vrot.slane %v405_v58, %v10888_v59  ;;  %s7856_s18 = sshll.u32 %s373_s20, 4  ;;  %s7844_s8 = scalar_lea.sflag [#allocation5], %s372_s16  ;;  %s7857_s18 = int_to_ptr.vmem [resolvable:$true] %s7856_s18 }
  0x7c   : > { %468 = vxpose.xlu0.b32.start.end [1/1] (short) %v407_v1, 128  ;;  %v466_v10 = vcombine.high %v407_v1, %v407_v1  ;;  %14918 = vst [vmem:[#allocation41_spill] sm:$0xff] %v10891_v62  ;;  %14919 = vst [vmem:[#allocation42_spill] sm:$0xff] %v10894_v63  ;;  %v10920_v8 = vrot.slane %v405_v58, %v10894_v63  ;;  %s10204_s23 = scalar_lea.vmem %s7857_s18, 16  ;;  %p15912_p6 = scmp.ne.s32.totalorder %s14887_s11, 0 }
  0x7d   : > { %p10205_p0 = scmp.ne.s32.totalorder %s7857_s18, %s10204_s23  ;;  %s10311_s12 = smov [#allocation14]  }
  0x7e   : > { %s10208_s1 = sshll.u32 %s10311_s12, 4  ;;  %s10209_s1 = int_to_ptr.vmem [resolvable:$false] %s10208_s1 }
  0x7f   : > { %p10206_p7 = pnand %p10205_p0, %p15912_p6  ;;  %s10210_s27 = scalar_lea.vmem %s10209_s1, 32 }
  0x80   : > { %p10211_p12 = scmp.lt.s32.totalorder %s7857_s18, %s10209_s1  ;;  %p10212_p1 = scmp.lt.s32.totalorder %s10210_s27, %s10204_s23 }
  0x81   : > { %p10207_p9 = pneg %p10206_p7 }
  0x82   : > { %p10213_p2 = por %p10212_p1, %p10211_p12 }
  0x84   : > { %p10214_p3 = pnand %p10213_p2, %p10207_p9 }
  0xb9   : > { %500 = vxpose.xlu0.b32.start.end [1/1] (short) %v466_v10, 128 }
  0xf8   : > { %v10502_v11 = vpop.trf.xlu0 }
  0xf9   : > { %8006 = vmatmul.mubr.msk.f32.vlgmr.msra.gmra.mxu0 %vm542_vm1, %v10502_v11  ;;  %8040 = vmatmul.mubr.msk.f32.vlgmr.msra.gmra.mxu1 %vm542_vm1, %v10502_v11 }
  0xfa   : > { %730 = vmatprep.mubr.f32.mxu0 %v14646_v0  ;;  %987 = vmatprep.mubr.f32.mxu1 %v14646_v0 }
  0xfb   : > { %8073 = vmatpush1.msk.msra.mxu0 %vm639_vm0, %v410_v6  ;;  %8107 = vmatpush1.msk.msra.mxu1 %vm639_vm0, %v411_v7  ;;  %v10917_v7 = vrot.slane %v405_v58, %v10891_v62 }
  0xfc   : > { %v10512_v12 = vpop.trf.xlu0  ;;  %8140 = vmatprep.subr.msk.mxu0 %vm639_vm0, %v541_v22 }
  0xfd   : > { %8007 = vmatmul.mubr.msk.f32.gmra.mxu0 %vm542_vm1, %v10512_v12  ;;  %8041 = vmatmul.mubr.msk.f32.gmra.mxu1 %vm542_vm1, %v10512_v12 }
  0xfe   : > { %736 = vmatprep.mubr.f32.mxu0 %v14646_v0  ;;  %993 = vmatprep.mubr.f32.mxu1 %v14646_v0 }
 0x100   : > { %v10520_v13 = vpop.trf.xlu0 }
 0x101   : > { %8008 = vmatmul.mubr.msk.f32.gmra.mxu0 %vm542_vm1, %v10520_v13  ;;  %8042 = vmatmul.mubr.msk.f32.gmra.mxu1 %vm542_vm1, %v10520_v13 }
 0x102   : > { %742 = vmatprep.mubr.f32.mxu0 %v14646_v0  ;;  %999 = vmatprep.mubr.f32.mxu1 %v14646_v0 }
 0x104   : > { %v10528_v14 = vpop.trf.xlu0 }
 0x105   : > { %8009 = vmatmul.mubr.msk.f32.gmra.mxu0 %vm542_vm1, %v10528_v14  ;;  %8043 = vmatmul.mubr.msk.f32.gmra.mxu1 %vm542_vm1, %v10528_v14 }
 0x106   : > { %748 = vmatprep.mubr.f32.mxu0 %v14646_v0  ;;  %1005 = vmatprep.mubr.f32.mxu1 %v14646_v0 }
 0x108   : > { %v10536_v15 = vpop.trf.xlu0 }
 0x109   : > { %8010 = vmatmul.mubr.msk.f32.gmra.mxu0 %vm542_vm1, %v10536_v15  ;;  %8044 = vmatmul.mubr.msk.f32.gmra.mxu1 %vm542_vm1, %v10536_v15 }
 0x10a   : > { %754 = vmatprep.mubr.f32.mxu0 %v14646_v0  ;;  %1011 = vmatprep.mubr.f32.mxu1 %v14646_v0 }
 0x10c   : > { %v10544_v16 = vpop.trf.xlu0 }
 0x10d   : > { %8011 = vmatmul.mubr.msk.f32.gmra.mxu0 %vm542_vm1, %v10544_v16  ;;  %8045 = vmatmul.mubr.msk.f32.gmra.mxu1 %vm542_vm1, %v10544_v16 }
 0x10e   : > { %760 = vmatprep.mubr.f32.mxu0 %v14646_v0  ;;  %1017 = vmatprep.mubr.f32.mxu1 %v14646_v0 }
 0x110   : > { %v10552_v17 = vpop.trf.xlu0 }
 0x111   : > { %8012 = vmatmul.mubr.msk.f32.gmra.mxu0 %vm542_vm1, %v10552_v17  ;;  %8046 = vmatmul.mubr.msk.f32.gmra.mxu1 %vm542_vm1, %v10552_v17 }
 0x112   : > { %766 = vmatprep.mubr.f32.mxu0 %v14646_v0  ;;  %1023 = vmatprep.mubr.f32.mxu1 %v14646_v0 }
 0x114   : > { %v10560_v18 = vpop.trf.xlu0 }
 0x115   : > { %8013 = vmatmul.mubr.msk.f32.gmra.mxu0 %vm542_vm1, %v10560_v18  ;;  %8047 = vmatmul.mubr.msk.f32.gmra.mxu1 %vm542_vm1, %v10560_v18 }
 0x116   : > { %772 = vmatprep.mubr.f32.mxu0 %v14646_v0  ;;  %1029 = vmatprep.mubr.f32.mxu1 %v14646_v0 }
 0x118   : > { %v10568_v19 = vpop.trf.xlu0 }
 0x119   : > { %8014 = vmatmul.mubr.msk.f32.gmra.mxu0 %vm542_vm1, %v10568_v19  ;;  %8048 = vmatmul.mubr.msk.f32.gmra.mxu1 %vm542_vm1, %v10568_v19 }
 0x11a   : > { %778 = vmatprep.mubr.f32.mxu0 %v14646_v0  ;;  %1035 = vmatprep.mubr.f32.mxu1 %v14646_v0 }
 0x11c   : > { %v10576_v20 = vpop.trf.xlu0 }
 0x11d   : > { %8015 = vmatmul.mubr.msk.f32.gmra.mxu0 %vm542_vm1, %v10576_v20  ;;  %8049 = vmatmul.mubr.msk.f32.gmra.mxu1 %vm542_vm1, %v10576_v20 }
 0x11e   : > { %784 = vmatprep.mubr.f32.mxu0 %v14646_v0  ;;  %1041 = vmatprep.mubr.f32.mxu1 %v14646_v0 }
 0x120   : > { %v10588_v23 = vpop.trf.xlu0 }
 0x121   : > { %8016 = vmatmul.mubr.msk.f32.gmra.mxu0 %vm542_vm1, %v10588_v23  ;;  %8050 = vmatmul.mubr.msk.f32.gmra.mxu1 %vm542_vm1, %v10588_v23 }
 0x122   : > { %790 = vmatprep.mubr.f32.mxu0 %v14646_v0  ;;  %1047 = vmatprep.mubr.f32.mxu1 %v14646_v0 }
 0x124   : > { %v10597_v24 = vpop.trf.xlu0 }
 0x125   : > { %8017 = vmatmul.mubr.msk.f32.gmra.mxu0 %vm542_vm1, %v10597_v24  ;;  %8051 = vmatmul.mubr.msk.f32.gmra.mxu1 %vm542_vm1, %v10597_v24 }
 0x126   : > { %796 = vmatprep.mubr.f32.mxu0 %v14646_v0  ;;  %1053 = vmatprep.mubr.f32.mxu1 %v14646_v0 }
 0x128   : > { %v10605_v25 = vpop.trf.xlu0 }
 0x129   : > { %8018 = vmatmul.mubr.msk.f32.gmra.mxu0 %vm542_vm1, %v10605_v25  ;;  %8052 = vmatmul.mubr.msk.f32.gmra.mxu1 %vm542_vm1, %v10605_v25 }
 0x12a   : > { %802 = vmatprep.mubr.f32.mxu0 %v14646_v0  ;;  %1059 = vmatprep.mubr.f32.mxu1 %v14646_v0 }
 0x12c   : > { %v10613_v26 = vpop.trf.xlu0 }
 0x12d   : > { %8019 = vmatmul.mubr.msk.f32.gmra.mxu0 %vm542_vm1, %v10613_v26  ;;  %8053 = vmatmul.mubr.msk.f32.gmra.mxu1 %vm542_vm1, %v10613_v26 }
 0x12e   : > { %808 = vmatprep.mubr.f32.mxu0 %v14646_v0  ;;  %1065 = vmatprep.mubr.f32.mxu1 %v14646_v0 }
 0x130   : > { %v10621_v27 = vpop.trf.xlu0 }
 0x131   : > { %14897 = vst [vmem:[#allocation20_spill] sm:$0xff] %v10621_v27  ;;  %8020 = vmatmul.mubr.msk.f32.gmra.mxu0 %vm542_vm1, %v10621_v27  ;;  %8054 = vmatmul.mubr.msk.f32.gmra.mxu1 %vm542_vm1, %v10621_v27 }
 0x132   : > { %814 = vmatprep.mubr.f32.mxu0 %v14646_v0  ;;  %1071 = vmatprep.mubr.f32.mxu1 %v14646_v0 }
 0x134   : > { %v10629_v28 = vpop.trf.xlu0 }
 0x135   : > { %14898 = vst [vmem:[#allocation21_spill] sm:$0xff] %v10629_v28  ;;  %8021 = vmatmul.mubr.msk.f32.gmra.mxu0 %vm542_vm1, %v10629_v28  ;;  %8055 = vmatmul.mubr.msk.f32.gmra.mxu1 %vm542_vm1, %v10629_v28 }
 0x136   : > { %820 = vmatprep.mubr.f32.mxu0 %v14646_v0  ;;  %1077 = vmatprep.mubr.f32.mxu1 %v14646_v0 }
 0x138   : > { %v10637_v29 = vpop.trf.xlu0 }
 0x139   : > { %14899 = vst [vmem:[#allocation22_spill] sm:$0xff] %v10637_v29  ;;  %8022 = vmatmul.mubr.msk.f32.gmra.mxu0 %vm542_vm1, %v10637_v29  ;;  %8056 = vmatmul.mubr.msk.f32.gmra.mxu1 %vm542_vm1, %v10637_v29 }
 0x13a   : > { %826 = vmatprep.mubr.f32.mxu0 %v14646_v0  ;;  %1083 = vmatprep.mubr.f32.mxu1 %v14646_v0 }
 0x13c   : > { %v10645_v30 = vpop.trf.xlu0 }
 0x13d   : > { %14900 = vst [vmem:[#allocation23_spill] sm:$0xff] %v10645_v30  ;;  %8023 = vmatmul.mubr.msk.f32.gmra.mxu0 %vm542_vm1, %v10645_v30  ;;  %8057 = vmatmul.mubr.msk.f32.gmra.mxu1 %vm542_vm1, %v10645_v30 }
 0x13e   : > { %832 = vmatprep.mubr.f32.mxu0 %v14646_v0  ;;  %1089 = vmatprep.mubr.f32.mxu1 %v14646_v0 }
 0x140   : > { %v10653_v31 = vpop.trf.xlu0 }
 0x141   : > { %14901 = vst [vmem:[#allocation24_spill] sm:$0xff] %v10653_v31  ;;  %8024 = vmatmul.mubr.msk.f32.gmra.mxu0 %vm542_vm1, %v10653_v31  ;;  %8058 = vmatmul.mubr.msk.f32.gmra.mxu1 %vm542_vm1, %v10653_v31 }
 0x142   : > { %838 = vmatprep.mubr.f32.mxu0 %v14646_v0  ;;  %1095 = vmatprep.mubr.f32.mxu1 %v14646_v0 }
 0x144   : > { %v10661_v32 = vpop.trf.xlu0 }
 0x145   : > { %14902 = vst [vmem:[#allocation25_spill] sm:$0xff] %v10661_v32  ;;  %8025 = vmatmul.mubr.msk.f32.gmra.mxu0 %vm542_vm1, %v10661_v32  ;;  %8059 = vmatmul.mubr.msk.f32.gmra.mxu1 %vm542_vm1, %v10661_v32 }
 0x146   : > { %844 = vmatprep.mubr.f32.mxu0 %v14646_v0  ;;  %1101 = vmatprep.mubr.f32.mxu1 %v14646_v0 }
 0x148   : > { %v10669_v33 = vpop.trf.xlu0 }
 0x149   : > { %14903 = vst [vmem:[#allocation26_spill] sm:$0xff] %v10669_v33  ;;  %8026 = vmatmul.mubr.msk.f32.gmra.mxu0 %vm542_vm1, %v10669_v33  ;;  %8060 = vmatmul.mubr.msk.f32.gmra.mxu1 %vm542_vm1, %v10669_v33 }
 0x14a   : > { %850 = vmatprep.mubr.f32.mxu0 %v14646_v0  ;;  %1107 = vmatprep.mubr.f32.mxu1 %v14646_v0 }
 0x14c   : > { %v10677_v34 = vpop.trf.xlu0 }
 0x14d   : > { %14904 = vst [vmem:[#allocation27_spill] sm:$0xff] %v10677_v34  ;;  %8027 = vmatmul.mubr.msk.f32.gmra.mxu0 %vm542_vm1, %v10677_v34  ;;  %8061 = vmatmul.mubr.msk.f32.gmra.mxu1 %vm542_vm1, %v10677_v34 }
 0x14e   : > { %856 = vmatprep.mubr.f32.mxu0 %v14646_v0  ;;  %1113 = vmatprep.mubr.f32.mxu1 %v14646_v0 }
 0x150   : > { %v10685_v35 = vpop.trf.xlu0 }
 0x151   : > { %14905 = vst [vmem:[#allocation28_spill] sm:$0xff] %v10685_v35  ;;  %8028 = vmatmul.mubr.msk.f32.gmra.mxu0 %vm542_vm1, %v10685_v35  ;;  %8062 = vmatmul.mubr.msk.f32.gmra.mxu1 %vm542_vm1, %v10685_v35 }
 0x152   : > { %862 = vmatprep.mubr.f32.mxu0 %v14646_v0  ;;  %1119 = vmatprep.mubr.f32.mxu1 %v14646_v0 }
 0x154   : > { %v10693_v36 = vpop.trf.xlu0 }
 0x155   : > { %14906 = vst [vmem:[#allocation29_spill] sm:$0xff] %v10693_v36  ;;  %8029 = vmatmul.mubr.msk.f32.gmra.mxu0 %vm542_vm1, %v10693_v36  ;;  %8063 = vmatmul.mubr.msk.f32.gmra.mxu1 %vm542_vm1, %v10693_v36 }
 0x156   : > { %868 = vmatprep.mubr.f32.mxu0 %v14646_v0  ;;  %1125 = vmatprep.mubr.f32.mxu1 %v14646_v0 }
 0x158   : > { %v10701_v37 = vpop.trf.xlu0 }
 0x159   : > { %14907 = vst [vmem:[#allocation30_spill] sm:$0xff] %v10701_v37  ;;  %8030 = vmatmul.mubr.msk.f32.gmra.mxu0 %vm542_vm1, %v10701_v37  ;;  %8064 = vmatmul.mubr.msk.f32.gmra.mxu1 %vm542_vm1, %v10701_v37 }
 0x15a   : > { %874 = vmatprep.mubr.f32.mxu0 %v14646_v0  ;;  %1131 = vmatprep.mubr.f32.mxu1 %v14646_v0 }
 0x15c   : > { %v10709_v38 = vpop.trf.xlu0 }
 0x15d   : > { %14908 = vst [vmem:[#allocation31_spill] sm:$0xff] %v10709_v38  ;;  %8031 = vmatmul.mubr.msk.f32.gmra.mxu0 %vm542_vm1, %v10709_v38  ;;  %8065 = vmatmul.mubr.msk.f32.gmra.mxu1 %vm542_vm1, %v10709_v38 }
 0x15e   : > { %880 = vmatprep.mubr.f32.mxu0 %v14646_v0  ;;  %1137 = vmatprep.mubr.f32.mxu1 %v14646_v0 }
 0x160   : > { %v10717_v39 = vpop.trf.xlu0 }
 0x161   : > { %14909 = vst [vmem:[#allocation32_spill] sm:$0xff] %v10717_v39  ;;  %8032 = vmatmul.mubr.msk.f32.gmra.mxu0 %vm542_vm1, %v10717_v39  ;;  %8066 = vmatmul.mubr.msk.f32.gmra.mxu1 %vm542_vm1, %v10717_v39 }
 0x162   : > { %886 = vmatprep.mubr.f32.mxu0 %v14646_v0  ;;  %1143 = vmatprep.mubr.f32.mxu1 %v14646_v0 }
 0x164   : > { %v10725_v40 = vpop.trf.xlu0 }
 0x165   : > { %14910 = vst [vmem:[#allocation33_spill] sm:$0xff] %v10725_v40  ;;  %8033 = vmatmul.mubr.msk.f32.gmra.mxu0 %vm542_vm1, %v10725_v40  ;;  %8067 = vmatmul.mubr.msk.f32.gmra.mxu1 %vm542_vm1, %v10725_v40 }
 0x166   : > { %892 = vmatprep.mubr.f32.mxu0 %v14646_v0  ;;  %1149 = vmatprep.mubr.f32.mxu1 %v14646_v0 }
 0x168   : > { %v10733_v41 = vpop.trf.xlu0 }
 0x169   : > { %14911 = vst [vmem:[#allocation34_spill] sm:$0xff] %v10733_v41  ;;  %8034 = vmatmul.mubr.msk.f32.gmra.mxu0 %vm542_vm1, %v10733_v41  ;;  %8068 = vmatmul.mubr.msk.f32.gmra.mxu1 %vm542_vm1, %v10733_v41 }
 0x16a   : > { %898 = vmatprep.mubr.f32.mxu0 %v14646_v0  ;;  %1155 = vmatprep.mubr.f32.mxu1 %v14646_v0 }
 0x16c   : > { %v10741_v42 = vpop.trf.xlu0 }
 0x16d   : > { %14912 = vst [vmem:[#allocation35_spill] sm:$0xff] %v10741_v42  ;;  %8035 = vmatmul.mubr.msk.f32.gmra.mxu0 %vm542_vm1, %v10741_v42  ;;  %8069 = vmatmul.mubr.msk.f32.gmra.mxu1 %vm542_vm1, %v10741_v42 }
 0x16e   : > { %904 = vmatprep.mubr.f32.mxu0 %v14646_v0  ;;  %1161 = vmatprep.mubr.f32.mxu1 %v14646_v0 }
 0x170   : > { %v10749_v43 = vpop.trf.xlu0 }
 0x171   : > { %14913 = vst [vmem:[#allocation36_spill] sm:$0xff] %v10749_v43  ;;  %8036 = vmatmul.mubr.msk.f32.gmra.mxu0 %vm542_vm1, %v10749_v43  ;;  %8070 = vmatmul.mubr.msk.f32.gmra.mxu1 %vm542_vm1, %v10749_v43 }
 0x172   : > { %910 = vmatprep.mubr.f32.mxu0 %v14646_v0  ;;  %1167 = vmatprep.mubr.f32.mxu1 %v14646_v0 }
 0x174   : > { %v10757_v44 = vpop.trf.xlu0 }
 0x175   : > { %14914 = vst [vmem:[#allocation37_spill] sm:$0xff] %v10757_v44  ;;  %8037 = vmatmul.mubr.msk.f32.gmra.mxu0 %vm542_vm1, %v10757_v44  ;;  %8071 = vmatmul.mubr.msk.f32.gmra.mxu1 %vm542_vm1, %v10757_v44 }
 0x176   : > { %1238 = vmatprep.mubr.f32.mxu0 %v14646_v0  ;;  %1495 = vmatprep.mubr.f32.mxu1 %v14646_v0 }
 0x179   : > { %8074 = vmatmul.mubr.msk.f32.vlgmr.msra.gmra.mxu0 %vm542_vm1, %v10502_v11  ;;  %8108 = vmatmul.mubr.msk.f32.vlgmr.msra.gmra.mxu1 %vm542_vm1, %v10502_v11 }
 0x17a   : > { %1244 = vmatprep.mubr.f32.mxu0 %v14646_v0  ;;  %1501 = vmatprep.mubr.f32.mxu1 %v14646_v0 }
 0x17b   : > { %8141 = vmatpush1.msk.msra.mxu0 %vm639_vm0, %v10582_v21 }
 0x17d   : > { %8075 = vmatmul.mubr.msk.f32.gmra.mxu0 %vm542_vm1, %v10512_v12  ;;  %8109 = vmatmul.mubr.msk.f32.gmra.mxu1 %vm542_vm1, %v10512_v12 }
 0x17e   : > { %1250 = vmatprep.mubr.f32.mxu0 %v14646_v0  ;;  %1507 = vmatprep.mubr.f32.mxu1 %v14646_v0 }
 0x181   : > { %8076 = vmatmul.mubr.msk.f32.gmra.mxu0 %vm542_vm1, %v10520_v13  ;;  %8110 = vmatmul.mubr.msk.f32.gmra.mxu1 %vm542_vm1, %v10520_v13 }
 0x182   : > { %1256 = vmatprep.mubr.f32.mxu0 %v14646_v0  ;;  %1513 = vmatprep.mubr.f32.mxu1 %v14646_v0 }
 0x185   : > { %8077 = vmatmul.mubr.msk.f32.gmra.mxu0 %vm542_vm1, %v10528_v14  ;;  %8111 = vmatmul.mubr.msk.f32.gmra.mxu1 %vm542_vm1, %v10528_v14 }
 0x186   : > { %1262 = vmatprep.mubr.f32.mxu0 %v14646_v0  ;;  %1519 = vmatprep.mubr.f32.mxu1 %v14646_v0 }
 0x189   : > { %8078 = vmatmul.mubr.msk.f32.gmra.mxu0 %vm542_vm1, %v10536_v15  ;;  %8112 = vmatmul.mubr.msk.f32.gmra.mxu1 %vm542_vm1, %v10536_v15 }
 0x18a   : > { %1268 = vmatprep.mubr.f32.mxu0 %v14646_v0  ;;  %1525 = vmatprep.mubr.f32.mxu1 %v14646_v0 }
 0x18d   : > { %8079 = vmatmul.mubr.msk.f32.gmra.mxu0 %vm542_vm1, %v10544_v16  ;;  %8113 = vmatmul.mubr.msk.f32.gmra.mxu1 %vm542_vm1, %v10544_v16 }
 0x18e   : > { %1274 = vmatprep.mubr.f32.mxu0 %v14646_v0  ;;  %1531 = vmatprep.mubr.f32.mxu1 %v14646_v0 }
 0x191   : > { %8080 = vmatmul.mubr.msk.f32.gmra.mxu0 %vm542_vm1, %v10552_v17  ;;  %8114 = vmatmul.mubr.msk.f32.gmra.mxu1 %vm542_vm1, %v10552_v17 }
 0x192   : > { %1280 = vmatprep.mubr.f32.mxu0 %v14646_v0  ;;  %1537 = vmatprep.mubr.f32.mxu1 %v14646_v0 }
 0x195   : > { %8081 = vmatmul.mubr.msk.f32.gmra.mxu0 %vm542_vm1, %v10560_v18  ;;  %8115 = vmatmul.mubr.msk.f32.gmra.mxu1 %vm542_vm1, %v10560_v18 }
 0x196   : > { %1286 = vmatprep.mubr.f32.mxu0 %v14646_v0  ;;  %1543 = vmatprep.mubr.f32.mxu1 %v14646_v0 }
 0x199   : > { %8082 = vmatmul.mubr.msk.f32.gmra.mxu0 %vm542_vm1, %v10568_v19  ;;  %8116 = vmatmul.mubr.msk.f32.gmra.mxu1 %vm542_vm1, %v10568_v19 }
 0x19a   : > { %1292 = vmatprep.mubr.f32.mxu0 %v14646_v0  ;;  %1549 = vmatprep.mubr.f32.mxu1 %v14646_v0 }
 0x19d   : > { %8083 = vmatmul.mubr.msk.f32.gmra.mxu0 %vm542_vm1, %v10576_v20  ;;  %8117 = vmatmul.mubr.msk.f32.gmra.mxu1 %vm542_vm1, %v10576_v20 }
 0x19e   : > { %1298 = vmatprep.mubr.f32.mxu0 %v14646_v0  ;;  %1555 = vmatprep.mubr.f32.mxu1 %v14646_v0 }
 0x1a1   : > { %8084 = vmatmul.mubr.msk.f32.gmra.mxu0 %vm542_vm1, %v10588_v23  ;;  %8118 = vmatmul.mubr.msk.f32.gmra.mxu1 %vm542_vm1, %v10588_v23 }
 0x1a2   : > { %1304 = vmatprep.mubr.f32.mxu0 %v14646_v0  ;;  %1561 = vmatprep.mubr.f32.mxu1 %v14646_v0 }
 0x1a5   : > { %8085 = vmatmul.mubr.msk.f32.gmra.mxu0 %vm542_vm1, %v10597_v24  ;;  %8119 = vmatmul.mubr.msk.f32.gmra.mxu1 %vm542_vm1, %v10597_v24 }
 0x1a6   : > { %1310 = vmatprep.mubr.f32.mxu0 %v14646_v0  ;;  %1567 = vmatprep.mubr.f32.mxu1 %v14646_v0 }
 0x1a9   : > { %8086 = vmatmul.mubr.msk.f32.gmra.mxu0 %vm542_vm1, %v10605_v25  ;;  %8120 = vmatmul.mubr.msk.f32.gmra.mxu1 %vm542_vm1, %v10605_v25 }
 0x1aa   : > { %1316 = vmatprep.mubr.f32.mxu0 %v14646_v0  ;;  %1573 = vmatprep.mubr.f32.mxu1 %v14646_v0 }
 0x1ad   : > { %8087 = vmatmul.mubr.msk.f32.gmra.mxu0 %vm542_vm1, %v10613_v26  ;;  %8121 = vmatmul.mubr.msk.f32.gmra.mxu1 %vm542_vm1, %v10613_v26 }
 0x1ae   : > { %1322 = vmatprep.mubr.f32.mxu0 %v14646_v0  ;;  %1579 = vmatprep.mubr.f32.mxu1 %v14646_v0 }
 0x1b1   : > { %8088 = vmatmul.mubr.msk.f32.gmra.mxu0 %vm542_vm1, %v10621_v27  ;;  %8122 = vmatmul.mubr.msk.f32.gmra.mxu1 %vm542_vm1, %v10621_v27 }
 0x1b2   : > { %1328 = vmatprep.mubr.f32.mxu0 %v14646_v0  ;;  %1585 = vmatprep.mubr.f32.mxu1 %v14646_v0 }
 0x1b5   : > { %8089 = vmatmul.mubr.msk.f32.gmra.mxu0 %vm542_vm1, %v10629_v28  ;;  %8123 = vmatmul.mubr.msk.f32.gmra.mxu1 %vm542_vm1, %v10629_v28 }
 0x1b6   : > { %1334 = vmatprep.mubr.f32.mxu0 %v14646_v0  ;;  %1591 = vmatprep.mubr.f32.mxu1 %v14646_v0 }
 0x1b9   : > { %v726_v45 = vpop.f32.mrf.mxu0  ;;  %v983_v46 = vpop.f32.mrf.mxu1  ;;  %8090 = vmatmul.mubr.msk.f32.gmra.mxu0 %vm542_vm1, %v10637_v29  ;;  %8124 = vmatmul.mubr.msk.f32.gmra.mxu1 %vm542_vm1, %v10637_v29 }
 0x1ba   : > { %1340 = vmatprep.mubr.f32.mxu0 %v14646_v0  ;;  %1597 = vmatprep.mubr.f32.mxu1 %v14646_v0  ;;  %v10931_v21 = vadd.f32 %v726_v45, %v10905_v3  ;;  %v10936_v22 = vadd.f32 %v983_v46, %v10910_v4 }
 0x1bb   : > { %v728_v48 = vpop.f32.mrf.mxu0  ;;  %v985_v49 = vpop.f32.mrf.mxu1 }
 0x1bc   : > { %14920 = vst [vmem:[#allocation43_spill] sm:$0xff] %v10931_v21  ;;  %14921 = vst [vmem:[#allocation44_spill] sm:$0xff] %v10936_v22  ;;  %v10943_v59 = vadd.f32 %v728_v48, %v10917_v7  ;;  %v10946_v63 = vadd.f32 %v985_v49, %v10920_v8  ;;  %v8174_v45 = vmul.f32 -1.442695, %v10931_v21  ;;  %v14925_v48 = vmov 0.0  }
 0x1bd   : > { %v732_v50 = vpop.f32.mrf.mxu0  ;;  %v989_v51 = vpop.f32.mrf.mxu1  ;;  %8091 = vmatmul.mubr.msk.f32.gmra.mxu0 %vm542_vm1, %v10645_v30  ;;  %8125 = vmatmul.mubr.msk.f32.gmra.mxu1 %vm542_vm1, %v10645_v30  ;;  %v8176_v49 = vmul.f32 -1.442695, %v10936_v22 }
 0x1be   : > { %1346 = vmatprep.mubr.f32.mxu0 %v14646_v0  ;;  %1603 = vmatprep.mubr.f32.mxu1 %v14646_v0  ;;  %14922 = vst [vmem:[#allocation45_spill] sm:$0xff] %v10943_v59  ;;  %14923 = vst [vmem:[#allocation46_spill] sm:$0xff] %v10946_v63  ;;  %v10956_v46 = vadd.f32 %v732_v50, %v10905_v3  ;;  %v10964_v57 = vadd.f32 %v989_v51, %v10910_v4  ;;  %v8177_v50 = vmul.f32 -1.442695, %v10946_v63 }
 0x1bf   : > { %v734_v53 = vpop.f32.mrf.mxu0  ;;  %v991_v54 = vpop.f32.mrf.mxu1  ;;  %8767 = vpow2.f32 %v8174_v45 }
 0x1c0   : > { %14924 = vst [vmem:[#allocation47_spill] sm:$0xff] %v10956_v46  ;;  %14926 = vst [vmem:[#allocation48_spill] sm:$0xff] %v10964_v57  ;;  %v10970_v21 = vadd.f32 %v734_v53, %v10917_v7  ;;  %v8184_v51 = vmul.f32 -1.442695, %v10956_v46  ;;  %8769 = vpow2.f32 %v8176_v49 }
 0x1c1   : > { %v738_v55 = vpop.f32.mrf.mxu0  ;;  %v995_v56 = vpop.f32.mrf.mxu1  ;;  %8092 = vmatmul.mubr.msk.f32.gmra.mxu0 %vm542_vm1, %v10653_v31  ;;  %8126 = vmatmul.mubr.msk.f32.gmra.mxu1 %vm542_vm1, %v10653_v31 }
 0x1c2   : > { %1352 = vmatprep.mubr.f32.mxu0 %v14646_v0  ;;  %1609 = vmatprep.mubr.f32.mxu1 %v14646_v0  ;;  %14927 = vst [vmem:[#allocation49_spill] sm:$0xff] %v10970_v21  ;;  %v10984_v22 = vadd.f32 %v738_v55, %v10905_v3  ;;  %v10992_v63 = vadd.f32 %v995_v56, %v10910_v4  ;;  %v8185_v45 = vmul.f32 -1.442695, %v10970_v21 }
 0x1c3   : > { %v740_v60 = vpop.f32.mrf.mxu0  ;;  %v997_v61 = vpop.f32.mrf.mxu1 }
 0x1c4   : > { %14929 = vst [vmem:[#allocation51_spill] sm:$0xff] %v10984_v22  ;;  %14930 = vst [vmem:[#allocation52_spill] sm:$0xff] %v10992_v63  ;;  %v10998_v55 = vadd.f32 %v740_v60, %v10917_v7  ;;  %v8196_v60 = vmul.f32 -1.442695, %v10992_v63 }
 0x1c5   : > { %v10896_v1 = vpop.f32.mrf.mxu0  ;;  %v10898_v2 = vpop.f32.mrf.mxu1  ;;  %8093 = vmatmul.mubr.msk.f32.gmra.mxu0 %vm542_vm1, %v10661_v32  ;;  %8127 = vmatmul.mubr.msk.f32.gmra.mxu1 %vm542_vm1, %v10661_v32 }
 0x1c6   : > { %1358 = vmatprep.mubr.f32.mxu0 %v14646_v0  ;;  %1615 = vmatprep.mubr.f32.mxu1 %v14646_v0  ;;  %14931 = vst [vmem:[#allocation53_spill] sm:$0xff] %v10998_v55 }
 0x1c7   : > { %v10912_v5 = vpop.f32.mrf.mxu0  ;;  %v10914_v6 = vpop.f32.mrf.mxu1 }
 0x1c9   : > { %v10922_v9 = vpop.f32.mrf.mxu0  ;;  %v10924_v10 = vpop.f32.mrf.mxu1  ;;  %8094 = vmatmul.mubr.msk.f32.gmra.mxu0 %vm542_vm1, %v10669_v33  ;;  %8128 = vmatmul.mubr.msk.f32.gmra.mxu1 %vm542_vm1, %v10669_v33  ;;  %v10974_v33 = vadd.f32 %v991_v54, %v10920_v8  ;;  %v8186_v54 = vmul.f32 -1.442695, %v10964_v57 }
 0x1ca   : > { %1364 = vmatprep.mubr.f32.mxu0 %v14646_v0  ;;  %1621 = vmatprep.mubr.f32.mxu1 %v14646_v0 }
 0x1cb   : > { %v10938_v58 = vpop.f32.mrf.mxu0  ;;  %v10940_v47 = vpop.f32.mrf.mxu1  ;;  %14928 = vst [vmem:[#allocation50_spill] sm:$0xff] %v10974_v33  ;;  %v8187_v46 = vmul.f32 -1.442695, %v10974_v33 }
 0x1cd   : > { %v10948_v62 = vpop.f32.mrf.mxu0  ;;  %8095 = vmatmul.mubr.msk.f32.gmra.mxu0 %vm542_vm1, %v10677_v34  ;;  %8129 = vmatmul.mubr.msk.f32.gmra.mxu1 %vm542_vm1, %v10677_v34  ;;  %v10958_v0 = vpop.f32.mrf.mxu1  ;;  %v8175_v34 = vmul.f32 -1.442695, %v10943_v59 }
 0x1ce   : > { %1370 = vmatprep.mubr.f32.mxu0 %v14925_v48  ;;  %1627 = vmatprep.mubr.f32.mxu1 %v14925_v48 }
 0x1cf   : > { %v10966_v52 = vpop.f32.mrf.mxu0  ;;  %v10986_v53 = vpop.f32.mrf.mxu1  ;;  %8771 = vpow2.f32 %v8175_v34  ;;  %v8194_v34 = vmul.f32 -1.442695, %v10984_v22 }
 0x1d0   : > { %8773 = vpow2.f32 %v8177_v50  ;;  %v8195_v50 = vmul.f32 -1.442695, %v10998_v55 }
 0x1d1   : > { %v10976_v32 = vpop.f32.mrf.mxu0  ;;  %8096 = vmatmul.mubr.msk.f32.gmra.mxu0 %vm542_vm1, %v10685_v35  ;;  %8130 = vmatmul.mubr.msk.f32.gmra.mxu1 %vm542_vm1, %v10685_v35  ;;  %v11002_v35 = vadd.f32 %v997_v61, %v10920_v8  ;;  %8775 = vpow2.f32 %v8184_v51  ;;  %v11011_v56 = vpop.f32.mrf.mxu1 }
 0x1d2   : > { %1376 = vmatprep.mubr.f32.mxu0 %v14925_v48  ;;  %1633 = vmatprep.mubr.f32.mxu1 %v14925_v48  ;;  %8777 = vpow2.f32 %v8186_v54  ;;  %v11028_v54 = vadd.f32 %v10896_v1, %v10905_v3  ;;  %v11046_v1 = vadd.f32 %v10914_v6, %v10920_v8 }
 0x1d3   : > { %v10994_v59 = vpop.f32.mrf.mxu0  ;;  %14932 = vst [vmem:[#allocation54_spill] sm:$0xff] %v11002_v35  ;;  %8779 = vpow2.f32 %v8185_v45  ;;  %v8197_v57 = vmul.f32 -1.442695, %v11002_v35  ;;  %v11030_v33 = vpop.f32.mrf.mxu1 }
 0x1d4   : > { %8781 = vpow2.f32 %v8187_v46  ;;  %14933 = vst [vmem:[#allocation55_spill] sm:$0xff] %v11028_v54  ;;  %v11036_v46 = vadd.f32 %v10898_v2, %v10910_v4  ;;  %14936 = vst [vmem:[#allocation58_spill] sm:$0xff] %v11046_v1  ;;  %v8204_v2 = vmul.f32 -1.442695, %v11028_v54  ;;  %v8207_v22 = vmul.f32 -1.442695, %v11046_v1 }
 0x1d5   : > { %v11004_v49 = vpop.f32.mrf.mxu0  ;;  %8097 = vmatmul.mubr.msk.f32.gmra.mxu0 %vm542_vm1, %v10693_v36  ;;  %8131 = vmatmul.mubr.msk.f32.gmra.mxu1 %vm542_vm1, %v10693_v36  ;;  %8783 = vpow2.f32 %v8194_v34  ;;  %v11042_v34 = vadd.f32 %v10912_v5, %v10917_v7 }
 0x1d6   : > { %1382 = vmatprep.mubr.f32.mxu0 %v14925_v48  ;;  %1639 = vmatprep.mubr.f32.mxu1 %v14925_v48  ;;  %8785 = vpow2.f32 %v8196_v60  ;;  %14934 = vst [vmem:[#allocation56_spill] sm:$0xff] %v11036_v46  ;;  %v11055_v60 = vpop.f32.mrf.mxu1  ;;  %v8206_v5 = vmul.f32 -1.442695, %v11036_v46 }
 0x1d7   : > { %v11016_v61 = vpop.f32.mrf.mxu0  ;;  %8787 = vpow2.f32 %v8195_v50  ;;  %14935 = vst [vmem:[#allocation57_spill] sm:$0xff] %v11042_v34  ;;  %v8205_v35 = vmul.f32 -1.442695, %v11042_v34 }
 0x1d8   : > { %8789 = vpow2.f32 %v8197_v57  ;;  %v8768_v57 = vpop.eup %8767  ;;  %v11070_v46 = vpop.f32.mrf.mxu1 }
 0x1d9   : > { %v11020_v51 = vpop.f32.mrf.mxu0  ;;  %8098 = vmatmul.mubr.msk.f32.gmra.mxu0 %vm542_vm1, %v10701_v37  ;;  %8132 = vmatmul.mubr.msk.f32.gmra.mxu1 %vm542_vm1, %v10701_v37  ;;  %v8770_v50 = vpop.eup %8769  ;;  %8791 = vpow2.f32 %v8204_v2 }
 0x1da   : > { %1388 = vmatprep.mubr.f32.mxu0 %v14925_v48  ;;  %1645 = vmatprep.mubr.f32.mxu1 %v14925_v48  ;;  %v2907_v37 = vadd.f32 1.0, %v8770_v50  ;;  %8793 = vpow2.f32 %v8206_v5  ;;  %v11082_v5 = vpop.f32.mrf.mxu1 }
 0x1db   : > { %v11038_v45 = vpop.f32.mrf.mxu0  ;;  %8795 = vpow2.f32 %v8205_v35 }
 0x1dc   : > { %v8772_v21 = vpop.eup %8771  ;;  %8797 = vpow2.f32 %v8207_v22 }
 0x1dd   : > { %v11048_v63 = vpop.f32.mrf.mxu0  ;;  %8099 = vmatmul.mubr.msk.f32.gmra.mxu0 %vm542_vm1, %v10709_v38  ;;  %8133 = vmatmul.mubr.msk.f32.gmra.mxu1 %vm542_vm1, %v10709_v38  ;;  %v8774_v54 = vpop.eup %8773  ;;  %v2905_v38 = vadd.f32 1.0, %v8768_v57  ;;  %v2906_v31 = vadd.f32 1.0, %v8772_v21 }
 0x1de   : > { %1394 = vmatprep.mubr.f32.mxu0 %v14925_v48  ;;  %1651 = vmatprep.mubr.f32.mxu1 %v14925_v48  ;;  %v8776_v34 = vpop.eup %8775  ;;  %v2908_v29 = vadd.f32 1.0, %v8774_v54 }
 0x1df   : > { %v11060_v6 = vpop.f32.mrf.mxu0  ;;  %v8778_v36 = vpop.eup %8777  ;;  %8799 = vrcp.f32 %v2905_v38  ;;  %v2915_v57 = vadd.f32 1.0, %v8776_v34 }
 0x1e0   : > { %v8780_v30 = vpop.eup %8779  ;;  %8801 = vrcp.f32 %v2907_v37  ;;  %v2917_v21 = vadd.f32 1.0, %v8778_v36  ;;  %v11096_v36 = vadd.f32 %v10922_v9, %v10905_v3  ;;  %v11110_v9 = vadd.f32 %v10938_v58, %v10917_v7 }
 0x1e1   : > { %v11064_v55 = vpop.f32.mrf.mxu0  ;;  %8100 = vmatmul.mubr.msk.f32.gmra.mxu0 %vm542_vm1, %v10717_v39  ;;  %8134 = vmatmul.mubr.msk.f32.gmra.mxu1 %vm542_vm1, %v10717_v39  ;;  %v8782_v2 = vpop.eup %8781  ;;  %8803 = vrcp.f32 %v2906_v31  ;;  %v2916_v50 = vadd.f32 1.0, %v8780_v30  ;;  %v11104_v30 = vadd.f32 %v10924_v10, %v10910_v4  ;;  %v11125_v10 = vadd.f32 %v10948_v62, %v10905_v3 }
 0x1e2   : > { %1400 = vmatprep.mubr.f32.mxu0 %v14925_v48  ;;  %1657 = vmatprep.mubr.f32.mxu1 %v14925_v48  ;;  %v8784_v35 = vpop.eup %8783  ;;  %8805 = vrcp.f32 %v2908_v29  ;;  %14937 = vst [vmem:[#allocation59_spill] sm:$0xff] %v11096_v36  ;;  %v11098_v31 = vpop.f32.mrf.mxu1  ;;  %14939 = vst [vmem:[#allocation61_spill] sm:$0xff] %v11110_v9  ;;  %v8215_v62 = vmul.f32 -1.442695, %v11110_v9  ;;  %v11185_v9 = vadd.f32 %v10994_v59, %v10917_v7 }
 0x1e3   : > { %v11074_v1 = vpop.f32.mrf.mxu0  ;;  %v8786_v54 = vpop.eup %8785  ;;  %8807 = vrcp.f32 %v2915_v57  ;;  %v2925_v37 = vadd.f32 1.0, %v8784_v35  ;;  %14938 = vst [vmem:[#allocation60_spill] sm:$0xff] %v11104_v30  ;;  %v11114_v35 = vadd.f32 %v10940_v47, %v10920_v8  ;;  %14941 = vst [vmem:[#allocation63_spill] sm:$0xff] %v11125_v10  ;;  %v8216_v58 = vmul.f32 -1.442695, %v11104_v30 }
 0x1e4   : > { %v8788_v28 = vpop.eup %8787  ;;  %8809 = vrcp.f32 %v2917_v21  ;;  %v2927_v29 = vadd.f32 1.0, %v8786_v54  ;;  %v11136_v54 = vadd.f32 %v10958_v0, %v10910_v4  ;;  %v11152_v0 = vadd.f32 %v10986_v53, %v10920_v8  ;;  %14949 = vst [vmem:[#allocation71_spill] sm:$0xff] %v11185_v9 }
 0x1e5   : > { %v11076_v39 = vpop.f32.mrf.mxu0  ;;  %8101 = vmatmul.mubr.msk.f32.gmra.mxu0 %vm542_vm1, %v10725_v40  ;;  %8135 = vmatmul.mubr.msk.f32.gmra.mxu1 %vm542_vm1, %v10725_v40  ;;  %v2918_v40 = vadd.f32 1.0, %v8782_v2  ;;  %v8790_v38 = vpop.eup %8789  ;;  %8811 = vrcp.f32 %v2916_v50  ;;  %v2926_v2 = vadd.f32 1.0, %v8788_v28  ;;  %14940 = vst [vmem:[#allocation62_spill] sm:$0xff] %v11114_v35  ;;  %v8214_v28 = vmul.f32 -1.442695, %v11096_v36 }
 0x1e6   : > { %1406 = vmatprep.mubr.f32.mxu0 %v14925_v48  ;;  %1663 = vmatprep.mubr.f32.mxu1 %v14925_v48  ;;  %v2928_v57 = vadd.f32 1.0, %v8790_v38  ;;  %v11131_v47 = vpop.eup %8791  ;;  %14942 = vst [vmem:[#allocation64_spill] sm:$0xff] %v11136_v54  ;;  %14944 = vst [vmem:[#allocation66_spill] sm:$0xff] %v11152_v0 }
 0x1e7   : > { %v11086_v22 = vpop.f32.mrf.mxu0  ;;  %8813 = vrcp.f32 %v2918_v40  ;;  %v11127_v40 = vpop.f32.mrf.mxu1 }
 0x1e8   : > { %8815 = vrcp.f32 %v2925_v37  ;;  %v11140_v38 = vpop.eup %8793  ;;  %v11145_v37 = vadd.f32 %v10966_v52, %v10917_v7  ;;  %v8224_v52 = vmul.f32 -1.442695, %v11125_v10 }
 0x1e9   : > { %v11088_v27 = vpop.f32.mrf.mxu0  ;;  %8102 = vmatmul.mubr.msk.f32.gmra.mxu0 %vm542_vm1, %v10733_v41  ;;  %8136 = vmatmul.mubr.msk.f32.gmra.mxu1 %vm542_vm1, %v10733_v41  ;;  %8817 = vrcp.f32 %v2927_v29  ;;  %v8217_v29 = vmul.f32 -1.442695, %v11114_v35  ;;  %v11167_v35 = vpop.f32.mrf.mxu1 }
 0x1ea   : > { %1412 = vmatprep.mubr.f32.mxu0 %v14925_v48  ;;  %1669 = vmatprep.mubr.f32.mxu1 %v14925_v48  ;;  %8819 = vrcp.f32 %v2926_v2  ;;  %14943 = vst [vmem:[#allocation65_spill] sm:$0xff] %v11145_v37 }
 0x1eb   : > { %v11106_v34 = vpop.f32.mrf.mxu0  ;;  %8821 = vrcp.f32 %v2928_v57  ;;  %v11165_v57 = vadd.f32 %v10976_v32, %v10905_v3  ;;  %v8225_v32 = vmul.f32 -1.442695, %v11145_v37 }
 0x1ec   : > { %8823 = vpow2.f32 %v8214_v28  ;;  %v11176_v28 = vadd.f32 %v11011_v56, %v10910_v4  ;;  %v11192_v56 = vadd.f32 %v11030_v33, %v10920_v8 }
 0x1ed   : > { %v11116_v21 = vpop.f32.mrf.mxu0  ;;  %8103 = vmatmul.mubr.msk.f32.gmra.mxu0 %vm542_vm1, %v10741_v42  ;;  %8137 = vmatmul.mubr.msk.f32.gmra.mxu1 %vm542_vm1, %v10741_v42  ;;  %v11147_v42 = vpop.eup %8795  ;;  %14945 = vst [vmem:[#allocation67_spill] sm:$0xff] %v11165_v57  ;;  %8825 = vpow2.f32 %v8216_v58  ;;  %v8227_v58 = vmul.f32 -1.442695, %v11152_v0  ;;  %v8234_v59 = vmul.f32 -1.442695, %v11165_v57 }
 0x1ee   : > { %1418 = vmatprep.mubr.f32.mxu0 %v14925_v48  ;;  %1675 = vmatprep.mubr.f32.mxu1 %v14925_v48  ;;  %v11160_v2 = vpop.eup %8797  ;;  %14947 = vst [vmem:[#allocation69_spill] sm:$0xff] %v11176_v28  ;;  %8827 = vpow2.f32 %v8215_v62  ;;  %14951 = vst [vmem:[#allocation73_spill] sm:$0xff] %v11192_v56  ;;  %v8236_v0 = vmul.f32 -1.442695, %v11176_v28 }
 0x1ef   : > { %v11138_v50 = vpop.f32.mrf.mxu0  ;;  %v11171_v53 = vpop.eup %8799  ;;  %8829 = vpow2.f32 %v8217_v29  ;;  %v11205_v29 = vadd.f32 %v11004_v49, %v10905_v3  ;;  %v8235_v49 = vmul.f32 -1.442695, %v11185_v9 }
 0x1f0   : > { %14946 = vst [vmem:[#allocation68_spill] sm:$0xff] %v11171_v53  ;;  %v11180_v36 = vpop.eup %8801  ;;  %8831 = vpow2.f32 %v8224_v52  ;;  %v11224_v53 = vadd.f32 %v11016_v61, %v10917_v7 }
 0x1f1   : > { %v11154_v30 = vpop.f32.mrf.mxu0  ;;  %8104 = vmatmul.mubr.msk.f32.gmra.mxu0 %vm542_vm1, %v10749_v43  ;;  %8138 = vmatmul.mubr.msk.f32.gmra.mxu1 %vm542_vm1, %v10749_v43  ;;  %v8226_v43 = vmul.f32 -1.442695, %v11136_v54  ;;  %14948 = vst [vmem:[#allocation70_spill] sm:$0xff] %v11180_v36  ;;  %v11187_v10 = vpop.eup %8803  ;;  %14953 = vst [vmem:[#allocation75_spill] sm:$0xff] %v11205_v29  ;;  %v8244_v61 = vmul.f32 -1.442695, %v11205_v29 }
 0x1f2   : > { %1424 = vmatprep.mubr.f32.mxu0 %v14925_v48  ;;  %1681 = vmatprep.mubr.f32.mxu1 %v14925_v48  ;;  %14950 = vst [vmem:[#allocation72_spill] sm:$0xff] %v11187_v10  ;;  %v11200_v62 = vpop.eup %8805  ;;  %v11207_v36 = vpop.f32.mrf.mxu1  ;;  %14957 = vst [vmem:[#allocation79_spill] sm:$0xff] %v11224_v53 }
 0x1f3   : > { %v11178_v41 = vpop.f32.mrf.mxu0  ;;  %14952 = vst [vmem:[#allocation74_spill] sm:$0xff] %v11200_v62  ;;  %v11210_v33 = vpop.eup %8807  ;;  %8833 = vpow2.f32 %v8226_v43  ;;  %v8237_v43 = vmul.f32 -1.442695, %v11192_v56 }
 0x1f4   : > { %14954 = vst [vmem:[#allocation76_spill] sm:$0xff] %v11210_v33  ;;  %v11219_v62 = vpop.eup %8809  ;;  %8835 = vpow2.f32 %v8225_v32 }
 0x1f5   : > { %v11194_v54 = vpop.f32.mrf.mxu0  ;;  %8105 = vmatmul.mubr.msk.f32.gmra.mxu0 %vm542_vm1, %v10757_v44  ;;  %8139 = vmatmul.mubr.msk.f32.gmra.mxu1 %vm542_vm1, %v10757_v44  ;;  %v11215_v44 = vadd.f32 %v11055_v60, %v10910_v4  ;;  %14956 = vst [vmem:[#allocation78_spill] sm:$0xff] %v11219_v62  ;;  %v11226_v10 = vpop.eup %8811  ;;  %8837 = vpow2.f32 %v8227_v58  ;;  %v11231_v60 = vadd.f32 %v11070_v46, %v10920_v8 }
 0x1f6   : > { %1752 = vmatprep.mubr.f32.mxu0 %v14925_v48  ;;  %14958 = vst [vmem:[#allocation80_spill] sm:$0xff] %v11226_v10  ;;  %v11237_v32 = vpop.eup %8813  ;;  %8839 = vpow2.f32 %v8234_v59  ;;  %v11240_v62 = vpop.f32.mrf.mxu1 }
 0x1f7   : > { %14955 = vst [vmem:[#allocation77_spill] sm:$0xff] %v11215_v44  ;;  %v11217_v52 = vpop.f32.mrf.mxu0  ;;  %14959 = vst [vmem:[#allocation81_spill] sm:$0xff] %v11231_v60  ;;  %v11243_v58 = vpop.eup %8815  ;;  %8841 = vpow2.f32 %v8236_v0  ;;  %v8246_v46 = vmul.f32 -1.442695, %v11215_v44  ;;  %v8247_v59 = vmul.f32 -1.442695, %v11231_v60 }
 0x1f8   : > { %14960 = vst [vmem:[#allocation82_spill] sm:$0xff] %v11237_v32  ;;  %14961 = vst [vmem:[#allocation83_spill] sm:$0xff] %v11243_v58  ;;  %v11248_v33 = vpop.eup %8817  ;;  %8843 = vpow2.f32 %v8235_v49  ;;  %v2935_v44 = vadd.f32 1.0, %v11131_v47  ;;  %v11261_v58 = vpop.f32.mrf.mxu1 }
 0x1f9   : > { %v11233_v28 = vpop.f32.mrf.mxu0  ;;  %8142 = vmatmul.mubr.msk.f32.vlgmr.msra.gmra.mxu0 %vm542_vm1, %v10502_v11  ;;  %14962 = vst [vmem:[#allocation84_spill] sm:$0xff] %v11248_v33  ;;  %v8245_v11 = vmul.f32 -1.442695, %v11224_v53  ;;  %v11251_v32 = vpop.eup %8819  ;;  %8845 = vpow2.f32 %v8237_v43  ;;  %v2937_v33 = vadd.f32 1.0, %v11140_v38 }
 0x1fa   : > { %1758 = vmatprep.mubr.f32.mxu0 %v14925_v48  ;;  %14963 = vst [vmem:[#allocation85_spill] sm:$0xff] %v11251_v32  ;;  %v11258_v0 = vpop.eup %8821  ;;  %8847 = vpow2.f32 %v8244_v61  ;;  %v2936_v32 = vadd.f32 1.0, %v11147_v42  ;;  %v11273_v38 = vpop.f32.mrf.mxu1 }
 0x1fb   : > { %v11246_v56 = vpop.f32.mrf.mxu0  ;;  %14964 = vst [vmem:[#allocation86_spill] sm:$0xff] %v11258_v0  ;;  %v8824_v49 = vpop.eup %8823  ;;  %8849 = vpow2.f32 %v8246_v46  ;;  %v2938_v0 = vadd.f32 1.0, %v11160_v2 }
 0x1fc   : > { %v8826_v60 = vpop.eup %8825  ;;  %8851 = vpow2.f32 %v8245_v11  ;;  %v2945_v37 = vadd.f32 1.0, %v8824_v49  ;;  %v11282_v49 = vpop.f32.mrf.mxu1 }
 0x1fd   : > { %v11254_v10 = vpop.f32.mrf.mxu0  ;;  %8143 = vmatmul.mubr.msk.f32.gmra.mxu0 %vm542_vm1, %v10512_v12  ;;  %v8828_v12 = vpop.eup %8827  ;;  %8853 = vpow2.f32 %v8247_v59  ;;  %v2947_v42 = vadd.f32 1.0, %v8826_v60 }
 0x1fe   : > { %1764 = vmatprep.mubr.f32.mxu0 %v14925_v48  ;;  %v8830_v61 = vpop.eup %8829  ;;  %8855 = vrcp.f32 %v2935_v44  ;;  %v2946_v2 = vadd.f32 1.0, %v8828_v12 }
 0x1ff   : > { %v11265_v43 = vpop.f32.mrf.mxu0  ;;  %v8832_v46 = vpop.eup %8831  ;;  %8857 = vrcp.f32 %v2937_v33  ;;  %v2948_v9 = vadd.f32 1.0, %v8830_v61 }
 0x200   : > { %v8834_v57 = vpop.eup %8833  ;;  %8859 = vrcp.f32 %v2936_v32  ;;  %v2955_v44 = vadd.f32 1.0, %v8832_v46  ;;  %v11291_v46 = vpop.f32.mrf.mxu1 }
 0x201   : > { %v11269_v47 = vpop.f32.mrf.mxu0  ;;  %8144 = vmatmul.mubr.msk.f32.gmra.mxu0 %vm542_vm1, %v10520_v13  ;;  %v8836_v59 = vpop.eup %8835  ;;  %8861 = vrcp.f32 %v2938_v0  ;;  %v2957_v60 = vadd.f32 1.0, %v8834_v57 }
 0x202   : > { %1770 = vmatprep.mubr.f32.mxu0 %v14925_v48  ;;  %v8838_v13 = vpop.eup %8837  ;;  %8863 = vrcp.f32 %v2945_v37  ;;  %v2956_v0 = vadd.f32 1.0, %v8836_v59 }
 0x203   : > { %v11276_v11 = vpop.f32.mrf.mxu0  ;;  %v8840_v33 = vpop.eup %8839  ;;  %8865 = vrcp.f32 %v2947_v42 }
 0x204   : > { %v8842_v12 = vpop.eup %8841  ;;  %8867 = vrcp.f32 %v2946_v2  ;;  %v2965_v37 = vadd.f32 1.0, %v8840_v33  ;;  %v11302_v33 = vadd.f32 %v11020_v51, %v10905_v3  ;;  %v11319_v51 = vadd.f32 %v11038_v45, %v10917_v7 }
 0x205   : > { %v11278_v29 = vpop.f32.mrf.mxu0  ;;  %8145 = vmatmul.mubr.msk.f32.gmra.mxu0 %vm542_vm1, %v10528_v14  ;;  %v8844_v61 = vpop.eup %8843  ;;  %8869 = vrcp.f32 %v2948_v9  ;;  %v2967_v42 = vadd.f32 1.0, %v8842_v12  ;;  %v11336_v45 = vadd.f32 %v11048_v63, %v10905_v3 }
 0x206   : > { %14965 = vst [vmem:[#allocation87_spill] sm:$0xff] %v11278_v29  ;;  %1776 = vmatprep.mubr.f32.mxu0 %v14925_v48  ;;  %v2958_v29 = vadd.f32 1.0, %v8838_v13  ;;  %v8846_v14 = vpop.eup %8845  ;;  %8871 = vrcp.f32 %v2955_v44  ;;  %v2966_v9 = vadd.f32 1.0, %v8844_v61  ;;  %v8255_v63 = vmul.f32 -1.442695, %v11319_v51 }
 0x207   : > { %v11285_v32 = vpop.f32.mrf.mxu0  ;;  %v8848_v57 = vpop.eup %8847  ;;  %8873 = vrcp.f32 %v2957_v60 }
 0x208   : > { %14966 = vst [vmem:[#allocation88_spill] sm:$0xff] %v11285_v32  ;;  %v8850_v59 = vpop.eup %8849  ;;  %8875 = vrcp.f32 %v2956_v0  ;;  %v2975_v44 = vadd.f32 1.0, %v8848_v57  ;;  %v11304_v60 = vpop.f32.mrf.mxu1  ;;  %v11311_v0 = vadd.f32 %v11082_v5, %v10910_v4 }
 0x209   : > { %v11287_v53 = vpop.f32.mrf.mxu0  ;;  %8146 = vmatmul.mubr.msk.f32.gmra.mxu0 %vm542_vm1, %v10536_v15  ;;  %v8852_v13 = vpop.eup %8851  ;;  %8877 = vrcp.f32 %v2958_v29  ;;  %v2977_v29 = vadd.f32 1.0, %v8850_v59 }
 0x20a   : > { %14967 = vst [vmem:[#allocation89_spill] sm:$0xff] %v11287_v53  ;;  %1782 = vmatprep.mubr.f32.mxu0 %v14925_v48  ;;  %v2968_v53 = vadd.f32 1.0, %v8846_v14  ;;  %v8854_v15 = vpop.eup %8853  ;;  %8879 = vrcp.f32 %v2965_v37  ;;  %14971 = vst [vmem:[#allocation93_spill] sm:$0xff] %v11311_v0  ;;  %v2976_v14 = vadd.f32 1.0, %v8852_v13  ;;  %v8256_v13 = vmul.f32 -1.442695, %v11311_v0 }
 0x20b   : > { %v11294_v2 = vpop.f32.mrf.mxu0  ;;  %v11307_v12 = vpop.eup %8855  ;;  %8881 = vrcp.f32 %v2967_v42  ;;  %v2978_v57 = vadd.f32 1.0, %v8854_v15  ;;  %v11325_v42 = vadd.f32 %v11098_v31, %v10920_v8 }
 0x20c   : > { %14968 = vst [vmem:[#allocation90_spill] sm:$0xff] %v11294_v2  ;;  %14970 = vst [vmem:[#allocation92_spill] sm:$0xff] %v11307_v12  ;;  %v11315_v61 = vpop.eup %8857  ;;  %8883 = vrcp.f32 %v2966_v9  ;;  %v8254_v9 = vmul.f32 -1.442695, %v11302_v33 }
 0x20d   : > { %v11296_v32 = vpop.f32.mrf.mxu0  ;;  %8147 = vmatmul.mubr.msk.f32.gmra.mxu0 %vm542_vm1, %v10544_v16  ;;  %14973 = vst [vmem:[#allocation95_spill] sm:$0xff] %v11315_v61  ;;  %v11321_v37 = vpop.eup %8859  ;;  %8885 = vrcp.f32 %v2968_v53  ;;  %14975 = vst [vmem:[#allocation97_spill] sm:$0xff] %v11325_v42  ;;  %v11355_v61 = vadd.f32 %v11060_v6, %v10917_v7  ;;  %v8264_v6 = vmul.f32 -1.442695, %v11336_v45 }
 0x20e   : > { %14969 = vst [vmem:[#allocation91_spill] sm:$0xff] %v11296_v32  ;;  %1788 = vmatprep.mubr.f32.mxu0 %v14925_v48  ;;  %14974 = vst [vmem:[#allocation96_spill] sm:$0xff] %v11321_v37  ;;  %v11331_v59 = vpop.eup %8861  ;;  %8887 = vrcp.f32 %v2975_v44  ;;  %v11338_v53 = vpop.f32.mrf.mxu1 }
 0x20f   : > { %v11313_v16 = vpop.f32.mrf.mxu0  ;;  %14977 = vst [vmem:[#allocation99_spill] sm:$0xff] %v11331_v59  ;;  %v11341_v31 = vpop.eup %8863  ;;  %8889 = vrcp.f32 %v2977_v29  ;;  %v8257_v29 = vmul.f32 -1.442695, %v11325_v42 }
 0x210   : > { %14972 = vst [vmem:[#allocation94_spill] sm:$0xff] %v11313_v16  ;;  %14978 = vst [vmem:[#allocation100_spill] sm:$0xff] %v11341_v31  ;;  %v11350_v44 = vpop.eup %8865  ;;  %8891 = vrcp.f32 %v2976_v14 }
 0x211   : > { %v11327_v5 = vpop.f32.mrf.mxu0  ;;  %8148 = vmatmul.mubr.msk.f32.gmra.mxu0 %vm542_vm1, %v10552_v17  ;;  %v11346_v17 = vadd.f32 %v11127_v40, %v10910_v4  ;;  %14981 = vst [vmem:[#allocation103_spill] sm:$0xff] %v11350_v44  ;;  %v11357_v59 = vpop.eup %8867  ;;  %8893 = vrcp.f32 %v2978_v57  ;;  %v11362_v40 = vadd.f32 %v11167_v35, %v10920_v8  ;;  %v11373_v44 = vadd.f32 %v11064_v55, %v10905_v3 }
 0x212   : > { %14976 = vst [vmem:[#allocation98_spill] sm:$0xff] %v11327_v5  ;;  %1794 = vmatprep.mubr.f32.mxu0 %v14925_v48  ;;  %14982 = vst [vmem:[#allocation104_spill] sm:$0xff] %v11357_v59  ;;  %v11368_v14 = vpop.eup %8869  ;;  %8895 = vpow2.f32 %v8254_v9  ;;  %v11375_v57 = vpop.f32.mrf.mxu1  ;;  %v8265_v55 = vmul.f32 -1.442695, %v11355_v61 }
 0x213   : > { %14979 = vst [vmem:[#allocation101_spill] sm:$0xff] %v11346_v17  ;;  %v11348_v15 = vpop.f32.mrf.mxu0  ;;  %14983 = vst [vmem:[#allocation105_spill] sm:$0xff] %v11362_v40  ;;  %v11378_v35 = vpop.eup %8871  ;;  %8897 = vpow2.f32 %v8256_v13  ;;  %v8266_v42 = vmul.f32 -1.442695, %v11346_v17  ;;  %v8267_v13 = vmul.f32 -1.442695, %v11362_v40 }
 0x214   : > { %14980 = vst [vmem:[#allocation102_spill] sm:$0xff] %v11348_v15  ;;  %14985 = vst [vmem:[#allocation107_spill] sm:$0xff] %v11368_v14  ;;  %v11387_v14 = vpop.eup %8873  ;;  %8899 = vpow2.f32 %v8255_v63 }
 0x215   : > { %v11364_v0 = vpop.f32.mrf.mxu0  ;;  %8149 = vmatmul.mubr.msk.f32.gmra.mxu0 %vm542_vm1, %v10560_v18  ;;  %14986 = vst [vmem:[#allocation108_spill] sm:$0xff] %v11378_v35  ;;  %v11383_v18 = vadd.f32 %v11207_v36, %v10910_v4  ;;  %14989 = vst [vmem:[#allocation111_spill] sm:$0xff] %v11387_v14  ;;  %v11394_v15 = vpop.eup %8875  ;;  %8901 = vpow2.f32 %v8257_v29  ;;  %v11399_v36 = vadd.f32 %v11240_v62, %v10920_v8 }
 0x216   : > { %14984 = vst [vmem:[#allocation106_spill] sm:$0xff] %v11364_v0  ;;  %1800 = vmatprep.mubr.f32.mxu0 %v14925_v48  ;;  %v11392_v0 = vadd.f32 %v11074_v1, %v10917_v7  ;;  %14990 = vst [vmem:[#allocation112_spill] sm:$0xff] %v11394_v15  ;;  %v11405_v63 = vpop.eup %8877  ;;  %8903 = vpow2.f32 %v8264_v6  ;;  %v8274_v1 = vmul.f32 -1.442695, %v11373_v44  ;;  %v11410_v14 = vadd.f32 %v11076_v39, %v10905_v3  ;;  %v11412_v29 = vpop.f32.mrf.mxu1 }
 0x217   : > { %14987 = vst [vmem:[#allocation109_spill] sm:$0xff] %v11383_v18  ;;  %v11385_v9 = vpop.f32.mrf.mxu0  ;;  %14991 = vst [vmem:[#allocation113_spill] sm:$0xff] %v11399_v36  ;;  %v11415_v62 = vpop.eup %8879  ;;  %8905 = vpow2.f32 %v8266_v42  ;;  %v8276_v40 = vmul.f32 -1.442695, %v11383_v18  ;;  %v8277_v42 = vmul.f32 -1.442695, %v11399_v36 }
 0x218   : > { %14988 = vst [vmem:[#allocation110_spill] sm:$0xff] %v11385_v9  ;;  %14993 = vst [vmem:[#allocation115_spill] sm:$0xff] %v11405_v63  ;;  %v11424_v63 = vpop.eup %8881  ;;  %8907 = vpow2.f32 %v8265_v55  ;;  %v8275_v39 = vmul.f32 -1.442695, %v11392_v0 }
 0x219   : > { %v11401_v17 = vpop.f32.mrf.mxu0  ;;  %8150 = vmatmul.mubr.msk.f32.gmra.mxu0 %vm542_vm1, %v10568_v19  ;;  %14994 = vst [vmem:[#allocation116_spill] sm:$0xff] %v11415_v62  ;;  %v11420_v19 = vadd.f32 %v11261_v58, %v10910_v4  ;;  %14997 = vst [vmem:[#allocation119_spill] sm:$0xff] %v11424_v63  ;;  %v11431_v9 = vpop.eup %8883  ;;  %8909 = vpow2.f32 %v8267_v13  ;;  %v11436_v58 = vadd.f32 %v11273_v38, %v10920_v8 }
 0x21a   : > { %14992 = vst [vmem:[#allocation114_spill] sm:$0xff] %v11401_v17  ;;  %1806 = vmatprep.mubr.f32.mxu0 %v14925_v48  ;;  %v11429_v17 = vadd.f32 %v11086_v22, %v10917_v7  ;;  %14998 = vst [vmem:[#allocation120_spill] sm:$0xff] %v11431_v9  ;;  %v11442_v55 = vpop.eup %8885  ;;  %8911 = vpow2.f32 %v8274_v1  ;;  %v8284_v22 = vmul.f32 -1.442695, %v11410_v14  ;;  %v11447_v63 = vadd.f32 %v11106_v34, %v10917_v7  ;;  %v11449_v13 = vpop.f32.mrf.mxu1 }
 0x21b   : > { %14995 = vst [vmem:[#allocation117_spill] sm:$0xff] %v11420_v19  ;;  %v11422_v6 = vpop.f32.mrf.mxu0  ;;  %14999 = vst [vmem:[#allocation121_spill] sm:$0xff] %v11436_v58  ;;  %v11452_v38 = vpop.eup %8887  ;;  %8913 = vpow2.f32 %v8276_v40  ;;  %v8286_v36 = vmul.f32 -1.442695, %v11420_v19  ;;  %v8287_v40 = vmul.f32 -1.442695, %v11436_v58  ;;  %v11491_v58 = vadd.f32 %v11116_v21, %v10905_v3 }
 0x21c   : > { %14996 = vst [vmem:[#allocation118_spill] sm:$0xff] %v11422_v6  ;;  %15001 = vst [vmem:[#allocation123_spill] sm:$0xff] %v11442_v55  ;;  %v11461_v55 = vpop.eup %8889  ;;  %8915 = vpow2.f32 %v8275_v39  ;;  %v8285_v34 = vmul.f32 -1.442695, %v11429_v17 }
 0x21d   : > { %v11438_v18 = vpop.f32.mrf.mxu0  ;;  %8151 = vmatmul.mubr.msk.f32.gmra.mxu0 %vm542_vm1, %v10576_v20  ;;  %15002 = vst [vmem:[#allocation124_spill] sm:$0xff] %v11452_v38  ;;  %v11457_v20 = vadd.f32 %v11138_v50, %v10917_v7  ;;  %15004 = vst [vmem:[#allocation126_spill] sm:$0xff] %v11461_v55  ;;  %v11468_v6 = vpop.eup %8891  ;;  %8917 = vpow2.f32 %v8277_v42  ;;  %v11473_v50 = vadd.f32 %v11154_v30, %v10905_v3 }
 0x21e   : > { %15000 = vst [vmem:[#allocation122_spill] sm:$0xff] %v11438_v18  ;;  %1812 = vmatprep.mubr.f32.mxu0 %v14925_v48  ;;  %v11466_v18 = vadd.f32 %v11178_v41, %v10917_v7  ;;  %v11479_v39 = vpop.eup %8893  ;;  %8919 = vpow2.f32 %v8284_v22  ;;  %v8295_v41 = vmul.f32 -1.442695, %v11447_v63  ;;  %v11484_v55 = vadd.f32 %v11194_v54, %v10905_v3  ;;  %v11486_v42 = vpop.f32.mrf.mxu1 }
 0x21f   : > { %v11459_v1 = vpop.f32.mrf.mxu0  ;;  %15006 = vst [vmem:[#allocation128_spill] sm:$0xff] %v11479_v39  ;;  %v8896_v30 = vpop.eup %8895  ;;  %8921 = vpow2.f32 %v8286_v36  ;;  %v11499_v54 = vadd.f32 %v11217_v52, %v10917_v7  ;;  %v11503_v36 = vadd.f32 %v11088_v27, %v10905_v3  ;;  %v8314_v21 = vmul.f32 -1.442695, %v11473_v50 }
 0x220   : > { %15003 = vst [vmem:[#allocation125_spill] sm:$0xff] %v11459_v1  ;;  %v8898_v22 = vpop.eup %8897  ;;  %8923 = vpow2.f32 %v8285_v34  ;;  %v11511_v16 = vpop.f32.mrf.mxu1  ;;  %v2985_v37 = vadd.f32 1.0, %v8896_v30 }
 0x221   : > { %v11475_v19 = vpop.f32.mrf.mxu0  ;;  %8152 = vmatmul.mubr.msk.f32.gmra.mxu0 %vm542_vm1, %v10588_v23  ;;  %v8305_v23 = vmul.f32 -1.442695, %v11457_v20  ;;  %v8900_v1 = vpop.eup %8899  ;;  %8925 = vpow2.f32 %v8287_v40  ;;  %v8304_v40 = vmul.f32 -1.442695, %v11491_v58 }
 0x222   : > { %15005 = vst [vmem:[#allocation127_spill] sm:$0xff] %v11475_v19  ;;  %1818 = vmatprep.mubr.f32.mxu0 %v14925_v48  ;;  %v8315_v19 = vmul.f32 -1.442695, %v11466_v18  ;;  %v8902_v34 = vpop.eup %8901  ;;  %8927 = vpow2.f32 %v8295_v41  ;;  %v11523_v31 = vpop.f32.mrf.mxu1 }
 0x223   : > { %v11494_v39 = vpop.f32.mrf.mxu0  ;;  %v8904_v52 = vpop.eup %8903  ;;  %8929 = vpow2.f32 %v8305_v23 }
 0x224   : > { %15007 = vst [vmem:[#allocation129_spill] sm:$0xff] %v11494_v39  ;;  %v8324_v39 = vmul.f32 -1.442695, %v11484_v55  ;;  %v8906_v32 = vpop.eup %8905  ;;  %8931 = vpow2.f32 %v8315_v19  ;;  %v2987_v19 = vadd.f32 1.0, %v8898_v22  ;;  %v2995_v22 = vadd.f32 1.0, %v8904_v52 }
 0x225   : > { %v11506_v5 = vpop.f32.mrf.mxu0  ;;  %8153 = vmatmul.mubr.msk.f32.gmra.mxu0 %vm542_vm1, %v10597_v24  ;;  %v8908_v2 = vpop.eup %8907  ;;  %v8294_v24 = vmul.f32 -1.442695, %v11503_v36  ;;  %8933 = vpow2.f32 %v8314_v21  ;;  %v2986_v21 = vadd.f32 1.0, %v8900_v1  ;;  %v2997_v1 = vadd.f32 1.0, %v8906_v32 }
 0x226   : > { %15008 = vst [vmem:[#allocation130_spill] sm:$0xff] %v11506_v5  ;;  %1824 = vmatprep.mubr.f32.mxu0 %v14925_v48  ;;  %v8325_v5 = vmul.f32 -1.442695, %v11499_v54  ;;  %v8910_v12 = vpop.eup %8909  ;;  %8935 = vpow2.f32 %v8324_v39  ;;  %v2996_v52 = vadd.f32 1.0, %v8908_v2  ;;  %v11563_v32 = vadd.f32 %v11338_v53, %v10920_v8 }
 0x227   : > { %v11515_v27 = vpop.f32.mrf.mxu0  ;;  %v11526_v23 = vpop.eup %8911  ;;  %8937 = vpow2.f32 %v8304_v40  ;;  %v11542_v40 = vadd.f32 %v11282_v49, %v10910_v4  ;;  %v11559_v49 = vadd.f32 %v11304_v60, %v10910_v4 }
 0x228   : > { %15009 = vst [vmem:[#allocation131_spill] sm:$0xff] %v11515_v27  ;;  %v11530_v59 = vpop.eup %8913  ;;  %8939 = vpow2.f32 %v8325_v5  ;;  %15017 = vst [vmem:[#allocation139_spill] sm:$0xff] %v11563_v32 }
 0x229   : > { %v11519_v41 = vpop.f32.mrf.mxu0  ;;  %8154 = vmatmul.mubr.msk.f32.gmra.mxu0 %vm542_vm1, %v10605_v25  ;;  %v2988_v25 = vadd.f32 1.0, %v8902_v34  ;;  %8941 = vpow2.f32 %v8294_v24  ;;  %15013 = vst [vmem:[#allocation135_spill] sm:$0xff] %v11542_v40  ;;  %v11551_v34 = vadd.f32 %v11291_v46, %v10920_v8  ;;  %15016 = vst [vmem:[#allocation138_spill] sm:$0xff] %v11559_v49  ;;  %v15019_v46 = vld [vmem:[#allocation20_spill] sm:$0xff]  ;;  %v8296_v2 = vmul.f32 -1.442695, %v11542_v40 }
 0x22a   : > { %15010 = vst [vmem:[#allocation132_spill] sm:$0xff] %v11519_v41  ;;  %1830 = vmatprep.mubr.f32.mxu0 %v14925_v48  ;;  %v11532_v41 = vpop.eup %8915  ;;  %8943 = vrcp.f32 %v2985_v37  ;;  %v15022_v40 = vld [vmem:[#allocation21_spill] sm:$0xff] }
 0x22b   : > { %v11528_v27 = vpop.f32.mrf.mxu0  ;;  %v11538_v39 = vpop.eup %8917  ;;  %8945 = vrcp.f32 %v2987_v19  ;;  %15014 = vst [vmem:[#allocation136_spill] sm:$0xff] %v11551_v34 }
 0x22c   : > { %15011 = vst [vmem:[#allocation133_spill] sm:$0xff] %v11528_v27  ;;  %v11544_v27 = vpop.f32.mrf.mxu1  ;;  %v11547_v5 = vpop.eup %8919  ;;  %8947 = vrcp.f32 %v2986_v21 }
 0x22d   : > { %v11534_v30 = vpop.f32.mrf.mxu0  ;;  %8155 = vmatmul.mubr.msk.f32.gmra.mxu0 %vm542_vm1, %v10613_v26  ;;  %v11555_v37 = vpop.eup %8921  ;;  %8949 = vrcp.f32 %v2988_v25 }
 0x22e   : > { %15012 = vst [vmem:[#allocation134_spill] sm:$0xff] %v11534_v30  ;;  %1836 = vmatprep.mubr.f32.mxu0 %v14925_v48  ;;  %v8924_v24 = vpop.eup %8923  ;;  %v2998_v30 = vadd.f32 1.0, %v8910_v12  ;;  %8951 = vrcp.f32 %v2995_v22  ;;  %v11572_v21 = vpop.f32.mrf.mxu1  ;;  %v8297_v12 = vmul.f32 -1.442695, %v11551_v34  ;;  %v8307_v22 = vmul.f32 -1.442695, %v11563_v32 }
 0x22f   : > { %v11553_v26 = vpop.f32.mrf.mxu0  ;;  %8953 = vrcp.f32 %v2997_v1 }
 0x230   : > { %15015 = vst [vmem:[#allocation137_spill] sm:$0xff] %v11553_v26  ;;  %v11569_v26 = vpop.eup %8925  ;;  %8955 = vrcp.f32 %v2996_v52  ;;  %v11584_v62 = vpop.f32.mrf.mxu1 }
 0x231   : > { %v11565_v19 = vpop.f32.mrf.mxu0  ;;  %8156 = vmatmul.mubr.msk.f32.gmra.mxu0 %vm542_vm1, %v15019_v46  ;;  %v8928_v60 = vpop.eup %8927  ;;  %8957 = vrcp.f32 %v2998_v30 }
 0x232   : > { %15018 = vst [vmem:[#allocation140_spill] sm:$0xff] %v11565_v19  ;;  %1842 = vmatprep.mubr.f32.mxu0 %v14925_v48  ;;  %v8930_v25 = vpop.eup %8929  ;;  %v8306_v19 = vmul.f32 -1.442695, %v11559_v49  ;;  %8959 = vpow2.f32 %v8296_v2  ;;  %v11593_v38 = vpop.f32.mrf.mxu1 }
 0x233   : > { %v11576_v53 = vpop.f32.mrf.mxu0  ;;  %v8932_v46 = vpop.eup %8931  ;;  %8961 = vpow2.f32 %v8297_v12 }
 0x234   : > { %15020 = vst [vmem:[#allocation20_spill] sm:$0xff] %v11576_v53  ;;  %v8934_v15 = vpop.eup %8933  ;;  %v3046_v1 = vadd.f32 1.0, %v8932_v46  ;;  %8963 = vpow2.f32 %v8306_v19  ;;  %v3036_v46 = vadd.f32 1.0, %v8930_v25  ;;  %v15027_v25 = vld [vmem:[#allocation23_spill] sm:$0xff] }
 0x235   : > { %v11580_v35 = vpop.f32.mrf.mxu0  ;;  %8157 = vmatmul.mubr.msk.f32.gmra.mxu0 %vm542_vm1, %v15022_v40  ;;  %v8936_v34 = vpop.eup %8935  ;;  %8965 = vpow2.f32 %v8307_v22  ;;  %v15025_v40 = vld [vmem:[#allocation22_spill] sm:$0xff] }
 0x236   : > { %15021 = vst [vmem:[#allocation141_spill] sm:$0xff] %v11580_v35  ;;  %1848 = vmatprep.mubr.f32.mxu0 %v14925_v48  ;;  %v8938_v49 = vpop.eup %8937  ;;  %v3055_v30 = vadd.f32 1.0, %v8936_v34  ;;  %v3045_v35 = vadd.f32 1.0, %v8934_v15  ;;  %8967 = vrcp.f32 %v3046_v1  ;;  %v3026_v15 = vadd.f32 1.0, %v8928_v60 }
 0x237   : > { %v11587_v52 = vpop.f32.mrf.mxu0  ;;  %v8940_v32 = vpop.eup %8939  ;;  %v3035_v19 = vadd.f32 1.0, %v8938_v49  ;;  %v3016_v1 = vadd.f32 1.0, %v8924_v24  ;;  %v3005_v24 = vadd.f32 1.0, %v11526_v23  ;;  %v3008_v23 = vadd.f32 1.0, %v11538_v39 }
 0x238   : > { %15023 = vst [vmem:[#allocation21_spill] sm:$0xff] %v11587_v52  ;;  %v8942_v2 = vpop.eup %8941  ;;  %v3056_v9 = vadd.f32 1.0, %v8940_v32  ;;  %8969 = vrcp.f32 %v3055_v30  ;;  %v11608_v52 = vpop.f32.mrf.mxu1  ;;  %v11649_v39 = vadd.f32 %v11486_v42, %v10920_v8 }
 0x239   : > { %v11589_v53 = vpop.f32.mrf.mxu0  ;;  %8158 = vmatmul.mubr.msk.f32.gmra.mxu0 %vm542_vm1, %v15025_v40  ;;  %v11596_v12 = vpop.eup %8943  ;;  %v3025_v40 = vadd.f32 1.0, %v8942_v2 }
 0x23a   : > { %15024 = vst [vmem:[#allocation142_spill] sm:$0xff] %v11589_v53  ;;  %1854 = vmatprep.mubr.f32.mxu0 %v14925_v48  ;;  %v11598_v34 = vpop.eup %8945  ;;  %8971 = vrcp.f32 %v3056_v9  ;;  %v3015_v9 = vadd.f32 1.0, %v11547_v5  ;;  %v3007_v5 = vadd.f32 1.0, %v11530_v59  ;;  %v3017_v59 = vadd.f32 1.0, %v11555_v37  ;;  %15036 = vst [vmem:[#allocation148_spill] sm:$0xff] %v11649_v39 }
 0x23b   : > { %15026 = vst [vmem:[#allocation22_spill] sm:$0xff] %v11598_v34  ;;  %v11600_v22 = vpop.f32.mrf.mxu0  ;;  %v11602_v53 = vpop.eup %8947  ;;  %8973 = vrcp.f32 %v3045_v35  ;;  %v3006_v35 = vadd.f32 1.0, %v11532_v41 }
 0x23c   : > { %v11606_v32 = vpop.eup %8949  ;;  %8975 = vrcp.f32 %v3036_v46  ;;  %v15030_v46 = vld [vmem:[#allocation24_spill] sm:$0xff]  ;;  %v11631_v41 = vpop.f32.mrf.mxu1 }
 0x23d   : > { %8159 = vmatmul.mubr.msk.f32.gmra.mxu0 %vm542_vm1, %v15027_v25  ;;  %15028 = vst [vmem:[#allocation23_spill] sm:$0xff] %v11606_v32  ;;  %v11611_v49 = vpop.eup %8951  ;;  %8977 = vrcp.f32 %v3035_v19  ;;  %v11617_v30 = vpop.f32.mrf.mxu0  ;;  %v11629_v19 = vadd.f32 %v11375_v57, %v10910_v4  ;;  %v11642_v57 = vadd.f32 %v11449_v13, %v10910_v4  ;;  %v3018_v32 = vadd.f32 1.0, %v11569_v26 }
 0x23e   : > { %1860 = vmatprep.mubr.f32.mxu0 %v14925_v48  ;;  %v11614_v60 = vpop.eup %8953  ;;  %8979 = vrcp.f32 %v3026_v15 }
 0x23f   : > { %15029 = vst [vmem:[#allocation143_spill] sm:$0xff] %v11614_v60  ;;  %v11619_v2 = vpop.eup %8955  ;;  %8981 = vrcp.f32 %v3025_v40  ;;  %15032 = vst [vmem:[#allocation144_spill] sm:$0xff] %v11629_v19  ;;  %v11637_v40 = vadd.f32 %v11412_v29, %v10920_v8  ;;  %v15037_v29 = vld [vmem:[#allocation25_spill] sm:$0xff]  ;;  %v8316_v37 = vmul.f32 -1.442695, %v11629_v19 }
 0x240   : > { %v11624_v25 = vpop.eup %8957  ;;  %8983 = vrcp.f32 %v3016_v1  ;;  %15034 = vst [vmem:[#allocation146_spill] sm:$0xff] %v11642_v57  ;;  %v11644_v1 = vpop.f32.mrf.mxu0  ;;  %v8326_v42 = vmul.f32 -1.442695, %v11642_v57 }
 0x241   : > { %8160 = vmatmul.mubr.msk.f32.gmra.mxu0 %vm542_vm1, %v15030_v46  ;;  %15031 = vst [vmem:[#allocation24_spill] sm:$0xff] %v11624_v25  ;;  %v8960_v15 = vpop.eup %8959  ;;  %8985 = vrcp.f32 %v3015_v9  ;;  %15033 = vst [vmem:[#allocation145_spill] sm:$0xff] %v11637_v40 }
 0x242   : > { %1866 = vmatprep.mubr.f32.mxu0 %v14925_v48  ;;  %v8962_v46 = vpop.eup %8961  ;;  %8987 = vrcp.f32 %v3006_v35  ;;  %15035 = vst [vmem:[#allocation147_spill] sm:$0xff] %v11644_v1  ;;  %v11654_v35 = vpop.f32.mrf.mxu1  ;;  %v3027_v1 = vadd.f32 1.0, %v8960_v15 }
 0x243   : > { %v8964_v34 = vpop.eup %8963  ;;  %8989 = vrcp.f32 %v3005_v24  ;;  %v8317_v24 = vmul.f32 -1.442695, %v11637_v40  ;;  %v11659_v60 = vpop.f32.mrf.mxu0  ;;  %v11667_v40 = vadd.f32 %v11233_v28, %v10905_v3  ;;  %v11680_v28 = vadd.f32 %v11246_v56, %v10917_v7 }
 0x244   : > { %v8966_v9 = vpop.eup %8965  ;;  %8991 = vrcp.f32 %v3007_v5  ;;  %v8327_v5 = vmul.f32 -1.442695, %v11649_v39 }
 0x245   : > { %8161 = vmatmul.mubr.msk.f32.gmra.mxu0 %vm542_vm1, %v15037_v29  ;;  %v8968_v13 = vpop.eup %8967  ;;  %8993 = vrcp.f32 %v3008_v23  ;;  %v15038_v29 = vld [vmem:[#allocation26_spill] sm:$0xff]  ;;  %15039 = vst [vmem:[#allocation25_spill] sm:$0xff] %v11667_v40  ;;  %15041 = vst [vmem:[#allocation149_spill] sm:$0xff] %v11680_v28 }
 0x246   : > { %1872 = vmatprep.mubr.f32.mxu0 %v14925_v48  ;;  %v8970_v26 = vpop.eup %8969  ;;  %8995 = vrcp.f32 %v3017_v59  ;;  %v11669_v59 = vpop.f32.mrf.mxu1 }
 0x247   : > { %v8972_v25 = vpop.eup %8971  ;;  %8997 = vrcp.f32 %v3018_v32  ;;  %v3028_v32 = vadd.f32 1.0, %v8962_v46  ;;  %v4015_v39 = vmul.f32 %v8970_v26, %v11484_v55  ;;  %v11710_v26 = vadd.f32 %v11265_v43, %v10917_v7 }
 0x248   : > { %v8974_v19 = vpop.eup %8973  ;;  %8999 = vpow2.f32 %v8316_v37  ;;  %v4016_v23 = vmul.f32 %v8972_v25, %v11499_v54  ;;  %v3037_v37 = vadd.f32 1.0, %v8964_v34  ;;  %v4006_v54 = vmul.f32 %v8968_v13, %v11466_v18  ;;  %v11682_v25 = vpop.f32.mrf.mxu0  ;;  %v15043_v34 = vld [vmem:[#allocation27_spill] sm:$0xff] }
 0x249   : > { %8162 = vmatmul.mubr.msk.f32.gmra.mxu0 %vm542_vm1, %v15038_v29  ;;  %v8976_v57 = vpop.eup %8975  ;;  %9001 = vpow2.f32 %v8317_v24  ;;  %v11675_v29 = vadd.f32 %v11511_v16, %v10910_v4  ;;  %v3038_v24 = vadd.f32 1.0, %v8966_v9  ;;  %v4005_v55 = vmul.f32 %v8974_v19, %v11473_v50  ;;  %v11697_v50 = vpop.f32.mrf.mxu1  ;;  %15046 = vst [vmem:[#allocation152_spill] sm:$0xff] %v11710_v26 }
 0x24a   : > { %1878 = vmatprep.mubr.f32.mxu0 %v14925_v48  ;;  %v8978_v15 = vpop.eup %8977  ;;  %9003 = vpow2.f32 %v8326_v42  ;;  %4185 = vmatprep.subr.mxu1 %v4016_v23  ;;  %v11687_v16 = vadd.f32 %v11523_v31, %v10920_v8  ;;  %v3996_v56 = vmul.f32 %v8976_v57, %v11457_v20  ;;  %v8334_v13 = vmul.f32 -1.442695, %v11667_v40  ;;  %v11712_v42 = vpop.f32.mrf.mxu0 }
 0x24b   : > { %15040 = vst [vmem:[#allocation26_spill] sm:$0xff] %v11675_v29  ;;  %v8980_v46 = vpop.eup %8979  ;;  %9005 = vpow2.f32 %v8327_v5  ;;  %4186 = vmatpush1.msra.mxu1 %v4015_v39  ;;  %v11695_v9 = vadd.f32 %v11254_v10, %v10905_v3  ;;  %v3995_v19 = vmul.f32 %v8978_v15, %v11491_v58  ;;  %v8336_v39 = vmul.f32 -1.442695, %v11675_v29 }
 0x24c   : > { %15042 = vst [vmem:[#allocation150_spill] sm:$0xff] %v11687_v16  ;;  %v8982_v18 = vpop.eup %8981  ;;  %9007 = vrcp.f32 %v3027_v1  ;;  %4187 = vmatprep.subr.mxu1 %v4006_v54  ;;  %v11704_v20 = vadd.f32 %v11544_v27, %v10910_v4  ;;  %v3986_v10 = vmul.f32 %v8980_v46, %v11447_v63  ;;  %v8335_v1 = vmul.f32 -1.442695, %v11680_v28  ;;  %v15048_v63 = vld [vmem:[#allocation28_spill] sm:$0xff] }
 0x24d   : > { %8163 = vmatmul.mubr.msk.f32.gmra.mxu0 %vm542_vm1, %v15043_v34  ;;  %15044 = vst [vmem:[#allocation27_spill] sm:$0xff] %v11695_v9  ;;  %v8984_v31 = vpop.eup %8983  ;;  %9009 = vrcp.f32 %v3028_v32  ;;  %4188 = vmatpush1.msra.mxu1 %v4005_v55  ;;  %v3985_v5 = vmul.f32 %v8982_v18, %v11503_v36  ;;  %v8337_v27 = vmul.f32 -1.442695, %v11687_v16  ;;  %v11718_v23 = vadd.f32 %v11572_v21, %v10920_v8 }
 0x24e   : > { %1884 = vmatprep.mubr.f32.mxu0 %v14925_v48  ;;  %15045 = vst [vmem:[#allocation151_spill] sm:$0xff] %v11704_v20  ;;  %v8986_v57 = vpop.eup %8985  ;;  %9011 = vrcp.f32 %v3037_v37  ;;  %4189 = vmatprep.subr.mxu1 %v3996_v56  ;;  %v3976_v43 = vmul.f32 %v8984_v31, %v11429_v17  ;;  %v8344_v15 = vmul.f32 -1.442695, %v11695_v9  ;;  %v11726_v36 = vadd.f32 %v11269_v47, %v10905_v3  ;;  %v11728_v37 = vpop.f32.mrf.mxu1 }
 0x24f   : > { %v8988_v58 = vpop.eup %8987  ;;  %9013 = vrcp.f32 %v3038_v24  ;;  %15047 = vst [vmem:[#allocation153_spill] sm:$0xff] %v11718_v23  ;;  %4190 = vmatpush1.msra.mxu1 %v3995_v19  ;;  %v3975_v54 = vmul.f32 %v8986_v57, %v11410_v14  ;;  %v8346_v46 = vmul.f32 -1.442695, %v11704_v20  ;;  %v11737_v17 = vadd.f32 %v11584_v62, %v10910_v4  ;;  %v11747_v14 = vpop.f32.mrf.mxu0 }
 0x250   : > { %v8990_v32 = vpop.eup %8989  ;;  %9015 = vpow2.f32 %v8334_v13  ;;  %15049 = vst [vmem:[#allocation28_spill] sm:$0xff] %v11726_v36  ;;  %4191 = vmatprep.subr.mxu1 %v3986_v10  ;;  %v3966_v47 = vmul.f32 %v8988_v58, %v11392_v0  ;;  %v8345_v55 = vmul.f32 -1.442695, %v11710_v26  ;;  %v11745_v34 = vadd.f32 %v11276_v11, %v10917_v7  ;;  %v15056_v13 = vld [vmem:[#allocation29_spill] sm:$0xff] }
 0x251   : > { %8164 = vmatmul.mubr.msk.f32.gmra.mxu0 %vm542_vm1, %v15048_v63  ;;  %v11731_v21 = vpop.eup %8991  ;;  %9017 = vpow2.f32 %v8336_v39  ;;  %15051 = vst [vmem:[#allocation155_spill] sm:$0xff] %v11737_v17  ;;  %4192 = vmatpush1.msra.mxu1 %v3985_v5  ;;  %v3965_v62 = vmul.f32 %v8990_v32, %v11373_v44  ;;  %v8347_v56 = vmul.f32 -1.442695, %v11718_v23  ;;  %v11755_v0 = vadd.f32 %v11593_v38, %v10920_v8  ;;  %v11764_v44 = vpop.f32.mrf.mxu1  ;;  %v15060_v63 = vld [vmem:[#allocation79_spill] sm:$0xff]  ;;  %v15094_v23 = vld [vmem:[#allocation85_spill] sm:$0xff] }
 0x252   : > { %1890 = vmatprep.mubr.f32.mxu0 %v14925_v48  ;;  %15050 = vst [vmem:[#allocation154_spill] sm:$0xff] %v11731_v21  ;;  %v11739_v24 = vpop.eup %8993  ;;  %9019 = vpow2.f32 %v8335_v1  ;;  %15053 = vst [vmem:[#allocation157_spill] sm:$0xff] %v11745_v34  ;;  %4193 = vmatprep.subr.mxu1 %v3976_v43  ;;  %v3956_v31 = vmul.f32 %v11619_v2, %v11355_v61  ;;  %v8354_v19 = vmul.f32 -1.442695, %v11726_v36  ;;  %v8356_v57 = vmul.f32 -1.442695, %v11737_v17  ;;  %v11773_v1 = vpop.f32.mrf.mxu0 }
 0x253   : > { %15052 = vst [vmem:[#allocation156_spill] sm:$0xff] %v11739_v24  ;;  %v11749_v18 = vpop.eup %8995  ;;  %9021 = vpow2.f32 %v8337_v27  ;;  %15055 = vst [vmem:[#allocation159_spill] sm:$0xff] %v11755_v0  ;;  %4194 = vmatpush1.msra.mxu1 %v3975_v54  ;;  %v3955_v38 = vmul.f32 %v11611_v49, %v11336_v45  ;;  %v3946_v61 = vmul.f32 %v11602_v53, %v11319_v51  ;;  %v8355_v2 = vmul.f32 -1.442695, %v11745_v34  ;;  %v15059_v49 = vld [vmem:[#allocation30_spill] sm:$0xff]  ;;  %v15061_v32 = vld [vmem:[#allocation87_spill] sm:$0xff] }
 0x254   : > { %15054 = vst [vmem:[#allocation158_spill] sm:$0xff] %v11749_v18  ;;  %v11759_v11 = vpop.eup %8997  ;;  %9023 = vpow2.f32 %v8344_v15  ;;  %4195 = vmatprep.subr.mxu1 %v3966_v47  ;;  %15058 = vst [vmem:[#allocation160_spill] sm:$0xff] %v11773_v1  ;;  %v3945_v5 = vmul.f32 %v11596_v12, %v11302_v33  ;;  %v8357_v45 = vmul.f32 -1.442695, %v11755_v0  ;;  %v3936_v51 = vmul.f32 %v11468_v6, %v15060_v63  ;;  %v11786_v15 = vpop.f32.mrf.mxu1  ;;  %v15064_v12 = vld [vmem:[#allocation75_spill] sm:$0xff]  ;;  %v15065_v54 = vld [vmem:[#allocation124_spill] sm:$0xff] }
 0x255   : > { %8165 = vmatmul.mubr.msk.f32.gmra.mxu0 %vm542_vm1, %v15056_v13  ;;  %15057 = vst [vmem:[#allocation29_spill] sm:$0xff] %v11759_v11  ;;  %v9000_v39 = vpop.eup %8999  ;;  %9025 = vpow2.f32 %v8346_v46  ;;  %4196 = vmatpush1.msra.mxu1 %v3965_v62  ;;  %v11784_v43 = vadd.f32 %v15061_v32, %v10905_v3  ;;  %v3935_v46 = vmul.f32 %v15065_v54, %v15064_v12  ;;  %v15068_v62 = vld [vmem:[#allocation71_spill] sm:$0xff]  ;;  %v15079_v63 = vld [vmem:[#allocation65_spill] sm:$0xff] }
 0x256   : > { %1896 = vmatprep.mubr.f32.mxu0 %v14925_v48  ;;  %v9002_v10 = vpop.eup %9001  ;;  %9027 = vpow2.f32 %v8345_v55  ;;  %4197 = vmatprep.subr.mxu1 %v3956_v31  ;;  %v3047_v53 = vadd.f32 1.0, %v9000_v39  ;;  %v11795_v6 = vadd.f32 %v11608_v52, %v10910_v4  ;;  %v15075_v52 = vld [vmem:[#allocation116_spill] sm:$0xff]  ;;  %v11822_v54 = vpop.f32.mrf.mxu1 }
 0x257   : > { %v9004_v58 = vpop.eup %9003  ;;  %9029 = vpow2.f32 %v8347_v56  ;;  %4198 = vmatpush1.msra.mxu1 %v3955_v38  ;;  %15062 = vst [vmem:[#allocation30_spill] sm:$0xff] %v11784_v43  ;;  %v3048_v47 = vadd.f32 1.0, %v9002_v10  ;;  %v15069_v56 = vld [vmem:[#allocation120_spill] sm:$0xff]  ;;  %v11805_v38 = vpop.f32.mrf.mxu0  ;;  %v15074_v10 = vld [vmem:[#allocation67_spill] sm:$0xff]  ;;  %v8364_v12 = vmul.f32 -1.442695, %v11784_v43 }
 0x258   : > { %v9006_v27 = vpop.eup %9005  ;;  %9031 = vpow2.f32 %v8354_v19  ;;  %4199 = vmatprep.subr.mxu1 %v3946_v61  ;;  %15066 = vst [vmem:[#allocation87_spill] sm:$0xff] %v11795_v6  ;;  %v3926_v13 = vmul.f32 %v15069_v56, %v15068_v62  ;;  %v3057_v31 = vadd.f32 1.0, %v9004_v58  ;;  %v15070_v19 = vld [vmem:[#allocation88_spill] sm:$0xff]  ;;  %15072 = vst [vmem:[#allocation71_spill] sm:$0xff] %v11805_v38  ;;  %v3925_v61 = vmul.f32 %v15075_v52, %v15074_v10 }
 0x259   : > { %8166 = vmatmul.mubr.msk.f32.gmra.mxu0 %vm542_vm1, %v15059_v49  ;;  %v11789_v33 = vpop.eup %9007  ;;  %9033 = vpow2.f32 %v8356_v57  ;;  %4200 = vmatpush1.msra.mxu1 %v3945_v5  ;;  %v11803_v39 = vadd.f32 %v15070_v19, %v10917_v7  ;;  %v3058_v5 = vadd.f32 1.0, %v9006_v27  ;;  %v11813_v49 = vadd.f32 %v11631_v41, %v10920_v8  ;;  %v15081_v41 = vld [vmem:[#allocation63_spill] sm:$0xff]  ;;  %v15082_v27 = vld [vmem:[#allocation108_spill] sm:$0xff]  ;;  %v15083_v19 = vld [vmem:[#allocation61_spill] sm:$0xff] }
 0x25a   : > { %1902 = vmatprep.mubr.f32.mxu0 %v14925_v48  ;;  %15063 = vst [vmem:[#allocation79_spill] sm:$0xff] %v11789_v33  ;;  %v11797_v55 = vpop.eup %9009  ;;  %9035 = vpow2.f32 %v8355_v2  ;;  %4201 = vmatprep.subr.mxu1 %v3936_v51  ;;  %v15077_v2 = vld [vmem:[#allocation31_spill] sm:$0xff]  ;;  %v15080_v51 = vld [vmem:[#allocation112_spill] sm:$0xff]  ;;  %v8366_v62 = vmul.f32 -1.442695, %v11795_v6 }
 0x25b   : > { %15067 = vst [vmem:[#allocation75_spill] sm:$0xff] %v11797_v55  ;;  %15071 = vst [vmem:[#allocation124_spill] sm:$0xff] %v11803_v39  ;;  %v11807_v57 = vpop.eup %9011  ;;  %9037 = vpow2.f32 %v8357_v45  ;;  %4202 = vmatpush1.msra.mxu1 %v3935_v46  ;;  %v3916_v32 = vmul.f32 %v15080_v51, %v15079_v63  ;;  %v3915_v46 = vmul.f32 %v15082_v27, %v15081_v41  ;;  %v15084_v10 = vld [vmem:[#allocation104_spill] sm:$0xff]  ;;  %v15086_v63 = vld [vmem:[#allocation59_spill] sm:$0xff] }
 0x25c   : > { %15073 = vst [vmem:[#allocation120_spill] sm:$0xff] %v11807_v57  ;;  %15076 = vst [vmem:[#allocation88_spill] sm:$0xff] %v11813_v49  ;;  %v11817_v58 = vpop.eup %9013  ;;  %9039 = vrcp.f32 %v3047_v53  ;;  %4203 = vmatprep.subr.mxu1 %v3926_v13  ;;  %v3906_v52 = vmul.f32 %v15084_v10, %v15083_v19  ;;  %v8365_v53 = vmul.f32 -1.442695, %v11803_v39  ;;  %v15087_v51 = vld [vmem:[#allocation100_spill] sm:$0xff]  ;;  %v15089_v27 = vld [vmem:[#allocation57_spill] sm:$0xff] }
 0x25d   : > { %8167 = vmatmul.mubr.msk.f32.gmra.mxu0 %vm542_vm1, %v15077_v2  ;;  %15078 = vst [vmem:[#allocation67_spill] sm:$0xff] %v11817_v58  ;;  %v9016_v45 = vpop.eup %9015  ;;  %9041 = vrcp.f32 %v3048_v47  ;;  %4204 = vmatpush1.msra.mxu1 %v3925_v61  ;;  %v11831_v2 = vpop.f32.mrf.mxu0  ;;  %v3905_v29 = vmul.f32 %v15087_v51, %v15086_v63  ;;  %v8367_v47 = vmul.f32 -1.442695, %v11813_v49  ;;  %v15088_v41 = vld [vmem:[#allocation32_spill] sm:$0xff]  ;;  %v15091_v63 = vld [vmem:[#allocation55_spill] sm:$0xff] }
 0x25e   : > { %1908 = vmatprep.mubr.f32.mxu0 %v14925_v48  ;;  %v9018_v56 = vpop.eup %9017  ;;  %9043 = vrcp.f32 %v3057_v31  ;;  %4205 = vmatprep.subr.mxu1 %v3916_v32  ;;  %15085 = vst [vmem:[#allocation116_spill] sm:$0xff] %v11831_v2  ;;  %v15090_v19 = vld [vmem:[#allocation96_spill] sm:$0xff]  ;;  %v3065_v10 = vadd.f32 1.0, %v9016_v45  ;;  %v11840_v32 = vpop.f32.mrf.mxu1 }
 0x25f   : > { %v9020_v13 = vpop.eup %9019  ;;  %9045 = vrcp.f32 %v3058_v5  ;;  %4206 = vmatpush1.msra.mxu1 %v3915_v46  ;;  %v3896_v31 = vmul.f32 %v15090_v19, %v15089_v27  ;;  %v15092_v5 = vld [vmem:[#allocation92_spill] sm:$0xff]  ;;  %v3067_v20 = vadd.f32 1.0, %v9018_v56  ;;  %v15097_v27 = vld [vmem:[#allocation83_spill] sm:$0xff] }
 0x260   : > { %v9022_v61 = vpop.eup %9021  ;;  %9047 = vpow2.f32 %v8364_v12  ;;  %4207 = vmatprep.subr.mxu1 %v3906_v52  ;;  %v3895_v51 = vmul.f32 %v15092_v5, %v15091_v63  ;;  %v3066_v0 = vadd.f32 1.0, %v9020_v13  ;;  %v11847_v12 = vpop.f32.mrf.mxu0  ;;  %v15096_v52 = vld [vmem:[#allocation51_spill] sm:$0xff]  ;;  %v15098_v63 = vld [vmem:[#allocation33_spill] sm:$0xff]  ;;  %v15100_v56 = vld [vmem:[#allocation80_spill] sm:$0xff] }
 0x261   : > { %8168 = vmatmul.mubr.msk.f32.gmra.mxu0 %vm542_vm1, %v15088_v41  ;;  %v9024_v16 = vpop.eup %9023  ;;  %9049 = vpow2.f32 %v8366_v62  ;;  %4208 = vmatpush1.msra.mxu1 %v3905_v29  ;;  %v15093_v41 = vld [vmem:[#allocation53_spill] sm:$0xff]  ;;  %15095 = vst [vmem:[#allocation31_spill] sm:$0xff] %v11847_v12  ;;  %v3885_v19 = vmul.f32 %v15097_v27, %v15096_v52  ;;  %v3068_v6 = vadd.f32 1.0, %v9022_v61  ;;  %v15104_v27 = vld [vmem:[#allocation72_spill] sm:$0xff] }
 0x262   : > { %1914 = vmatprep.mubr.f32.mxu0 %v14925_v48  ;;  %v9026_v46 = vpop.eup %9025  ;;  %v3886_v17 = vmul.f32 %v15094_v23, %v15093_v41  ;;  %9051 = vpow2.f32 %v8365_v53  ;;  %4209 = vmatprep.subr.mxu1 %v3896_v31  ;;  %v15099_v62 = vld [vmem:[#allocation49_spill] sm:$0xff]  ;;  %v3075_v23 = vadd.f32 1.0, %v9024_v16  ;;  %v11855_v53 = vpop.f32.mrf.mxu1  ;;  %v15101_v31 = vld [vmem:[#allocation47_spill] sm:$0xff]  ;;  %v15102_v41 = vld [vmem:[#allocation76_spill] sm:$0xff] }
 0x263   : > { %v9028_v45 = vpop.eup %9027  ;;  %9053 = vpow2.f32 %v8367_v47  ;;  %4210 = vmatpush1.msra.mxu1 %v3895_v51  ;;  %v3876_v5 = vmul.f32 %v15100_v56, %v15099_v62  ;;  %v3875_v61 = vmul.f32 %v15102_v41, %v15101_v31  ;;  %v3077_v47 = vadd.f32 1.0, %v9026_v46  ;;  %v15103_v52 = vld [vmem:[#allocation45_spill] sm:$0xff]  ;;  %v11862_v16 = vpop.f32.mrf.mxu0  ;;  %v15107_v56 = vld [vmem:[#allocation68_spill] sm:$0xff]  ;;  %v15108_v31 = vld [vmem:[#allocation34_spill] sm:$0xff] }
 0x264   : > { %v9030_v29 = vpop.eup %9029  ;;  %9055 = vrcp.f32 %v3065_v10  ;;  %4211 = vmatprep.subr.mxu1 %v3886_v17  ;;  %v3076_v62 = vadd.f32 1.0, %v9028_v45  ;;  %15105 = vst [vmem:[#allocation65_spill] sm:$0xff] %v11862_v16  ;;  %v15106_v17 = vld [vmem:[#allocation43_spill] sm:$0xff]  ;;  %v11872_v45 = vpop.f32.mrf.mxu1  ;;  %v15114_v41 = vld [vmem:[#allocation90_spill] sm:$0xff] }
 0x265   : > { %8169 = vmatmul.mubr.msk.f32.gmra.mxu0 %vm542_vm1, %v15098_v63  ;;  %v9032_v13 = vpop.eup %9031  ;;  %9057 = vrcp.f32 %v3067_v20  ;;  %4212 = vmatpush1.msra.mxu1 %v3885_v19  ;;  %v3866_v63 = vmul.f32 %v15104_v27, %v15103_v52  ;;  %v3865_v49 = vmul.f32 %v15107_v56, %v15106_v17  ;;  %v3078_v21 = vadd.f32 1.0, %v9030_v29  ;;  %v15109_v19 = vld [vmem:[#allocation89_spill] sm:$0xff]  ;;  %v11887_v52 = vpop.f32.mrf.mxu0 }
 0x266   : > { %1920 = vmatprep.mubr.f32.mxu0 %v14925_v48  ;;  %v9034_v51 = vpop.eup %9033  ;;  %9059 = vrcp.f32 %v3066_v0  ;;  %4213 = vmatprep.subr.mxu1 %v3876_v5  ;;  %v3085_v46 = vadd.f32 1.0, %v9032_v13  ;;  %v11870_v0 = vadd.f32 %v15109_v19, %v10905_v3  ;;  %v11879_v29 = vadd.f32 %v11654_v35, %v10910_v4  ;;  %15116 = vst [vmem:[#allocation59_spill] sm:$0xff] %v11887_v52  ;;  %v15119_v35 = vld [vmem:[#allocation35_spill] sm:$0xff]  ;;  %v11904_v17 = vpop.f32.mrf.mxu1 }
 0x267   : > { %v9036_v10 = vpop.eup %9035  ;;  %9061 = vrcp.f32 %v3068_v6  ;;  %4214 = vmatpush1.msra.mxu1 %v3875_v61  ;;  %v3087_v6 = vadd.f32 1.0, %v9034_v51  ;;  %v11885_v61 = vadd.f32 %v15114_v41, %v10917_v7  ;;  %v11893_v51 = vadd.f32 %v11669_v59, %v10920_v8  ;;  %v11921_v41 = vpop.f32.mrf.mxu0 }
 0x268   : > { %v9038_v20 = vpop.eup %9037  ;;  %9063 = vrcp.f32 %v3075_v23  ;;  %15110 = vst [vmem:[#allocation112_spill] sm:$0xff] %v11870_v0  ;;  %4215 = vmatprep.subr.mxu1 %v3866_v63  ;;  %15112 = vst [vmem:[#allocation108_spill] sm:$0xff] %v11879_v29  ;;  %v3086_v13 = vadd.f32 1.0, %v9036_v10  ;;  %v8374_v63 = vmul.f32 -1.442695, %v11870_v0  ;;  %v11912_v56 = vadd.f32 %v11697_v50, %v10910_v4  ;;  %v11939_v18 = vpop.f32.mrf.mxu1 }
 0x269   : > { %8170 = vmatmul.mubr.msk.f32.gmra.mxu0 %vm542_vm1, %v15108_v31  ;;  %v11875_v5 = vpop.eup %9039  ;;  %9065 = vrcp.f32 %v3077_v47  ;;  %4216 = vmatpush1.msra.mxu1 %v3865_v49  ;;  %15115 = vst [vmem:[#allocation104_spill] sm:$0xff] %v11885_v61  ;;  %v3088_v47 = vadd.f32 1.0, %v9038_v20  ;;  %15118 = vst [vmem:[#allocation32_spill] sm:$0xff] %v11893_v51  ;;  %v8376_v59 = vmul.f32 -1.442695, %v11879_v29  ;;  %v11928_v50 = vadd.f32 %v11728_v37, %v10920_v8  ;;  %v15129_v29 = vld [vmem:[#allocation98_spill] sm:$0xff] }
 0x26a   : > { %1926 = vmatprep.mubr.f32.mxu0 %v14925_v48  ;;  %15111 = vst [vmem:[#allocation63_spill] sm:$0xff] %v11875_v5  ;;  %v11881_v23 = vpop.eup %9041  ;;  %9067 = vrcp.f32 %v3076_v62  ;;  %v15121_v62 = vld [vmem:[#allocation91_spill] sm:$0xff]  ;;  %15123 = vst [vmem:[#allocation55_spill] sm:$0xff] %v11912_v56  ;;  %v8375_v20 = vmul.f32 -1.442695, %v11885_v61  ;;  %v11937_v24 = vadd.f32 %v15129_v29, %v10905_v3  ;;  %v15134_v29 = vld [vmem:[#allocation102_spill] sm:$0xff]  ;;  %v11974_v33 = vpop.f32.mrf.mxu1 }
 0x26b   : > { %15113 = vst [vmem:[#allocation61_spill] sm:$0xff] %v11881_v23  ;;  %v11889_v27 = vpop.eup %9043  ;;  %9069 = vrcp.f32 %v3078_v21  ;;  %v11902_v10 = vadd.f32 %v15121_v62, %v10905_v3  ;;  %15126 = vst [vmem:[#allocation53_spill] sm:$0xff] %v11921_v41  ;;  %v15128_v62 = vld [vmem:[#allocation36_spill] sm:$0xff]  ;;  %v8386_v37 = vmul.f32 -1.442695, %v11912_v56  ;;  %v11954_v11 = vadd.f32 %v15134_v29, %v10917_v7  ;;  %v11956_v41 = vpop.f32.mrf.mxu0  ;;  %v15139_v56 = vld [vmem:[#allocation37_spill] sm:$0xff] }
 0x26c   : > { %15117 = vst [vmem:[#allocation100_spill] sm:$0xff] %v11889_v27  ;;  %v11897_v49 = vpop.eup %9045  ;;  %9071 = vrcp.f32 %v3085_v46  ;;  %v15124_v46 = vld [vmem:[#allocation94_spill] sm:$0xff]  ;;  %15127 = vst [vmem:[#allocation85_spill] sm:$0xff] %v11928_v50  ;;  %v8394_v29 = vmul.f32 -1.442695, %v11937_v24 }
 0x26d   : > { %8171 = vmatmul.mubr.msk.f32.gmra.mxu0 %vm542_vm1, %v15119_v35  ;;  %15120 = vst [vmem:[#allocation57_spill] sm:$0xff] %v11897_v49  ;;  %15122 = vst [vmem:[#allocation96_spill] sm:$0xff] %v11902_v10  ;;  %v11907_v21 = vpop.eup %9047  ;;  %9073 = vrcp.f32 %v3087_v6  ;;  %v11919_v19 = vadd.f32 %v15124_v46, %v10917_v7  ;;  %v8377_v6 = vmul.f32 -1.442695, %v11893_v51  ;;  %v8384_v46 = vmul.f32 -1.442695, %v11902_v10  ;;  %v11990_v52 = vpop.f32.mrf.mxu0 }
 0x26e   : > { %1932 = vmatprep.mubr.f32.mxu0 %v14925_v48  ;;  %v11914_v31 = vpop.eup %9049  ;;  %9075 = vrcp.f32 %v3086_v13  ;;  %15130 = vst [vmem:[#allocation51_spill] sm:$0xff] %v11937_v24  ;;  %15135 = vst [vmem:[#allocation80_spill] sm:$0xff] %v11954_v11  ;;  %v3095_v57 = vadd.f32 1.0, %v11907_v21 }
 0x26f   : > { %15125 = vst [vmem:[#allocation92_spill] sm:$0xff] %v11919_v19  ;;  %v11923_v35 = vpop.eup %9051  ;;  %9077 = vrcp.f32 %v3088_v47  ;;  %v8385_v51 = vmul.f32 -1.442695, %v11919_v19  ;;  %15136 = vst [vmem:[#allocation47_spill] sm:$0xff] %v11956_v41 }
 0x270   : > { %v11932_v13 = vpop.eup %9053  ;;  %9079 = vpow2.f32 %v8374_v63  ;;  %15146 = vst [vmem:[#allocation89_spill] sm:$0xff] %v11990_v52  ;;  %v3096_v58 = vadd.f32 1.0, %v11923_v35 }
 0x271   : > { %8172 = vmatmul.mubr.msk.f32.gmra.mxu0 %vm542_vm1, %v15128_v62  ;;  %v11942_v47 = vpop.eup %9055  ;;  %9081 = vpow2.f32 %v8376_v59  ;;  %v11947_v62 = vadd.f32 %v11764_v44, %v10910_v4  ;;  %v8387_v59 = vmul.f32 -1.442695, %v11928_v50  ;;  %v11963_v44 = vadd.f32 %v11786_v15, %v10920_v8 }
 0x272   : > { %1938 = vmatprep.mubr.f32.mxu0 %v14925_v48  ;;  %15131 = vst [vmem:[#allocation83_spill] sm:$0xff] %v11942_v47  ;;  %v11949_v63 = vpop.eup %9057  ;;  %9083 = vpow2.f32 %v8375_v20  ;;  %v11981_v50 = vadd.f32 %v11822_v54, %v10910_v4  ;;  %v11997_v54 = vadd.f32 %v11840_v32, %v10920_v8 }
 0x273   : > { %15132 = vst [vmem:[#allocation33_spill] sm:$0xff] %v11947_v62  ;;  %15133 = vst [vmem:[#allocation49_spill] sm:$0xff] %v11949_v63  ;;  %v11958_v48 = vpop.eup %9059  ;;  %9085 = vpow2.f32 %v8377_v6  ;;  %v15141_v63 = vld [vmem:[#allocation106_spill] sm:$0xff]  ;;  %v8396_v15 = vmul.f32 -1.442695, %v11947_v62 }
 0x274   : > { %15137 = vst [vmem:[#allocation76_spill] sm:$0xff] %v11958_v48  ;;  %15138 = vst [vmem:[#allocation45_spill] sm:$0xff] %v11963_v44  ;;  %v11967_v20 = vpop.eup %9061  ;;  %9087 = vpow2.f32 %v8384_v46  ;;  %v11972_v41 = vadd.f32 %v15141_v63, %v10905_v3  ;;  %v8395_v46 = vmul.f32 -1.442695, %v11954_v11  ;;  %v8406_v52 = vmul.f32 -1.442695, %v11981_v50 }
 0x275   : > { %8173 = vmatmul.mubr.msk.f32.gmra.mxu0 %vm542_vm1, %v15139_v56  ;;  %15140 = vst [vmem:[#allocation72_spill] sm:$0xff] %v11967_v20  ;;  %v11976_v6 = vpop.eup %9063  ;;  %9089 = vpow2.f32 %v8386_v37  ;;  %15143 = vst [vmem:[#allocation68_spill] sm:$0xff] %v11981_v50  ;;  %v15145_v20 = vld [vmem:[#allocation110_spill] sm:$0xff]  ;;  %v8397_v37 = vmul.f32 -1.442695, %v11963_v44  ;;  %v12010_v44 = vpop.f32.mrf.mxu0 }
 0x276   : > { %15142 = vst [vmem:[#allocation43_spill] sm:$0xff] %v11976_v6  ;;  %v11983_v56 = vpop.eup %9065  ;;  %9091 = vpow2.f32 %v8385_v51  ;;  %v11988_v63 = vadd.f32 %v15145_v20, %v10917_v7  ;;  %15148 = vst [vmem:[#allocation35_spill] sm:$0xff] %v11997_v54  ;;  %v8404_v51 = vmul.f32 -1.442695, %v11972_v41 }
 0x277   : > { %15144 = vst [vmem:[#allocation34_spill] sm:$0xff] %v11983_v56  ;;  %v11992_v55 = vpop.eup %9067  ;;  %9093 = vpow2.f32 %v8387_v59  ;;  %v12002_v56 = vpop.f32.mrf.mxu1  ;;  %15152 = vst [vmem:[#allocation98_spill] sm:$0xff] %v12010_v44 }
 0x278   : > { %15147 = vst [vmem:[#allocation90_spill] sm:$0xff] %v11992_v55  ;;  %v11999_v62 = vpop.eup %9069  ;;  %9095 = vpow2.f32 %v8394_v29  ;;  %v8405_v59 = vmul.f32 -1.442695, %v11988_v63  ;;  %v8407_v29 = vmul.f32 -1.442695, %v11997_v54  ;;  %v12022_v44 = vpop.f32.mrf.mxu0  ;;  %v3098_v54 = vadd.f32 1.0, %v11932_v13 }
 0x279   : > { %15149 = vst [vmem:[#allocation91_spill] sm:$0xff] %v11999_v62  ;;  %v12004_v20 = vpop.eup %9071  ;;  %9097 = vpow2.f32 %v8396_v15  ;;  %v12018_v15 = vpop.f32.mrf.mxu1  ;;  %15155 = vst [vmem:[#allocation106_spill] sm:$0xff] %v12022_v44 }
 0x27a   : > { %15150 = vst [vmem:[#allocation94_spill] sm:$0xff] %v12004_v20  ;;  %v12007_v16 = vpop.eup %9073  ;;  %9099 = vpow2.f32 %v8395_v46  ;;  %v12027_v27 = vpop.f32.mrf.mxu0 }
 0x27b   : > { %15151 = vst [vmem:[#allocation36_spill] sm:$0xff] %v12007_v16  ;;  %v12012_v32 = vpop.eup %9075  ;;  %9101 = vpow2.f32 %v8397_v37  ;;  %v3097_v16 = vadd.f32 1.0, %v11914_v31  ;;  %15156 = vst [vmem:[#allocation110_spill] sm:$0xff] %v12027_v27 }
 0x27c   : > { %15153 = vst [vmem:[#allocation102_spill] sm:$0xff] %v12012_v32  ;;  %v12015_v62 = vpop.eup %9077  ;;  %9103 = vpow2.f32 %v8404_v51  ;;  %v12025_v51 = vpop.f32.mrf.mxu1 }
 0x27d   : > { %15154 = vst [vmem:[#allocation37_spill] sm:$0xff] %v12015_v62  ;;  %v9080_v50 = vpop.eup %9079  ;;  %9105 = vpow2.f32 %v8406_v52 }
 0x27e   : > { %v9082_v46 = vpop.eup %9081  ;;  %9107 = vpow2.f32 %v8405_v59  ;;  %v3105_v21 = vadd.f32 1.0, %v9080_v50 }
 0x27f   : > { %v9084_v37 = vpop.eup %9083  ;;  %9109 = vpow2.f32 %v8407_v29  ;;  %v3107_v23 = vadd.f32 1.0, %v9082_v46  ;;  %v12029_v29 = vpop.f32.mrf.mxu1 }
 0x280   : > { %v9086_v62 = vpop.eup %9085  ;;  %9111 = vrcp.f32 %v3095_v57  ;;  %v3106_v52 = vadd.f32 1.0, %v9084_v37  ;;  %v12031_v46 = vpop.f32.mrf.mxu0 }
 0x281   : > { %v9088_v5 = vpop.eup %9087  ;;  %9113 = vrcp.f32 %v3097_v16  ;;  %v3108_v59 = vadd.f32 1.0, %v9086_v62  ;;  %15157 = vst [vmem:[#allocation161_spill] sm:$0xff] %v12031_v46  ;;  %v12033_v62 = vpop.f32.mrf.mxu1 }
 0x282   : > { %v9090_v31 = vpop.eup %9089  ;;  %9115 = vrcp.f32 %v3096_v58  ;;  %v3115_v13 = vadd.f32 1.0, %v9088_v5 }
 0x283   : > { %v9092_v35 = vpop.eup %9091  ;;  %9117 = vrcp.f32 %v3098_v54  ;;  %v3117_v50 = vadd.f32 1.0, %v9090_v31  ;;  %v12035_v31 = vpop.f32.mrf.mxu0 }
 0x284   : > { %v9094_v44 = vpop.eup %9093  ;;  %9119 = vrcp.f32 %v3105_v21  ;;  %v3116_v16 = vadd.f32 1.0, %v9092_v35  ;;  %15158 = vst [vmem:[#allocation162_spill] sm:$0xff] %v12035_v31 }
 0x285   : > { %v9096_v57 = vpop.eup %9095  ;;  %9121 = vrcp.f32 %v3107_v23  ;;  %v3118_v37 = vadd.f32 1.0, %v9094_v44  ;;  %v15159_v44 = vld [vmem:[#allocation114_spill] sm:$0xff] }
 0x286   : > { %v9098_v12 = vpop.eup %9097  ;;  %9123 = vrcp.f32 %v3106_v52  ;;  %v3125_v54 = vadd.f32 1.0, %v9096_v57  ;;  %v12041_v57 = vpop.f32.mrf.mxu1 }
 0x287   : > { %v9100_v58 = vpop.eup %9099  ;;  %9125 = vrcp.f32 %v3108_v59  ;;  %v3127_v5 = vadd.f32 1.0, %v9098_v12 }
 0x288   : > { %v9102_v27 = vpop.eup %9101  ;;  %9127 = vrcp.f32 %v3115_v13  ;;  %v3126_v23 = vadd.f32 1.0, %v9100_v58  ;;  %v12039_v13 = vadd.f32 %v15159_v44, %v10905_v3  ;;  %v15163_v58 = vld [vmem:[#allocation118_spill] sm:$0xff] }
 0x289   : > { %v9104_v21 = vpop.eup %9103  ;;  %9129 = vrcp.f32 %v3117_v50  ;;  %v3128_v35 = vadd.f32 1.0, %v9102_v27  ;;  %v12047_v50 = vadd.f32 %v11855_v53, %v10910_v4 }
 0x28a   : > { %v9106_v49 = vpop.eup %9105  ;;  %9131 = vrcp.f32 %v3116_v16  ;;  %v3135_v59 = vadd.f32 1.0, %v9104_v21 }
 0x28b   : > { %v9108_v52 = vpop.eup %9107  ;;  %9133 = vrcp.f32 %v3118_v37  ;;  %v3137_v12 = vadd.f32 1.0, %v9106_v49  ;;  %15161 = vst [vmem:[#allocation163_spill] sm:$0xff] %v12047_v50  ;;  %v12053_v37 = vadd.f32 %v15163_v58, %v10917_v7  ;;  %v12061_v49 = vadd.f32 %v11872_v45, %v10920_v8  ;;  %v12070_v58 = vpop.f32.mrf.mxu1 }
 0x28c   : > { %v9110_v46 = vpop.eup %9109  ;;  %9135 = vrcp.f32 %v3125_v54  ;;  %v3136_v27 = vadd.f32 1.0, %v9108_v52  ;;  %v12055_v54 = vpop.f32.mrf.mxu0  ;;  %v12077_v45 = vadd.f32 %v11904_v17, %v10910_v4  ;;  %v12093_v17 = vadd.f32 %v11939_v18, %v10920_v8 }
 0x28d   : > { %v12043_v2 = vpop.eup %9111  ;;  %9137 = vrcp.f32 %v3127_v5  ;;  %15164 = vst [vmem:[#allocation118_spill] sm:$0xff] %v12055_v54  ;;  %v3138_v44 = vadd.f32 1.0, %v9110_v46  ;;  %15166 = vst [vmem:[#allocation166_spill] sm:$0xff] %v12061_v49  ;;  %v8414_v5 = vmul.f32 -1.442695, %v12039_v13  ;;  %v12102_v47 = vpop.f32.mrf.mxu1  ;;  %v12109_v18 = vadd.f32 %v11974_v33, %v10910_v4 }
 0x28e   : > { %15160 = vst [vmem:[#allocation114_spill] sm:$0xff] %v12043_v2  ;;  %v12049_v16 = vpop.eup %9113  ;;  %9139 = vrcp.f32 %v3126_v23  ;;  %v15168_v23 = vld [vmem:[#allocation122_spill] sm:$0xff]  ;;  %v8416_v46 = vmul.f32 -1.442695, %v12047_v50  ;;  %15170 = vst [vmem:[#allocation168_spill] sm:$0xff] %v12077_v45  ;;  %v12086_v54 = vpop.f32.mrf.mxu0  ;;  %v12125_v33 = vadd.f32 %v12002_v56, %v10920_v8  ;;  %v12141_v56 = vadd.f32 %v12018_v15, %v10910_v4 }
 0x28f   : > { %15162 = vst [vmem:[#allocation164_spill] sm:$0xff] %v12049_v16  ;;  %v12057_v21 = vpop.eup %9115  ;;  %9141 = vrcp.f32 %v3128_v35  ;;  %v12068_v52 = vadd.f32 %v15168_v23, %v10905_v3  ;;  %15175 = vst [vmem:[#allocation171_spill] sm:$0xff] %v12093_v17  ;;  %v12134_v48 = vpop.f32.mrf.mxu1  ;;  %v12157_v15 = vadd.f32 %v12025_v51, %v10920_v8 }
 0x290   : > { %15165 = vst [vmem:[#allocation165_spill] sm:$0xff] %v12057_v21  ;;  %v12063_v53 = vpop.eup %9117  ;;  %9143 = vrcp.f32 %v3135_v59  ;;  %v8415_v59 = vmul.f32 -1.442695, %v12053_v37  ;;  %15179 = vst [vmem:[#allocation173_spill] sm:$0xff] %v12109_v18  ;;  %v12118_v40 = vpop.f32.mrf.mxu0 }
 0x291   : > { %15167 = vst [vmem:[#allocation167_spill] sm:$0xff] %v12063_v53  ;;  %v12072_v16 = vpop.eup %9119  ;;  %9145 = vrcp.f32 %v3137_v12  ;;  %v15172_v53 = vld [vmem:[#allocation125_spill] sm:$0xff]  ;;  %v8417_v12 = vmul.f32 -1.442695, %v12061_v49  ;;  %15184 = vst [vmem:[#allocation176_spill] sm:$0xff] %v12125_v33  ;;  %v12166_v6 = vpop.f32.mrf.mxu1 }
 0x292   : > { %15169 = vst [vmem:[#allocation122_spill] sm:$0xff] %v12072_v16  ;;  %v12079_v35 = vpop.eup %9121  ;;  %9147 = vrcp.f32 %v3136_v27  ;;  %v12084_v23 = vadd.f32 %v15172_v53, %v10917_v7  ;;  %15173 = vst [vmem:[#allocation125_spill] sm:$0xff] %v12086_v54  ;;  %v8424_v27 = vmul.f32 -1.442695, %v12068_v52  ;;  %v12150_v28 = vpop.f32.mrf.mxu0 }
 0x293   : > { %15171 = vst [vmem:[#allocation169_spill] sm:$0xff] %v12079_v35  ;;  %v12088_v31 = vpop.eup %9123  ;;  %9149 = vrcp.f32 %v3138_v44  ;;  %v15177_v35 = vld [vmem:[#allocation127_spill] sm:$0xff]  ;;  %v8426_v44 = vmul.f32 -1.442695, %v12077_v45  ;;  %15188 = vst [vmem:[#allocation178_spill] sm:$0xff] %v12141_v56  ;;  %v12198_v36 = vpop.f32.mrf.mxu1 }
 0x294   : > { %15174 = vst [vmem:[#allocation170_spill] sm:$0xff] %v12088_v31  ;;  %v12095_v50 = vpop.eup %9125  ;;  %9151 = vpow2.f32 %v8414_v5  ;;  %v12100_v53 = vadd.f32 %v15177_v35, %v10905_v3  ;;  %v8425_v5 = vmul.f32 -1.442695, %v12084_v23  ;;  %15193 = vst [vmem:[#allocation181_spill] sm:$0xff] %v12157_v15  ;;  %v12182_v55 = vpop.f32.mrf.mxu0 }
 0x295   : > { %15176 = vst [vmem:[#allocation172_spill] sm:$0xff] %v12095_v50  ;;  %v12104_v54 = vpop.eup %9127  ;;  %9153 = vpow2.f32 %v8416_v46  ;;  %v15181_v50 = vld [vmem:[#allocation129_spill] sm:$0xff]  ;;  %v8427_v46 = vmul.f32 -1.442695, %v12093_v17  ;;  %v12218_v39 = vpop.f32.mrf.mxu1 }
 0x296   : > { %15178 = vst [vmem:[#allocation127_spill] sm:$0xff] %v12104_v54  ;;  %v12111_v49 = vpop.eup %9129  ;;  %9155 = vpow2.f32 %v8415_v59  ;;  %v12116_v35 = vadd.f32 %v15181_v50, %v10917_v7  ;;  %15182 = vst [vmem:[#allocation129_spill] sm:$0xff] %v12118_v40  ;;  %v8434_v59 = vmul.f32 -1.442695, %v12100_v53 }
 0x297   : > { %15180 = vst [vmem:[#allocation174_spill] sm:$0xff] %v12111_v49  ;;  %v12120_v38 = vpop.eup %9131  ;;  %9157 = vpow2.f32 %v8417_v12  ;;  %v15186_v49 = vld [vmem:[#allocation130_spill] sm:$0xff]  ;;  %v8436_v12 = vmul.f32 -1.442695, %v12109_v18  ;;  %v12225_v31 = vpop.f32.mrf.mxu1 }
 0x298   : > { %15183 = vst [vmem:[#allocation175_spill] sm:$0xff] %v12120_v38  ;;  %v12127_v45 = vpop.eup %9133  ;;  %9159 = vpow2.f32 %v8424_v27  ;;  %v12132_v50 = vadd.f32 %v15186_v49, %v10905_v3  ;;  %v8435_v27 = vmul.f32 -1.442695, %v12116_v35 }
 0x299   : > { %15185 = vst [vmem:[#allocation177_spill] sm:$0xff] %v12127_v45  ;;  %v12136_v40 = vpop.eup %9135  ;;  %9161 = vpow2.f32 %v8426_v44  ;;  %v15190_v45 = vld [vmem:[#allocation131_spill] sm:$0xff]  ;;  %v8437_v44 = vmul.f32 -1.442695, %v12125_v33  ;;  %v15197_v33 = vld [vmem:[#allocation137_spill] sm:$0xff] }
 0x29a   : > { %15187 = vst [vmem:[#allocation130_spill] sm:$0xff] %v12136_v40  ;;  %v12143_v17 = vpop.eup %9137  ;;  %9163 = vpow2.f32 %v8425_v5  ;;  %v12148_v49 = vadd.f32 %v15190_v45, %v10917_v7  ;;  %15191 = vst [vmem:[#allocation131_spill] sm:$0xff] %v12150_v28  ;;  %v8444_v5 = vmul.f32 -1.442695, %v12132_v50  ;;  %v12173_v51 = vadd.f32 %v15197_v33, %v10917_v7 }
 0x29b   : > { %15189 = vst [vmem:[#allocation179_spill] sm:$0xff] %v12143_v17  ;;  %v12152_v1 = vpop.eup %9139  ;;  %9165 = vpow2.f32 %v8427_v46  ;;  %v15195_v17 = vld [vmem:[#allocation133_spill] sm:$0xff]  ;;  %v8446_v46 = vmul.f32 -1.442695, %v12141_v56  ;;  %v15201_v56 = vld [vmem:[#allocation140_spill] sm:$0xff] }
 0x29c   : > { %15192 = vst [vmem:[#allocation180_spill] sm:$0xff] %v12152_v1  ;;  %v12159_v18 = vpop.eup %9141  ;;  %9167 = vpow2.f32 %v8434_v59  ;;  %v12164_v45 = vadd.f32 %v15195_v17, %v10917_v7  ;;  %v8445_v59 = vmul.f32 -1.442695, %v12148_v49  ;;  %v12189_v33 = vadd.f32 %v15201_v56, %v10905_v3 }
 0x29d   : > { %15194 = vst [vmem:[#allocation182_spill] sm:$0xff] %v12159_v18  ;;  %v12168_v28 = vpop.eup %9143  ;;  %9169 = vpow2.f32 %v8436_v12  ;;  %v15199_v18 = vld [vmem:[#allocation20_spill] sm:$0xff]  ;;  %v8447_v12 = vmul.f32 -1.442695, %v12157_v15  ;;  %v8465_v56 = vmul.f32 -1.442695, %v12173_v51 }
 0x29e   : > { %15196 = vst [vmem:[#allocation133_spill] sm:$0xff] %v12168_v28  ;;  %v12175_v9 = vpop.eup %9145  ;;  %9171 = vpow2.f32 %v8435_v27  ;;  %v12180_v17 = vadd.f32 %v15199_v18, %v10917_v7  ;;  %15200 = vst [vmem:[#allocation20_spill] sm:$0xff] %v12182_v55  ;;  %v8455_v27 = vmul.f32 -1.442695, %v12164_v45 }
 0x29f   : > { %15198 = vst [vmem:[#allocation137_spill] sm:$0xff] %v12175_v9  ;;  %v12184_v26 = vpop.eup %9147  ;;  %9173 = vpow2.f32 %v8437_v44  ;;  %v15203_v9 = vld [vmem:[#allocation141_spill] sm:$0xff]  ;;  %v15204_v44 = vld [vmem:[#allocation134_spill] sm:$0xff] }
 0x2a0   : > { %v12191_v20 = vpop.eup %9149  ;;  %9175 = vpow2.f32 %v8444_v5  ;;  %v12196_v18 = vadd.f32 %v15203_v9, %v10905_v3  ;;  %v12202_v15 = vadd.f32 %v15204_v44, %v10905_v3  ;;  %v8475_v5 = vmul.f32 -1.442695, %v12180_v17  ;;  %v12210_v9 = vpop.f32.mrf.mxu0 }
 0x2a1   : > { %15202 = vst [vmem:[#allocation140_spill] sm:$0xff] %v12191_v20  ;;  %v9152_v55 = vpop.eup %9151  ;;  %9177 = vpow2.f32 %v8446_v46  ;;  %v15205_v20 = vld [vmem:[#allocation21_spill] sm:$0xff]  ;;  %15206 = vst [vmem:[#allocation141_spill] sm:$0xff] %v12210_v9  ;;  %v15207_v46 = vld [vmem:[#allocation132_spill] sm:$0xff]  ;;  %v8474_v44 = vmul.f32 -1.442695, %v12189_v33 }
 0x2a2   : > { %v9154_v32 = vpop.eup %9153  ;;  %9179 = vpow2.f32 %v8445_v59  ;;  %v12208_v34 = vadd.f32 %v15205_v20, %v10917_v7  ;;  %v12214_v43 = vadd.f32 %v15207_v46, %v10905_v3  ;;  %v8484_v59 = vmul.f32 -1.442695, %v12196_v18  ;;  %v12222_v9 = vpop.f32.mrf.mxu0 }
 0x2a3   : > { %v9156_v2 = vpop.eup %9155  ;;  %9181 = vpow2.f32 %v8447_v12  ;;  %v8464_v7 = vmul.f32 -1.442695, %v12202_v15  ;;  %15208 = vst [vmem:[#allocation134_spill] sm:$0xff] %v12222_v9  ;;  %v3147_v54 = vadd.f32 1.0, %v9154_v32  ;;  %v12241_v32 = vpop.f32.mrf.mxu1 }
 0x2a4   : > { %v9158_v21 = vpop.eup %9157  ;;  %9183 = vpow2.f32 %v8455_v27  ;;  %v8485_v12 = vmul.f32 -1.442695, %v12208_v34  ;;  %v8454_v46 = vmul.f32 -1.442695, %v12214_v43  ;;  %v3145_v27 = vadd.f32 1.0, %v9152_v55  ;;  %v12231_v10 = vpop.f32.mrf.mxu0 }
 0x2a5   : > { %v9160_v16 = vpop.eup %9159  ;;  %9185 = vpow2.f32 %v8465_v56  ;;  %15209 = vst [vmem:[#allocation21_spill] sm:$0xff] %v12231_v10  ;;  %v3148_v38 = vadd.f32 1.0, %v9158_v21 }
 0x2a6   : > { %v9162_v20 = vpop.eup %9161  ;;  %9187 = vpow2.f32 %v8475_v5  ;;  %v3146_v5 = vadd.f32 1.0, %v9156_v2  ;;  %v3155_v55 = vadd.f32 1.0, %v9160_v16  ;;  %v12251_v16 = vadd.f32 %v12041_v57, %v10910_v4 }
 0x2a7   : > { %v9164_v3 = vpop.eup %9163  ;;  %9189 = vpow2.f32 %v8474_v44  ;;  %v3157_v2 = vadd.f32 1.0, %v9162_v20 }
 0x2a8   : > { %v9166_v0 = vpop.eup %9165  ;;  %9191 = vpow2.f32 %v8484_v59  ;;  %v12239_v59 = vadd.f32 %v12029_v29, %v10910_v4  ;;  %v3156_v21 = vadd.f32 1.0, %v9164_v3  ;;  %15212 = vst [vmem:[#allocation184_spill] sm:$0xff] %v12251_v16 }
 0x2a9   : > { %v12227_v61 = vpop.eup %9167  ;;  %9193 = vpow2.f32 %v8464_v7 }
 0x2aa   : > { %v12229_v56 = vpop.eup %9169  ;;  %9195 = vpow2.f32 %v8485_v12  ;;  %15210 = vst [vmem:[#allocation132_spill] sm:$0xff] %v12239_v59  ;;  %v12245_v12 = vadd.f32 %v12033_v62, %v10920_v8  ;;  %v8456_v62 = vmul.f32 -1.442695, %v12239_v59 }
 0x2ab   : > { %v12233_v9 = vpop.eup %9171  ;;  %9197 = vpow2.f32 %v8454_v46  ;;  %v12253_v46 = vpop.f32.mrf.mxu0 }
 0x2ac   : > { %v12235_v44 = vpop.eup %9173  ;;  %9199 = vrcp.f32 %v3145_v27  ;;  %15211 = vst [vmem:[#allocation183_spill] sm:$0xff] %v12245_v12  ;;  %15213 = vst [vmem:[#allocation185_spill] sm:$0xff] %v12253_v46  ;;  %v3158_v27 = vadd.f32 1.0, %v9166_v0  ;;  %v8457_v57 = vmul.f32 -1.442695, %v12245_v12 }
 0x2ad   : > { %v9176_v7 = vpop.eup %9175  ;;  %9201 = vrcp.f32 %v3147_v54  ;;  %v12257_v54 = vadd.f32 %v12070_v58, %v10920_v8  ;;  %v12266_v0 = vpop.f32.mrf.mxu0 }
 0x2ae   : > { %v12247_v10 = vpop.eup %9177  ;;  %9203 = vrcp.f32 %v3146_v5  ;;  %v12262_v5 = vpop.f32.mrf.mxu1  ;;  %15215 = vst [vmem:[#allocation187_spill] sm:$0xff] %v12266_v0 }
 0x2af   : > { %v9180_v29 = vpop.eup %9179  ;;  %9205 = vrcp.f32 %v3148_v38  ;;  %15214 = vst [vmem:[#allocation186_spill] sm:$0xff] %v12257_v54  ;;  %v8466_v38 = vmul.f32 -1.442695, %v12251_v16  ;;  %v8467_v58 = vmul.f32 -1.442695, %v12257_v54  ;;  %v12271_v1 = vpop.f32.mrf.mxu0 }
 0x2b0   : > { %v12259_v20 = vpop.eup %9181  ;;  %9207 = vrcp.f32 %v3155_v55  ;;  %v12269_v59 = vpop.f32.mrf.mxu1  ;;  %15216 = vst [vmem:[#allocation188_spill] sm:$0xff] %v12271_v1 }
 0x2b1   : > { %v9184_v3 = vpop.eup %9183  ;;  %9209 = vrcp.f32 %v3157_v2 }
 0x2b2   : > { %v9186_v19 = vpop.eup %9185  ;;  %9211 = vrcp.f32 %v3156_v21  ;;  %v12273_v54 = vpop.f32.mrf.mxu1 }
 0x2b3   : > { %v9188_v46 = vpop.eup %9187  ;;  %9213 = vrcp.f32 %v3158_v27  ;;  %v3196_v11 = vadd.f32 1.0, %v9186_v19 }
 0x2b4   : > { %v9190_v40 = vpop.eup %9189  ;;  %9215 = vpow2.f32 %v8456_v62  ;;  %v3206_v55 = vadd.f32 1.0, %v9188_v46 }
 0x2b5   : > { %v9192_v24 = vpop.eup %9191  ;;  %9217 = vpow2.f32 %v8457_v57  ;;  %v3205_v16 = vadd.f32 1.0, %v9190_v40  ;;  %v3186_v57 = vadd.f32 1.0, %v9184_v3  ;;  %v14761_v40 = vmov 0.00390625  }
 0x2b6   : > { %v9194_v2 = vpop.eup %9193  ;;  %9219 = vpow2.f32 %v8466_v38  ;;  %v3215_v12 = vadd.f32 1.0, %v9192_v24  ;;  %v12279_v24 = vpop.f32.mrf.mxu0  ;;  %4249 = vmatprep.mubr.f32.mxu1 %v14761_v40  ;;  %4391 = vmatprep.mubr.f32.mxu0 %v14761_v40  ;;  %v3175_v3 = vadd.f32 1.0, %v9176_v7  ;;  %v3165_v7 = vadd.f32 1.0, %v12227_v61 }
 0x2b7   : > { %v9196_v21 = vpop.eup %9195  ;;  %9221 = vpow2.f32 %v8467_v58  ;;  %v3195_v46 = vadd.f32 1.0, %v9194_v2  ;;  %15218 = vst [vmem:[#allocation190_spill] sm:$0xff] %v12279_v24 }
 0x2b8   : > { %v9198_v0 = vpop.eup %9197  ;;  %9223 = vrcp.f32 %v3206_v55  ;;  %v3216_v27 = vadd.f32 1.0, %v9196_v21  ;;  %v3176_v55 = vadd.f32 1.0, %v9180_v29  ;;  %v12293_v21 = vadd.f32 %v12102_v47, %v10910_v4 }
 0x2b9   : > { %v12275_v62 = vpop.eup %9199  ;;  %9225 = vrcp.f32 %v3215_v12  ;;  %v3185_v58 = vadd.f32 1.0, %v9198_v0  ;;  %v12287_v12 = vpop.f32.mrf.mxu1  ;;  %v3166_v0 = vadd.f32 1.0, %v12233_v9  ;;  %v12309_v47 = vadd.f32 %v12166_v6, %v10910_v4 }
 0x2ba   : > { %v12277_v28 = vpop.eup %9201  ;;  %9227 = vrcp.f32 %v3216_v27  ;;  %15220 = vst [vmem:[#allocation192_spill] sm:$0xff] %v12293_v21  ;;  %v12300_v27 = vadd.f32 %v12134_v48, %v10920_v8  ;;  %v3167_v9 = vadd.f32 1.0, %v12229_v56  ;;  %v12316_v48 = vadd.f32 %v12198_v36, %v10920_v8 }
 0x2bb   : > { %15217 = vst [vmem:[#allocation189_spill] sm:$0xff] %v12277_v28  ;;  %v12281_v38 = vpop.eup %9203  ;;  %9229 = vrcp.f32 %v3205_v16  ;;  %15224 = vst [vmem:[#allocation196_spill] sm:$0xff] %v12309_v47  ;;  %v8486_v24 = vmul.f32 -1.442695, %v12309_v47  ;;  %v3178_v47 = vadd.f32 1.0, %v12259_v20 }
 0x2bc   : > { %v12285_v19 = vpop.eup %9205  ;;  %9231 = vrcp.f32 %v3196_v11  ;;  %15222 = vst [vmem:[#allocation194_spill] sm:$0xff] %v12300_v27  ;;  %v12302_v11 = vpop.f32.mrf.mxu0  ;;  %15226 = vst [vmem:[#allocation198_spill] sm:$0xff] %v12316_v48  ;;  %v8477_v56 = vmul.f32 -1.442695, %v12300_v27  ;;  %v8487_v28 = vmul.f32 -1.442695, %v12316_v48 }
 0x2bd   : > { %15219 = vst [vmem:[#allocation191_spill] sm:$0xff] %v12285_v19  ;;  %v12289_v2 = vpop.eup %9207  ;;  %9233 = vrcp.f32 %v3195_v46  ;;  %15223 = vst [vmem:[#allocation195_spill] sm:$0xff] %v12302_v11  ;;  %v12321_v11 = vpop.f32.mrf.mxu1  ;;  %v10047_v19 = vld [vmem:[#allocation6] sm:$0xff] }
 0x2be   : > { %v12295_v16 = vpop.eup %9209  ;;  %9235 = vrcp.f32 %v3186_v57  ;;  %v15227_v57 = vld [vmem:[#allocation38_spill] sm:$0xff]  ;;  %v12331_v8 = vpop.f32.mrf.mxu0 }
 0x2bf   : > { %15221 = vst [vmem:[#allocation193_spill] sm:$0xff] %v12295_v16  ;;  %v12304_v29 = vpop.eup %9211  ;;  %9237 = vrcp.f32 %v3185_v58  ;;  %v12319_v40 = vsub.s32 4, %v15227_v57  ;;  %v8476_v58 = vmul.f32 -1.442695, %v12293_v21  ;;  %v12325_v4 = vsub.s32 6, %v15227_v57  ;;  %15231 = vst [vmem:[#allocation202_spill] sm:$0xff] %v12331_v8  ;;  %v12341_v16 = vpop.f32.mrf.mxu1 }
 0x2c0   : > { %v12311_v46 = vpop.eup %9213  ;;  %9239 = vrcp.f32 %v3176_v55  ;;  %v12329_v55 = vsub.s32 5, %v15227_v57  ;;  %15233 = vst [vmem:[#allocation204_spill] sm:$0xff] %v12341_v16  ;;  %v3168_v8 = vadd.f32 1.0, %v12235_v44  ;;  %v12351_v27 = vpop.f32.mrf.mxu0 }
 0x2c1   : > { %15225 = vst [vmem:[#allocation197_spill] sm:$0xff] %v12311_v46  ;;  %15228 = vst [vmem:[#allocation199_spill] sm:$0xff] %v12319_v40  ;;  %v9216_v61 = vpop.eup %9215  ;;  %9241 = vrcp.f32 %v3175_v3  ;;  %v12335_v3 = vsub.s32 7, %v15227_v57  ;;  %v3177_v57 = vadd.f32 1.0, %v12247_v10  ;;  %v15235_v10 = vld [vmem:[#allocation142_spill] sm:$0xff] }
 0x2c2   : > { %15229 = vst [vmem:[#allocation200_spill] sm:$0xff] %v12325_v4  ;;  %v9218_v6 = vpop.eup %9217  ;;  %9243 = vrcp.f32 %v3166_v0  ;;  %15230 = vst [vmem:[#allocation201_spill] sm:$0xff] %v12329_v55  ;;  %v12339_v0 = vrot.slane %v10047_v19, %v12319_v40 }
 0x2c3   : > { %v9220_v36 = vpop.eup %9219  ;;  %9245 = vrcp.f32 %v3165_v7  ;;  %15232 = vst [vmem:[#allocation203_spill] sm:$0xff] %v12335_v3  ;;  %v12345_v7 = vrot.slane %v10047_v19, %v12325_v4  ;;  %15234 = vst [vmem:[#allocation205_spill] sm:$0xff] %v12351_v27  ;;  %v12355_v48 = vrot.slane %v10047_v19, %v12335_v3  ;;  %v3188_v27 = vadd.f32 1.0, %v9218_v6 }
 0x2c4   : > { %v9222_v1 = vpop.eup %9221  ;;  %9247 = vrcp.f32 %v3167_v9  ;;  %v12349_v9 = vrot.slane %v10047_v19, %v12329_v55  ;;  %v12362_v55 = vpop.f32.mrf.mxu1 }
 0x2c5   : > { %v9224_v46 = vpop.eup %9223  ;;  %9249 = vpow2.f32 %v8476_v58  ;;  %v3187_v58 = vadd.f32 1.0, %v9216_v61  ;;  %v3197_v61 = vadd.f32 1.0, %v9220_v36  ;;  %v3198_v6 = vadd.f32 1.0, %v9222_v1 }
 0x2c6   : > { %v9226_v21 = vpop.eup %9225  ;;  %9251 = vpow2.f32 %v8477_v56  ;;  %v12360_v56 = vadd.f32 %v15235_v10, %v12339_v0 }
 0x2c7   : > { %v9228_v40 = vpop.eup %9227  ;;  %9253 = vpow2.f32 %v8486_v24  ;;  %v4175_v20 = vmul.f32 %v9226_v21, %v12196_v18  ;;  %v12367_v24 = vadd.f32 %v12218_v39, %v12345_v7  ;;  %v12379_v39 = vadd.f32 %v12225_v31, %v12355_v48 }
 0x2c8   : > { %v9230_v44 = vpop.eup %9229  ;;  %v4176_v4 = vmul.f32 %v9228_v40, %v12208_v34  ;;  %9255 = vpow2.f32 %v8487_v28  ;;  %15236 = vst [vmem:[#allocation142_spill] sm:$0xff] %v12360_v56  ;;  %v4166_v28 = vmul.f32 %v9224_v46, %v12180_v17  ;;  %v12372_v34 = vadd.f32 %v11600_v22, %v12349_v9  ;;  %v12374_v40 = vpop.f32.mrf.mxu0 }
 0x2c9   : > { %v9232_v16 = vpop.eup %9231  ;;  %9257 = vrcp.f32 %v3168_v8  ;;  %15237 = vst [vmem:[#allocation206_spill] sm:$0xff] %v12367_v24  ;;  %15239 = vst [vmem:[#allocation208_spill] sm:$0xff] %v12374_v40  ;;  %v4165_v18 = vmul.f32 %v9230_v44, %v12189_v33  ;;  %v8178_v22 = vmul.f32 -1.442695, %v12360_v56  ;;  %v12385_v46 = vadd.f32 %v11617_v30, %v12339_v0 }
 0x2ca   : > { %v9234_v19 = vpop.eup %9233  ;;  %9259 = vrcp.f32 %v3177_v57  ;;  %15238 = vst [vmem:[#allocation207_spill] sm:$0xff] %v12372_v34  ;;  %4217 = vmatprep.subr.mxu1 %v4176_v4  ;;  %15240 = vst [vmem:[#allocation209_spill] sm:$0xff] %v12379_v39  ;;  %v4156_v17 = vmul.f32 %v9232_v16, %v12173_v51  ;;  %v12387_v57 = vpop.f32.mrf.mxu1  ;;  %v8180_v31 = vmul.f32 -1.442695, %v12367_v24  ;;  %v8179_v30 = vmul.f32 -1.442695, %v12372_v34 }
 0x2cb   : > { %v9236_v8 = vpop.eup %9235  ;;  %9261 = vrcp.f32 %v3178_v47  ;;  %4218 = vmatpush2.msra.mxu1 %v4175_v20  ;;  %15241 = vst [vmem:[#allocation210_spill] sm:$0xff] %v12385_v46  ;;  %v4155_v33 = vmul.f32 %v9234_v19, %v12202_v15  ;;  %v12393_v47 = vadd.f32 %v12241_v32, %v12345_v7  ;;  %v15243_v4 = vld [vmem:[#allocation147_spill] sm:$0xff]  ;;  %v8181_v32 = vmul.f32 -1.442695, %v12379_v39 }
 0x2cc   : > { %v9238_v21 = vpop.eup %9237  ;;  %9263 = vrcp.f32 %v3187_v58  ;;  %4219 = vmatprep.subr.mxu1 %v4166_v28  ;;  %v4146_v16 = vmul.f32 %v9236_v8, %v12164_v45  ;;  %v12399_v36 = vadd.f32 %v15243_v4, %v12349_v9  ;;  %v12407_v58 = vadd.f32 %v12262_v5, %v12355_v48 }
 0x2cd   : > { %v9240_v1 = vpop.eup %9239  ;;  %9265 = vrcp.f32 %v3188_v27  ;;  %15242 = vst [vmem:[#allocation211_spill] sm:$0xff] %v12393_v47  ;;  %4220 = vmatpush2.msra.mxu1 %v4165_v18  ;;  %v12401_v27 = vpop.f32.mrf.mxu0  ;;  %v4145_v44 = vmul.f32 %v9238_v21, %v12214_v43  ;;  %v8188_v20 = vmul.f32 -1.442695, %v12385_v46  ;;  %v12413_v19 = vadd.f32 %v11659_v60, %v12339_v0  ;;  %v15307_v46 = vld [vmem:[#allocation63_spill] sm:$0xff] }
 0x2ce   : > { %v9242_v51 = vpop.eup %9241  ;;  %9267 = vrcp.f32 %v3197_v61  ;;  %15244 = vst [vmem:[#allocation147_spill] sm:$0xff] %v12399_v36  ;;  %4221 = vmatprep.subr.mxu1 %v4156_v17  ;;  %15245 = vst [vmem:[#allocation212_spill] sm:$0xff] %v12401_v27  ;;  %v4136_v10 = vmul.f32 %v9240_v1, %v12148_v49  ;;  %v12415_v61 = vpop.f32.mrf.mxu1  ;;  %v8190_v5 = vmul.f32 -1.442695, %v12393_v47  ;;  %v8191_v17 = vmul.f32 -1.442695, %v12407_v58 }
 0x2cf   : > { %v9244_v15 = vpop.eup %9243  ;;  %9269 = vrcp.f32 %v3198_v6  ;;  %15246 = vst [vmem:[#allocation213_spill] sm:$0xff] %v12407_v58  ;;  %4222 = vmatpush2.msra.mxu1 %v4155_v33  ;;  %15247 = vst [vmem:[#allocation214_spill] sm:$0xff] %v12413_v19  ;;  %v4135_v28 = vmul.f32 %v9242_v51, %v12132_v50  ;;  %v8189_v6 = vmul.f32 -1.442695, %v12399_v36  ;;  %v12423_v60 = vpop.f32.mrf.mxu0  ;;  %v15306_v58 = vld [vmem:[#allocation144_spill] sm:$0xff] }
 0x2d0   : > { %v9246_v45 = vpop.eup %9245  ;;  %9271 = vpow2.f32 %v8178_v22  ;;  %4223 = vmatprep.subr.mxu1 %v4146_v16  ;;  %v4126_v49 = vmul.f32 %v9244_v15, %v12116_v35  ;;  %15248 = vst [vmem:[#allocation215_spill] sm:$0xff] %v12423_v60  ;;  %v4116_v22 = vmul.f32 %v12304_v29, %v12084_v23  ;;  %v8198_v35 = vmul.f32 -1.442695, %v12413_v19  ;;  %v12430_v1 = vpop.f32.mrf.mxu1  ;;  %v15311_v36 = vld [vmem:[#allocation120_spill] sm:$0xff] }
 0x2d1   : > { %v12417_v43 = vpop.eup %9247  ;;  %9273 = vpow2.f32 %v8180_v31  ;;  %4224 = vmatpush2.msra.mxu1 %v4145_v44  ;;  %v4125_v21 = vmul.f32 %v9246_v45, %v12100_v53  ;;  %v4115_v31 = vmul.f32 %v12289_v2, %v12068_v52  ;;  %v12436_v53 = vadd.f32 %v12269_v59, %v12345_v7  ;;  %v12446_v52 = vpop.f32.mrf.mxu0 }
 0x2d2   : > { %v9250_v8 = vpop.eup %9249  ;;  %9275 = vpow2.f32 %v8179_v30  ;;  %4225 = vmatprep.subr.mxu1 %v4136_v10  ;;  %v4106_v23 = vmul.f32 %v12281_v38, %v12053_v37  ;;  %v12444_v30 = vadd.f32 %v11682_v25, %v12349_v9  ;;  %15251 = vst [vmem:[#allocation218_spill] sm:$0xff] %v12446_v52  ;;  %v4105_v59 = vmul.f32 %v12275_v62, %v12039_v13  ;;  %v15257_v10 = vld [vmem:[#allocation180_spill] sm:$0xff] }
 0x2d3   : > { %v9252_v18 = vpop.eup %9251  ;;  %9277 = vpow2.f32 %v8181_v32  ;;  %4226 = vmatpush2.msra.mxu1 %v4135_v28  ;;  %v3207_v51 = vadd.f32 1.0, %v9250_v8  ;;  %15249 = vst [vmem:[#allocation216_spill] sm:$0xff] %v12436_v53  ;;  %v12454_v15 = vadd.f32 %v11712_v42, %v12339_v0  ;;  %v4096_v25 = vmul.f32 %v12184_v26, %v11988_v63  ;;  %v12464_v32 = vpop.f32.mrf.mxu1  ;;  %v15254_v42 = vld [vmem:[#allocation133_spill] sm:$0xff] }
 0x2d4   : > { %v9254_v50 = vpop.eup %9253  ;;  %9279 = vpow2.f32 %v8188_v20  ;;  %4227 = vmatprep.subr.mxu1 %v4126_v49  ;;  %v3208_v29 = vadd.f32 1.0, %v9252_v18  ;;  %15250 = vst [vmem:[#allocation217_spill] sm:$0xff] %v12444_v30  ;;  %v12462_v44 = vadd.f32 %v11747_v14, %v12349_v9  ;;  %v4095_v62 = vmul.f32 %v15254_v42, %v11972_v41  ;;  %v15256_v14 = vld [vmem:[#allocation80_spill] sm:$0xff]  ;;  %v12484_v41 = vpop.f32.mrf.mxu0  ;;  %v15261_v49 = vld [vmem:[#allocation130_spill] sm:$0xff] }
 0x2d5   : > { %v9256_v33 = vpop.eup %9255  ;;  %9281 = vpow2.f32 %v8190_v5  ;;  %4228 = vmatpush2.msra.mxu1 %v4125_v21  ;;  %v3217_v4 = vadd.f32 1.0, %v9254_v50  ;;  %15252 = vst [vmem:[#allocation219_spill] sm:$0xff] %v12454_v15  ;;  %v8200_v45 = vmul.f32 -1.442695, %v12436_v53  ;;  %v12473_v26 = vadd.f32 %v12273_v54, %v12355_v48  ;;  %15259 = vst [vmem:[#allocation180_spill] sm:$0xff] %v12484_v41  ;;  %v15260_v54 = vld [vmem:[#allocation51_spill] sm:$0xff] }
 0x2d6   : > { %v12438_v16 = vpop.eup %9257  ;;  %9283 = vpow2.f32 %v8189_v6  ;;  %4229 = vmatprep.subr.mxu1 %v4116_v22  ;;  %v3218_v38 = vadd.f32 1.0, %v9256_v33  ;;  %15253 = vst [vmem:[#allocation220_spill] sm:$0xff] %v12462_v44  ;;  %v4086_v20 = vmul.f32 %v15257_v10, %v15256_v14  ;;  %v8199_v28 = vmul.f32 -1.442695, %v12444_v30  ;;  %v15264_v50 = vld [vmem:[#allocation175_spill] sm:$0xff]  ;;  %v12500_v33 = vpop.f32.mrf.mxu1  ;;  %v15270_v10 = vld [vmem:[#allocation112_spill] sm:$0xff] }
 0x2d7   : > { %v12448_v2 = vpop.eup %9259  ;;  %9285 = vpow2.f32 %v8191_v17  ;;  %4230 = vmatpush2.msra.mxu1 %v4115_v31  ;;  %15255 = vst [vmem:[#allocation133_spill] sm:$0xff] %v12473_v26  ;;  %v12482_v5 = vadd.f32 %v12287_v12, %v12345_v7  ;;  %v4085_v6 = vmul.f32 %v15261_v49, %v15260_v54  ;;  %v8208_v18 = vmul.f32 -1.442695, %v12454_v15  ;;  %v15263_v12 = vld [vmem:[#allocation92_spill] sm:$0xff]  ;;  %v15310_v53 = vld [vmem:[#allocation138_spill] sm:$0xff] }
 0x2d8   : > { %v12456_v37 = vpop.eup %9261  ;;  %9287 = vpow2.f32 %v8198_v35  ;;  %4231 = vmatprep.subr.mxu1 %v4106_v23  ;;  %v12493_v21 = vadd.f32 %v12321_v11, %v12355_v48  ;;  %v4076_v22 = vmul.f32 %v15264_v50, %v15263_v12  ;;  %v8209_v35 = vmul.f32 -1.442695, %v12462_v44  ;;  %v15266_v23 = vld [vmem:[#allocation127_spill] sm:$0xff]  ;;  %v15273_v12 = vld [vmem:[#allocation165_spill] sm:$0xff] }
 0x2d9   : > { %v12466_v13 = vpop.eup %9263  ;;  %9289 = vrcp.f32 %v3207_v51  ;;  %4232 = vmatpush2.msra.mxu1 %v4105_v59  ;;  %15258 = vst [vmem:[#allocation80_spill] sm:$0xff] %v12482_v5  ;;  %v15265_v51 = vld [vmem:[#allocation96_spill] sm:$0xff]  ;;  %v8201_v11 = vmul.f32 -1.442695, %v12473_v26 }
 0x2da   : > { %v12475_v63 = vpop.eup %9265  ;;  %9291 = vrcp.f32 %v3208_v29  ;;  %4233 = vmatprep.subr.mxu1 %v4096_v25  ;;  %15262 = vst [vmem:[#allocation51_spill] sm:$0xff] %v12493_v21  ;;  %v4075_v29 = vmul.f32 %v15266_v23, %v15265_v51  ;;  %v15268_v25 = vld [vmem:[#allocation170_spill] sm:$0xff] }
 0x2db   : > { %v12486_v8 = vpop.eup %9267  ;;  %9293 = vrcp.f32 %v3217_v4  ;;  %4234 = vmatpush2.msra.mxu1 %v4095_v62  ;;  %v15267_v4 = vld [vmem:[#allocation104_spill] sm:$0xff]  ;;  %v12508_v62 = vpop.f32.mrf.mxu0  ;;  %v15274_v23 = vld [vmem:[#allocation30_spill] sm:$0xff] }
 0x2dc   : > { %v12495_v17 = vpop.eup %9269  ;;  %9295 = vrcp.f32 %v3218_v38  ;;  %4235 = vmatprep.subr.mxu1 %v4086_v20  ;;  %v4066_v42 = vmul.f32 %v15268_v25, %v15267_v4  ;;  %v8210_v38 = vmul.f32 -1.442695, %v12482_v5  ;;  %15269 = vst [vmem:[#allocation130_spill] sm:$0xff] %v12508_v62  ;;  %v15271_v20 = vld [vmem:[#allocation122_spill] sm:$0xff]  ;;  %v15321_v5 = vld [vmem:[#allocation53_spill] sm:$0xff] }
 0x2dd   : > { %v9272_v31 = vpop.eup %9271  ;;  %9297 = vpow2.f32 %v8200_v45  ;;  %4236 = vmatpush2.msra.mxu1 %v4085_v6  ;;  %v4065_v54 = vmul.f32 %v15271_v20, %v15270_v10  ;;  %v8211_v45 = vmul.f32 -1.442695, %v12493_v21  ;;  %v15272_v6 = vld [vmem:[#allocation124_spill] sm:$0xff]  ;;  %v15275_v4 = vld [vmem:[#allocation114_spill] sm:$0xff]  ;;  %v15276_v10 = vld [vmem:[#allocation157_spill] sm:$0xff]  ;;  %v12605_v30 = vadd.f32 %v15321_v5, %v12339_v0 }
 0x2de   : > { %v9274_v59 = vpop.eup %9273  ;;  %9299 = vpow2.f32 %v8199_v28  ;;  %4237 = vmatprep.subr.mxu1 %v4076_v22  ;;  %v4056_v50 = vmul.f32 %v15273_v12, %v15272_v6  ;;  %v2909_v51 = vadd.f32 1.0, %v9272_v31  ;;  %v12515_v28 = vpop.f32.mrf.mxu1  ;;  %v4055_v25 = vmul.f32 %v15275_v4, %v15274_v23  ;;  %v15277_v20 = vld [vmem:[#allocation102_spill] sm:$0xff]  ;;  %v15279_v31 = vld [vmem:[#allocation28_spill] sm:$0xff]  ;;  %v15366_v21 = vld [vmem:[#allocation123_spill] sm:$0xff] }
 0x2df   : > { %v9276_v14 = vpop.eup %9275  ;;  %9301 = vpow2.f32 %v8208_v18  ;;  %4238 = vmatpush2.msra.mxu1 %v4075_v29  ;;  %v2911_v3 = vadd.f32 1.0, %v9274_v59  ;;  %v4046_v29 = vmul.f32 %v15277_v20, %v15276_v10  ;;  %v12521_v6 = vpop.f32.mrf.mxu0  ;;  %v15280_v12 = vld [vmem:[#allocation94_spill] sm:$0xff]  ;;  %v15281_v59 = vld [vmem:[#allocation152_spill] sm:$0xff]  ;;  %15322 = vst [vmem:[#allocation30_spill] sm:$0xff] %v12605_v30 }
 0x2e0   : > { %v9278_v49 = vpop.eup %9277  ;;  %9303 = vpow2.f32 %v8209_v35  ;;  %4239 = vmatprep.subr.mxu1 %v4066_v42  ;;  %v2910_v24 = vadd.f32 1.0, %v9276_v14  ;;  %15278 = vst [vmem:[#allocation92_spill] sm:$0xff] %v12521_v6  ;;  %v4045_v42 = vmul.f32 %v15280_v12, %v15279_v31  ;;  %v12527_v39 = vpop.f32.mrf.mxu1  ;;  %v15283_v14 = vld [vmem:[#allocation27_spill] sm:$0xff]  ;;  %v15285_v31 = vld [vmem:[#allocation160_spill] sm:$0xff]  ;;  %v15329_v5 = vld [vmem:[#allocation158_spill] sm:$0xff] }
 0x2e1   : > { %v9280_v22 = vpop.eup %9279  ;;  %9305 = vpow2.f32 %v8201_v11  ;;  %4240 = vmatpush2.msra.mxu1 %v4065_v54  ;;  %v2912_v62 = vadd.f32 1.0, %v9278_v49  ;;  %v15282_v11 = vld [vmem:[#allocation90_spill] sm:$0xff]  ;;  %v12533_v49 = vadd.f32 %v15285_v31, %v12339_v0  ;;  %v15288_v12 = vld [vmem:[#allocation76_spill] sm:$0xff] }
 0x2e2   : > { %v9282_v18 = vpop.eup %9281  ;;  %9307 = vpow2.f32 %v8210_v38  ;;  %4241 = vmatprep.subr.mxu1 %v4056_v50  ;;  %v4036_v54 = vmul.f32 %v15282_v11, %v15281_v59  ;;  %v2919_v4 = vadd.f32 1.0, %v9280_v22  ;;  %v15284_v50 = vld [vmem:[#allocation43_spill] sm:$0xff]  ;;  %v12543_v11 = vpop.f32.mrf.mxu0  ;;  %v15294_v31 = vld [vmem:[#allocation116_spill] sm:$0xff] }
 0x2e3   : > { %v9284_v35 = vpop.eup %9283  ;;  %9309 = vpow2.f32 %v8211_v45  ;;  %4242 = vmatpush2.msra.mxu1 %v4055_v25  ;;  %v4035_v10 = vmul.f32 %v15284_v50, %v15283_v14  ;;  %v2921_v20 = vadd.f32 1.0, %v9282_v18  ;;  %15286 = vst [vmem:[#allocation175_spill] sm:$0xff] %v12533_v49  ;;  %v15287_v25 = vld [vmem:[#allocation149_spill] sm:$0xff]  ;;  %15291 = vst [vmem:[#allocation127_spill] sm:$0xff] %v12543_v11  ;;  %v15293_v14 = vld [vmem:[#allocation83_spill] sm:$0xff]  ;;  %v12551_v6 = vadd.f32 %v15294_v31, %v12339_v0  ;;  %v12561_v47 = vpop.f32.mrf.mxu1 }
 0x2e4   : > { %v9286_v23 = vpop.eup %9285  ;;  %9311 = vrcp.f32 %v2909_v51  ;;  %4243 = vmatprep.subr.mxu1 %v4046_v29  ;;  %v4026_v51 = vmul.f32 %v15288_v12, %v15287_v25  ;;  %v2920_v22 = vadd.f32 1.0, %v9284_v35  ;;  %v15289_v29 = vld [vmem:[#allocation71_spill] sm:$0xff]  ;;  %v15292_v18 = vld [vmem:[#allocation25_spill] sm:$0xff]  ;;  %v15296_v35 = vld [vmem:[#allocation148_spill] sm:$0xff] }
 0x2e5   : > { %v9288_v38 = vpop.eup %9287  ;;  %9313 = vrcp.f32 %v2911_v3  ;;  %4244 = vmatpush2.msra.mxu1 %v4045_v42  ;;  %v12541_v59 = vadd.f32 %v15289_v29, %v12349_v9  ;;  %v4025_v50 = vmul.f32 %v15293_v14, %v15292_v18  ;;  %v2922_v42 = vadd.f32 1.0, %v9286_v23  ;;  %15295 = vst [vmem:[#allocation104_spill] sm:$0xff] %v12551_v6  ;;  %v15297_v25 = vld [vmem:[#allocation57_spill] sm:$0xff]  ;;  %v15298_v29 = vld [vmem:[#allocation31_spill] sm:$0xff]  ;;  %v15300_v23 = vld [vmem:[#allocation146_spill] sm:$0xff] }
 0x2e6   : > { %v12535_v45 = vpop.eup %9289  ;;  %9315 = vrcp.f32 %v2910_v24  ;;  %4245 = vmatprep.subr.mxu1 %v4036_v54  ;;  %v4018_v12 = vmul.f32 %v15297_v25, %v15296_v35  ;;  %v2929_v54 = vadd.f32 1.0, %v9288_v38  ;;  %v12559_v11 = vadd.f32 %v15298_v29, %v12349_v9  ;;  %v15301_v18 = vld [vmem:[#allocation100_spill] sm:$0xff]  ;;  %v15302_v35 = vld [vmem:[#allocation145_spill] sm:$0xff] }
 0x2e7   : > { %15290 = vst [vmem:[#allocation96_spill] sm:$0xff] %v12541_v59  ;;  %v12545_v3 = vpop.eup %9291  ;;  %9317 = vrcp.f32 %v2912_v62  ;;  %4246 = vmatpush2.msra.mxu1 %v4035_v10  ;;  %v4017_v14 = vmul.f32 %v15301_v18, %v15300_v23  ;;  %v8218_v10 = vmul.f32 -1.442695, %v12533_v49  ;;  %v8219_v25 = vmul.f32 -1.442695, %v12541_v59  ;;  %v15308_v18 = vld [vmem:[#allocation139_spill] sm:$0xff] }
 0x2e8   : > { %v12553_v24 = vpop.eup %9293  ;;  %9319 = vrcp.f32 %v2919_v4  ;;  %15299 = vst [vmem:[#allocation170_spill] sm:$0xff] %v12559_v11  ;;  %4247 = vmatprep.subr.mxu1 %v4026_v51  ;;  %v15303_v4 = vld [vmem:[#allocation61_spill] sm:$0xff]  ;;  %v15304_v29 = vmov 0.00390625   ;;  %v12572_v51 = vpop.f32.mrf.mxu0  ;;  %v4007_v23 = vmul.f32 %v15307_v46, %v15306_v58  ;;  %v3997_v46 = vmul.f32 %v15311_v36, %v15310_v53 }
 0x2e9   : > { %v12563_v62 = vpop.eup %9295  ;;  %9321 = vrcp.f32 %v2921_v20  ;;  %4248 = vmatpush2.msra.mxu1 %v4025_v50  ;;  %v4008_v38 = vmul.f32 %v15303_v4, %v15302_v35  ;;  %15305 = vst [vmem:[#allocation112_spill] sm:$0xff] %v12572_v51  ;;  %v8228_v20 = vmul.f32 -1.442695, %v12551_v6  ;;  %v12581_v4 = vpop.f32.mrf.mxu1 }
 0x2ea   : > { %v9298_v31 = vpop.eup %9297  ;;  %9323 = vrcp.f32 %v2920_v22  ;;  %4256 = vmatprep.subr.mxu1 %v4018_v12  ;;  %4250 = vmatmul.mubr.f32.vlgmr.msra.gmra.mxu1 %v15304_v29  ;;  %v15309_v22 = vld [vmem:[#allocation67_spill] sm:$0xff]  ;;  %v8229_v12 = vmul.f32 -1.442695, %v12559_v11  ;;  %v12597_v36 = vpop.f32.mrf.mxu0 }
 0x2eb   : > { %v9300_v34 = vpop.eup %9299  ;;  %9325 = vrcp.f32 %v2922_v42  ;;  %4257 = vmatpush1.msra.mxu1 %v4017_v14  ;;  %4320 = vmatprep.mubr.f32.mxu1 %v15304_v29  ;;  %v3998_v35 = vmul.f32 %v15309_v22, %v15308_v18  ;;  %v2931_v58 = vadd.f32 1.0, %v9298_v31  ;;  %v15312_v42 = vld [vmem:[#allocation65_spill] sm:$0xff]  ;;  %v15314_v18 = vld [vmem:[#allocation136_spill] sm:$0xff]  ;;  %15318 = vst [vmem:[#allocation165_spill] sm:$0xff] %v12597_v36  ;;  %v15320_v31 = vld [vmem:[#allocation79_spill] sm:$0xff]  ;;  %v12615_v56 = vpop.f32.mrf.mxu1 }
 0x2ec   : > { %v9302_v50 = vpop.eup %9301  ;;  %9327 = vrcp.f32 %v2929_v54  ;;  %4258 = vmatprep.subr.mxu1 %v4008_v38  ;;  %v12587_v14 = vadd.f32 %v15312_v42, %v12339_v0  ;;  %v15315_v54 = vld [vmem:[#allocation75_spill] sm:$0xff]  ;;  %v2930_v26 = vadd.f32 1.0, %v9300_v34 }
 0x2ed   : > { %v9304_v51 = vpop.eup %9303  ;;  %9329 = vpow2.f32 %v8218_v10  ;;  %4259 = vmatpush1.msra.mxu1 %v4007_v23  ;;  %v3988_v22 = vmul.f32 %v15315_v54, %v15314_v18  ;;  %v15316_v38 = vld [vmem:[#allocation59_spill] sm:$0xff]  ;;  %v2939_v23 = vadd.f32 1.0, %v9302_v50  ;;  %v15324_v18 = vld [vmem:[#allocation29_spill] sm:$0xff] }
 0x2ee   : > { %15313 = vst [vmem:[#allocation122_spill] sm:$0xff] %v12587_v14  ;;  %v12589_v41 = vpop.eup %9305  ;;  %9331 = vpow2.f32 %v8219_v25  ;;  %v12595_v19 = vadd.f32 %v15316_v38, %v12349_v9  ;;  %4260 = vmatprep.subr.mxu1 %v3998_v35  ;;  %v15319_v10 = vld [vmem:[#allocation135_spill] sm:$0xff]  ;;  %v15323_v25 = vld [vmem:[#allocation121_spill] sm:$0xff]  ;;  %v2940_v35 = vadd.f32 1.0, %v9304_v51  ;;  %v8238_v51 = vmul.f32 -1.442695, %v12587_v14 }
 0x2ef   : > { %v12599_v53 = vpop.eup %9307  ;;  %v3987_v42 = vmul.f32 %v15320_v31, %v15319_v10  ;;  %9333 = vpow2.f32 %v8228_v20  ;;  %4261 = vmatpush1.msra.mxu1 %v3997_v46  ;;  %v3978_v54 = vmul.f32 %v15324_v18, %v15323_v25  ;;  %v15325_v38 = vld [vmem:[#allocation47_spill] sm:$0xff]  ;;  %v15328_v50 = vld [vmem:[#allocation117_spill] sm:$0xff]  ;;  %v15330_v46 = vld [vmem:[#allocation204_spill] sm:$0xff] }
 0x2f0   : > { %15317 = vst [vmem:[#allocation124_spill] sm:$0xff] %v12595_v19  ;;  %v12607_v34 = vpop.eup %9309  ;;  %9335 = vpow2.f32 %v8229_v12  ;;  %v12613_v36 = vadd.f32 %v15325_v38, %v12349_v9  ;;  %4262 = vmatprep.subr.mxu1 %v3988_v22  ;;  %v3977_v10 = vmul.f32 %v15329_v5, %v15328_v50  ;;  %v12623_v31 = vadd.f32 %v15330_v46, %v12345_v7  ;;  %v15333_v25 = vld [vmem:[#allocation113_spill] sm:$0xff]  ;;  %v15334_v18 = vld [vmem:[#allocation156_spill] sm:$0xff] }
 0x2f1   : > { %v12617_v20 = vpop.eup %9311  ;;  %9337 = vrcp.f32 %v2931_v58  ;;  %4263 = vmatpush1.msra.mxu1 %v3987_v42  ;;  %v3968_v38 = vmul.f32 %v15334_v18, %v15333_v25  ;;  %v12632_v22 = vadd.f32 %v12362_v55, %v12355_v48  ;;  %v8239_v50 = vmul.f32 -1.442695, %v12595_v19  ;;  %v12635_v58 = vpop.f32.mrf.mxu0  ;;  %v15338_v46 = vld [vmem:[#allocation109_spill] sm:$0xff]  ;;  %v15343_v18 = vld [vmem:[#allocation24_spill] sm:$0xff] }
 0x2f2   : > { %15326 = vst [vmem:[#allocation114_spill] sm:$0xff] %v12613_v36  ;;  %15327 = vst [vmem:[#allocation157_spill] sm:$0xff] %v12617_v20  ;;  %v12626_v12 = vpop.eup %9313  ;;  %9339 = vrcp.f32 %v2930_v26  ;;  %4264 = vmatprep.subr.mxu1 %v3978_v54  ;;  %v15339_v20 = vld [vmem:[#allocation154_spill] sm:$0xff]  ;;  %v8248_v26 = vmul.f32 -1.442695, %v12605_v30  ;;  %v15342_v25 = vld [vmem:[#allocation105_spill] sm:$0xff] }
 0x2f3   : > { %15331 = vst [vmem:[#allocation102_spill] sm:$0xff] %v12623_v31  ;;  %15332 = vst [vmem:[#allocation28_spill] sm:$0xff] %v12626_v12  ;;  %v12637_v5 = vpop.eup %9315  ;;  %v3967_v42 = vmul.f32 %v15339_v20, %v15338_v46  ;;  %9341 = vrcp.f32 %v2939_v23  ;;  %v12643_v12 = vadd.f32 %v12387_v57, %v12345_v7  ;;  %4265 = vmatpush1.msra.mxu1 %v3977_v10  ;;  %v8249_v20 = vmul.f32 -1.442695, %v12613_v36  ;;  %v12655_v23 = vpop.f32.mrf.mxu1  ;;  %v15346_v46 = vld [vmem:[#allocation101_spill] sm:$0xff] }
 0x2f4   : > { %15335 = vst [vmem:[#allocation94_spill] sm:$0xff] %v12632_v22  ;;  %15336 = vst [vmem:[#allocation152_spill] sm:$0xff] %v12635_v58  ;;  %v12646_v55 = vpop.eup %9317  ;;  %v3958_v54 = vmul.f32 %v15343_v18, %v15342_v25  ;;  %9343 = vrcp.f32 %v2940_v35  ;;  %v12652_v58 = vadd.f32 %v12415_v61, %v12355_v48  ;;  %4266 = vmatprep.subr.mxu1 %v3968_v38  ;;  %v15350_v25 = vld [vmem:[#allocation97_spill] sm:$0xff]  ;;  %v15351_v18 = vld [vmem:[#allocation23_spill] sm:$0xff]  ;;  %v8221_v38 = vmul.f32 -1.442695, %v12632_v22 }
 0x2f5   : > { %15337 = vst [vmem:[#allocation90_spill] sm:$0xff] %v12637_v5  ;;  %15340 = vst [vmem:[#allocation27_spill] sm:$0xff] %v12643_v12  ;;  %v12657_v57 = vpop.eup %9319  ;;  %v15347_v5 = vld [vmem:[#allocation143_spill] sm:$0xff]  ;;  %9345 = vpow2.f32 %v8238_v51  ;;  %v12664_v35 = vadd.f32 %v12430_v1, %v12345_v7  ;;  %4267 = vmatpush1.msra.mxu1 %v3967_v42  ;;  %v3948_v52 = vmul.f32 %v15351_v18, %v15350_v25  ;;  %v15355_v1 = vld [vmem:[#allocation93_spill] sm:$0xff] }
 0x2f6   : > { %15341 = vst [vmem:[#allocation43_spill] sm:$0xff] %v12646_v55  ;;  %15344 = vst [vmem:[#allocation160_spill] sm:$0xff] %v12652_v58  ;;  %v3957_v10 = vmul.f32 %v15347_v5, %v15346_v46  ;;  %v8220_v55 = vmul.f32 -1.442695, %v12623_v31  ;;  %v12666_v61 = vpop.eup %9321  ;;  %9347 = vpow2.f32 %v8239_v50  ;;  %4268 = vmatprep.subr.mxu1 %v3958_v54  ;;  %v12675_v5 = vpop.f32.mrf.mxu0  ;;  %v15356_v46 = vld [vmem:[#allocation22_spill] sm:$0xff]  ;;  %v12684_v25 = vadd.f32 %v12500_v33, %v12345_v7  ;;  %v15360_v18 = vld [vmem:[#allocation128_spill] sm:$0xff] }
 0x2f7   : > { %15345 = vst [vmem:[#allocation149_spill] sm:$0xff] %v12657_v57  ;;  %15348 = vst [vmem:[#allocation76_spill] sm:$0xff] %v12664_v35  ;;  %v12673_v57 = vadd.f32 %v12464_v32, %v12355_v48  ;;  %v12677_v51 = vpop.eup %9323  ;;  %v3947_v42 = vmul.f32 %v15356_v46, %v15355_v1  ;;  %9349 = vpow2.f32 %v8248_v26  ;;  %v15359_v32 = vld [vmem:[#allocation81_spill] sm:$0xff]  ;;  %v12695_v1 = vpop.f32.mrf.mxu1  ;;  %v15364_v46 = vld [vmem:[#allocation126_spill] sm:$0xff] }
 0x2f8   : > { %15349 = vst [vmem:[#allocation71_spill] sm:$0xff] %v12666_v61  ;;  %15353 = vst [vmem:[#allocation83_spill] sm:$0xff] %v12675_v5  ;;  %v8230_v61 = vmul.f32 -1.442695, %v12643_v12  ;;  %4269 = vmatpush1.msra.mxu1 %v3957_v10  ;;  %v12686_v50 = vpop.eup %9325  ;;  %v3938_v54 = vmul.f32 %v15360_v18, %v15359_v32  ;;  %v8231_v5 = vmul.f32 -1.442695, %v12652_v58  ;;  %9351 = vpow2.f32 %v8249_v20  ;;  %v12705_v15 = vpop.f32.mrf.mxu0 }
 0x2f9   : > { %15352 = vst [vmem:[#allocation25_spill] sm:$0xff] %v12673_v57  ;;  %15354 = vst [vmem:[#allocation116_spill] sm:$0xff] %v12677_v51  ;;  %v12693_v51 = vadd.f32 %v12515_v28, %v12355_v48  ;;  %4270 = vmatprep.subr.mxu1 %v3948_v52  ;;  %v12697_v26 = vpop.eup %9327  ;;  %v15363_v33 = vld [vmem:[#allocation77_spill] sm:$0xff]  ;;  %9353 = vpow2.f32 %v8220_v55  ;;  %v8241_v28 = vmul.f32 -1.442695, %v12673_v57 }
 0x2fa   : > { %15357 = vst [vmem:[#allocation148_spill] sm:$0xff] %v12684_v25  ;;  %15358 = vst [vmem:[#allocation57_spill] sm:$0xff] %v12686_v50  ;;  %v3937_v10 = vmul.f32 %v15364_v46, %v15363_v33  ;;  %v8240_v50 = vmul.f32 -1.442695, %v12664_v35  ;;  %4271 = vmatpush1.msra.mxu1 %v3947_v42  ;;  %v9330_v32 = vpop.eup %9329  ;;  %v15365_v18 = vld [vmem:[#allocation73_spill] sm:$0xff]  ;;  %9355 = vpow2.f32 %v8221_v38  ;;  %v15370_v42 = vld [vmem:[#allocation66_spill] sm:$0xff]  ;;  %v12713_v38 = vpop.f32.mrf.mxu1 }
 0x2fb   : > { %15361 = vst [vmem:[#allocation31_spill] sm:$0xff] %v12693_v51  ;;  %15362 = vst [vmem:[#allocation146_spill] sm:$0xff] %v12697_v26  ;;  %v3928_v20 = vmul.f32 %v15366_v21, %v15365_v18  ;;  %4272 = vmatprep.subr.mxu1 %v3938_v54  ;;  %v9332_v52 = vpop.eup %9331  ;;  %v15368_v31 = vld [vmem:[#allocation69_spill] sm:$0xff]  ;;  %v15369_v26 = vld [vmem:[#allocation119_spill] sm:$0xff]  ;;  %9357 = vpow2.f32 %v8230_v61  ;;  %v8250_v55 = vmul.f32 -1.442695, %v12684_v25  ;;  %v12857_v14 = vadd.f32 %v12713_v38, %v12345_v7 }
 0x2fc   : > { %15367 = vst [vmem:[#allocation100_spill] sm:$0xff] %v12705_v15  ;;  %v3927_v44 = vmul.f32 %v15369_v26, %v15368_v31  ;;  %4273 = vmatpush1.msra.mxu1 %v3937_v10  ;;  %v9334_v33 = vpop.eup %9333  ;;  %v15371_v46 = vld [vmem:[#allocation115_spill] sm:$0xff]  ;;  %9359 = vpow2.f32 %v8231_v5  ;;  %v8251_v21 = vmul.f32 -1.442695, %v12693_v51  ;;  %v15372_v18 = vld [vmem:[#allocation64_spill] sm:$0xff]  ;;  %v2949_v12 = vadd.f32 1.0, %v9330_v32 }
 0x2fd   : > { %v3918_v22 = vmul.f32 %v15371_v46, %v15370_v42  ;;  %4274 = vmatprep.subr.mxu1 %v3928_v20  ;;  %v9336_v54 = vpop.eup %9335  ;;  %v15373_v15 = vld [vmem:[#allocation111_spill] sm:$0xff]  ;;  %9361 = vpow2.f32 %v8240_v50  ;;  %v15374_v31 = vld [vmem:[#allocation89_spill] sm:$0xff]  ;;  %v15377_v10 = vld [vmem:[#allocation62_spill] sm:$0xff]  ;;  %v2950_v46 = vadd.f32 1.0, %v9332_v52  ;;  %15430 = vst [vmem:[#allocation156_spill] sm:$0xff] %v12857_v14 }
 0x2fe   : > { %v3917_v49 = vmul.f32 %v15373_v15, %v15372_v18  ;;  %v12719_v61 = vadd.f32 %v15374_v31, %v12339_v0  ;;  %4275 = vmatpush1.msra.mxu1 %v3927_v44  ;;  %v12721_v26 = vpop.eup %9337  ;;  %v15378_v5 = vld [vmem:[#allocation107_spill] sm:$0xff]  ;;  %9363 = vpow2.f32 %v8241_v28  ;;  %v15379_v20 = vld [vmem:[#allocation98_spill] sm:$0xff]  ;;  %v12729_v15 = vpop.f32.mrf.mxu0  ;;  %v15383_v32 = vld [vmem:[#allocation60_spill] sm:$0xff]  ;;  %v2959_v44 = vadd.f32 1.0, %v9334_v33 }
 0x2ff   : > { %15376 = vst [vmem:[#allocation61_spill] sm:$0xff] %v12721_v26  ;;  %v3908_v42 = vmul.f32 %v15378_v5, %v15377_v10  ;;  %v12727_v59 = vadd.f32 %v15379_v20, %v12349_v9  ;;  %4276 = vmatprep.subr.mxu1 %v3918_v22  ;;  %15381 = vst [vmem:[#allocation63_spill] sm:$0xff] %v12729_v15  ;;  %v12731_v50 = vpop.eup %9339  ;;  %v15384_v18 = vld [vmem:[#allocation103_spill] sm:$0xff]  ;;  %9365 = vpow2.f32 %v8250_v55  ;;  %v15385_v26 = vld [vmem:[#allocation106_spill] sm:$0xff]  ;;  %v2960_v22 = vadd.f32 1.0, %v9336_v54 }
 0x300   : > { %15375 = vst [vmem:[#allocation145_spill] sm:$0xff] %v12719_v61  ;;  %15382 = vst [vmem:[#allocation139_spill] sm:$0xff] %v12731_v50  ;;  %v3907_v31 = vmul.f32 %v15384_v18, %v15383_v32  ;;  %v12737_v58 = vadd.f32 %v15385_v26, %v12339_v0  ;;  %4277 = vmatpush1.msra.mxu1 %v3917_v49  ;;  %v12739_v28 = vpop.eup %9341  ;;  %v15388_v52 = vld [vmem:[#allocation58_spill] sm:$0xff]  ;;  %v15389_v10 = vld [vmem:[#allocation99_spill] sm:$0xff]  ;;  %9367 = vpow2.f32 %v8251_v21  ;;  %v12747_v50 = vpop.f32.mrf.mxu1  ;;  %v8258_v49 = vmul.f32 -1.442695, %v12719_v61 }
 0x301   : > { %15380 = vst [vmem:[#allocation144_spill] sm:$0xff] %v12727_v59  ;;  %15387 = vst [vmem:[#allocation138_spill] sm:$0xff] %v12739_v28  ;;  %v3898_v5 = vmul.f32 %v15389_v10, %v15388_v52  ;;  %v15390_v20 = vld [vmem:[#allocation110_spill] sm:$0xff]  ;;  %4278 = vmatprep.subr.mxu1 %v3908_v42  ;;  %v12749_v55 = vpop.eup %9343  ;;  %v15393_v33 = vld [vmem:[#allocation56_spill] sm:$0xff]  ;;  %9369 = vrcp.f32 %v2949_v12  ;;  %v8259_v10 = vmul.f32 -1.442695, %v12727_v59 }
 0x302   : > { %15386 = vst [vmem:[#allocation67_spill] sm:$0xff] %v12737_v58  ;;  %v12745_v15 = vadd.f32 %v15390_v20, %v12349_v9  ;;  %15392 = vst [vmem:[#allocation65_spill] sm:$0xff] %v12749_v55  ;;  %v15394_v26 = vld [vmem:[#allocation95_spill] sm:$0xff]  ;;  %4279 = vmatpush1.msra.mxu1 %v3907_v31  ;;  %v9346_v18 = vpop.eup %9345  ;;  %v15395_v52 = vld [vmem:[#allocation54_spill] sm:$0xff]  ;;  %9371 = vrcp.f32 %v2950_v46  ;;  %v12757_v20 = vpop.f32.mrf.mxu0  ;;  %v8268_v12 = vmul.f32 -1.442695, %v12737_v58 }
 0x303   : > { %v3897_v32 = vmul.f32 %v15394_v26, %v15393_v33  ;;  %v15396_v54 = vld [vmem:[#allocation86_spill] sm:$0xff]  ;;  %4280 = vmatprep.subr.mxu1 %v3898_v5  ;;  %15397 = vst [vmem:[#allocation136_spill] sm:$0xff] %v12757_v20  ;;  %v9348_v42 = vpop.eup %9347  ;;  %v15398_v28 = vld [vmem:[#allocation52_spill] sm:$0xff]  ;;  %9373 = vrcp.f32 %v2959_v44  ;;  %v2969_v57 = vadd.f32 1.0, %v9346_v18  ;;  %v12771_v44 = vadd.f32 %v12527_v39, %v12345_v7  ;;  %v15437_v38 = vld [vmem:[#allocation181_spill] sm:$0xff] }
 0x304   : > { %15391 = vst [vmem:[#allocation120_spill] sm:$0xff] %v12745_v15  ;;  %v3888_v21 = vmul.f32 %v15396_v54, %v15395_v52  ;;  %v15399_v55 = vld [vmem:[#allocation84_spill] sm:$0xff]  ;;  %v9350_v33 = vpop.eup %9349  ;;  %v15400_v31 = vld [vmem:[#allocation50_spill] sm:$0xff]  ;;  %9375 = vrcp.f32 %v2960_v22  ;;  %v8269_v46 = vmul.f32 -1.442695, %v12745_v15  ;;  %v12765_v52 = vpop.f32.mrf.mxu1  ;;  %v15478_v61 = vld [vmem:[#allocation21_spill] sm:$0xff] }
 0x305   : > { %v3887_v6 = vmul.f32 %v15399_v55, %v15398_v28  ;;  %4281 = vmatpush1.msra.mxu1 %v3897_v32  ;;  %v15401_v26 = vld [vmem:[#allocation82_spill] sm:$0xff]  ;;  %v9352_v5 = vpop.eup %9351  ;;  %v15402_v54 = vld [vmem:[#allocation48_spill] sm:$0xff]  ;;  %9377 = vpow2.f32 %v8258_v49  ;;  %15404 = vst [vmem:[#allocation75_spill] sm:$0xff] %v12771_v44  ;;  %v15489_v15 = vld [vmem:[#allocation187_spill] sm:$0xff] }
 0x306   : > { %v3878_v35 = vmul.f32 %v15401_v26, %v15400_v31  ;;  %4282 = vmatprep.subr.mxu1 %v3888_v21  ;;  %v15403_v20 = vld [vmem:[#allocation78_spill] sm:$0xff]  ;;  %v12773_v28 = vpop.eup %9353  ;;  %v2970_v31 = vadd.f32 1.0, %v9348_v42  ;;  %9379 = vpow2.f32 %v8259_v10  ;;  %v12779_v21 = vadd.f32 %v12561_v47, %v12355_v48  ;;  %v15409_v18 = vld [vmem:[#allocation44_spill] sm:$0xff] }
 0x307   : > { %v3877_v11 = vmul.f32 %v15403_v20, %v15402_v54  ;;  %4283 = vmatpush1.msra.mxu1 %v3887_v6  ;;  %v15405_v55 = vld [vmem:[#allocation46_spill] sm:$0xff]  ;;  %v12781_v20 = vpop.f32.mrf.mxu0  ;;  %v12783_v49 = vpop.eup %9355  ;;  %v2979_v6 = vadd.f32 1.0, %v9350_v33  ;;  %9381 = vpow2.f32 %v8268_v12  ;;  %v12789_v54 = vadd.f32 %v12581_v4, %v12345_v7  ;;  %v15414_v33 = vld [vmem:[#allocation196_spill] sm:$0xff] }
 0x308   : > { %v15406_v22 = vld [vmem:[#allocation74_spill] sm:$0xff]  ;;  %15407 = vst [vmem:[#allocation59_spill] sm:$0xff] %v12779_v21  ;;  %4284 = vmatprep.subr.mxu1 %v3878_v35  ;;  %15408 = vst [vmem:[#allocation135_spill] sm:$0xff] %v12781_v20  ;;  %v12791_v10 = vpop.eup %9357  ;;  %v2980_v35 = vadd.f32 1.0, %v9352_v5  ;;  %9383 = vpow2.f32 %v8269_v46  ;;  %v4177_v4 = vmul.f32 %v12553_v24, %v15414_v33 }
 0x309   : > { %v3868_v32 = vmul.f32 %v15406_v22, %v15405_v55  ;;  %v15410_v39 = vld [vmem:[#allocation70_spill] sm:$0xff]  ;;  %15411 = vst [vmem:[#allocation79_spill] sm:$0xff] %v12789_v54  ;;  %4285 = vmatpush1.msra.mxu1 %v3877_v11  ;;  %v12797_v55 = vadd.f32 %v12615_v56, %v12355_v48  ;;  %v12799_v22 = vpop.f32.mrf.mxu1  ;;  %v12801_v12 = vpop.eup %9359  ;;  %9385 = vrcp.f32 %v2969_v57  ;;  %v8260_v11 = vmul.f32 -1.442695, %v12771_v44 }
 0x30a   : > { %v3867_v26 = vmul.f32 %v15410_v39, %v15409_v18  ;;  %v15412_v42 = vld [vmem:[#allocation198_spill] sm:$0xff]  ;;  %v15415_v18 = vld [vmem:[#allocation161_spill] sm:$0xff]  ;;  %v12810_v46 = vpop.eup %9361  ;;  %9387 = vrcp.f32 %v2970_v31  ;;  %v12817_v39 = vadd.f32 %v12655_v23, %v12345_v7  ;;  %v12819_v24 = vpop.f32.mrf.mxu0  ;;  %v8270_v33 = vmul.f32 -1.442695, %v12789_v54 }
 0x30b   : > { %v4178_v47 = vmul.f32 %v12563_v62, %v15412_v42  ;;  %15413 = vst [vmem:[#allocation53_spill] sm:$0xff] %v12797_v55  ;;  %4286 = vmatprep.subr.mxu1 %v3868_v32  ;;  %v12808_v62 = vadd.f32 %v15415_v18, %v12339_v0  ;;  %v15417_v56 = vld [vmem:[#allocation194_spill] sm:$0xff]  ;;  %v8261_v32 = vmul.f32 -1.442695, %v12779_v21  ;;  %15419 = vst [vmem:[#allocation47_spill] sm:$0xff] %v12819_v24  ;;  %v12821_v57 = vpop.eup %9363  ;;  %v15420_v42 = vld [vmem:[#allocation192_spill] sm:$0xff]  ;;  %9389 = vrcp.f32 %v2979_v6 }
 0x30c   : > { %4287 = vmatpush1.msra.mxu1 %v3867_v26  ;;  %v4168_v5 = vmul.f32 %v12545_v3, %v15417_v56  ;;  %15418 = vst [vmem:[#allocation29_spill] sm:$0xff] %v12817_v39  ;;  %v4167_v26 = vmul.f32 %v12535_v45, %v15420_v42  ;;  %v15421_v3 = vld [vmem:[#allocation162_spill] sm:$0xff]  ;;  %v12830_v18 = vpop.eup %9365  ;;  %9391 = vrcp.f32 %v2980_v35  ;;  %v8271_v56 = vmul.f32 -1.442695, %v12797_v55  ;;  %v12839_v45 = vpop.f32.mrf.mxu1  ;;  %v15425_v42 = vld [vmem:[#allocation184_spill] sm:$0xff] }
 0x30d   : > { %15416 = vst [vmem:[#allocation121_spill] sm:$0xff] %v12808_v62  ;;  %4288 = vmatprep.subr.mxu1 %v4178_v47  ;;  %v12828_v31 = vadd.f32 %v15421_v3, %v12349_v9  ;;  %v15423_v23 = vld [vmem:[#allocation186_spill] sm:$0xff]  ;;  %v12837_v24 = vadd.f32 %v12695_v1, %v12355_v48  ;;  %v12841_v6 = vpop.eup %9367  ;;  %9393 = vpow2.f32 %v8260_v11  ;;  %v8278_v3 = vmul.f32 -1.442695, %v12808_v62  ;;  %v15429_v1 = vld [vmem:[#allocation183_spill] sm:$0xff] }
 0x30e   : > { %4289 = vmatpush2.msra.mxu1 %v4177_v4  ;;  %v4158_v47 = vmul.f32 %v12495_v17, %v15423_v23  ;;  %v4157_v4 = vmul.f32 %v12486_v8, %v15425_v42  ;;  %v15426_v17 = vld [vmem:[#allocation118_spill] sm:$0xff]  ;;  %v12850_v23 = vpop.eup %9369  ;;  %v4148_v20 = vmul.f32 %v12475_v63, %v15429_v1  ;;  %9395 = vpow2.f32 %v8261_v32  ;;  %v12859_v8 = vpop.f32.mrf.mxu0  ;;  %v15433_v42 = vld [vmem:[#allocation132_spill] sm:$0xff]  ;;  %v15434_v63 = vld [vmem:[#allocation125_spill] sm:$0xff] }
 0x30f   : > { %15422 = vst [vmem:[#allocation117_spill] sm:$0xff] %v12828_v31  ;;  %15424 = vst [vmem:[#allocation158_spill] sm:$0xff] %v12837_v24  ;;  %4290 = vmatprep.subr.mxu1 %v4168_v5  ;;  %v12848_v35 = vadd.f32 %v15426_v17, %v12339_v0  ;;  %v8280_v5 = vmul.f32 -1.442695, %v12817_v39  ;;  %v12861_v11 = vpop.eup %9371  ;;  %9397 = vpow2.f32 %v8270_v33  ;;  %v8279_v17 = vmul.f32 -1.442695, %v12828_v31 }
 0x310   : > { %4291 = vmatpush2.msra.mxu1 %v4167_v26  ;;  %15428 = vst [vmem:[#allocation113_spill] sm:$0xff] %v12850_v23  ;;  %15431 = vst [vmem:[#allocation109_spill] sm:$0xff] %v12859_v8  ;;  %v4147_v26 = vmul.f32 %v12466_v13, %v15433_v42  ;;  %v12868_v32 = vadd.f32 %v15434_v63, %v12349_v9  ;;  %v12870_v1 = vpop.eup %9373  ;;  %9399 = vpow2.f32 %v8271_v56  ;;  %v8281_v8 = vmul.f32 -1.442695, %v12837_v24  ;;  %v12879_v13 = vpop.f32.mrf.mxu1  ;;  %v15440_v42 = vld [vmem:[#allocation178_spill] sm:$0xff]  ;;  %v15441_v56 = vld [vmem:[#allocation176_spill] sm:$0xff] }
 0x311   : > { %15427 = vst [vmem:[#allocation204_spill] sm:$0xff] %v12848_v35  ;;  %4292 = vmatprep.subr.mxu1 %v4158_v47  ;;  %15432 = vst [vmem:[#allocation154_spill] sm:$0xff] %v12861_v11  ;;  %v4138_v47 = vmul.f32 %v12456_v37, %v15437_v38  ;;  %v12877_v23 = vadd.f32 %v12747_v50, %v12355_v48  ;;  %v12881_v33 = vpop.eup %9375  ;;  %9401 = vpow2.f32 %v8278_v3  ;;  %v8288_v63 = vmul.f32 -1.442695, %v12848_v35  ;;  %v12889_v11 = vpop.f32.mrf.mxu0  ;;  %v15501_v35 = vld [vmem:[#allocation26_spill] sm:$0xff] }
 0x312   : > { %15435 = vst [vmem:[#allocation105_spill] sm:$0xff] %v12868_v32  ;;  %4293 = vmatpush2.msra.mxu1 %v4157_v4  ;;  %15436 = vst [vmem:[#allocation24_spill] sm:$0xff] %v12870_v1  ;;  %v4137_v4 = vmul.f32 %v12448_v2, %v15440_v42  ;;  %v9378_v37 = vpop.eup %9377  ;;  %v4128_v38 = vmul.f32 %v12438_v16, %v15441_v56  ;;  %9403 = vpow2.f32 %v8280_v5  ;;  %v8290_v50 = vmul.f32 -1.442695, %v12857_v14  ;;  %v15443_v1 = vld [vmem:[#allocation173_spill] sm:$0xff]  ;;  %v1581_v5 = vpop.f32.mrf.mxu1  ;;  %v15446_v56 = vld [vmem:[#allocation168_spill] sm:$0xff] }
 0x313   : > { %15438 = vst [vmem:[#allocation101_spill] sm:$0xff] %v12877_v23  ;;  %4294 = vmatprep.subr.mxu1 %v4148_v20  ;;  %15439 = vst [vmem:[#allocation143_spill] sm:$0xff] %v12881_v33  ;;  %v9380_v20 = vpop.eup %9379  ;;  %v4127_v33 = vmul.f32 %v12417_v43, %v15443_v1  ;;  %9405 = vpow2.f32 %v8279_v17  ;;  %v8289_v2 = vmul.f32 -1.442695, %v12868_v32  ;;  %v15445_v42 = vld [vmem:[#allocation197_spill] sm:$0xff]  ;;  %v2989_v51 = vadd.f32 1.0, %v9378_v37 }
 0x314   : > { %4295 = vmatpush2.msra.mxu1 %v4147_v26  ;;  %15442 = vst [vmem:[#allocation97_spill] sm:$0xff] %v12889_v11  ;;  %v9382_v3 = vpop.eup %9381  ;;  %v15444_v26 = vld [vmem:[#allocation171_spill] sm:$0xff]  ;;  %9407 = vpow2.f32 %v8281_v8  ;;  %v8291_v16 = vmul.f32 -1.442695, %v12877_v23  ;;  %v15447_v11 = vld [vmem:[#allocation193_spill] sm:$0xff]  ;;  %v12973_v27 = vadd.f32 %v1581_v5, %v12345_v7  ;;  %v15479_v5 = vld [vmem:[#allocation108_spill] sm:$0xff]  ;;  %v13016_v24 = vadd.f32 %v15489_v15, %v12349_v9 }
 0x315   : > { %4296 = vmatprep.subr.mxu1 %v4138_v47  ;;  %v4118_v25 = vmul.f32 %v15445_v42, %v15444_v26  ;;  %v9384_v47 = vpop.eup %9383  ;;  %v4117_v19 = vmul.f32 %v15447_v11, %v15446_v56  ;;  %9409 = vpow2.f32 %v8288_v63  ;;  %v15448_v43 = vld [vmem:[#allocation129_spill] sm:$0xff]  ;;  %v15451_v26 = vld [vmem:[#allocation191_spill] sm:$0xff]  ;;  %v2990_v42 = vadd.f32 1.0, %v9380_v20  ;;  %v12911_v11 = vpop.f32.mrf.mxu0 }
 0x316   : > { %4297 = vmatpush2.msra.mxu1 %v4137_v4  ;;  %v12901_v17 = vadd.f32 %v15448_v43, %v12339_v0  ;;  %v12903_v1 = vpop.eup %9385  ;;  %v15450_v4 = vld [vmem:[#allocation166_spill] sm:$0xff]  ;;  %9411 = vpow2.f32 %v8290_v50  ;;  %15453 = vst [vmem:[#allocation93_spill] sm:$0xff] %v12911_v11  ;;  %v15455_v37 = vld [vmem:[#allocation163_spill] sm:$0xff]  ;;  %v15456_v56 = vld [vmem:[#allocation189_spill] sm:$0xff]  ;;  %v13030_v15 = vadd.f32 %v12765_v52, %v12345_v7  ;;  %v8329_v23 = vmul.f32 -1.442695, %v13016_v24 }
 0x317   : > { %4298 = vmatprep.subr.mxu1 %v4128_v38  ;;  %15449 = vst [vmem:[#allocation23_spill] sm:$0xff] %v12903_v1  ;;  %v4108_v8 = vmul.f32 %v15451_v26, %v15450_v4  ;;  %v15452_v38 = vld [vmem:[#allocation131_spill] sm:$0xff]  ;;  %v12913_v63 = vpop.eup %9387  ;;  %v4107_v43 = vmul.f32 %v15456_v56, %v15455_v37  ;;  %9413 = vpow2.f32 %v8289_v2  ;;  %v12919_v1 = vadd.f32 %v12799_v22, %v12355_v48  ;;  %v15459_v4 = vld [vmem:[#allocation140_spill] sm:$0xff]  ;;  %v15463_v37 = vld [vmem:[#allocation137_spill] sm:$0xff] }
 0x318   : > { %4299 = vmatpush2.msra.mxu1 %v4127_v33  ;;  %v12909_v30 = vadd.f32 %v15452_v38, %v12349_v9  ;;  %15454 = vst [vmem:[#allocation22_spill] sm:$0xff] %v12913_v63  ;;  %v2999_v33 = vadd.f32 1.0, %v9382_v3  ;;  %v12921_v50 = vpop.eup %9389  ;;  %v15458_v20 = vld [vmem:[#allocation35_spill] sm:$0xff]  ;;  %9415 = vpow2.f32 %v8291_v16  ;;  %v15460_v38 = vld [vmem:[#allocation20_spill] sm:$0xff]  ;;  %v1583_v63 = vpop.f32.mrf.mxu1  ;;  %v12936_v56 = vadd.f32 %v12839_v45, %v12345_v7  ;;  %v15468_v45 = vld [vmem:[#allocation33_spill] sm:$0xff] }
 0x319   : > { %4300 = vmatprep.subr.mxu1 %v4118_v25  ;;  %15457 = vst [vmem:[#allocation81_spill] sm:$0xff] %v12921_v50  ;;  %v4098_v26 = vmul.f32 %v15459_v4, %v15458_v20  ;;  %v3000_v25 = vadd.f32 1.0, %v9384_v47  ;;  %v12927_v11 = vadd.f32 %v15460_v38, %v12339_v0  ;;  %v12929_v3 = vpop.eup %9391  ;;  %v15462_v2 = vld [vmem:[#allocation68_spill] sm:$0xff]  ;;  %9417 = vrcp.f32 %v2989_v51  ;;  %v15464_v47 = vld [vmem:[#allocation45_spill] sm:$0xff]  ;;  %v15465_v20 = vld [vmem:[#allocation182_spill] sm:$0xff]  ;;  %v12947_v51 = vpop.f32.mrf.mxu0 }
 0x31a   : > { %4301 = vmatpush2.msra.mxu1 %v4117_v19  ;;  %15461 = vst [vmem:[#allocation128_spill] sm:$0xff] %v12929_v3  ;;  %v4097_v22 = vmul.f32 %v15463_v37, %v15462_v2  ;;  %v8298_v19 = vmul.f32 -1.442695, %v12901_v17  ;;  %v12938_v16 = vpop.eup %9393  ;;  %v4088_v4 = vmul.f32 %v15465_v20, %v15464_v47  ;;  %9419 = vrcp.f32 %v2990_v42  ;;  %v15466_v38 = vld [vmem:[#allocation141_spill] sm:$0xff]  ;;  %15467 = vst [vmem:[#allocation77_spill] sm:$0xff] %v12947_v51  ;;  %v15469_v37 = vld [vmem:[#allocation179_spill] sm:$0xff] }
 0x31b   : > { %4302 = vmatprep.subr.mxu1 %v4108_v8  ;;  %v8299_v8 = vmul.f32 -1.442695, %v12909_v30  ;;  %v12945_v50 = vadd.f32 %v15466_v38, %v12349_v9  ;;  %v12949_v2 = vpop.eup %9395  ;;  %9421 = vrcp.f32 %v2999_v33  ;;  %v8301_v60 = vmul.f32 -1.442695, %v12919_v1  ;;  %v15470_v20 = vld [vmem:[#allocation85_spill] sm:$0xff]  ;;  %v15472_v51 = vld [vmem:[#allocation134_spill] sm:$0xff]  ;;  %v1587_v33 = vpop.f32.mrf.mxu1 }
 0x31c   : > { %4303 = vmatpush2.msra.mxu1 %v4107_v43  ;;  %v4087_v43 = vmul.f32 %v15469_v37, %v15468_v45  ;;  %v12956_v42 = vadd.f32 %v12879_v13, %v12355_v48  ;;  %v12958_v47 = vpop.eup %9397  ;;  %v15471_v38 = vld [vmem:[#allocation177_spill] sm:$0xff]  ;;  %9423 = vrcp.f32 %v3000_v25  ;;  %v12965_v3 = vadd.f32 %v15472_v51, %v12339_v0  ;;  %v15473_v37 = vld [vmem:[#allocation55_spill] sm:$0xff]  ;;  %v15474_v13 = vld [vmem:[#allocation174_spill] sm:$0xff]  ;;  %v12975_v25 = vpop.f32.mrf.mxu0 }
 0x31d   : > { %4304 = vmatprep.subr.mxu1 %v4098_v26  ;;  %v4078_v44 = vmul.f32 %v15471_v38, %v15470_v20  ;;  %v8308_v26 = vmul.f32 -1.442695, %v12927_v11  ;;  %v12967_v45 = vpop.eup %9399  ;;  %v4077_v36 = vmul.f32 %v15474_v13, %v15473_v37  ;;  %9425 = vpow2.f32 %v8298_v19  ;;  %15475 = vst [vmem:[#allocation126_spill] sm:$0xff] %v12975_v25  ;;  %v15476_v51 = vld [vmem:[#allocation32_spill] sm:$0xff]  ;;  %v15480_v13 = vld [vmem:[#allocation169_spill] sm:$0xff]  ;;  %v1589_v55 = vpop.f32.mrf.mxu1  ;;  %v15498_v52 = vld [vmem:[#allocation150_spill] sm:$0xff] }
 0x31e   : > { %4305 = vmatpush2.msra.mxu1 %v4097_v22  ;;  %v8310_v22 = vmul.f32 -1.442695, %v12936_v56  ;;  %v12977_v20 = vpop.eup %9401  ;;  %v15477_v38 = vld [vmem:[#allocation172_spill] sm:$0xff]  ;;  %9427 = vpow2.f32 %v8299_v8  ;;  %v12984_v37 = vadd.f32 %v15478_v61, %v12349_v9  ;;  %v4067_v40 = vmul.f32 %v15480_v13, %v15479_v5  ;;  %v15484_v5 = vld [vmem:[#allocation87_spill] sm:$0xff]  ;;  %v15502_v32 = vld [vmem:[#allocation49_spill] sm:$0xff] }
 0x31f   : > { %4306 = vmatprep.subr.mxu1 %v4088_v4  ;;  %v4068_v21 = vmul.f32 %v15477_v38, %v15476_v51  ;;  %v8309_v4 = vmul.f32 -1.442695, %v12945_v50  ;;  %v12986_v19 = vpop.eup %9403  ;;  %9429 = vpow2.f32 %v8301_v60  ;;  %v12992_v25 = vadd.f32 %v1583_v63, %v12355_v48  ;;  %v15481_v51 = vld [vmem:[#allocation88_spill] sm:$0xff]  ;;  %v15482_v38 = vld [vmem:[#allocation167_spill] sm:$0xff]  ;;  %v13033_v14 = vpop.f32.mrf.mxu1 }
 0x320   : > { %4307 = vmatpush2.msra.mxu1 %v4087_v43  ;;  %v8311_v43 = vmul.f32 -1.442695, %v12956_v42  ;;  %v9406_v8 = vpop.eup %9405  ;;  %v4058_v54 = vmul.f32 %v15482_v38, %v15481_v51  ;;  %9431 = vpow2.f32 %v8308_v26  ;;  %v8318_v61 = vmul.f32 -1.442695, %v12965_v3  ;;  %v15485_v13 = vld [vmem:[#allocation164_spill] sm:$0xff]  ;;  %v13009_v26 = vpop.f32.mrf.mxu0  ;;  %v15487_v38 = vld [vmem:[#allocation159_spill] sm:$0xff] }
 0x321   : > { %4308 = vmatprep.subr.mxu1 %v4078_v44  ;;  %v15483_v44 = vld [vmem:[#allocation185_spill] sm:$0xff]  ;;  %v13001_v60 = vpop.eup %9407  ;;  %v4057_v63 = vmul.f32 %v15485_v13, %v15484_v5  ;;  %9433 = vpow2.f32 %v8310_v22  ;;  %v13007_v58 = vadd.f32 %v1587_v33, %v12345_v7  ;;  %15486 = vst [vmem:[#allocation73_spill] sm:$0xff] %v13009_v26  ;;  %v15490_v5 = vld [vmem:[#allocation155_spill] sm:$0xff]  ;;  %v15491_v33 = vld [vmem:[#allocation36_spill] sm:$0xff]  ;;  %v13024_v26 = vadd.f32 %v1589_v55, %v12355_v48 }
 0x322   : > { %4309 = vmatpush2.msra.mxu1 %v4077_v36  ;;  %v12999_v59 = vadd.f32 %v15483_v44, %v12339_v0  ;;  %v8320_v36 = vmul.f32 -1.442695, %v12973_v27  ;;  %v9410_v51 = vpop.eup %9409  ;;  %v15488_v44 = vld [vmem:[#allocation37_spill] sm:$0xff]  ;;  %9435 = vpow2.f32 %v8309_v4  ;;  %v4047_v13 = vmul.f32 %v15491_v33, %v15490_v5  ;;  %v15494_v5 = vld [vmem:[#allocation151_spill] sm:$0xff]  ;;  %v15495_v55 = vld [vmem:[#allocation34_spill] sm:$0xff]  ;;  %v13040_v31 = vpop.f32.mrf.mxu0 }
 0x323   : > { %4310 = vmatprep.subr.mxu1 %v4068_v21  ;;  %v4048_v39 = vmul.f32 %v15488_v44, %v15487_v38  ;;  %v8319_v21 = vmul.f32 -1.442695, %v12984_v37  ;;  %v13018_v22 = vpop.eup %9411  ;;  %9437 = vpow2.f32 %v8311_v43  ;;  %v15492_v38 = vld [vmem:[#allocation153_spill] sm:$0xff]  ;;  %v15493_v44 = vld [vmem:[#allocation91_spill] sm:$0xff]  ;;  %v4037_v33 = vmul.f32 %v15495_v55, %v15494_v5  ;;  %15496 = vst [vmem:[#allocation123_spill] sm:$0xff] %v13040_v31  ;;  %v13055_v31 = vpop.f32.mrf.mxu1 }
 0x324   : > { %4311 = vmatpush2.msra.mxu1 %v4067_v40  ;;  %v8321_v40 = vmul.f32 -1.442695, %v12992_v25  ;;  %v9414_v4 = vpop.eup %9413  ;;  %v4038_v62 = vmul.f32 %v15493_v44, %v15492_v38  ;;  %9439 = vpow2.f32 %v8318_v61  ;;  %v15499_v61 = vld [vmem:[#allocation72_spill] sm:$0xff]  ;;  %v4027_v5 = vmul.f32 %v15502_v32, %v15501_v35 }
 0x325   : > { %4312 = vmatprep.subr.mxu1 %v4058_v54  ;;  %v8328_v54 = vmul.f32 -1.442695, %v12999_v59  ;;  %v13035_v43 = vpop.eup %9415  ;;  %9441 = vpow2.f32 %v8320_v36  ;;  %v4028_v44 = vmul.f32 %v15499_v61, %v15498_v52  ;;  %v8331_v36 = vmul.f32 -1.442695, %v13024_v26  ;;  %v13060_v52 = vpop.f32.mrf.mxu0 }
 0x326   : > { %4313 = vmatpush2.msra.mxu1 %v4057_v63  ;;  %v8330_v63 = vmul.f32 -1.442695, %v13007_v58  ;;  %v13042_v38 = vpop.eup %9417  ;;  %9443 = vpow2.f32 %v8319_v21  ;;  %15505 = vst [vmem:[#allocation64_spill] sm:$0xff] %v13060_v52  ;;  %v3010_v32 = vadd.f32 1.0, %v9406_v8  ;;  %v3020_v61 = vadd.f32 1.0, %v9414_v4 }
 0x327   : > { %4314 = vmatprep.subr.mxu1 %v4048_v39  ;;  %15497 = vst [vmem:[#allocation69_spill] sm:$0xff] %v13042_v38  ;;  %v13047_v39 = vpop.eup %9419  ;;  %9445 = vpow2.f32 %v8321_v40  ;;  %v13066_v52 = vpop.f32.mrf.mxu0 }
 0x328   : > { %4315 = vmatpush2.msra.mxu1 %v4047_v13  ;;  %15500 = vst [vmem:[#allocation119_spill] sm:$0xff] %v13047_v39  ;;  %v13052_v55 = vpop.eup %9421  ;;  %v8300_v13 = vmul.f32 -1.442695, %v13030_v15  ;;  %9447 = vpow2.f32 %v8328_v54  ;;  %15506 = vst [vmem:[#allocation111_spill] sm:$0xff] %v13066_v52 }
 0x329   : > { %4316 = vmatprep.subr.mxu1 %v4038_v62  ;;  %15503 = vst [vmem:[#allocation66_spill] sm:$0xff] %v13052_v55  ;;  %v13057_v21 = vpop.eup %9423  ;;  %v3009_v62 = vadd.f32 1.0, %v12977_v20  ;;  %9449 = vpow2.f32 %v8330_v63 }
 0x32a   : > { %4317 = vmatpush2.msra.mxu1 %v4037_v33  ;;  %15504 = vst [vmem:[#allocation115_spill] sm:$0xff] %v13057_v21  ;;  %v9426_v35 = vpop.eup %9425  ;;  %9451 = vpow2.f32 %v8329_v23  ;;  %v3019_v33 = vadd.f32 1.0, %v9410_v51 }
 0x32b   : > { %4318 = vmatprep.subr.mxu1 %v4028_v44  ;;  %v9428_v40 = vpop.eup %9427  ;;  %9453 = vpow2.f32 %v8331_v36  ;;  %v13064_v44 = vpop.f32.mrf.mxu1  ;;  %v3029_v63 = vadd.f32 1.0, %v9426_v35 }
 0x32c   : > { %4319 = vmatpush2.msra.mxu1 %v4027_v5  ;;  %v9430_v54 = vpop.eup %9429  ;;  %9455 = vpow2.f32 %v8300_v13  ;;  %v3030_v23 = vadd.f32 1.0, %v9428_v40  ;;  %v13070_v13 = vpop.f32.mrf.mxu0 }
 0x32d   : > { %4321 = vmatmul.mubr.f32.vlgmr.msra.gmra.mxu1 %v15304_v29  ;;  %v9432_v20 = vpop.eup %9431  ;;  %9457 = vrcp.f32 %v3009_v62  ;;  %15507 = vst [vmem:[#allocation89_spill] sm:$0xff] %v13070_v13 }
 0x32e   : > { %4462 = vmatprep.mubr.f32.mxu1 %v15304_v29  ;;  %v9434_v5 = vpop.eup %9433  ;;  %9459 = vrcp.f32 %v3010_v32  ;;  %v3039_v38 = vadd.f32 1.0, %v9432_v20  ;;  %v13068_v29 = vpop.f32.mrf.mxu1 }
 0x32f   : > { %v9436_v8 = vpop.eup %9435  ;;  %9461 = vrcp.f32 %v3019_v33  ;;  %v13074_v20 = vpop.f32.mrf.mxu0 }
 0x330   : > { %v9438_v51 = vpop.eup %9437  ;;  %9463 = vrcp.f32 %v3020_v61  ;;  %v3040_v36 = vadd.f32 1.0, %v9436_v8  ;;  %v13072_v40 = vpop.f32.mrf.mxu1  ;;  %15509 = vst [vmem:[#allocation107_spill] sm:$0xff] %v13074_v20  ;;  %v3041_v20 = vadd.f32 1.0, %v9434_v5 }
 0x331   : > { %v9440_v4 = vpop.eup %9439  ;;  %9465 = vrcp.f32 %v3029_v63  ;;  %15508 = vst [vmem:[#allocation62_spill] sm:$0xff] %v13072_v40 }
 0x332   : > { %v9442_v39 = vpop.eup %9441  ;;  %9467 = vrcp.f32 %v3030_v23  ;;  %v3049_v62 = vadd.f32 1.0, %v9440_v4  ;;  %v13076_v21 = vpop.f32.mrf.mxu1 }
 0x333   : > { %v9444_v35 = vpop.eup %9443  ;;  %9469 = vrcp.f32 %v3039_v38  ;;  %v3051_v4 = vadd.f32 1.0, %v9442_v39 }
 0x334   : > { %v9446_v52 = vpop.eup %9445  ;;  %9471 = vrcp.f32 %v3040_v36  ;;  %v3050_v32 = vadd.f32 1.0, %v9444_v35  ;;  %v3042_v35 = vadd.f32 1.0, %v9438_v51 }
 0x335   : > { %v9448_v33 = vpop.eup %9447  ;;  %9473 = vrcp.f32 %v3049_v62  ;;  %v3052_v61 = vadd.f32 1.0, %v9446_v52  ;;  %v13078_v62 = vpop.f32.mrf.mxu0 }
 0x336   : > { %v9450_v8 = vpop.eup %9449  ;;  %9475 = vrcp.f32 %v3050_v32  ;;  %v3059_v63 = vadd.f32 1.0, %v9448_v33  ;;  %15510 = vst [vmem:[#allocation98_spill] sm:$0xff] %v13078_v62  ;;  %v3032_v33 = vadd.f32 1.0, %v9430_v54  ;;  %v3021_v54 = vadd.f32 1.0, %v13018_v22  ;;  %v15516_v22 = vld [vmem:[#allocation188_spill] sm:$0xff] }
 0x337   : > { %v9452_v55 = vpop.eup %9451  ;;  %9477 = vrcp.f32 %v3052_v61  ;;  %v3061_v13 = vadd.f32 1.0, %v9450_v8  ;;  %v13084_v61 = vpop.f32.mrf.mxu0 }
 0x338   : > { %v9454_v23 = vpop.eup %9453  ;;  %9479 = vrcp.f32 %v3059_v63  ;;  %v3060_v38 = vadd.f32 1.0, %v9452_v55  ;;  %15511 = vst [vmem:[#allocation60_spill] sm:$0xff] %v13084_v61  ;;  %v13088_v8 = vpop.f32.mrf.mxu1 }
 0x339   : > { %v9456_v36 = vpop.eup %9455  ;;  %9481 = vrcp.f32 %v3061_v13  ;;  %v3062_v40 = vadd.f32 1.0, %v9454_v23  ;;  %15512 = vst [vmem:[#allocation103_spill] sm:$0xff] %v13088_v8  ;;  %v3022_v13 = vadd.f32 1.0, %v13035_v43  ;;  %v13093_v63 = vpop.f32.mrf.mxu0  ;;  %v3012_v23 = vadd.f32 1.0, %v13001_v60 }
 0x33a   : > { %v13080_v52 = vpop.eup %9457  ;;  %9483 = vrcp.f32 %v3060_v38  ;;  %v3031_v55 = vadd.f32 1.0, %v9456_v36  ;;  %15513 = vst [vmem:[#allocation106_spill] sm:$0xff] %v13093_v63  ;;  %v3011_v36 = vadd.f32 1.0, %v12986_v19  ;;  %v13106_v43 = vpop.f32.mrf.mxu1  ;;  %v3002_v63 = vadd.f32 1.0, %v12967_v45 }
 0x33b   : > { %v13082_v32 = vpop.eup %9459  ;;  %9485 = vrcp.f32 %v3062_v40  ;;  %15515 = vst [vmem:[#allocation99_spill] sm:$0xff] %v13106_v43  ;;  %v13117_v60 = vadd.f32 %v13033_v14, %v12345_v7  ;;  %v3001_v19 = vadd.f32 1.0, %v12958_v47  ;;  %v13128_v45 = vadd.f32 %v13055_v31, %v12355_v48 }
 0x33c   : > { %v13086_v39 = vpop.eup %9461  ;;  %9487 = vrcp.f32 %v3051_v4  ;;  %v13101_v4 = vpop.f32.mrf.mxu0 }
 0x33d   : > { %v13090_v51 = vpop.eup %9463  ;;  %9489 = vrcp.f32 %v3042_v35  ;;  %15514 = vst [vmem:[#allocation58_spill] sm:$0xff] %v13101_v4  ;;  %15518 = vst [vmem:[#allocation56_spill] sm:$0xff] %v13117_v60  ;;  %v13134_v47 = vpop.f32.mrf.mxu1  ;;  %v13141_v31 = vmul.f32 -1.442695, %v13117_v60 }
 0x33e   : > { %v13095_v5 = vpop.eup %9465  ;;  %9491 = vrcp.f32 %v3041_v20  ;;  %v13113_v20 = vadd.f32 %v15516_v22, %v12339_v0  ;;  %15522 = vst [vmem:[#allocation86_spill] sm:$0xff] %v13128_v45  ;;  %v2992_v22 = vadd.f32 1.0, %v12949_v2  ;;  %15524 = vst [vmem:[#allocation84_spill] sm:$0xff] %v13134_v47  ;;  %v15531_v47 = vld [vmem:[#allocation202_spill] sm:$0xff] }
 0x33f   : > { %v13098_v40 = vpop.eup %9467  ;;  %9493 = vrcp.f32 %v3032_v33  ;;  %v13119_v33 = vpop.f32.mrf.mxu0 }
 0x340   : > { %v13103_v38 = vpop.eup %9469  ;;  %9495 = vrcp.f32 %v3031_v55  ;;  %15517 = vst [vmem:[#allocation110_spill] sm:$0xff] %v13113_v20  ;;  %15519 = vst [vmem:[#allocation95_spill] sm:$0xff] %v13119_v33  ;;  %v15520_v55 = vld [vmem:[#allocation190_spill] sm:$0xff]  ;;  %v2991_v33 = vadd.f32 1.0, %v12938_v16  ;;  %v13138_v43 = vmul.f32 -1.442695, %v13113_v20 }
 0x341   : > { %v13108_v35 = vpop.eup %9471  ;;  %9497 = vrcp.f32 %v3022_v13  ;;  %v13124_v61 = vadd.f32 %v15520_v55, %v12349_v9  ;;  %v13131_v14 = vpop.f32.mrf.mxu0  ;;  %v2982_v55 = vadd.f32 1.0, %v12841_v6  ;;  %v15527_v20 = vld [vmem:[#allocation195_spill] sm:$0xff] }
 0x342   : > { %v9474_v4 = vpop.eup %9473  ;;  %9499 = vrcp.f32 %v3021_v54  ;;  %15523 = vst [vmem:[#allocation52_spill] sm:$0xff] %v13131_v14  ;;  %v2981_v14 = vadd.f32 1.0, %v12830_v18  ;;  %v13155_v60 = vadd.f32 %v15527_v20, %v12339_v0 }
 0x343   : > { %15521 = vst [vmem:[#allocation54_spill] sm:$0xff] %v13124_v61  ;;  %v9476_v13 = vpop.eup %9475  ;;  %9501 = vrcp.f32 %v3012_v23  ;;  %v13143_v2 = vpop.f32.mrf.mxu0  ;;  %v13147_v16 = vmul.f32 -1.442695, %v13124_v61  ;;  %v2971_v61 = vadd.f32 1.0, %v12810_v46 }
 0x344   : > { %v9478_v62 = vpop.eup %9477  ;;  %9503 = vrcp.f32 %v3011_v36  ;;  %15525 = vst [vmem:[#allocation50_spill] sm:$0xff] %v13143_v2  ;;  %v13150_v36 = vmul.f32 -1.442695, %v13128_v45  ;;  %15528 = vst [vmem:[#allocation48_spill] sm:$0xff] %v13155_v60  ;;  %v13159_v2 = vadd.f32 %v13064_v44, %v12345_v7 }
 0x345   : > { %v9480_v54 = vpop.eup %9479  ;;  %9505 = vrcp.f32 %v3002_v63  ;;  %v2972_v63 = vadd.f32 1.0, %v12821_v57  ;;  %v13161_v18 = vpop.f32.mrf.mxu0  ;;  %v13167_v57 = vadd.f32 %v15531_v47, %v12349_v9 }
 0x346   : > { %v9482_v23 = vpop.eup %9481  ;;  %9507 = vrcp.f32 %v3001_v19  ;;  %15526 = vst [vmem:[#allocation82_spill] sm:$0xff] %v13150_v36  ;;  %15529 = vst [vmem:[#allocation78_spill] sm:$0xff] %v13159_v2  ;;  %v2962_v36 = vadd.f32 1.0, %v12801_v12  ;;  %v4019_v44 = vmul.f32 %v9480_v54, %v12999_v59  ;;  %v4009_v12 = vmul.f32 %v9474_v4, %v12965_v3 }
 0x347   : > { %v9484_v6 = vpop.eup %9483  ;;  %9509 = vrcp.f32 %v2992_v22  ;;  %15530 = vst [vmem:[#allocation46_spill] sm:$0xff] %v13161_v18  ;;  %15532 = vst [vmem:[#allocation74_spill] sm:$0xff] %v13167_v57  ;;  %v13169_v22 = vpop.f32.mrf.mxu1  ;;  %v4021_v47 = vmul.f32 %v9482_v23, %v13007_v58  ;;  %v4012_v59 = vmul.f32 %v9478_v62, %v12992_v25  ;;  %v2951_v54 = vadd.f32 1.0, %v12773_v28  ;;  %v15540_v23 = vld [vmem:[#allocation156_spill] sm:$0xff] }
 0x348   : > { %v9486_v19 = vpop.eup %9485  ;;  %9511 = vrcp.f32 %v2991_v33  ;;  %v4020_v45 = vmul.f32 %v9484_v6, %v13016_v24  ;;  %15533 = vst [vmem:[#allocation44_spill] sm:$0xff] %v13169_v22  ;;  %v13174_v8 = vpop.f32.mrf.mxu0  ;;  %v2961_v33 = vadd.f32 1.0, %v12791_v10  ;;  %v4010_v24 = vmul.f32 %v9476_v13, %v12984_v37  ;;  %v15538_v13 = vld [vmem:[#allocation101_spill] sm:$0xff] }
 0x349   : > { %v9488_v20 = vpop.eup %9487  ;;  %9513 = vrcp.f32 %v2982_v55  ;;  %v4022_v18 = vmul.f32 %v9486_v19, %v13024_v26  ;;  %v2952_v22 = vadd.f32 1.0, %v12783_v49  ;;  %v4000_v10 = vmul.f32 %v13108_v35, %v12945_v50  ;;  %v13186_v37 = vpop.f32.mrf.mxu1 }
 0x34a   : > { %v9490_v46 = vpop.eup %9489  ;;  %9515 = vrcp.f32 %v2981_v14  ;;  %4327 = vmatprep.subr.mxu0 %v4020_v45  ;;  %v4011_v58 = vmul.f32 %v9488_v20, %v12973_v27  ;;  %v13188_v49 = vpop.f32.mrf.mxu0  ;;  %v2942_v25 = vadd.f32 1.0, %v12607_v34  ;;  %v3999_v62 = vmul.f32 %v13103_v38, %v12927_v11  ;;  %v15534_v38 = vld [vmem:[#allocation105_spill] sm:$0xff] }
 0x34b   : > { %v9492_v6 = vpop.eup %9491  ;;  %9517 = vrcp.f32 %v2972_v63  ;;  %4328 = vmatpush1.msra.mxu0 %v4019_v44  ;;  %4398 = vmatprep.subr.mxu1 %v4022_v18  ;;  %v4002_v28 = vmul.f32 %v9490_v46, %v12956_v42  ;;  %v2941_v27 = vadd.f32 1.0, %v12599_v53  ;;  %v2932_v35 = vadd.f32 1.0, %v12589_v41  ;;  %v13209_v41 = vpop.f32.mrf.mxu1 }
 0x34c   : > { %v9494_v26 = vpop.eup %9493  ;;  %9519 = vrcp.f32 %v2971_v61  ;;  %4329 = vmatprep.subr.mxu0 %v4010_v24  ;;  %4399 = vmatpush1.msra.mxu1 %v4021_v47  ;;  %v3990_v61 = vmul.f32 %v13098_v40, %v12909_v30  ;;  %v4001_v4 = vmul.f32 %v9492_v6, %v12936_v56  ;;  %v3989_v11 = vmul.f32 %v13095_v5, %v12901_v17  ;;  %v13211_v17 = vpop.f32.mrf.mxu0  ;;  %v15537_v5 = vld [vmem:[#allocation204_spill] sm:$0xff]  ;;  %v15545_v47 = vld [vmem:[#allocation29_spill] sm:$0xff] }
 0x34d   : > { %v9496_v3 = vpop.eup %9495  ;;  %9521 = vrcp.f32 %v2962_v36  ;;  %4330 = vmatpush1.msra.mxu0 %v4009_v12  ;;  %4400 = vmatprep.subr.mxu1 %v4012_v59  ;;  %v3992_v42 = vmul.f32 %v9494_v26, %v12919_v1  ;;  %v3980_v30 = vmul.f32 %v13090_v51, %v15534_v38  ;;  %v13207_v40 = vadd.f32 %v13068_v29, %v12355_v48  ;;  %v15539_v29 = vld [vmem:[#allocation117_spill] sm:$0xff]  ;;  %v13234_v59 = vpop.f32.mrf.mxu1 }
 0x34e   : > { %v9498_v50 = vpop.eup %9497  ;;  %9523 = vrcp.f32 %v2961_v33  ;;  %4331 = vmatprep.subr.mxu0 %v4000_v10  ;;  %4401 = vmatpush1.msra.mxu1 %v4011_v58  ;;  %v3991_v56 = vmul.f32 %v9496_v3, %v13030_v15  ;;  %15536 = vst [vmem:[#allocation198_spill] sm:$0xff] %v13211_v17  ;;  %v3979_v45 = vmul.f32 %v13086_v39, %v15537_v5  ;;  %v8348_v51 = vmul.f32 -1.442695, %v13155_v60  ;;  %v15541_v39 = vld [vmem:[#allocation121_spill] sm:$0xff]  ;;  %v15544_v33 = vld [vmem:[#allocation115_spill] sm:$0xff]  ;;  %v15548_v10 = vld [vmem:[#allocation66_spill] sm:$0xff] }
 0x34f   : > { %v9500_v34 = vpop.eup %9499  ;;  %9525 = vrcp.f32 %v2952_v22  ;;  %4332 = vmatpush1.msra.mxu0 %v3999_v62  ;;  %4402 = vmatprep.subr.mxu1 %v4002_v28  ;;  %15535 = vst [vmem:[#allocation70_spill] sm:$0xff] %v13207_v40  ;;  %v3982_v14 = vmul.f32 %v9498_v50, %v15538_v13  ;;  %v3970_v55 = vmul.f32 %v13082_v32, %v15539_v29  ;;  %v13221_v63 = vmul.f32 -1.442695, %v13159_v2  ;;  %v15542_v22 = vld [vmem:[#allocation158_spill] sm:$0xff]  ;;  %v15543_v32 = vld [vmem:[#allocation120_spill] sm:$0xff]  ;;  %v15549_v3 = vld [vmem:[#allocation53_spill] sm:$0xff] }
 0x350   : > { %v9502_v53 = vpop.eup %9501  ;;  %9527 = vrcp.f32 %v2951_v54  ;;  %4333 = vmatprep.subr.mxu0 %v3990_v61  ;;  %4403 = vmatpush1.msra.mxu1 %v4001_v4  ;;  %v3981_v36 = vmul.f32 %v9500_v34, %v15540_v23  ;;  %v3969_v19 = vmul.f32 %v13080_v52, %v15541_v39  ;;  %v8349_v44 = vmul.f32 -1.442695, %v13167_v57  ;;  %v13236_v52 = vpop.f32.mrf.mxu0  ;;  %v15547_v54 = vld [vmem:[#allocation67_spill] sm:$0xff]  ;;  %v15550_v62 = vld [vmem:[#allocation205_spill] sm:$0xff]  ;;  %v15552_v50 = vld [vmem:[#allocation144_spill] sm:$0xff] }
 0x351   : > { %v9504_v1 = vpop.eup %9503  ;;  %9529 = vrcp.f32 %v2942_v25  ;;  %4334 = vmatpush1.msra.mxu0 %v3989_v11  ;;  %4404 = vmatprep.subr.mxu1 %v3992_v42  ;;  %v3972_v20 = vmul.f32 %v9502_v53, %v15542_v22  ;;  %v3960_v24 = vmul.f32 %v15544_v33, %v15543_v32  ;;  %v13232_v12 = vmul.f32 -1.442695, %v13207_v40  ;;  %15546 = vst [vmem:[#allocation196_spill] sm:$0xff] %v13236_v52  ;;  %v15554_v4 = vld [vmem:[#allocation79_spill] sm:$0xff]  ;;  %v15557_v42 = vld [vmem:[#allocation145_spill] sm:$0xff]  ;;  %v15563_v13 = vld [vmem:[#allocation128_spill] sm:$0xff] }
 0x352   : > { %v9506_v15 = vpop.eup %9505  ;;  %9531 = vrcp.f32 %v2941_v27  ;;  %4335 = vmatprep.subr.mxu0 %v3980_v30  ;;  %4405 = vmatpush1.msra.mxu1 %v3991_v56  ;;  %v3971_v6 = vmul.f32 %v9504_v1, %v15545_v47  ;;  %v3959_v58 = vmul.f32 %v15548_v10, %v15547_v54  ;;  %v15553_v27 = vld [vmem:[#allocation119_spill] sm:$0xff]  ;;  %v15558_v53 = vld [vmem:[#allocation69_spill] sm:$0xff]  ;;  %v15560_v1 = vld [vmem:[#allocation212_spill] sm:$0xff]  ;;  %v13453_v52 = vadd.f32 %v13234_v59, %v12345_v7 }
 0x353   : > { %v9508_v18 = vpop.eup %9507  ;;  %9533 = vrcp.f32 %v2932_v35  ;;  %4336 = vmatpush1.msra.mxu0 %v3979_v45  ;;  %4406 = vmatprep.subr.mxu1 %v3982_v14  ;;  %v3962_v25 = vmul.f32 %v9506_v15, %v15549_v3  ;;  %v3950_v61 = vmul.f32 %v15553_v27, %v15552_v50  ;;  %v15555_v35 = vld [vmem:[#allocation208_spill] sm:$0xff]  ;;  %v3949_v38 = vmul.f32 %v15558_v53, %v15557_v42  ;;  %v15559_v30 = vld [vmem:[#allocation59_spill] sm:$0xff]  ;;  %v15562_v45 = vld [vmem:[#allocation114_spill] sm:$0xff] }
 0x354   : > { %v9510_v46 = vpop.eup %9509  ;;  %9535 = vpow2.f32 %v13138_v43  ;;  %4337 = vmatprep.subr.mxu0 %v3970_v55  ;;  %4407 = vmatpush1.msra.mxu1 %v3981_v36  ;;  %v13244_v43 = vadd.f32 %v15550_v62, %v12339_v0  ;;  %v3961_v34 = vmul.f32 %v9508_v18, %v15554_v4  ;;  %v13252_v11 = vadd.f32 %v15555_v35, %v12349_v9  ;;  %v15564_v15 = vld [vmem:[#allocation75_spill] sm:$0xff]  ;;  %v13268_v36 = vpop.f32.mrf.mxu1  ;;  %v15568_v39 = vld [vmem:[#allocation30_spill] sm:$0xff]  ;;  %v15573_v47 = vld [vmem:[#allocation124_spill] sm:$0xff] }
 0x355   : > { %v9512_v26 = vpop.eup %9511  ;;  %9537 = vpow2.f32 %v13141_v31  ;;  %4338 = vmatpush1.msra.mxu0 %v3969_v19  ;;  %4408 = vmatprep.subr.mxu1 %v3972_v20  ;;  %v3952_v56 = vmul.f32 %v9510_v46, %v15559_v30  ;;  %v13259_v5 = vadd.f32 %v15560_v1, %v12339_v0  ;;  %v3940_v14 = vmul.f32 %v15563_v13, %v15562_v45  ;;  %v15565_v55 = vld [vmem:[#allocation215_spill] sm:$0xff]  ;;  %v15569_v19 = vld [vmem:[#allocation81_spill] sm:$0xff]  ;;  %v15575_v54 = vld [vmem:[#allocation148_spill] sm:$0xff] }
 0x356   : > { %15551 = vst [vmem:[#allocation161_spill] sm:$0xff] %v13244_v43  ;;  %v9514_v28 = vpop.eup %9513  ;;  %9539 = vpow2.f32 %v13147_v16  ;;  %15556 = vst [vmem:[#allocation194_spill] sm:$0xff] %v13252_v11  ;;  %4339 = vmatprep.subr.mxu0 %v3960_v24  ;;  %4409 = vmatpush1.msra.mxu1 %v3971_v6  ;;  %v3951_v29 = vmul.f32 %v9512_v26, %v15564_v15  ;;  %v13266_v23 = vadd.f32 %v15565_v55, %v12349_v9  ;;  %v15570_v20 = vld [vmem:[#allocation31_spill] sm:$0xff]  ;;  %v15574_v6 = vld [vmem:[#allocation22_spill] sm:$0xff] }
 0x357   : > { %v9516_v31 = vpop.eup %9515  ;;  %9541 = vpow2.f32 %v8348_v51  ;;  %15561 = vst [vmem:[#allocation192_spill] sm:$0xff] %v13259_v5  ;;  %4340 = vmatpush1.msra.mxu0 %v3959_v58  ;;  %4410 = vmatprep.subr.mxu1 %v3962_v25  ;;  %v13270_v51 = vpop.f32.mrf.mxu0  ;;  %v3939_v22 = vmul.f32 %v15569_v19, %v15568_v39  ;;  %v3942_v46 = vmul.f32 %v9514_v28, %v15570_v20  ;;  %v8358_v32 = vmul.f32 -1.442695, %v13244_v43  ;;  %v15577_v62 = vld [vmem:[#allocation122_spill] sm:$0xff]  ;;  %v15578_v28 = vld [vmem:[#allocation23_spill] sm:$0xff]  ;;  %v15579_v27 = vld [vmem:[#allocation25_spill] sm:$0xff] }
 0x358   : > { %v9518_v16 = vpop.eup %9517  ;;  %9543 = vpow2.f32 %v8349_v44  ;;  %15566 = vst [vmem:[#allocation162_spill] sm:$0xff] %v13266_v23  ;;  %4341 = vmatprep.subr.mxu0 %v3950_v61  ;;  %4411 = vmatpush1.msra.mxu1 %v3961_v34  ;;  %15567 = vst [vmem:[#allocation186_spill] sm:$0xff] %v13270_v51  ;;  %v15571_v44 = vld [vmem:[#allocation62_spill] sm:$0xff]  ;;  %v3930_v26 = vmul.f32 %v15574_v6, %v15573_v47  ;;  %v3941_v10 = vmul.f32 %v9516_v31, %v15575_v54  ;;  %v15580_v34 = vld [vmem:[#allocation103_spill] sm:$0xff] }
 0x359   : > { %v9520_v18 = vpop.eup %9519  ;;  %v13278_v33 = vadd.f32 %v15571_v44, %v12345_v7  ;;  %4342 = vmatpush1.msra.mxu0 %v3949_v38  ;;  %4412 = vmatprep.subr.mxu1 %v3952_v56  ;;  %v8359_v58 = vmul.f32 -1.442695, %v13252_v11  ;;  %v13286_v3 = vadd.f32 %v13076_v21, %v12355_v48  ;;  %v3929_v50 = vmul.f32 %v15578_v28, %v15577_v62  ;;  %v15582_v42 = vld [vmem:[#allocation170_spill] sm:$0xff]  ;;  %v15583_v21 = vld [vmem:[#allocation143_spill] sm:$0xff]  ;;  %v15584_v38 = vld [vmem:[#allocation76_spill] sm:$0xff]  ;;  %v13306_v13 = vpop.f32.mrf.mxu0 }
 0x35a   : > { %v9522_v24 = vpop.eup %9521  ;;  %4343 = vmatprep.subr.mxu0 %v3940_v14  ;;  %4413 = vmatpush1.msra.mxu1 %v3951_v29  ;;  %v3932_v61 = vmul.f32 %v9518_v16, %v15579_v27  ;;  %v8368_v4 = vmul.f32 -1.442695, %v13259_v5  ;;  %v13294_v35 = vadd.f32 %v15580_v34, %v12345_v7  ;;  %v3920_v53 = vmul.f32 %v15583_v21, %v15582_v42  ;;  %v15585_v1 = vld [vmem:[#allocation99_spill] sm:$0xff]  ;;  %v13304_v16 = vpop.f32.mrf.mxu1  ;;  %v15588_v15 = vld [vmem:[#allocation104_spill] sm:$0xff]  ;;  %v15595_v62 = vld [vmem:[#allocation113_spill] sm:$0xff] }
 0x35b   : > { %15572 = vst [vmem:[#allocation184_spill] sm:$0xff] %v13278_v33  ;;  %15576 = vst [vmem:[#allocation118_spill] sm:$0xff] %v13286_v3  ;;  %v9524_v25 = vpop.eup %9523  ;;  %4344 = vmatpush1.msra.mxu0 %v3939_v22  ;;  %4414 = vmatprep.subr.mxu1 %v3942_v46  ;;  %v3931_v30 = vmul.f32 %v9520_v18, %v15584_v38  ;;  %v8369_v56 = vmul.f32 -1.442695, %v13266_v23  ;;  %v13302_v45 = vadd.f32 %v15585_v1, %v12355_v48  ;;  %v15589_v29 = vld [vmem:[#allocation24_spill] sm:$0xff]  ;;  %v15592_v46 = vld [vmem:[#allocation154_spill] sm:$0xff]  ;;  %v13326_v38 = vpop.f32.mrf.mxu0 }
 0x35c   : > { %15581 = vst [vmem:[#allocation183_spill] sm:$0xff] %v13294_v35  ;;  %v9526_v31 = vpop.eup %9525  ;;  %4345 = vmatprep.subr.mxu0 %v3930_v26  ;;  %4415 = vmatpush1.msra.mxu1 %v3941_v10  ;;  %15587 = vst [vmem:[#allocation125_spill] sm:$0xff] %v13306_v13  ;;  %v3919_v55 = vmul.f32 %v15589_v29, %v15588_v15  ;;  %v15590_v39 = vld [vmem:[#allocation160_spill] sm:$0xff]  ;;  %9545 = vpow2.f32 %v8358_v32  ;;  %v8360_v18 = vmul.f32 -1.442695, %v13278_v33  ;;  %v15593_v47 = vld [vmem:[#allocation27_spill] sm:$0xff] }
 0x35d   : > { %15586 = vst [vmem:[#allocation132_spill] sm:$0xff] %v13302_v45  ;;  %v9528_v14 = vpop.eup %9527  ;;  %v3922_v19 = vmul.f32 %v9522_v24, %v15590_v39  ;;  %4346 = vmatpush1.msra.mxu0 %v3929_v50  ;;  %4416 = vmatprep.subr.mxu1 %v3932_v61  ;;  %v15591_v20 = vld [vmem:[#allocation96_spill] sm:$0xff]  ;;  %v3921_v6 = vmul.f32 %v9524_v25, %v15593_v47  ;;  %9547 = vpow2.f32 %v8359_v58  ;;  %v8361_v26 = vmul.f32 -1.442695, %v13286_v3  ;;  %v15594_v10 = vld [vmem:[#allocation175_spill] sm:$0xff]  ;;  %v15596_v32 = vld [vmem:[#allocation94_spill] sm:$0xff] }
 0x35e   : > { %v9530_v22 = vpop.eup %9529  ;;  %v3910_v44 = vmul.f32 %v15592_v46, %v15591_v20  ;;  %4347 = vmatprep.subr.mxu0 %v3920_v53  ;;  %4417 = vmatpush1.msra.mxu1 %v3931_v30  ;;  %v3909_v24 = vmul.f32 %v15595_v62, %v15594_v10  ;;  %v3912_v28 = vmul.f32 %v9526_v31, %v15596_v32  ;;  %9549 = vpow2.f32 %v8368_v4  ;;  %v15597_v61 = vld [vmem:[#allocation220_spill] sm:$0xff]  ;;  %v15598_v34 = vld [vmem:[#allocation65_spill] sm:$0xff]  ;;  %v15599_v58 = vld [vmem:[#allocation102_spill] sm:$0xff]  ;;  %v13324_v53 = vpop.f32.mrf.mxu1 }
 0x35f   : > { %v9532_v54 = vpop.eup %9531  ;;  %v8370_v50 = vmul.f32 -1.442695, %v13294_v35  ;;  %4348 = vmatpush1.msra.mxu0 %v3919_v55  ;;  %4418 = vmatprep.subr.mxu1 %v3922_v19  ;;  %v3900_v25 = vmul.f32 %v15598_v34, %v15597_v61  ;;  %v3911_v42 = vmul.f32 %v9528_v14, %v15599_v58  ;;  %9551 = vpow2.f32 %v8369_v56  ;;  %15600 = vst [vmem:[#allocation181_spill] sm:$0xff] %v13326_v38  ;;  %v15601_v31 = vld [vmem:[#allocation219_spill] sm:$0xff]  ;;  %v15602_v30 = vld [vmem:[#allocation138_spill] sm:$0xff]  ;;  %v15608_v20 = vld [vmem:[#allocation157_spill] sm:$0xff] }
 0x360   : > { %v9534_v27 = vpop.eup %9533  ;;  %v8371_v21 = vmul.f32 -1.442695, %v13302_v45  ;;  %4349 = vmatprep.subr.mxu0 %v3910_v44  ;;  %4419 = vmatpush1.msra.mxu1 %v3921_v6  ;;  %v3899_v1 = vmul.f32 %v15602_v30, %v15601_v31  ;;  %v15603_v15 = vld [vmem:[#allocation51_spill] sm:$0xff]  ;;  %v15604_v55 = vld [vmem:[#allocation82_spill] sm:$0xff]  ;;  %v15609_v44 = vld [vmem:[#allocation217_spill] sm:$0xff]  ;;  %15659 = vst [vmem:[#allocation141_spill] sm:$0xff] %v13453_v52  ;;  %v13460_v51 = vadd.f32 %v13268_v36, %v12355_v48 }
 0x361   : > { %v9536_v4 = vpop.eup %9535  ;;  %v3902_v29 = vmul.f32 %v9530_v22, %v15603_v15  ;;  %9553 = vpow2.f32 %v15604_v55  ;;  %v15605_v39 = vld [vmem:[#allocation218_spill] sm:$0xff]  ;;  %4350 = vmatpush1.msra.mxu0 %v3909_v24  ;;  %4420 = vmatprep.subr.mxu1 %v3912_v28  ;;  %v15610_v47 = vld [vmem:[#allocation139_spill] sm:$0xff]  ;;  %v15611_v10 = vld [vmem:[#allocation80_spill] sm:$0xff] }
 0x362   : > { %v13334_v14 = vadd.f32 %v15605_v39, %v12339_v0  ;;  %v9538_v56 = vpop.eup %9537  ;;  %v15607_v19 = vld [vmem:[#allocation142_spill] sm:$0xff]  ;;  %v3890_v6 = vmul.f32 %v15610_v47, %v15609_v44  ;;  %v3901_v62 = vmul.f32 %v9532_v54, %v15611_v10  ;;  %9555 = vpow2.f32 %v13221_v63  ;;  %4351 = vmatprep.subr.mxu0 %v3900_v25  ;;  %4421 = vmatpush1.msra.mxu1 %v3911_v42  ;;  %v15614_v58 = vld [vmem:[#allocation133_spill] sm:$0xff]  ;;  %v15615_v28 = vld [vmem:[#allocation180_spill] sm:$0xff] }
 0x363   : > { %v3869_v46 = vmul.f32 %v15608_v20, %v15607_v19  ;;  %v9540_v22 = vpop.eup %9539  ;;  %v15612_v32 = vld [vmem:[#allocation214_spill] sm:$0xff]  ;;  %v3892_v24 = vmul.f32 %v9534_v27, %v15614_v58  ;;  %9557 = vpow2.f32 %v13232_v12  ;;  %v13348_v31 = vadd.f32 %v15615_v28, %v12349_v9  ;;  %4352 = vmatpush1.msra.mxu0 %v3899_v1  ;;  %4422 = vmatprep.subr.mxu1 %v3902_v29  ;;  %v15617_v54 = vld [vmem:[#allocation147_spill] sm:$0xff]  ;;  %v15618_v15 = vld [vmem:[#allocation116_spill] sm:$0xff]  ;;  %v13354_v19 = vpop.f32.mrf.mxu1 }
 0x364   : > { %15606 = vst [vmem:[#allocation178_spill] sm:$0xff] %v13334_v14  ;;  %v15613_v61 = vld [vmem:[#allocation146_spill] sm:$0xff]  ;;  %v9542_v30 = vpop.eup %9541  ;;  %v3880_v63 = vmul.f32 %v15618_v15, %v15617_v54  ;;  %v15619_v25 = vld [vmem:[#allocation216_spill] sm:$0xff]  ;;  %v15620_v42 = vld [vmem:[#allocation61_spill] sm:$0xff]  ;;  %v3069_v39 = vadd.f32 1.0, %v9536_v4  ;;  %9559 = vpow2.f32 %v8360_v18  ;;  %4353 = vmatprep.subr.mxu0 %v3890_v6  ;;  %4423 = vmatpush1.msra.mxu1 %v3901_v62  ;;  %v13356_v12 = vpop.f32.mrf.mxu0  ;;  %v3070_v62 = vadd.f32 1.0, %v9540_v22 }
 0x365   : > { %v3889_v34 = vmul.f32 %v15613_v61, %v15612_v32  ;;  %15616 = vst [vmem:[#allocation176_spill] sm:$0xff] %v13348_v31  ;;  %v3891_v55 = vmul.f32 %v15620_v42, %v15619_v25  ;;  %15621 = vst [vmem:[#allocation173_spill] sm:$0xff] %v13356_v12  ;;  %v9544_v27 = vpop.eup %9543  ;;  %v15622_v20 = vld [vmem:[#allocation210_spill] sm:$0xff]  ;;  %v15623_v44 = vld [vmem:[#allocation149_spill] sm:$0xff]  ;;  %v3071_v32 = vadd.f32 1.0, %v9538_v56  ;;  %9561 = vpow2.f32 %v8361_v26  ;;  %4424 = vmatprep.subr.mxu1 %v3892_v24 }
 0x366   : > { %v3879_v1 = vmul.f32 %v15623_v44, %v15622_v20  ;;  %v15624_v29 = vld [vmem:[#allocation213_spill] sm:$0xff]  ;;  %v15626_v61 = vld [vmem:[#allocation207_spill] sm:$0xff]  ;;  %v15627_v4 = vld [vmem:[#allocation90_spill] sm:$0xff]  ;;  %9563 = vpow2.f32 %v8370_v50  ;;  %v3079_v42 = vadd.f32 1.0, %v9542_v30  ;;  %v3080_v44 = vadd.f32 1.0, %v9544_v27  ;;  %15661 = vst [vmem:[#allocation179_spill] sm:$0xff] %v13460_v51 }
 0x367   : > { %v15625_v47 = vld [vmem:[#allocation57_spill] sm:$0xff]  ;;  %4354 = vmatpush1.msra.mxu0 %v3889_v34  ;;  %v3870_v18 = vmul.f32 %v15627_v4, %v15626_v61  ;;  %v15628_v58 = vld [vmem:[#allocation211_spill] sm:$0xff]  ;;  %4425 = vmatpush1.msra.mxu1 %v3891_v55  ;;  %9565 = vpow2.f32 %v8371_v21  ;;  %v15632_v56 = vld [vmem:[#allocation130_spill] sm:$0xff]  ;;  %v13380_v21 = vpop.f32.mrf.mxu0  ;;  %v8378_v30 = vmul.f32 -1.442695, %v13334_v14 }
 0x368   : > { %v3882_v10 = vmul.f32 %v15625_v47, %v15624_v29  ;;  %v15629_v28 = vld [vmem:[#allocation71_spill] sm:$0xff]  ;;  %4355 = vmatprep.subr.mxu0 %v3880_v63  ;;  %v15630_v54 = vld [vmem:[#allocation209_spill] sm:$0xff]  ;;  %v13370_v26 = vadd.f32 %v15632_v56, %v12339_v0  ;;  %v15634_v34 = vld [vmem:[#allocation206_spill] sm:$0xff]  ;;  %9567 = vrcp.f32 %v3069_v39  ;;  %v13378_v63 = vpop.f32.mrf.mxu1  ;;  %15638 = vst [vmem:[#allocation168_spill] sm:$0xff] %v13380_v21  ;;  %v8379_v39 = vmul.f32 -1.442695, %v13348_v31 }
 0x369   : > { %v3881_v6 = vmul.f32 %v15629_v28, %v15628_v58  ;;  %v15631_v15 = vld [vmem:[#allocation43_spill] sm:$0xff]  ;;  %4356 = vmatpush1.msra.mxu0 %v3879_v1  ;;  %v15635_v24 = vld [vmem:[#allocation28_spill] sm:$0xff]  ;;  %9569 = vrcp.f32 %v3071_v32  ;;  %v9546_v55 = vpop.eup %9545  ;;  %v13388_v32 = vpop.f32.mrf.mxu0  ;;  %v15719_v17 = vld [vmem:[#allocation89_spill] sm:$0xff] }
 0x36a   : > { %v3872_v25 = vmul.f32 %v15631_v15, %v15630_v54  ;;  %15633 = vst [vmem:[#allocation171_spill] sm:$0xff] %v13370_v26  ;;  %4426 = vmatprep.subr.mxu1 %v3882_v10  ;;  %v3871_v20 = vmul.f32 %v15635_v24, %v15634_v34  ;;  %v15636_v50 = vld [vmem:[#allocation92_spill] sm:$0xff]  ;;  %4357 = vmatprep.subr.mxu0 %v3870_v18  ;;  %9571 = vrcp.f32 %v3070_v62  ;;  %v9548_v27 = vpop.eup %9547  ;;  %v8388_v1 = vmul.f32 -1.442695, %v13370_v26  ;;  %v13386_v10 = vpop.f32.mrf.mxu1  ;;  %v15640_v4 = vld [vmem:[#allocation127_spill] sm:$0xff] }
 0x36b   : > { %v13376_v22 = vadd.f32 %v15636_v50, %v12349_v9  ;;  %4427 = vmatpush1.msra.mxu1 %v3881_v6  ;;  %4358 = vmatpush1.msra.mxu0 %v3869_v46  ;;  %9573 = vrcp.f32 %v3079_v42  ;;  %v9550_v29 = vpop.eup %9549  ;;  %15639 = vst [vmem:[#allocation193_spill] sm:$0xff] %v13388_v32  ;;  %v3089_v46 = vadd.f32 1.0, %v9546_v55  ;;  %v13392_v18 = vadd.f32 %v15640_v4, %v12339_v0  ;;  %v15643_v6 = vld [vmem:[#allocation112_spill] sm:$0xff]  ;;  %v13414_v50 = vpop.f32.mrf.mxu0  ;;  %v15669_v33 = vld [vmem:[#allocation83_spill] sm:$0xff] }
 0x36c   : > { %4428 = vmatprep.subr.mxu1 %v3872_v25  ;;  %9575 = vrcp.f32 %v3080_v44  ;;  %v9552_v61 = vpop.eup %9551  ;;  %v3090_v28 = vadd.f32 1.0, %v9548_v27  ;;  %v13398_v62 = vadd.f32 %v15643_v6, %v12349_v9  ;;  %v3099_v15 = vadd.f32 1.0, %v9550_v29  ;;  %v15646_v25 = vld [vmem:[#allocation165_spill] sm:$0xff]  ;;  %v15648_v24 = vld [vmem:[#allocation152_spill] sm:$0xff]  ;;  %v13412_v44 = vpop.f32.mrf.mxu1  ;;  %15650 = vst [vmem:[#allocation35_spill] sm:$0xff] %v13414_v50 }
 0x36d   : > { %15637 = vst [vmem:[#allocation197_spill] sm:$0xff] %v13376_v22  ;;  %4429 = vmatpush1.msra.mxu1 %v3871_v20  ;;  %v8389_v47 = vmul.f32 -1.442695, %v13376_v22  ;;  %9577 = vpow2.f32 %v8378_v30  ;;  %15641 = vst [vmem:[#allocation129_spill] sm:$0xff] %v13392_v18  ;;  %v13404_v42 = vadd.f32 %v15646_v25, %v12339_v0  ;;  %v3100_v34 = vadd.f32 1.0, %v9552_v61  ;;  %v15651_v55 = vld [vmem:[#allocation84_spill] sm:$0xff] }
 0x36e   : > { %v13394_v58 = vpop.eup %9553  ;;  %9579 = vpow2.f32 %v8379_v39  ;;  %15644 = vst [vmem:[#allocation191_spill] sm:$0xff] %v13398_v62  ;;  %v13410_v20 = vadd.f32 %v15648_v24, %v12349_v9  ;;  %v13420_v39 = vadd.f32 %v15651_v55, %v12345_v7  ;;  %v8398_v27 = vmul.f32 -1.442695, %v13392_v18  ;;  %v15653_v29 = vld [vmem:[#allocation44_spill] sm:$0xff]  ;;  %v13444_v55 = vpop.f32.mrf.mxu1 }
 0x36f   : > { %15642 = vst [vmem:[#allocation166_spill] sm:$0xff] %v13394_v58  ;;  %v13400_v54 = vpop.eup %9555  ;;  %9581 = vpow2.f32 %v8388_v1  ;;  %15647 = vst [vmem:[#allocation163_spill] sm:$0xff] %v13404_v42  ;;  %v8399_v61 = vmul.f32 -1.442695, %v13398_v62  ;;  %v8408_v6 = vmul.f32 -1.442695, %v13404_v42 }
 0x370   : > { %15645 = vst [vmem:[#allocation131_spill] sm:$0xff] %v13400_v54  ;;  %v13406_v56 = vpop.eup %9557  ;;  %9583 = vpow2.f32 %v8389_v47  ;;  %15649 = vst [vmem:[#allocation189_spill] sm:$0xff] %v13410_v20  ;;  %v13427_v47 = vadd.f32 %v15653_v29, %v12355_v48  ;;  %v8409_v24 = vmul.f32 -1.442695, %v13410_v20  ;;  %v13446_v29 = vpop.f32.mrf.mxu0  ;;  %v8401_v50 = vmul.f32 -1.442695, %v13460_v51 }
 0x371   : > { %v13416_v30 = vpop.eup %9559  ;;  %9585 = vrcp.f32 %v3089_v46  ;;  %15652 = vst [vmem:[#allocation140_spill] sm:$0xff] %v13420_v39  ;;  %v13434_v46 = vadd.f32 %v13186_v37, %v12345_v7  ;;  %15657 = vst [vmem:[#allocation45_spill] sm:$0xff] %v13446_v29  ;;  %v8380_v37 = vmul.f32 -1.442695, %v13420_v39  ;;  %v13476_v36 = vpop.f32.mrf.mxu1  ;;  %v15672_v35 = vld [vmem:[#allocation100_spill] sm:$0xff] }
 0x372   : > { %v13423_v1 = vpop.eup %9561  ;;  %9587 = vrcp.f32 %v3090_v28  ;;  %15654 = vst [vmem:[#allocation20_spill] sm:$0xff] %v13427_v47  ;;  %v13441_v28 = vadd.f32 %v13209_v41, %v12355_v48  ;;  %v8381_v41 = vmul.f32 -1.442695, %v13427_v47  ;;  %v13478_v21 = vpop.f32.mrf.mxu0  ;;  %v15678_v23 = vld [vmem:[#allocation136_spill] sm:$0xff] }
 0x373   : > { %v13430_v4 = vpop.eup %9563  ;;  %9589 = vrcp.f32 %v3099_v15  ;;  %15655 = vst [vmem:[#allocation68_spill] sm:$0xff] %v13434_v46  ;;  %v8390_v38 = vmul.f32 -1.442695, %v13434_v46  ;;  %15666 = vst [vmem:[#allocation174_spill] sm:$0xff] %v13478_v21  ;;  %v13486_v2 = vpop.f32.mrf.mxu1 }
 0x374   : > { %v13437_v25 = vpop.eup %9565  ;;  %9591 = vrcp.f32 %v3100_v34  ;;  %15656 = vst [vmem:[#allocation137_spill] sm:$0xff] %v13441_v28  ;;  %v8391_v12 = vmul.f32 -1.442695, %v13441_v28  ;;  %v13488_v21 = vpop.f32.mrf.mxu0 }
 0x375   : > { %v13448_v15 = vpop.eup %9567  ;;  %9593 = vpow2.f32 %v8398_v27  ;;  %v13467_v27 = vadd.f32 %v13304_v16, %v12345_v7  ;;  %15668 = vst [vmem:[#allocation172_spill] sm:$0xff] %v13488_v21  ;;  %v15675_v21 = vld [vmem:[#allocation63_spill] sm:$0xff] }
 0x376   : > { %15658 = vst [vmem:[#allocation182_spill] sm:$0xff] %v13448_v15  ;;  %v13455_v34 = vpop.eup %9569  ;;  %9595 = vpow2.f32 %v8399_v61  ;;  %v13474_v61 = vadd.f32 %v13324_v53, %v12355_v48 }
 0x377   : > { %15660 = vst [vmem:[#allocation33_spill] sm:$0xff] %v13455_v34  ;;  %v13462_v13 = vpop.eup %9571  ;;  %9597 = vpow2.f32 %v8408_v6  ;;  %15663 = vst [vmem:[#allocation177_spill] sm:$0xff] %v13467_v27  ;;  %v8400_v6 = vmul.f32 -1.442695, %v13453_v52 }
 0x378   : > { %15662 = vst [vmem:[#allocation85_spill] sm:$0xff] %v13462_v13  ;;  %v13469_v59 = vpop.eup %9573  ;;  %9599 = vpow2.f32 %v8409_v24  ;;  %15665 = vst [vmem:[#allocation55_spill] sm:$0xff] %v13474_v61  ;;  %v8410_v24 = vmul.f32 -1.442695, %v13467_v27  ;;  %v8411_v53 = vmul.f32 -1.442695, %v13474_v61 }
 0x379   : > { %15664 = vst [vmem:[#allocation134_spill] sm:$0xff] %v13469_v59  ;;  %v13480_v32 = vpop.eup %9575  ;;  %9601 = vpow2.f32 %v8380_v37 }
 0x37a   : > { %15667 = vst [vmem:[#allocation32_spill] sm:$0xff] %v13480_v32  ;;  %v9578_v16 = vpop.eup %9577  ;;  %9603 = vpow2.f32 %v8381_v41  ;;  %v13492_v41 = vadd.f32 %v15669_v33, %v12339_v0 }
 0x37b   : > { %v9580_v29 = vpop.eup %9579  ;;  %9605 = vpow2.f32 %v8390_v38  ;;  %v3109_v37 = vadd.f32 1.0, %v9578_v16  ;;  %v13504_v16 = vadd.f32 %v15675_v21, %v12339_v0 }
 0x37c   : > { %v9582_v34 = vpop.eup %9581  ;;  %9607 = vpow2.f32 %v8391_v12  ;;  %15670 = vst [vmem:[#allocation21_spill] sm:$0xff] %v13492_v41  ;;  %v3110_v38 = vadd.f32 1.0, %v9580_v29  ;;  %v13498_v12 = vadd.f32 %v15672_v35, %v12349_v9  ;;  %v13510_v29 = vadd.f32 %v15678_v23, %v12349_v9  ;;  %v13514_v35 = vpop.f32.mrf.mxu0 }
 0x37d   : > { %v9584_v40 = vpop.eup %9583  ;;  %9609 = vpow2.f32 %v8400_v6  ;;  %v3119_v39 = vadd.f32 1.0, %v9582_v34  ;;  %15676 = vst [vmem:[#allocation167_spill] sm:$0xff] %v13504_v16  ;;  %15680 = vst [vmem:[#allocation164_spill] sm:$0xff] %v13514_v35  ;;  %v8418_v34 = vmul.f32 -1.442695, %v13492_v41  ;;  %v15716_v41 = vld [vmem:[#allocation64_spill] sm:$0xff] }
 0x37e   : > { %v13494_v3 = vpop.eup %9585  ;;  %9611 = vpow2.f32 %v8401_v50  ;;  %15673 = vst [vmem:[#allocation169_spill] sm:$0xff] %v13498_v12  ;;  %v3120_v33 = vadd.f32 1.0, %v9584_v40  ;;  %15679 = vst [vmem:[#allocation87_spill] sm:$0xff] %v13510_v29  ;;  %v13512_v50 = vpop.f32.mrf.mxu1  ;;  %v8419_v21 = vmul.f32 -1.442695, %v13498_v12  ;;  %v13681_v13 = vadd.f32 %v15716_v41, %v12349_v9 }
 0x37f   : > { %15671 = vst [vmem:[#allocation108_spill] sm:$0xff] %v13494_v3  ;;  %v13500_v45 = vpop.eup %9587  ;;  %9613 = vpow2.f32 %v8410_v24  ;;  %v8428_v40 = vmul.f32 -1.442695, %v13504_v16  ;;  %v8429_v23 = vmul.f32 -1.442695, %v13510_v29  ;;  %v13524_v35 = vpop.f32.mrf.mxu0 }
 0x380   : > { %15674 = vst [vmem:[#allocation88_spill] sm:$0xff] %v13500_v45  ;;  %v13506_v6 = vpop.eup %9589  ;;  %9615 = vpow2.f32 %v8411_v53  ;;  %v13522_v46 = vpop.f32.mrf.mxu1  ;;  %15682 = vst [vmem:[#allocation37_spill] sm:$0xff] %v13524_v35 }
 0x381   : > { %15677 = vst [vmem:[#allocation185_spill] sm:$0xff] %v13506_v6  ;;  %v13516_v47 = vpop.eup %9591  ;;  %9617 = vrcp.f32 %v3109_v37  ;;  %v13578_v6 = vadd.f32 %v13476_v36, %v12355_v48  ;;  %v13594_v36 = vadd.f32 %v13486_v2, %v12345_v7 }
 0x382   : > { %15681 = vst [vmem:[#allocation159_spill] sm:$0xff] %v13516_v47  ;;  %v9594_v24 = vpop.eup %9593  ;;  %9619 = vrcp.f32 %v3110_v38  ;;  %v13528_v38 = vadd.f32 %v13354_v19, %v12345_v7 }
 0x383   : > { %v9596_v14 = vpop.eup %9595  ;;  %9621 = vrcp.f32 %v3119_v39  ;;  %v3129_v37 = vadd.f32 1.0, %v9594_v24  ;;  %v13540_v24 = vadd.f32 %v13386_v10, %v12345_v7  ;;  %v15688_v10 = vld [vmem:[#allocation135_spill] sm:$0xff]  ;;  %15693 = vst [vmem:[#allocation72_spill] sm:$0xff] %v13578_v6  ;;  %15697 = vst [vmem:[#allocation188_spill] sm:$0xff] %v13594_v36 }
 0x384   : > { %v9598_v53 = vpop.eup %9597  ;;  %9623 = vrcp.f32 %v3120_v33  ;;  %15683 = vst [vmem:[#allocation187_spill] sm:$0xff] %v13528_v38  ;;  %v3130_v39 = vadd.f32 1.0, %v9596_v14  ;;  %v13534_v33 = vadd.f32 %v13378_v63, %v12355_v48  ;;  %v13546_v14 = vadd.f32 %v13412_v44, %v12355_v48  ;;  %v13550_v63 = vpop.f32.mrf.mxu0 }
 0x385   : > { %v9600_v47 = vpop.eup %9599  ;;  %9625 = vpow2.f32 %v8418_v34  ;;  %v3139_v26 = vadd.f32 1.0, %v9598_v53  ;;  %15685 = vst [vmem:[#allocation36_spill] sm:$0xff] %v13540_v24  ;;  %15687 = vst [vmem:[#allocation91_spill] sm:$0xff] %v13550_v63  ;;  %v13557_v53 = vadd.f32 %v15688_v10, %v12339_v0  ;;  %v13564_v44 = vadd.f32 %v13444_v55, %v12345_v7  ;;  %v15691_v63 = vld [vmem:[#allocation47_spill] sm:$0xff] }
 0x386   : > { %v13530_v31 = vpop.eup %9601  ;;  %9627 = vpow2.f32 %v8419_v21  ;;  %15684 = vst [vmem:[#allocation155_spill] sm:$0xff] %v13534_v33  ;;  %v3140_v19 = vadd.f32 1.0, %v9600_v47  ;;  %15686 = vst [vmem:[#allocation153_spill] sm:$0xff] %v13546_v14  ;;  %v13548_v21 = vpop.f32.mrf.mxu1  ;;  %v8421_v47 = vmul.f32 -1.442695, %v13534_v33  ;;  %v13571_v22 = vadd.f32 %v15691_v63, %v12349_v9  ;;  %v15695_v63 = vld [vmem:[#allocation109_spill] sm:$0xff] }
 0x387   : > { %v13536_v28 = vpop.eup %9603  ;;  %9629 = vpow2.f32 %v8428_v40  ;;  %v8420_v40 = vmul.f32 -1.442695, %v13528_v38  ;;  %15689 = vst [vmem:[#allocation151_spill] sm:$0xff] %v13557_v53  ;;  %15690 = vst [vmem:[#allocation34_spill] sm:$0xff] %v13564_v44  ;;  %v13580_v5 = vpop.f32.mrf.mxu0  ;;  %v13587_v18 = vadd.f32 %v15695_v63, %v12339_v0 }
 0x388   : > { %v13542_v34 = vpop.eup %9605  ;;  %9631 = vpow2.f32 %v8429_v23  ;;  %15692 = vst [vmem:[#allocation150_spill] sm:$0xff] %v13571_v22  ;;  %v1671_v55 = vpop.f32.mrf.mxu1  ;;  %15694 = vst [vmem:[#allocation26_spill] sm:$0xff] %v13580_v5  ;;  %v15699_v5 = vld [vmem:[#allocation97_spill] sm:$0xff] }
 0x389   : > { %v13552_v35 = vpop.eup %9607  ;;  %9633 = vrcp.f32 %v3129_v37  ;;  %v8430_v37 = vmul.f32 -1.442695, %v13540_v24  ;;  %v13601_v27 = vadd.f32 %v15699_v5, %v12349_v9  ;;  %v13610_v62 = vpop.f32.mrf.mxu0  ;;  %v8450_v5 = vmul.f32 -1.442695, %v13594_v36 }
 0x38a   : > { %v13559_v52 = vpop.eup %9609  ;;  %9635 = vrcp.f32 %v3130_v39  ;;  %v8431_v39 = vmul.f32 -1.442695, %v13546_v14  ;;  %v1673_v2 = vpop.f32.mrf.mxu1  ;;  %15702 = vst [vmem:[#allocation105_spill] sm:$0xff] %v13610_v62 }
 0x38b   : > { %v13566_v23 = vpop.eup %9611  ;;  %9637 = vrcp.f32 %v3139_v26  ;;  %v8438_v26 = vmul.f32 -1.442695, %v13557_v53  ;;  %v13618_v42 = vpop.f32.mrf.mxu0 }
 0x38c   : > { %v13573_v10 = vpop.eup %9613  ;;  %9639 = vrcp.f32 %v3140_v19  ;;  %v8440_v19 = vmul.f32 -1.442695, %v13564_v44  ;;  %v1677_v61 = vpop.f32.mrf.mxu1  ;;  %15704 = vst [vmem:[#allocation101_spill] sm:$0xff] %v13618_v42  ;;  %v15710_v42 = vld [vmem:[#allocation126_spill] sm:$0xff]  ;;  %v13705_v44 = vadd.f32 %v15719_v17, %v12349_v9 }
 0x38d   : > { %v13582_v51 = vpop.eup %9615  ;;  %9641 = vpow2.f32 %v8420_v40  ;;  %v8439_v40 = vmul.f32 -1.442695, %v13571_v22 }
 0x38e   : > { %v13589_v45 = vpop.eup %9617  ;;  %9643 = vpow2.f32 %v8421_v47  ;;  %v8441_v47 = vmul.f32 -1.442695, %v13578_v6 }
 0x38f   : > { %15696 = vst [vmem:[#allocation49_spill] sm:$0xff] %v13589_v45  ;;  %v13596_v11 = vpop.eup %9619  ;;  %9645 = vpow2.f32 %v8430_v37  ;;  %v13608_v45 = vadd.f32 %v13512_v50, %v12355_v48  ;;  %v8448_v37 = vmul.f32 -1.442695, %v13587_v18 }
 0x390   : > { %15698 = vst [vmem:[#allocation190_spill] sm:$0xff] %v13596_v11  ;;  %v13603_v63 = vpop.eup %9621  ;;  %9647 = vpow2.f32 %v8431_v39  ;;  %v8449_v39 = vmul.f32 -1.442695, %v13601_v27 }
 0x391   : > { %15700 = vst [vmem:[#allocation195_spill] sm:$0xff] %v13603_v63  ;;  %15701 = vst [vmem:[#allocation202_spill] sm:$0xff] %v13608_v45  ;;  %v13612_v11 = vpop.eup %9623  ;;  %9649 = vpow2.f32 %v8438_v26  ;;  %v8451_v50 = vmul.f32 -1.442695, %v13608_v45  ;;  %v15705_v26 = vld [vmem:[#allocation93_spill] sm:$0xff] }
 0x392   : > { %15703 = vst [vmem:[#allocation204_spill] sm:$0xff] %v13612_v11  ;;  %v9626_v3 = vpop.eup %9625  ;;  %9651 = vpow2.f32 %v8440_v19  ;;  %v13622_v32 = vadd.f32 %v15705_v26, %v12339_v0 }
 0x393   : > { %v9628_v63 = vpop.eup %9627  ;;  %9653 = vpow2.f32 %v8439_v40  ;;  %v3149_v11 = vadd.f32 1.0, %v9626_v3  ;;  %v15707_v40 = vld [vmem:[#allocation77_spill] sm:$0xff]  ;;  %v13634_v3 = vadd.f32 %v13548_v21, %v12355_v48 }
 0x394   : > { %v9630_v43 = vpop.eup %9629  ;;  %9655 = vpow2.f32 %v8441_v47  ;;  %v3150_v57 = vadd.f32 1.0, %v9628_v63  ;;  %v13628_v38 = vadd.f32 %v15707_v40, %v12349_v9  ;;  %v13640_v63 = vadd.f32 %v15710_v42, %v12339_v0 }
 0x395   : > { %v9632_v62 = vpop.eup %9631  ;;  %9657 = vpow2.f32 %v8448_v37  ;;  %v3159_v20 = vadd.f32 1.0, %v9630_v43  ;;  %v8458_v43 = vmul.f32 -1.442695, %v13622_v32 }
 0x396   : > { %v13624_v19 = vpop.eup %9633  ;;  %9659 = vpow2.f32 %v8450_v5  ;;  %v3160_v26 = vadd.f32 1.0, %v9632_v62  ;;  %v1679_v5 = vpop.f32.mrf.mxu1  ;;  %v8459_v62 = vmul.f32 -1.442695, %v13628_v38 }
 0x397   : > { %15706 = vst [vmem:[#allocation117_spill] sm:$0xff] %v13624_v19  ;;  %v13630_v47 = vpop.eup %9635  ;;  %9661 = vpow2.f32 %v8449_v39  ;;  %v13642_v19 = vpop.f32.mrf.mxu0  ;;  %v13648_v39 = vadd.f32 %v1671_v55, %v12345_v7  ;;  %v8468_v55 = vmul.f32 -1.442695, %v13640_v63 }
 0x398   : > { %15708 = vst [vmem:[#allocation156_spill] sm:$0xff] %v13630_v47  ;;  %v13636_v37 = vpop.eup %9637  ;;  %9663 = vpow2.f32 %v8451_v50  ;;  %15711 = vst [vmem:[#allocation158_spill] sm:$0xff] %v13642_v19  ;;  %v15713_v50 = vld [vmem:[#allocation73_spill] sm:$0xff]  ;;  %v8461_v19 = vmul.f32 -1.442695, %v13634_v3  ;;  %v1683_v59 = vpop.f32.mrf.mxu1 }
 0x399   : > { %15709 = vst [vmem:[#allocation121_spill] sm:$0xff] %v13636_v37  ;;  %v13644_v40 = vpop.eup %9639  ;;  %9665 = vrcp.f32 %v3149_v11  ;;  %v13655_v42 = vadd.f32 %v15713_v50, %v12349_v9  ;;  %v13661_v11 = vadd.f32 %v1673_v2, %v12355_v48  ;;  %v13670_v50 = vpop.f32.mrf.mxu0  ;;  %v13676_v2 = vadd.f32 %v1677_v61, %v12345_v7 }
 0x39a   : > { %15712 = vst [vmem:[#allocation120_spill] sm:$0xff] %v13644_v40  ;;  %v13650_v21 = vpop.eup %9641  ;;  %9667 = vrcp.f32 %v3150_v57  ;;  %v15714_v57 = vld [vmem:[#allocation123_spill] sm:$0xff]  ;;  %15715 = vst [vmem:[#allocation115_spill] sm:$0xff] %v13670_v50  ;;  %v1685_v15 = vpop.f32.mrf.mxu1  ;;  %v13700_v16 = vadd.f32 %v1683_v59, %v12345_v7  ;;  %v13715_v59 = vadd.f32 %v13522_v46, %v12345_v7 }
 0x39b   : > { %v13657_v47 = vpop.eup %9643  ;;  %9669 = vrcp.f32 %v3159_v20  ;;  %v13668_v40 = vadd.f32 %v15714_v57, %v12339_v0  ;;  %v8470_v20 = vmul.f32 -1.442695, %v13648_v39  ;;  %v8471_v50 = vmul.f32 -1.442695, %v13661_v11  ;;  %v13694_v14 = vpop.f32.mrf.mxu0 }
 0x39c   : > { %v13663_v37 = vpop.eup %9645  ;;  %9671 = vrcp.f32 %v3160_v26  ;;  %v8469_v26 = vmul.f32 -1.442695, %v13655_v42  ;;  %15718 = vst [vmem:[#allocation29_spill] sm:$0xff] %v13694_v14  ;;  %v8490_v17 = vmul.f32 -1.442695, %v13700_v16 }
 0x39d   : > { %v13672_v60 = vpop.eup %9647  ;;  %9673 = vpow2.f32 %v8458_v43  ;;  %v13687_v43 = vadd.f32 %v1679_v5, %v12355_v48  ;;  %v8478_v61 = vmul.f32 -1.442695, %v13668_v40  ;;  %v13718_v29 = vpop.f32.mrf.mxu0 }
 0x39e   : > { %v9650_v33 = vpop.eup %9649  ;;  %9675 = vpow2.f32 %v8459_v62  ;;  %v15717_v62 = vld [vmem:[#allocation111_spill] sm:$0xff]  ;;  %15720 = vst [vmem:[#allocation67_spill] sm:$0xff] %v13718_v29 }
 0x39f   : > { %v13683_v57 = vpop.eup %9651  ;;  %9677 = vpow2.f32 %v8461_v19  ;;  %v13692_v12 = vadd.f32 %v15717_v62, %v12339_v0  ;;  %v8480_v19 = vmul.f32 -1.442695, %v13676_v2  ;;  %v8481_v62 = vmul.f32 -1.442695, %v13687_v43  ;;  %v13732_v29 = vpop.f32.mrf.mxu0 }
 0x3a0   : > { %v9654_v24 = vpop.eup %9653  ;;  %9679 = vpow2.f32 %v8468_v55  ;;  %v8479_v55 = vmul.f32 -1.442695, %v13681_v13  ;;  %15724 = vst [vmem:[#allocation144_spill] sm:$0xff] %v13732_v29  ;;  %v3169_v6 = vadd.f32 1.0, %v9650_v33 }
 0x3a1   : > { %v13696_v41 = vpop.eup %9655  ;;  %9681 = vpow2.f32 %v8470_v20  ;;  %v13711_v20 = vadd.f32 %v1685_v15, %v12355_v48  ;;  %v8489_v48 = vmul.f32 -1.442695, %v13705_v44  ;;  %v13736_v36 = vpop.f32.mrf.mxu0 }
 0x3a2   : > { %v9658_v5 = vpop.eup %9657  ;;  %9683 = vpow2.f32 %v8469_v26  ;;  %v8488_v26 = vmul.f32 -1.442695, %v13692_v12  ;;  %15726 = vst [vmem:[#allocation79_spill] sm:$0xff] %v13736_v36  ;;  %v15729_v36 = vld [vmem:[#allocation39_spill] sm:$0xff] }
 0x3a3   : > { %v13707_v0 = vpop.eup %9659  ;;  %9685 = vpow2.f32 %v8471_v50  ;;  %v8491_v7 = vmul.f32 -1.442695, %v13711_v20  ;;  %v3179_v58 = vadd.f32 1.0, %v9658_v5 }
 0x3a4   : > { %v9662_v14 = vpop.eup %9661  ;;  %9687 = vpow2.f32 %v8478_v61  ;;  %v8460_v61 = vmul.f32 -1.442695, %v13715_v59 }
 0x3a5   : > { %v13720_v9 = vpop.eup %9663  ;;  %9689 = vpow2.f32 %v8480_v19 }
 0x3a6   : > { %v13723_v50 = vpop.eup %9665  ;;  %9691 = vpow2.f32 %v8479_v55  ;;  %v3170_v55 = vadd.f32 1.0, %v9654_v24 }
 0x3a7   : > { %15721 = vst [vmem:[#allocation66_spill] sm:$0xff] %v13723_v50  ;;  %v13726_v15 = vpop.eup %9667  ;;  %9693 = vpow2.f32 %v8481_v62 }
 0x3a8   : > { %15722 = vst [vmem:[#allocation53_spill] sm:$0xff] %v13726_v15  ;;  %v13729_v46 = vpop.eup %9669  ;;  %9695 = vpow2.f32 %v8488_v26  ;;  %v3180_v15 = vadd.f32 1.0, %v9662_v14 }
 0x3a9   : > { %15723 = vst [vmem:[#allocation205_spill] sm:$0xff] %v13729_v46  ;;  %v13734_v19 = vpop.eup %9671  ;;  %9697 = vpow2.f32 %v8490_v17 }
 0x3aa   : > { %15725 = vst [vmem:[#allocation119_spill] sm:$0xff] %v13734_v19  ;;  %v9674_v50 = vpop.eup %9673  ;;  %9699 = vpow2.f32 %v8489_v48  ;;  %v13738_v48 = vpop.f32.mrf.mxu0 }
 0x3ab   : > { %v9676_v53 = vpop.eup %9675  ;;  %9701 = vpow2.f32 %v8491_v7  ;;  %v3189_v26 = vadd.f32 1.0, %v9674_v50  ;;  %15727 = vst [vmem:[#allocation208_spill] sm:$0xff] %v13738_v48 }
 0x3ac   : > { %v9678_v62 = vpop.eup %9677  ;;  %9703 = vpow2.f32 %v8460_v61  ;;  %v3190_v29 = vadd.f32 1.0, %v9676_v53  ;;  %v13740_v53 = vpop.f32.mrf.mxu0 }
 0x3ad   : > { %v9680_v46 = vpop.eup %9679  ;;  %9705 = vrcp.f32 %v3169_v6  ;;  %15728 = vst [vmem:[#allocation145_spill] sm:$0xff] %v13740_v53 }
 0x3ae   : > { %v9682_v22 = vpop.eup %9681  ;;  %9707 = vrcp.f32 %v3170_v55  ;;  %v3199_v33 = vadd.f32 1.0, %v9680_v46  ;;  %v406_v55 = vld [vmem:[#allocation6 + $0x8] sm:$0x3]  ;;  %v13748_v53 = vpop.f32.mrf.mxu0 }
 0x3af   : > { %v9684_v19 = vpop.eup %9683  ;;  %9709 = vrcp.f32 %v3179_v58  ;;  %15731 = vst [vmem:[#allocation69_spill] sm:$0xff] %v13748_v53 }
 0x3b0   : > { %v9686_v17 = vpop.eup %9685  ;;  %9711 = vrcp.f32 %v3180_v15  ;;  %v3200_v24 = vadd.f32 1.0, %v9684_v19 }
 0x3b1   : > { %v9688_v5 = vpop.eup %9687  ;;  %9713 = vrcp.f32 %v3189_v26 }
 0x3b2   : > { %v9690_v14 = vpop.eup %9689  ;;  %9715 = vrcp.f32 %v3190_v29  ;;  %v3209_v7 = vadd.f32 1.0, %v9688_v5  ;;  %v13743_v29 = vrot.slane %v406_v55, %v15729_v36  ;;  %v15730_v5 = vld [vmem:[#allocation41_spill] sm:$0xff]  ;;  %v3192_v36 = vadd.f32 1.0, %v9678_v62 }
 0x3b3   : > { %v9692_v61 = vpop.eup %9691  ;;  %9717 = vrcp.f32 %v3199_v33  ;;  %v13746_v33 = vrot.slane %v406_v55, %v15730_v5  ;;  %v15734_v55 = vld [vmem:[#allocation107_spill] sm:$0xff] }
 0x3b4   : > { %v9694_v6 = vpop.eup %9693  ;;  %9719 = vrcp.f32 %v3200_v24  ;;  %v3210_v50 = vadd.f32 1.0, %v9692_v61  ;;  %v3211_v61 = vadd.f32 1.0, %v9690_v14  ;;  %v13756_v5 = vadd.f32 %v15734_v55, %v13743_v29 }
 0x3b5   : > { %v9696_v58 = vpop.eup %9695  ;;  %9721 = vrcp.f32 %v3209_v7  ;;  %v3212_v46 = vadd.f32 1.0, %v9694_v6  ;;  %v3202_v6 = vadd.f32 1.0, %v9686_v17  ;;  %v3172_v55 = vadd.f32 1.0, %v13696_v41 }
 0x3b6   : > { %v9698_v15 = vpop.eup %9697  ;;  %9723 = vrcp.f32 %v3210_v50  ;;  %v3219_v19 = vadd.f32 1.0, %v9696_v58  ;;  %15735 = vst [vmem:[#allocation114_spill] sm:$0xff] %v13756_v5 }
 0x3b7   : > { %v9700_v48 = vpop.eup %9699  ;;  %9725 = vrcp.f32 %v3212_v46  ;;  %v3221_v26 = vadd.f32 1.0, %v9698_v15  ;;  %v3201_v46 = vadd.f32 1.0, %v9682_v22 }
 0x3b8   : > { %v9702_v24 = vpop.eup %9701  ;;  %9727 = vrcp.f32 %v3219_v19  ;;  %v3220_v54 = vadd.f32 1.0, %v9700_v48  ;;  %v15736_v48 = vld [vmem:[#allocation98_spill] sm:$0xff] }
 0x3b9   : > { %v9704_v7 = vpop.eup %9703  ;;  %9729 = vrcp.f32 %v3221_v26  ;;  %v3222_v50 = vadd.f32 1.0, %v9702_v24  ;;  %v13760_v14 = vadd.f32 %v15736_v48, %v13746_v33  ;;  %v13764_v26 = vpop.f32.mrf.mxu0  ;;  %v3181_v24 = vadd.f32 1.0, %v13707_v0 }
 0x3ba   : > { %v13750_v58 = vpop.eup %9705  ;;  %9731 = vrcp.f32 %v3220_v54  ;;  %v3191_v17 = vadd.f32 1.0, %v9704_v7  ;;  %15738 = vst [vmem:[#allocation75_spill] sm:$0xff] %v13764_v26  ;;  %v3182_v54 = vadd.f32 1.0, %v13720_v9  ;;  %v13776_v7 = vmul.f32 -1.442695, %v13756_v5 }
 0x3bb   : > { %15732 = vst [vmem:[#allocation59_spill] sm:$0xff] %v13750_v58  ;;  %v13752_v15 = vpop.eup %9707  ;;  %9733 = vrcp.f32 %v3222_v50  ;;  %15737 = vst [vmem:[#allocation128_spill] sm:$0xff] %v13760_v14  ;;  %v3171_v9 = vadd.f32 1.0, %v13683_v57  ;;  %v3162_v5 = vadd.f32 1.0, %v13672_v60  ;;  %v15748_v57 = vld [vmem:[#allocation95_spill] sm:$0xff]  ;;  %v15754_v58 = vld [vmem:[#allocation46_spill] sm:$0xff] }
 0x3bc   : > { %15733 = vst [vmem:[#allocation212_spill] sm:$0xff] %v13752_v15  ;;  %v13762_v19 = vpop.eup %9709  ;;  %9735 = vrcp.f32 %v3211_v61  ;;  %15739 = vst [vmem:[#allocation215_spill] sm:$0xff] %v13776_v7  ;;  %v13779_v61 = vmul.f32 -1.442695, %v13760_v14  ;;  %v15746_v14 = vld [vmem:[#allocation58_spill] sm:$0xff] }
 0x3bd   : > { %v13766_v22 = vpop.eup %9711  ;;  %9737 = vrcp.f32 %v3202_v6  ;;  %v15741_v6 = vld [vmem:[#allocation60_spill] sm:$0xff]  ;;  %v13799_v53 = vadd.f32 %v15746_v14, %v13743_v29  ;;  %v15752_v7 = vld [vmem:[#allocation50_spill] sm:$0xff]  ;;  %v3152_v14 = vadd.f32 1.0, %v13657_v47 }
 0x3be   : > { %v13769_v62 = vpop.eup %9713  ;;  %9739 = vrcp.f32 %v3201_v46  ;;  %15740 = vst [vmem:[#allocation30_spill] sm:$0xff] %v13779_v61  ;;  %v13786_v0 = vadd.f32 %v15741_v6, %v13743_v29  ;;  %v15743_v46 = vld [vmem:[#allocation106_spill] sm:$0xff]  ;;  %v3161_v61 = vadd.f32 1.0, %v13663_v37  ;;  %v13812_v60 = vadd.f32 %v15752_v7, %v13746_v33 }
 0x3bf   : > { %v13772_v50 = vpop.eup %9715  ;;  %9741 = vrcp.f32 %v3192_v36  ;;  %v13790_v26 = vadd.f32 %v15743_v46, %v13746_v33  ;;  %v13792_v36 = vpop.f32.mrf.mxu0  ;;  %15747 = vst [vmem:[#allocation124_spill] sm:$0xff] %v13799_v53  ;;  %v15750_v46 = vld [vmem:[#allocation52_spill] sm:$0xff]  ;;  %v13821_v37 = vadd.f32 %v13174_v8, %v13746_v33  ;;  %v13834_v45 = vmul.f32 -1.442695, %v13799_v53 }
 0x3c0   : > { %v13781_v48 = vpop.eup %9717  ;;  %9743 = vrcp.f32 %v3191_v17  ;;  %15742 = vst [vmem:[#allocation81_spill] sm:$0xff] %v13786_v0  ;;  %15745 = vst [vmem:[#allocation62_spill] sm:$0xff] %v13792_v36  ;;  %v13803_v17 = vadd.f32 %v15748_v57, %v13746_v33  ;;  %v13808_v36 = vadd.f32 %v15750_v46, %v13743_v29  ;;  %v13817_v57 = vadd.f32 %v15754_v58, %v13743_v29 }
 0x3c1   : > { %15744 = vst [vmem:[#allocation31_spill] sm:$0xff] %v13790_v26  ;;  %v13794_v41 = vpop.eup %9719  ;;  %9745 = vrcp.f32 %v3182_v54  ;;  %15753 = vst [vmem:[#allocation122_spill] sm:$0xff] %v13812_v60  ;;  %v3151_v46 = vadd.f32 1.0, %v13650_v21  ;;  %v13825_v15 = vmul.f32 -1.442695, %v13786_v0  ;;  %v13830_v47 = vpop.f32.mrf.mxu0  ;;  %v3142_v58 = vadd.f32 1.0, %v13582_v51 }
 0x3c2   : > { %15749 = vst [vmem:[#allocation22_spill] sm:$0xff] %v13803_v17  ;;  %v9722_v6 = vpop.eup %9721  ;;  %9747 = vrcp.f32 %v3181_v24  ;;  %15751 = vst [vmem:[#allocation148_spill] sm:$0xff] %v13808_v36  ;;  %v13828_v7 = vmul.f32 -1.442695, %v13790_v26  ;;  %v13837_v8 = vmul.f32 -1.442695, %v13803_v17 }
 0x3c3   : > { %v9724_v54 = vpop.eup %9723  ;;  %9749 = vrcp.f32 %v3172_v55  ;;  %15755 = vst [vmem:[#allocation23_spill] sm:$0xff] %v13817_v57  ;;  %15756 = vst [vmem:[#allocation25_spill] sm:$0xff] %v13821_v37  ;;  %v13841_v0 = vmul.f32 -1.442695, %v13808_v36  ;;  %v13844_v26 = vmul.f32 -1.442695, %v13812_v60  ;;  %v13857_v36 = vadd.f32 %v13188_v49, %v13743_v29  ;;  %v13859_v60 = vpop.f32.mrf.mxu0 }
 0x3c4   : > { %v9726_v24 = vpop.eup %9725  ;;  %9751 = vrcp.f32 %v3171_v9  ;;  %15757 = vst [vmem:[#allocation103_spill] sm:$0xff] %v13830_v47  ;;  %v3141_v9 = vadd.f32 1.0, %v13573_v10  ;;  %v3132_v51 = vadd.f32 1.0, %v13566_v23  ;;  %v13851_v53 = vmul.f32 -1.442695, %v13821_v37 }
 0x3c5   : > { %v9728_v55 = vpop.eup %9727  ;;  %9753 = vrcp.f32 %v3162_v5  ;;  %v13848_v5 = vmul.f32 -1.442695, %v13817_v57  ;;  %v3131_v10 = vadd.f32 1.0, %v13559_v52  ;;  %v3121_v52 = vadd.f32 1.0, %v13542_v34  ;;  %v13874_v34 = vpop.f32.mrf.mxu0 }
 0x3c6   : > { %v9730_v21 = vpop.eup %9729  ;;  %9755 = vrcp.f32 %v3161_v61  ;;  %15758 = vst [vmem:[#allocation170_spill] sm:$0xff] %v13851_v53  ;;  %v4179_v57 = vmul.f32 %v9728_v55, %v13692_v12  ;;  %v15764_v55 = vld [vmem:[#allocation166_spill] sm:$0xff] }
 0x3c7   : > { %v9732_v47 = vpop.eup %9731  ;;  %9757 = vrcp.f32 %v3152_v14  ;;  %v3122_v14 = vadd.f32 1.0, %v13552_v35  ;;  %v4169_v35 = vmul.f32 %v9722_v6, %v13668_v40  ;;  %v3102_v40 = vadd.f32 1.0, %v13437_v25 }
 0x3c8   : > { %v9734_v17 = vpop.eup %9733  ;;  %9759 = vrcp.f32 %v3151_v46  ;;  %v4180_v61 = vmul.f32 %v9732_v47, %v13705_v44  ;;  %v4170_v44 = vmul.f32 %v9724_v54, %v13681_v13  ;;  %v4181_v46 = vmul.f32 %v9730_v21, %v13700_v16  ;;  %v15760_v54 = vld [vmem:[#allocation131_spill] sm:$0xff] }
 0x3c9   : > { %v9736_v23 = vpop.eup %9735  ;;  %9761 = vrcp.f32 %v3142_v58  ;;  %v4182_v37 = vmul.f32 %v9734_v17, %v13711_v20  ;;  %v3112_v47 = vadd.f32 1.0, %v13536_v28  ;;  %v4172_v58 = vmul.f32 %v9726_v24, %v13687_v43 }
 0x3ca   : > { %v9738_v53 = vpop.eup %9737  ;;  %9763 = vrcp.f32 %v3141_v9  ;;  %4359 = vmatprep.subr.mxu0 %v4180_v61  ;;  %v3111_v20 = vadd.f32 1.0, %v13530_v31  ;;  %v4160_v13 = vmul.f32 %v13794_v41, %v13655_v42  ;;  %v4171_v16 = vmul.f32 %v9736_v23, %v13676_v2  ;;  %v15768_v23 = vld [vmem:[#allocation87_spill] sm:$0xff] }
 0x3cb   : > { %v9740_v49 = vpop.eup %9739  ;;  %9765 = vrcp.f32 %v3132_v51  ;;  %4430 = vmatprep.subr.mxu1 %v4182_v37  ;;  %4360 = vmatpush2.msra.mxu0 %v4179_v57  ;;  %v4159_v43 = vmul.f32 %v13781_v48, %v13640_v63  ;;  %v4162_v17 = vmul.f32 %v9738_v53, %v13661_v11  ;;  %v3101_v42 = vadd.f32 1.0, %v13430_v4  ;;  %v15763_v37 = vld [vmem:[#allocation188_spill] sm:$0xff] }
 0x3cc   : > { %v9742_v12 = vpop.eup %9741  ;;  %9767 = vrcp.f32 %v3131_v10  ;;  %4431 = vmatpush2.msra.mxu1 %v4181_v46  ;;  %4361 = vmatprep.subr.mxu0 %v4170_v44  ;;  %v4150_v2 = vmul.f32 %v13772_v50, %v13628_v38  ;;  %v4161_v41 = vmul.f32 %v9740_v49, %v13648_v39  ;;  %v3092_v6 = vadd.f32 1.0, %v13423_v1  ;;  %v13892_v1 = vpop.f32.mrf.mxu0  ;;  %v15767_v51 = vld [vmem:[#allocation72_spill] sm:$0xff]  ;;  %v15770_v44 = vld [vmem:[#allocation34_spill] sm:$0xff] }
 0x3cd   : > { %v9744_v28 = vpop.eup %9743  ;;  %9769 = vrcp.f32 %v3122_v14  ;;  %4432 = vmatprep.subr.mxu1 %v4172_v58  ;;  %4362 = vmatpush2.msra.mxu0 %v4169_v35  ;;  %v4149_v63 = vmul.f32 %v13769_v62, %v13622_v32  ;;  %v4152_v11 = vmul.f32 %v9742_v12, %v13634_v3  ;;  %v3091_v53 = vadd.f32 1.0, %v13416_v30  ;;  %v15759_v62 = vld [vmem:[#allocation202_spill] sm:$0xff]  ;;  %v15769_v14 = vld [vmem:[#allocation119_spill] sm:$0xff] }
 0x3ce   : > { %v9746_v31 = vpop.eup %9745  ;;  %9771 = vrcp.f32 %v3121_v52  ;;  %4433 = vmatpush2.msra.mxu1 %v4171_v16  ;;  %4363 = vmatprep.subr.mxu0 %v4160_v13  ;;  %v4140_v38 = vmul.f32 %v13766_v22, %v13601_v27  ;;  %v4151_v39 = vmul.f32 %v9744_v28, %v13715_v59  ;;  %v3082_v32 = vadd.f32 1.0, %v13406_v56  ;;  %v15761_v59 = vld [vmem:[#allocation150_spill] sm:$0xff]  ;;  %v15762_v22 = vld [vmem:[#allocation212_spill] sm:$0xff]  ;;  %v13913_v35 = vpop.f32.mrf.mxu0  ;;  %v15773_v12 = vld [vmem:[#allocation167_spill] sm:$0xff] }
 0x3cf   : > { %v9748_v25 = vpop.eup %9747  ;;  %9773 = vrcp.f32 %v3112_v47  ;;  %4434 = vmatprep.subr.mxu1 %v4162_v17  ;;  %4364 = vmatpush2.msra.mxu0 %v4159_v43  ;;  %v4139_v3 = vmul.f32 %v13762_v19, %v13587_v18  ;;  %v4142_v48 = vmul.f32 %v9746_v31, %v15759_v62  ;;  %v3081_v27 = vadd.f32 1.0, %v15760_v54  ;;  %v15765_v18 = vld [vmem:[#allocation151_spill] sm:$0xff]  ;;  %v15771_v49 = vld [vmem:[#allocation198_spill] sm:$0xff]  ;;  %15772 = vst [vmem:[#allocation143_spill] sm:$0xff] %v13913_v35  ;;  %v15775_v16 = vld [vmem:[#allocation153_spill] sm:$0xff] }
 0x3d0   : > { %v9750_v4 = vpop.eup %9749  ;;  %9775 = vrcp.f32 %v3111_v20  ;;  %4435 = vmatpush2.msra.mxu1 %v4161_v41  ;;  %4365 = vmatprep.subr.mxu0 %v4150_v2  ;;  %v4130_v57 = vmul.f32 %v15762_v22, %v15761_v59  ;;  %v4141_v24 = vmul.f32 %v9748_v25, %v15763_v37  ;;  %v3072_v21 = vadd.f32 1.0, %v15764_v55  ;;  %v15766_v19 = vld [vmem:[#allocation59_spill] sm:$0xff]  ;;  %v15774_v20 = vld [vmem:[#allocation205_spill] sm:$0xff]  ;;  %v15776_v17 = vld [vmem:[#allocation110_spill] sm:$0xff]  ;;  %v13945_v55 = vpop.f32.mrf.mxu0 }
 0x3d1   : > { %v9752_v50 = vpop.eup %9751  ;;  %9777 = vrcp.f32 %v3102_v40  ;;  %4436 = vmatprep.subr.mxu1 %v4152_v11  ;;  %4366 = vmatpush2.msra.mxu0 %v4149_v63  ;;  %v4129_v9 = vmul.f32 %v15766_v19, %v15765_v18  ;;  %v4132_v10 = vmul.f32 %v9750_v4, %v15767_v51  ;;  %v4120_v52 = vmul.f32 %v15769_v14, %v15768_v23  ;;  %v15777_v31 = vld [vmem:[#allocation182_spill] sm:$0xff]  ;;  %v15778_v2 = vld [vmem:[#allocation169_spill] sm:$0xff]  ;;  %v15789_v22 = vld [vmem:[#allocation120_spill] sm:$0xff] }
 0x3d2   : > { %v9754_v30 = vpop.eup %9753  ;;  %9779 = vrcp.f32 %v3101_v42  ;;  %4437 = vmatpush2.msra.mxu1 %v4151_v39  ;;  %4367 = vmatprep.subr.mxu0 %v4140_v38  ;;  %v4131_v46 = vmul.f32 %v9752_v50, %v15770_v44  ;;  %v13911_v47 = vadd.f32 %v15771_v49, %v13746_v33  ;;  %v4119_v13 = vmul.f32 %v15774_v20, %v15773_v12  ;;  %v15779_v41 = vld [vmem:[#allocation53_spill] sm:$0xff]  ;;  %v15781_v4 = vld [vmem:[#allocation54_spill] sm:$0xff]  ;;  %v15790_v37 = vld [vmem:[#allocation187_spill] sm:$0xff] }
 0x3d3   : > { %v9756_v56 = vpop.eup %9755  ;;  %9781 = vrcp.f32 %v3092_v6  ;;  %4438 = vmatprep.subr.mxu1 %v4142_v48  ;;  %4368 = vmatpush2.msra.mxu0 %v4139_v3  ;;  %v4122_v28 = vmul.f32 %v9754_v30, %v15775_v16  ;;  %v13919_v40 = vmul.f32 -1.442695, %v13857_v36  ;;  %v13923_v42 = vmul.f32 %v15777_v31, %v15776_v17  ;;  %v15780_v6 = vld [vmem:[#allocation36_spill] sm:$0xff]  ;;  %v15783_v39 = vld [vmem:[#allocation21_spill] sm:$0xff]  ;;  %v15784_v50 = vld [vmem:[#allocation66_spill] sm:$0xff]  ;;  %15791 = vst [vmem:[#allocation76_spill] sm:$0xff] %v13945_v55 }
 0x3d4   : > { %v9758_v61 = vpop.eup %9757  ;;  %9783 = vrcp.f32 %v3091_v53  ;;  %4439 = vmatpush2.msra.mxu1 %v4141_v24  ;;  %4369 = vmatprep.subr.mxu0 %v4130_v57  ;;  %v4110_v25 = vmul.f32 %v15779_v41, %v15778_v2  ;;  %v4121_v63 = vmul.f32 %v9756_v56, %v15780_v6  ;;  %v15782_v53 = vld [vmem:[#allocation85_spill] sm:$0xff]  ;;  %v15785_v3 = vld [vmem:[#allocation155_spill] sm:$0xff]  ;;  %v15786_v30 = vld [vmem:[#allocation48_spill] sm:$0xff]  ;;  %v13943_v56 = vmul.f32 -1.442695, %v13911_v47 }
 0x3d5   : > { %v9760_v58 = vpop.eup %9759  ;;  %9785 = vrcp.f32 %v3082_v32  ;;  %4440 = vmatprep.subr.mxu1 %v4132_v10  ;;  %4370 = vmatpush2.msra.mxu0 %v4129_v9  ;;  %v13930_v38 = vmul.f32 %v15782_v53, %v15781_v4  ;;  %v4109_v32 = vmul.f32 %v15784_v50, %v15783_v39  ;;  %v4112_v62 = vmul.f32 %v9758_v61, %v15785_v3  ;;  %v15787_v54 = vld [vmem:[#allocation134_spill] sm:$0xff]  ;;  %v15788_v59 = vld [vmem:[#allocation189_spill] sm:$0xff]  ;;  %v15793_v19 = vld [vmem:[#allocation32_spill] sm:$0xff] }
 0x3d6   : > { %v9762_v43 = vpop.eup %9761  ;;  %9787 = vrcp.f32 %v3081_v27  ;;  %4441 = vmatpush2.msra.mxu1 %v4131_v46  ;;  %4371 = vmatprep.subr.mxu0 %v4120_v52  ;;  %v13937_v27 = vmul.f32 %v15787_v54, %v15786_v30  ;;  %v4100_v57 = vmul.f32 %v15789_v22, %v15788_v59  ;;  %v4111_v24 = vmul.f32 %v9760_v58, %v15790_v37  ;;  %v15792_v18 = vld [vmem:[#allocation74_spill] sm:$0xff]  ;;  %v15794_v51 = vld [vmem:[#allocation163_spill] sm:$0xff]  ;;  %v15795_v10 = vld [vmem:[#allocation121_spill] sm:$0xff]  ;;  %v13977_v22 = vpop.f32.mrf.mxu0 }
 0x3d7   : > { %v9764_v11 = vpop.eup %9763  ;;  %9789 = vrcp.f32 %v3072_v21  ;;  %4442 = vmatprep.subr.mxu1 %v4122_v28  ;;  %4372 = vmatpush2.msra.mxu0 %v4119_v13  ;;  %v13949_v9 = vmul.f32 %v15793_v19, %v15792_v18  ;;  %v4099_v61 = vmul.f32 %v15795_v10, %v15794_v51  ;;  %v15796_v23 = vld [vmem:[#allocation55_spill] sm:$0xff]  ;;  %v15798_v46 = vld [vmem:[#allocation161_spill] sm:$0xff]  ;;  %v15799_v49 = vld [vmem:[#allocation108_spill] sm:$0xff]  ;;  %15814 = vst [vmem:[#allocation99_spill] sm:$0xff] %v13977_v22 }
 0x3d8   : > { %v9766_v48 = vpop.eup %9765  ;;  %4443 = vmatpush2.msra.mxu1 %v4121_v63  ;;  %4373 = vmatprep.subr.mxu0 %v4110_v25  ;;  %v4102_v14 = vmul.f32 %v9762_v43, %v15796_v23  ;;  %v15797_v52 = vld [vmem:[#allocation215_spill] sm:$0xff]  ;;  %v13957_v58 = vmul.f32 %v15799_v49, %v15798_v46  ;;  %v15801_v20 = vld [vmem:[#allocation156_spill] sm:$0xff]  ;;  %v15802_v16 = vld [vmem:[#allocation177_spill] sm:$0xff] }
 0x3d9   : > { %v9768_v21 = vpop.eup %9767  ;;  %9791 = vpow2.f32 %v15797_v52  ;;  %4444 = vmatprep.subr.mxu1 %v4112_v62  ;;  %4374 = vmatpush2.msra.mxu0 %v4109_v32  ;;  %v15800_v12 = vld [vmem:[#allocation191_spill] sm:$0xff]  ;;  %v4101_v28 = vmul.f32 %v9764_v11, %v15802_v16  ;;  %v15803_v17 = vld [vmem:[#allocation30_spill] sm:$0xff]  ;;  %v15805_v2 = vld [vmem:[#allocation88_spill] sm:$0xff] }
 0x3da   : > { %v9770_v44 = vpop.eup %9769  ;;  %v4090_v13 = vmul.f32 %v15801_v20, %v15800_v12  ;;  %9793 = vpow2.f32 %v15803_v17  ;;  %4445 = vmatpush2.msra.mxu1 %v4111_v24  ;;  %4375 = vmatprep.subr.mxu0 %v4100_v57  ;;  %v15804_v43 = vld [vmem:[#allocation194_spill] sm:$0xff]  ;;  %v15806_v25 = vld [vmem:[#allocation129_spill] sm:$0xff]  ;;  %v15808_v4 = vld [vmem:[#allocation179_spill] sm:$0xff] }
 0x3db   : > { %v9772_v31 = vpop.eup %9771  ;;  %v13965_v41 = vmul.f32 %v15805_v2, %v15804_v43  ;;  %v15807_v6 = vld [vmem:[#allocation117_spill] sm:$0xff]  ;;  %v4092_v53 = vmul.f32 %v9766_v48, %v15808_v4  ;;  %9795 = vpow2.f32 %v13825_v15  ;;  %4446 = vmatprep.subr.mxu1 %v4102_v14  ;;  %4376 = vmatpush2.msra.mxu0 %v4099_v61  ;;  %v15809_v11 = vld [vmem:[#allocation192_spill] sm:$0xff]  ;;  %v15815_v57 = vld [vmem:[#allocation171_spill] sm:$0xff] }
 0x3dc   : > { %v4089_v63 = vmul.f32 %v15807_v6, %v15806_v25  ;;  %v9774_v39 = vpop.eup %9773  ;;  %v15810_v50 = vld [vmem:[#allocation185_spill] sm:$0xff]  ;;  %v15812_v62 = vld [vmem:[#allocation204_spill] sm:$0xff]  ;;  %9797 = vpow2.f32 %v13828_v7  ;;  %4447 = vmatpush2.msra.mxu1 %v4101_v28  ;;  %4377 = vmatprep.subr.mxu0 %v4090_v13  ;;  %v15816_v15 = vld [vmem:[#allocation195_spill] sm:$0xff] }
 0x3dd   : > { %v4059_v32 = vmul.f32 %v15810_v50, %v15809_v11  ;;  %v15811_v3 = vld [vmem:[#allocation197_spill] sm:$0xff]  ;;  %v9776_v48 = vpop.eup %9775  ;;  %v4079_v37 = vmul.f32 %v15816_v15, %v15815_v57  ;;  %9799 = vpow2.f32 %v13834_v45  ;;  %v15818_v19 = vld [vmem:[#allocation91_spill] sm:$0xff]  ;;  %4448 = vmatprep.subr.mxu1 %v4092_v53  ;;  %v15819_v7 = vld [vmem:[#allocation176_spill] sm:$0xff] }
 0x3de   : > { %v4080_v30 = vmul.f32 %v15812_v62, %v15811_v3  ;;  %v15813_v54 = vld [vmem:[#allocation141_spill] sm:$0xff]  ;;  %v13985_v51 = vadd.f32 %v15818_v19, %v13746_v33  ;;  %4378 = vmatpush2.msra.mxu0 %v4089_v63  ;;  %v15820_v10 = vld [vmem:[#allocation190_spill] sm:$0xff]  ;;  %v15821_v23 = vld [vmem:[#allocation68_spill] sm:$0xff]  ;;  %9801 = vpow2.f32 %v13837_v8 }
 0x3df   : > { %v4091_v59 = vmul.f32 %v9768_v21, %v15813_v54  ;;  %v15817_v24 = vld [vmem:[#allocation137_spill] sm:$0xff]  ;;  %v9778_v21 = vpop.eup %9777  ;;  %v4070_v61 = vmul.f32 %v15820_v10, %v15819_v7  ;;  %v4081_v14 = vmul.f32 %v9772_v31, %v15821_v23  ;;  %v15822_v52 = vld [vmem:[#allocation26_spill] sm:$0xff]  ;;  %v15825_v20 = vld [vmem:[#allocation20_spill] sm:$0xff]  ;;  %9803 = vpow2.f32 %v13841_v0  ;;  %v14011_v0 = vpop.f32.mrf.mxu0 }
 0x3e0   : > { %v4082_v18 = vmul.f32 %v9770_v44, %v15817_v24  ;;  %v13993_v46 = vadd.f32 %v15822_v52, %v13743_v29  ;;  %4379 = vmatprep.subr.mxu0 %v4080_v30  ;;  %v9780_v45 = vpop.eup %9779  ;;  %v15823_v44 = vld [vmem:[#allocation178_spill] sm:$0xff]  ;;  %v15824_v49 = vld [vmem:[#allocation49_spill] sm:$0xff]  ;;  %v4072_v13 = vmul.f32 %v9774_v39, %v15825_v20  ;;  %v15828_v31 = vld [vmem:[#allocation159_spill] sm:$0xff]  ;;  %9805 = vpow2.f32 %v13844_v26  ;;  %15831 = vst [vmem:[#allocation104_spill] sm:$0xff] %v14011_v0 }
 0x3e1   : > { %4449 = vmatpush2.msra.mxu1 %v4091_v59  ;;  %v4069_v12 = vmul.f32 %v15824_v49, %v15823_v44  ;;  %v15826_v16 = vld [vmem:[#allocation105_spill] sm:$0xff]  ;;  %4380 = vmatpush2.msra.mxu0 %v4079_v37  ;;  %v9782_v8 = vpop.eup %9781  ;;  %v15827_v17 = vld [vmem:[#allocation162_spill] sm:$0xff]  ;;  %v15829_v2 = vld [vmem:[#allocation140_spill] sm:$0xff]  ;;  %9807 = vpow2.f32 %v13848_v5  ;;  %v8303_v11 = vmul.f32 -1.442695, %v13985_v51 }
 0x3e2   : > { %v14001_v28 = vadd.f32 %v15826_v16, %v13746_v33  ;;  %4450 = vmatprep.subr.mxu1 %v4082_v18  ;;  %v4060_v43 = vmul.f32 %v15828_v31, %v15827_v17  ;;  %v4071_v25 = vmul.f32 %v9776_v48, %v15829_v2  ;;  %v15830_v6 = vld [vmem:[#allocation101_spill] sm:$0xff]  ;;  %4381 = vmatprep.subr.mxu0 %v4070_v61  ;;  %v9784_v4 = vpop.eup %9783  ;;  %v15832_v53 = vld [vmem:[#allocation132_spill] sm:$0xff]  ;;  %v15833_v50 = vld [vmem:[#allocation158_spill] sm:$0xff]  ;;  %v8312_v59 = vmul.f32 -1.442695, %v13993_v46 }
 0x3e3   : > { %v14009_v63 = vadd.f32 %v15830_v6, %v13743_v29  ;;  %4451 = vmatpush2.msra.mxu1 %v4081_v14  ;;  %v4062_v39 = vmul.f32 %v9778_v21, %v15832_v53  ;;  %v14018_v3 = vadd.f32 %v15833_v50, %v13746_v33  ;;  %4382 = vmatpush2.msra.mxu0 %v4069_v12  ;;  %v9786_v26 = vpop.eup %9785  ;;  %v15834_v62 = vld [vmem:[#allocation183_spill] sm:$0xff]  ;;  %v15835_v54 = vld [vmem:[#allocation170_spill] sm:$0xff]  ;;  %v15838_v18 = vld [vmem:[#allocation29_spill] sm:$0xff] }
 0x3e4   : > { %4452 = vmatprep.subr.mxu1 %v4072_v13  ;;  %v4061_v30 = vmul.f32 %v9780_v45, %v15834_v62  ;;  %9809 = vpow2.f32 %v15835_v54  ;;  %4383 = vmatprep.subr.mxu0 %v4060_v43  ;;  %v15836_v48 = vld [vmem:[#allocation115_spill] sm:$0xff]  ;;  %v9788_v57 = vpop.eup %9787  ;;  %v15837_v15 = vld [vmem:[#allocation118_spill] sm:$0xff]  ;;  %v8313_v24 = vmul.f32 -1.442695, %v14001_v28  ;;  %v14032_v19 = vadd.f32 %v15838_v18, %v13746_v33  ;;  %v15839_v7 = vld [vmem:[#allocation184_spill] sm:$0xff] }
 0x3e5   : > { %4453 = vmatpush2.msra.mxu1 %v4071_v25  ;;  %v14025_v5 = vadd.f32 %v15836_v48, %v13743_v29  ;;  %v4052_v37 = vmul.f32 %v9782_v8, %v15837_v15  ;;  %9811 = vpow2.f32 %v13919_v40  ;;  %4384 = vmatpush2.msra.mxu0 %v4059_v32  ;;  %v9790_v21 = vpop.eup %9789  ;;  %v4051_v10 = vmul.f32 %v9784_v4, %v15839_v7  ;;  %v15840_v61 = vld [vmem:[#allocation37_spill] sm:$0xff]  ;;  %v14042_v40 = vpop.f32.mrf.mxu0  ;;  %v15842_v32 = vld [vmem:[#allocation70_spill] sm:$0xff]  ;;  %v15843_v45 = vld [vmem:[#allocation164_spill] sm:$0xff] }
 0x3e6   : > { %4454 = vmatprep.subr.mxu1 %v4062_v39  ;;  %9813 = vpow2.f32 %v13943_v56  ;;  %v14038_v23 = vadd.f32 %v15840_v61, %v13743_v29  ;;  %v8322_v14 = vmul.f32 -1.442695, %v14009_v63  ;;  %4385 = vmatprep.subr.mxu0 %v13965_v41  ;;  %15841 = vst [vmem:[#allocation24_spill] sm:$0xff] %v14042_v40  ;;  %v4042_v52 = vmul.f32 %v9786_v26, %v15842_v32  ;;  %v14051_v49 = vpop.eup %9791  ;;  %v15844_v12 = vld [vmem:[#allocation78_spill] sm:$0xff]  ;;  %v15845_v41 = vld [vmem:[#allocation172_spill] sm:$0xff]  ;;  %v15849_v4 = vld [vmem:[#allocation33_spill] sm:$0xff] }
 0x3e7   : > { %4455 = vmatpush2.msra.mxu1 %v4061_v30  ;;  %v14047_v44 = vadd.f32 %v15843_v45, %v13746_v33  ;;  %9815 = vpow2.f32 %v8303_v11  ;;  %v8323_v56 = vmul.f32 -1.442695, %v14018_v3  ;;  %4386 = vmatpush2.msra.mxu0 %v13957_v58  ;;  %v4041_v20 = vmul.f32 %v9788_v57, %v15844_v12  ;;  %v14060_v8 = vpop.eup %9793  ;;  %v15846_v17 = vld [vmem:[#allocation86_spill] sm:$0xff]  ;;  %v15848_v6 = vld [vmem:[#allocation56_spill] sm:$0xff]  ;;  %v14079_v50 = vpop.f32.mrf.mxu0 }
 0x3e8   : > { %4456 = vmatprep.subr.mxu1 %v4052_v37  ;;  %v14056_v13 = vadd.f32 %v15845_v41, %v13743_v29  ;;  %9817 = vpow2.f32 %v8312_v59  ;;  %v8332_v16 = vmul.f32 -1.442695, %v14025_v5  ;;  %4387 = vmatprep.subr.mxu0 %v13949_v9  ;;  %v4032_v31 = vmul.f32 %v9790_v21, %v15846_v17  ;;  %v15847_v58 = vld [vmem:[#allocation174_spill] sm:$0xff]  ;;  %v14069_v25 = vpop.eup %9795  ;;  %v15850_v9 = vld [vmem:[#allocation45_spill] sm:$0xff]  ;;  %15851 = vst [vmem:[#allocation160_spill] sm:$0xff] %v14079_v50  ;;  %v15855_v37 = vld [vmem:[#allocation168_spill] sm:$0xff] }
 0x3e9   : > { %4457 = vmatpush2.msra.mxu1 %v4051_v10  ;;  %v14065_v43 = vadd.f32 %v15847_v58, %v13746_v33  ;;  %9819 = vpow2.f32 %v8313_v24  ;;  %v8333_v2 = vmul.f32 -1.442695, %v14032_v19  ;;  %4388 = vmatpush2.msra.mxu0 %v13937_v27  ;;  %v4031_v53 = vmul.f32 %v15849_v4, %v15848_v6  ;;  %v14081_v26 = vpop.eup %9797  ;;  %v15852_v27 = vld [vmem:[#allocation35_spill] sm:$0xff]  ;;  %v15853_v59 = vld [vmem:[#allocation193_spill] sm:$0xff]  ;;  %v14113_v32 = vpop.f32.mrf.mxu0  ;;  %v15860_v4 = vld [vmem:[#allocation186_spill] sm:$0xff] }
 0x3ea   : > { %4458 = vmatprep.subr.mxu1 %v4042_v52  ;;  %v14075_v39 = vadd.f32 %v15850_v9, %v13743_v29  ;;  %v8302_v11 = vmul.f32 -1.442695, %v14038_v23  ;;  %9821 = vpow2.f32 %v8322_v14  ;;  %4389 = vmatprep.subr.mxu0 %v13930_v38  ;;  %v14085_v62 = vadd.f32 %v15852_v27, %v13746_v33  ;;  %v14089_v54 = vpop.eup %9799  ;;  %v4752_v18 = vld [vmem:[#allocation8 + $0x3c8] sm:$0xff]  ;;  %v4751_v21 = vld [vmem:[#allocation8 + $0x3c0] sm:$0xff]  ;;  %v15856_v10 = vld [vmem:[#allocation173_spill] sm:$0xff]  ;;  %15857 = vst [vmem:[#allocation96_spill] sm:$0xff] %v14113_v32 }
 0x3eb   : > { %4459 = vmatpush2.msra.mxu1 %v4041_v20  ;;  %v8293_v30 = vmul.f32 -1.442695, %v14047_v44  ;;  %9823 = vpow2.f32 %v8323_v56  ;;  %4390 = vmatpush2.msra.mxu0 %v13923_v42  ;;  %v14093_v48 = vadd.f32 %v15853_v59, %v13743_v29  ;;  %v8292_v38 = vmul.f32 -1.442695, %v14056_v13  ;;  %v14097_v15 = vpop.eup %9801  ;;  %v4744_v52 = vld [vmem:[#allocation8 + $0x388] sm:$0xff]  ;;  %v15858_v56 = vld [vmem:[#allocation181_spill] sm:$0xff] }
 0x3ec   : > { %4460 = vmatprep.subr.mxu1 %v4032_v31  ;;  %9825 = vpow2.f32 %v8332_v16  ;;  %v15854_v57 = vmov 0.00390625   ;;  %v14101_v24 = vadd.f32 %v15855_v37, %v13746_v33  ;;  %v8283_v42 = vmul.f32 -1.442695, %v14065_v43  ;;  %v14106_v7 = vpop.eup %9803  ;;  %v4743_v41 = vld [vmem:[#allocation8 + $0x380] sm:$0xff]  ;;  %v15859_v17 = vld [vmem:[#allocation125_spill] sm:$0xff]  ;;  %v14143_v37 = vpop.f32.mrf.mxu0  ;;  %v4704_v35 = vld [vmem:[#allocation8 + $0x248] sm:$0xff] }
 0x3ed   : > { %4461 = vmatpush2.msra.mxu1 %v4031_v53  ;;  %4392 = vmatmul.mubr.f32.vlgmr.msra.gmra.mxu0 %v15854_v57  ;;  %9827 = vpow2.f32 %v8333_v2  ;;  %v14110_v61 = vadd.f32 %v15856_v10, %v13743_v29  ;;  %v8282_v14 = vmul.f32 -1.442695, %v14075_v39  ;;  %v14115_v45 = vpop.eup %9805  ;;  %v14119_v12 = vadd.f32 %v15858_v56, %v13746_v33  ;;  %v4736_v2 = vld [vmem:[#allocation8 + $0x348] sm:$0xff]  ;;  %15862 = vst [vmem:[#allocation154_spill] sm:$0xff] %v14143_v37 }
 0x3ee   : > { %4463 = vmatmul.mubr.f32.vlgmr.msra.gmra.mxu1 %v15854_v57  ;;  %4533 = vmatprep.mubr.f32.mxu0 %v15854_v57  ;;  %9829 = vpow2.f32 %v8302_v11  ;;  %v8273_v20 = vmul.f32 -1.442695, %v14085_v62  ;;  %v14122_v16 = vpop.eup %9807  ;;  %v14126_v31 = vadd.f32 %v15859_v17, %v13743_v29  ;;  %v8272_v58 = vmul.f32 -1.442695, %v14093_v48  ;;  %v4735_v11 = vld [vmem:[#allocation8 + $0x340] sm:$0xff]  ;;  %v14151_v57 = vpop.f32.mrf.mxu0 }
 0x3ef   : > { %6005 = vmatprep.subr.mxu1 %v4752_v18  ;;  %9831 = vpow2.f32 %v8293_v30  ;;  %v14133_v53 = vadd.f32 %v15860_v4, %v13746_v33  ;;  %v8263_v9 = vmul.f32 -1.442695, %v14101_v24  ;;  %v15861_v30 = vld [vmem:[#allocation196_spill] sm:$0xff]  ;;  %v8253_v10 = vmul.f32 -1.442695, %v14119_v12  ;;  %15863 = vst [vmem:[#allocation27_spill] sm:$0xff] %v14151_v57 }
 0x3f0   : > { %6006 = vmatpush1.msra.mxu1 %v4751_v21  ;;  %9833 = vpow2.f32 %v8292_v38  ;;  %v14140_v59 = vadd.f32 %v15861_v30, %v13743_v29  ;;  %v8262_v38 = vmul.f32 -1.442695, %v14110_v61  ;;  %v4728_v18 = vld [vmem:[#allocation8 + $0x308] sm:$0xff]  ;;  %v8252_v56 = vmul.f32 -1.442695, %v14126_v31  ;;  %v14153_v40 = vpop.f32.mrf.mxu0 }
 0x3f1   : > { %6007 = vmatprep.subr.mxu1 %v4744_v52  ;;  %v14129_v6 = vpop.eup %9809  ;;  %9835 = vpow2.f32 %v8283_v42  ;;  %v4727_v42 = vld [vmem:[#allocation8 + $0x300] sm:$0xff] }
 0x3f2   : > { %6008 = vmatpush1.msra.mxu1 %v4743_v41  ;;  %v14136_v27 = vpop.eup %9811  ;;  %9837 = vpow2.f32 %v8282_v14  ;;  %v4720_v41 = vld [vmem:[#allocation8 + $0x2c8] sm:$0xff]  ;;  %v8243_v14 = vmul.f32 -1.442695, %v14133_v53  ;;  %v8242_v30 = vmul.f32 -1.442695, %v14140_v59 }
 0x3f3   : > { %6009 = vmatprep.subr.mxu1 %v4736_v2  ;;  %v14145_v21 = vpop.eup %9813  ;;  %9839 = vpow2.f32 %v8273_v20  ;;  %v4719_v2 = vld [vmem:[#allocation8 + $0x2c0] sm:$0xff]  ;;  %v4712_v20 = vld [vmem:[#allocation8 + $0x288] sm:$0xff] }
 0x3f4   : > { %6010 = vmatpush1.msra.mxu1 %v4735_v11  ;;  %v9816_v52 = vpop.eup %9815  ;;  %9841 = vpow2.f32 %v8272_v58  ;;  %v4711_v58 = vld [vmem:[#allocation8 + $0x280] sm:$0xff] }
 0x3f5   : > { %6011 = vmatprep.subr.mxu1 %v4728_v18  ;;  %v9818_v17 = vpop.eup %9817  ;;  %9843 = vpow2.f32 %v8263_v9 }
 0x3f6   : > { %6012 = vmatpush1.msra.mxu1 %v4727_v42  ;;  %v9820_v4 = vpop.eup %9819  ;;  %9845 = vpow2.f32 %v8262_v38  ;;  %v4703_v42 = vld [vmem:[#allocation8 + $0x240] sm:$0xff]  ;;  %v3043_v32 = vadd.f32 1.0, %v9818_v17 }
 0x3f7   : > { %6013 = vmatprep.subr.mxu1 %v4720_v41  ;;  %v9822_v11 = vpop.eup %9821  ;;  %9847 = vpow2.f32 %v8253_v10  ;;  %v4696_v41 = vld [vmem:[#allocation8 + $0x208] sm:$0xff]  ;;  %v4679_v17 = vld [vmem:[#allocation8 + $0x180] sm:$0xff] }
 0x3f8   : > { %6014 = vmatpush1.msra.mxu1 %v4719_v2  ;;  %v9824_v18 = vpop.eup %9823  ;;  %9849 = vpow2.f32 %v8252_v56  ;;  %v3053_v38 = vadd.f32 1.0, %v9822_v11  ;;  %v3044_v2 = vadd.f32 1.0, %v9820_v4  ;;  %v4695_v56 = vld [vmem:[#allocation8 + $0x200] sm:$0xff]  ;;  %v4680_v4 = vld [vmem:[#allocation8 + $0x188] sm:$0xff] }
 0x3f9   : > { %6015 = vmatprep.subr.mxu1 %v4712_v20  ;;  %v9826_v55 = vpop.eup %9825  ;;  %9851 = vpow2.f32 %v8243_v14  ;;  %v3054_v9 = vadd.f32 1.0, %v9824_v18  ;;  %v4688_v14 = vld [vmem:[#allocation8 + $0x1c8] sm:$0xff]  ;;  %v3034_v18 = vadd.f32 1.0, %v9816_v52 }
 0x3fa   : > { %6016 = vmatpush1.msra.mxu1 %v4711_v58  ;;  %v9828_v22 = vpop.eup %9827  ;;  %9853 = vpow2.f32 %v8242_v30  ;;  %v3063_v0 = vadd.f32 1.0, %v9826_v55  ;;  %v4687_v55 = vld [vmem:[#allocation8 + $0x1c0] sm:$0xff]  ;;  %v4672_v52 = vld [vmem:[#allocation8 + $0x148] sm:$0xff] }
 0x3fb   : > { %6017 = vmatprep.subr.mxu1 %v4704_v35  ;;  %v9830_v10 = vpop.eup %9829  ;;  %9855 = vrcp.f32 %v3054_v9  ;;  %v3064_v50 = vadd.f32 1.0, %v9828_v22  ;;  %v14155_v35 = vpop.f32.mrf.mxu0 }
 0x3fc   : > { %6018 = vmatpush1.msra.mxu1 %v4703_v42  ;;  %v9832_v20 = vpop.eup %9831  ;;  %9857 = vrcp.f32 %v3063_v0  ;;  %v3033_v11 = vadd.f32 1.0, %v9830_v10  ;;  %v4671_v10 = vld [vmem:[#allocation8 + $0x140] sm:$0xff] }
 0x3fd   : > { %6019 = vmatprep.subr.mxu1 %v4696_v41  ;;  %v9834_v58 = vpop.eup %9833  ;;  %9859 = vrcp.f32 %v3064_v50  ;;  %v3024_v9 = vadd.f32 1.0, %v9832_v20  ;;  %v4664_v20 = vld [vmem:[#allocation8 + $0x108] sm:$0xff] }
 0x3fe   : > { %6020 = vmatpush1.msra.mxu1 %v4695_v56  ;;  %v9836_v30 = vpop.eup %9835  ;;  %9861 = vrcp.f32 %v3053_v38  ;;  %v3023_v42 = vadd.f32 1.0, %v9834_v58  ;;  %v4663_v58 = vld [vmem:[#allocation8 + $0x100] sm:$0xff] }
 0x3ff   : > { %6021 = vmatprep.subr.mxu1 %v4688_v14  ;;  %v9838_v22 = vpop.eup %9837  ;;  %9863 = vrcp.f32 %v3044_v2  ;;  %v3014_v41 = vadd.f32 1.0, %v9836_v30  ;;  %v14157_v14 = vpop.f32.mrf.mxu0  ;;  %v4656_v30 = vld [vmem:[#allocation8 + $0xc8] sm:$0xff] }
 0x400   : > { %6022 = vmatpush1.msra.mxu1 %v4687_v55  ;;  %v9840_v0 = vpop.eup %9839  ;;  %9865 = vrcp.f32 %v3043_v32  ;;  %v3013_v56 = vadd.f32 1.0, %v9838_v22  ;;  %v4655_v22 = vld [vmem:[#allocation8 + $0xc0] sm:$0xff] }
 0x401   : > { %6023 = vmatprep.subr.mxu1 %v4680_v4  ;;  %v9842_v50 = vpop.eup %9841  ;;  %9867 = vrcp.f32 %v3034_v18  ;;  %v3004_v55 = vadd.f32 1.0, %v9840_v0  ;;  %v4648_v0 = vld [vmem:[#allocation8 + $0x88] sm:$0xff] }
 0x402   : > { %6024 = vmatpush1.msra.mxu1 %v4679_v17  ;;  %v9844_v38 = vpop.eup %9843  ;;  %9869 = vrcp.f32 %v3033_v11  ;;  %v3003_v4 = vadd.f32 1.0, %v9842_v50  ;;  %v4647_v50 = vld [vmem:[#allocation8 + $0x80] sm:$0xff] }
 0x403   : > { %6025 = vmatprep.subr.mxu1 %v4672_v52  ;;  %v9846_v2 = vpop.eup %9845  ;;  %9871 = vrcp.f32 %v3024_v9  ;;  %v2994_v17 = vadd.f32 1.0, %v9844_v38  ;;  %v14159_v52 = vpop.f32.mrf.mxu0  ;;  %v4640_v38 = vld [vmem:[#allocation8 + $0x48] sm:$0xff] }
 0x404   : > { %6026 = vmatpush1.msra.mxu1 %v4671_v10  ;;  %v9848_v32 = vpop.eup %9847  ;;  %9873 = vrcp.f32 %v3023_v42  ;;  %v2993_v37 = vadd.f32 1.0, %v9846_v2  ;;  %v4639_v2 = vld [vmem:[#allocation8 + $0x40] sm:$0xff] }
 0x405   : > { %6027 = vmatprep.subr.mxu1 %v4664_v20  ;;  %v9850_v18 = vpop.eup %9849  ;;  %9875 = vrcp.f32 %v3014_v41  ;;  %v2984_v10 = vadd.f32 1.0, %v9848_v32  ;;  %v4632_v32 = vld [vmem:[#allocation8 + $0x8] sm:$0xff] }
 0x406   : > { %6028 = vmatpush1.msra.mxu1 %v4663_v58  ;;  %v9852_v11 = vpop.eup %9851  ;;  %9877 = vrcp.f32 %v3013_v56  ;;  %v2983_v20 = vadd.f32 1.0, %v9850_v18  ;;  %v4631_v18 = vld [vmem:[#allocation8] sm:$0xff] }
 0x407   : > { %6029 = vmatprep.subr.mxu1 %v4656_v30  ;;  %v9854_v9 = vpop.eup %9853  ;;  %9879 = vrcp.f32 %v3004_v55  ;;  %v2974_v58 = vadd.f32 1.0, %v9852_v11  ;;  %v14161_v30 = vpop.f32.mrf.mxu0 }
 0x408   : > { %6030 = vmatpush1.msra.mxu1 %v4655_v22  ;;  %v9856_v42 = vpop.eup %9855  ;;  %9881 = vrcp.f32 %v3003_v4  ;;  %v2973_v57 = vadd.f32 1.0, %v9854_v9  ;;  %v2964_v22 = vadd.f32 1.0, %v14145_v21  ;;  %v4879_v21 = vld [vmem:[#allocation8 + $0x7c0] sm:$0xff] }
 0x409   : > { %6031 = vmatprep.subr.mxu1 %v4648_v0  ;;  %v9858_v41 = vpop.eup %9857  ;;  %9883 = vrcp.f32 %v2994_v17  ;;  %v2963_v17 = vadd.f32 1.0, %v14136_v27 }
 0x40a   : > { %6032 = vmatpush1.msra.mxu1 %v4647_v50  ;;  %v9860_v56 = vpop.eup %9859  ;;  %9885 = vrcp.f32 %v2993_v37  ;;  %v4023_v11 = vmul.f32 %v9858_v41, %v14025_v5  ;;  %v4880_v37 = vld [vmem:[#allocation8 + $0x7c8] sm:$0xff]  ;;  %v2954_v50 = vadd.f32 1.0, %v14129_v6  ;;  %v2944_v6 = vadd.f32 1.0, %v14115_v45 }
 0x40b   : > { %6033 = vmatprep.subr.mxu1 %v4640_v38  ;;  %v9862_v55 = vpop.eup %9861  ;;  %9887 = vrcp.f32 %v2984_v10  ;;  %v4024_v4 = vmul.f32 %v9860_v56, %v14032_v19  ;;  %v4014_v38 = vmul.f32 %v9856_v42, %v14018_v3  ;;  %v2953_v10 = vadd.f32 1.0, %v14122_v16  ;;  %v4872_v5 = vld [vmem:[#allocation8 + $0x788] sm:$0xff]  ;;  %v4871_v42 = vld [vmem:[#allocation8 + $0x780] sm:$0xff] }
 0x40c   : > { %6034 = vmatpush1.msra.mxu1 %v4639_v2  ;;  %v9864_v0 = vpop.eup %9863  ;;  %9889 = vrcp.f32 %v2983_v20  ;;  %v4013_v27 = vmul.f32 %v9862_v55, %v14009_v63  ;;  %v14171_v20 = vpop.f32.mrf.mxu0  ;;  %v2943_v16 = vadd.f32 1.0, %v14106_v7  ;;  %v2934_v56 = vadd.f32 1.0, %v14097_v15 }
 0x40d   : > { %6035 = vmatprep.subr.mxu1 %v4632_v32  ;;  %v9866_v9 = vpop.eup %9865  ;;  %9891 = vrcp.f32 %v2974_v58  ;;  %4469 = vmatprep.subr.mxu0 %v4024_v4  ;;  %v4004_v3 = vmul.f32 %v9864_v0, %v14001_v28  ;;  %v4863_v28 = vld [vmem:[#allocation8 + $0x740] sm:$0xff]  ;;  %v2933_v55 = vadd.f32 1.0, %v14089_v54  ;;  %v2924_v15 = vadd.f32 1.0, %v14081_v26 }
 0x40e   : > { %6036 = vmatpush1.msra.mxu1 %v4631_v18  ;;  %v9868_v19 = vpop.eup %9867  ;;  %9893 = vrcp.f32 %v2973_v57  ;;  %4470 = vmatpush1.msra.mxu0 %v4023_v11  ;;  %v4003_v63 = vmul.f32 %v9866_v9, %v13993_v46  ;;  %v4864_v57 = vld [vmem:[#allocation8 + $0x748] sm:$0xff]  ;;  %v14181_v46 = vpop.f32.mrf.mxu0 }
 0x40f   : > { %6037 = vmatprep.subr.mxu1 %v4880_v37  ;;  %v9870_v41 = vpop.eup %9869  ;;  %9895 = vrcp.f32 %v2964_v22  ;;  %4471 = vmatprep.subr.mxu0 %v4014_v38  ;;  %v3994_v45 = vmul.f32 %v9868_v19, %v13985_v51  ;;  %v4856_v22 = vld [vmem:[#allocation8 + $0x708] sm:$0xff] }
 0x410   : > { %6038 = vmatpush2.msra.mxu1 %v4879_v21  ;;  %v9872_v58 = vpop.eup %9871  ;;  %9897 = vrcp.f32 %v2963_v17  ;;  %4472 = vmatpush1.msra.mxu0 %v4013_v27  ;;  %v3993_v7 = vmul.f32 %v9870_v41, %v14038_v23  ;;  %v15864_v18 = vld [vmem:[#allocation67_spill] sm:$0xff]  ;;  %v2923_v23 = vadd.f32 1.0, %v14069_v25  ;;  %v15866_v11 = vld [vmem:[#allocation144_spill] sm:$0xff]  ;;  %v15871_v41 = vld [vmem:[#allocation145_spill] sm:$0xff] }
 0x411   : > { %6039 = vmatprep.subr.mxu1 %v4872_v5  ;;  %v9874_v2 = vpop.eup %9873  ;;  %9899 = vrcp.f32 %v2954_v50  ;;  %4473 = vmatprep.subr.mxu0 %v4004_v3  ;;  %v3984_v51 = vmul.f32 %v9872_v58, %v14047_v44  ;;  %v14187_v0 = vadd.f32 %v15864_v18, %v13743_v29  ;;  %v14193_v37 = vadd.f32 %v15866_v11, %v13746_v33  ;;  %v15868_v50 = vld [vmem:[#allocation79_spill] sm:$0xff]  ;;  %v15870_v19 = vld [vmem:[#allocation208_spill] sm:$0xff] }
 0x412   : > { %6040 = vmatpush2.msra.mxu1 %v4871_v42  ;;  %v9876_v32 = vpop.eup %9875  ;;  %9901 = vrcp.f32 %v2953_v10  ;;  %4474 = vmatpush1.msra.mxu0 %v4003_v63  ;;  %v3983_v17 = vmul.f32 %v9874_v2, %v14056_v13  ;;  %v2914_v44 = vadd.f32 1.0, %v14060_v8  ;;  %v14199_v38 = vadd.f32 %v15868_v50, %v13743_v29  ;;  %v14207_v8 = vpop.f32.mrf.mxu0  ;;  %v15872_v42 = vld [vmem:[#allocation69_spill] sm:$0xff] }
 0x413   : > { %6041 = vmatprep.subr.mxu1 %v4864_v57  ;;  %v9878_v4 = vpop.eup %9877  ;;  %9903 = vrcp.f32 %v2944_v6  ;;  %15865 = vst [vmem:[#allocation175_spill] sm:$0xff] %v14187_v0  ;;  %4475 = vmatprep.subr.mxu0 %v3994_v45  ;;  %15867 = vst [vmem:[#allocation113_spill] sm:$0xff] %v14193_v37  ;;  %v3974_v9 = vmul.f32 %v9876_v32, %v14065_v43  ;;  %v2913_v13 = vadd.f32 1.0, %v14051_v49  ;;  %v8342_v5 = vmul.f32 -1.442695, %v14187_v0  ;;  %v15873_v57 = vld [vmem:[#allocation75_spill] sm:$0xff] }
 0x414   : > { %6042 = vmatpush2.msra.mxu1 %v4863_v28  ;;  %v9880_v54 = vpop.eup %9879  ;;  %9905 = vrcp.f32 %v2943_v16  ;;  %4476 = vmatpush1.msra.mxu0 %v3993_v7  ;;  %15869 = vst [vmem:[#allocation94_spill] sm:$0xff] %v14199_v38  ;;  %v3973_v21 = vmul.f32 %v9878_v4, %v14075_v39  ;;  %v14205_v10 = vadd.f32 %v15870_v19, %v13746_v33  ;;  %v8343_v3 = vmul.f32 -1.442695, %v14193_v37  ;;  %v15874_v28 = vld [vmem:[#allocation62_spill] sm:$0xff]  ;;  %v15875_v4 = vld [vmem:[#allocation103_spill] sm:$0xff]  ;;  %v15876_v19 = vld [vmem:[#allocation25_spill] sm:$0xff] }
 0x415   : > { %6043 = vmatprep.subr.mxu1 %v4856_v22  ;;  %v9882_v26 = vpop.eup %9881  ;;  %9907 = vrcp.f32 %v2934_v56  ;;  %4477 = vmatprep.subr.mxu0 %v3984_v51  ;;  %v3964_v43 = vmul.f32 %v9880_v54, %v14085_v62  ;;  %v14213_v6 = vadd.f32 %v15871_v41, %v13743_v29  ;;  %v14219_v58 = vadd.f32 %v15872_v42, %v13746_v33  ;;  %v15878_v42 = vld [vmem:[#allocation122_spill] sm:$0xff] }
 0x416   : > { %v9884_v25 = vpop.eup %9883  ;;  %9909 = vrcp.f32 %v2933_v55  ;;  %4478 = vmatpush1.msra.mxu0 %v3983_v17  ;;  %v3963_v39 = vmul.f32 %v9882_v26, %v14093_v48  ;;  %v8352_v63 = vmul.f32 -1.442695, %v14199_v38  ;;  %v14225_v2 = vadd.f32 %v15873_v57, %v13743_v29  ;;  %v1936_v55 = vpop.f32.mrf.mxu0  ;;  %v15879_v57 = vld [vmem:[#allocation148_spill] sm:$0xff] }
 0x417   : > { %v9886_v27 = vpop.eup %9885  ;;  %9911 = vrcp.f32 %v2924_v15  ;;  %4479 = vmatprep.subr.mxu0 %v3974_v9  ;;  %v3954_v62 = vmul.f32 %v9884_v25, %v14101_v24  ;;  %v8353_v45 = vmul.f32 -1.442695, %v14205_v10  ;;  %v14231_v32 = vadd.f32 %v15874_v28, %v13746_v33  ;;  %v15880_v28 = vld [vmem:[#allocation22_spill] sm:$0xff] }
 0x418   : > { %v9888_v49 = vpop.eup %9887  ;;  %9913 = vrcp.f32 %v2923_v23  ;;  %4480 = vmatpush1.msra.mxu0 %v3973_v21  ;;  %v3953_v48 = vmul.f32 %v9886_v27, %v14110_v61  ;;  %v8362_v22 = vmul.f32 -1.442695, %v14213_v6  ;;  %v14237_v15 = vadd.f32 %v15875_v4, %v13743_v29  ;;  %v15881_v4 = vld [vmem:[#allocation124_spill] sm:$0xff] }
 0x419   : > { %v9890_v16 = vpop.eup %9889  ;;  %9915 = vrcp.f32 %v2914_v44  ;;  %4481 = vmatprep.subr.mxu0 %v3964_v43  ;;  %v3944_v7 = vmul.f32 %v9888_v49, %v14119_v12  ;;  %v8363_v18 = vmul.f32 -1.442695, %v14219_v58  ;;  %v14243_v54 = vadd.f32 %v13859_v60, %v13746_v33 }
 0x41a   : > { %v9892_v56 = vpop.eup %9891  ;;  %9917 = vrcp.f32 %v2913_v13  ;;  %4482 = vmatpush1.msra.mxu0 %v3963_v39  ;;  %v3943_v51 = vmul.f32 %v9890_v16, %v14126_v31  ;;  %v8372_v17 = vmul.f32 -1.442695, %v14225_v2  ;;  %v14249_v11 = vadd.f32 %v13874_v34, %v13743_v29 }
 0x41b   : > { %v9894_v24 = vpop.eup %9893  ;;  %9919 = vpow2.f32 %v8342_v5  ;;  %4483 = vmatprep.subr.mxu0 %v3954_v62  ;;  %v3934_v23 = vmul.f32 %v9892_v56, %v14133_v53  ;;  %v8373_v44 = vmul.f32 -1.442695, %v14231_v32  ;;  %v14255_v60 = vadd.f32 %v13892_v1, %v13746_v33  ;;  %v1940_v53 = vpop.f32.mrf.mxu0  ;;  %v15877_v5 = vld [vmem:[#allocation23_spill] sm:$0xff] }
 0x41c   : > { %v9896_v61 = vpop.eup %9895  ;;  %9921 = vpow2.f32 %v8343_v3  ;;  %4484 = vmatpush1.msra.mxu0 %v3953_v48  ;;  %v3933_v26 = vmul.f32 %v9894_v24, %v14140_v59  ;;  %v8382_v34 = vmul.f32 -1.442695, %v14237_v15  ;;  %v14261_v25 = vadd.f32 %v14161_v30, %v13746_v33 }
 0x41d   : > { %v9898_v12 = vpop.eup %9897  ;;  %9923 = vpow2.f32 %v8352_v63  ;;  %4485 = vmatprep.subr.mxu0 %v3944_v7  ;;  %v3924_v50 = vmul.f32 %v9896_v61, %v13911_v47  ;;  %v8383_v1 = vmul.f32 -1.442695, %v14243_v54  ;;  %v14267_v21 = vadd.f32 %v14171_v20, %v13743_v29  ;;  %v1942_v39 = vpop.f32.mrf.mxu0 }
 0x41e   : > { %v9900_v31 = vpop.eup %9899  ;;  %9925 = vpow2.f32 %v8353_v45  ;;  %4486 = vmatpush1.msra.mxu0 %v3943_v51  ;;  %v3923_v13 = vmul.f32 %v9898_v12, %v13857_v36  ;;  %v8392_v43 = vmul.f32 -1.442695, %v14249_v11  ;;  %v14273_v30 = vadd.f32 %v14181_v46, %v13746_v33 }
 0x41f   : > { %v9902_v9 = vpop.eup %9901  ;;  %9927 = vpow2.f32 %v8362_v22  ;;  %4487 = vmatprep.subr.mxu0 %v3934_v23  ;;  %v3914_v27 = vmul.f32 %v9900_v31, %v15876_v19  ;;  %v8393_v49 = vmul.f32 -1.442695, %v14255_v60  ;;  %v14279_v20 = vadd.f32 %v14207_v8, %v13743_v29  ;;  %v15882_v23 = vld [vmem:[#allocation31_spill] sm:$0xff] }
 0x420   : > { %v9904_v59 = vpop.eup %9903  ;;  %9929 = vpow2.f32 %v8363_v18  ;;  %4488 = vmatpush1.msra.mxu0 %v3933_v26  ;;  %v3913_v41 = vmul.f32 %v9902_v9, %v15877_v5  ;;  %v8463_v46 = vmul.f32 -1.442695, %v14261_v25  ;;  %v14284_v62 = vadd.f32 %v1936_v55, %v13746_v33 }
 0x421   : > { %v9906_v47 = vpop.eup %9905  ;;  %9931 = vpow2.f32 %v8372_v17  ;;  %4489 = vmatprep.subr.mxu0 %v3924_v50  ;;  %v3904_v16 = vmul.f32 %v9904_v59, %v15878_v42  ;;  %v8472_v48 = vmul.f32 -1.442695, %v14267_v21  ;;  %v14289_v8 = vadd.f32 %v1940_v53, %v13743_v29  ;;  %v15883_v53 = vld [vmem:[#allocation81_spill] sm:$0xff] }
 0x422   : > { %v9908_v36 = vpop.eup %9907  ;;  %9933 = vpow2.f32 %v8373_v44  ;;  %4490 = vmatpush1.msra.mxu0 %v3923_v13  ;;  %v3903_v56 = vmul.f32 %v9906_v47, %v15879_v57  ;;  %v8473_v7 = vmul.f32 -1.442695, %v14273_v30  ;;  %v14294_v55 = vadd.f32 %v1942_v39, %v13746_v33 }
 0x423   : > { %v9910_v3 = vpop.eup %9909  ;;  %9935 = vpow2.f32 %v8382_v34  ;;  %4491 = vmatprep.subr.mxu0 %v3914_v27  ;;  %v3894_v24 = vmul.f32 %v9908_v36, %v15880_v28  ;;  %v14299_v51 = vadd.f32 %v14159_v52, %v13743_v29  ;;  %v8482_v18 = vmul.f32 -1.442695, %v14279_v20  ;;  %v15886_v27 = vld [vmem:[#allocation27_spill] sm:$0xff] }
 0x424   : > { %v9912_v63 = vpop.eup %9911  ;;  %9937 = vpow2.f32 %v8383_v1  ;;  %4492 = vmatpush1.msra.mxu0 %v3913_v41  ;;  %v3893_v61 = vmul.f32 %v9910_v3, %v15881_v4  ;;  %v14305_v31 = vadd.f32 %v14157_v14, %v13746_v33  ;;  %v8483_v26 = vmul.f32 -1.442695, %v14284_v62  ;;  %v15884_v14 = vld [vmem:[#allocation128_spill] sm:$0xff] }
 0x425   : > { %v9914_v45 = vpop.eup %9913  ;;  %9939 = vpow2.f32 %v8392_v43  ;;  %4493 = vmatprep.subr.mxu0 %v3904_v16  ;;  %v3884_v17 = vmul.f32 %v9912_v63, %v15882_v23  ;;  %v14313_v52 = vadd.f32 %v14155_v35, %v13743_v29  ;;  %v8492_v50 = vmul.f32 -1.442695, %v14289_v8  ;;  %v15885_v35 = vld [vmem:[#allocation114_spill] sm:$0xff]  ;;  %v15888_v3 = vld [vmem:[#allocation96_spill] sm:$0xff] }
 0x426   : > { %v9916_v22 = vpop.eup %9915  ;;  %9941 = vpow2.f32 %v8393_v49  ;;  %4494 = vmatpush1.msra.mxu0 %v3903_v56  ;;  %v3883_v9 = vmul.f32 %v9914_v45, %v15883_v53  ;;  %v14321_v13 = vadd.f32 %v14153_v40, %v13746_v33  ;;  %v8493_v1 = vmul.f32 -1.442695, %v14294_v55  ;;  %v15887_v40 = vld [vmem:[#allocation154_spill] sm:$0xff]  ;;  %v15889_v63 = vld [vmem:[#allocation160_spill] sm:$0xff] }
 0x427   : > { %v9918_v12 = vpop.eup %9917  ;;  %9943 = vpow2.f32 %v8463_v46  ;;  %4495 = vmatprep.subr.mxu0 %v3894_v24  ;;  %v3874_v59 = vmul.f32 %v9916_v22, %v15884_v14  ;;  %v14329_v43 = vadd.f32 %v15886_v27, %v13743_v29  ;;  %v8462_v36 = vmul.f32 -1.442695, %v14299_v51  ;;  %v4848_v45 = vld [vmem:[#allocation8 + $0x6c8] sm:$0xff] }
 0x428   : > { %v14308_v44 = vpop.eup %9919  ;;  %9945 = vpow2.f32 %v8472_v48  ;;  %4496 = vmatpush1.msra.mxu0 %v3893_v61  ;;  %v3873_v19 = vmul.f32 %v9918_v12, %v15885_v35  ;;  %v14336_v41 = vadd.f32 %v15887_v40, %v13746_v33  ;;  %v8453_v49 = vmul.f32 -1.442695, %v14305_v31  ;;  %v4855_v48 = vld [vmem:[#allocation8 + $0x700] sm:$0xff]  ;;  %v15890_v24 = vld [vmem:[#allocation24_spill] sm:$0xff] }
 0x429   : > { %v14316_v34 = vpop.eup %9921  ;;  %9947 = vpow2.f32 %v8473_v7  ;;  %4497 = vmatprep.subr.mxu0 %v3884_v17  ;;  %v14343_v42 = vadd.f32 %v15888_v3, %v13743_v29  ;;  %v8452_v16 = vmul.f32 -1.442695, %v14313_v52  ;;  %v14350_v57 = vadd.f32 %v15889_v63, %v13746_v33  ;;  %6044 = vmatpush2.msra.mxu1 %v4855_v48  ;;  %v15891_v61 = vld [vmem:[#allocation104_spill] sm:$0xff]  ;;  %v15892_v17 = vld [vmem:[#allocation99_spill] sm:$0xff] }
 0x42a   : > { %v14324_v47 = vpop.eup %9923  ;;  %9949 = vpow2.f32 %v8482_v18  ;;  %4498 = vmatpush1.msra.mxu0 %v3883_v9  ;;  %v8443_v56 = vmul.f32 -1.442695, %v14321_v13  ;;  %v14357_v7 = vadd.f32 %v15890_v24, %v13743_v29  ;;  %v8442_v22 = vmul.f32 -1.442695, %v14329_v43  ;;  %6045 = vmatprep.subr.mxu1 %v4848_v45  ;;  %v15894_v35 = vld [vmem:[#allocation143_spill] sm:$0xff] }
 0x42b   : > { %v14332_v5 = vpop.eup %9925  ;;  %9951 = vpow2.f32 %v8483_v26  ;;  %4499 = vmatprep.subr.mxu0 %v3874_v59  ;;  %v14364_v18 = vadd.f32 %v15891_v61, %v13746_v33  ;;  %v8433_v12 = vmul.f32 -1.442695, %v14336_v41  ;;  %v14371_v26 = vadd.f32 %v15892_v17, %v13743_v29  ;;  %v4847_v63 = vld [vmem:[#allocation8 + $0x6c0] sm:$0xff]  ;;  %v4840_v48 = vld [vmem:[#allocation8 + $0x688] sm:$0xff] }
 0x42c   : > { %v14339_v39 = vpop.eup %9927  ;;  %9953 = vpow2.f32 %v8492_v50  ;;  %4500 = vmatpush1.msra.mxu0 %v3873_v19  ;;  %v8432_v53 = vmul.f32 -1.442695, %v14343_v42  ;;  %v15893_v50 = vld [vmem:[#allocation76_spill] sm:$0xff]  ;;  %v8423_v59 = vmul.f32 -1.442695, %v14350_v57  ;;  %v14385_v19 = vadd.f32 %v15894_v35, %v13743_v29  ;;  %6046 = vmatpush2.msra.mxu1 %v4847_v63  ;;  %v4839_v24 = vld [vmem:[#allocation8 + $0x680] sm:$0xff] }
 0x42d   : > { %v14346_v46 = vpop.eup %9929  ;;  %9955 = vpow2.f32 %v8493_v1  ;;  %v14378_v14 = vadd.f32 %v15893_v50, %v13746_v33  ;;  %v8422_v27 = vmul.f32 -1.442695, %v14357_v7  ;;  %v8413_v40 = vmul.f32 -1.442695, %v14364_v18  ;;  %6047 = vmatprep.subr.mxu1 %v4840_v48  ;;  %v4832_v61 = vld [vmem:[#allocation8 + $0x648] sm:$0xff]  ;;  %v4823_v48 = vld [vmem:[#allocation8 + $0x600] sm:$0xff] }
 0x42e   : > { %v14353_v28 = vpop.eup %9931  ;;  %9957 = vpow2.f32 %v8462_v36  ;;  %v8412_v33 = vmul.f32 -1.442695, %v14371_v26  ;;  %v8402_v29 = vmul.f32 -1.442695, %v14385_v19  ;;  %6048 = vmatpush2.msra.mxu1 %v4839_v24 }
 0x42f   : > { %v14360_v4 = vpop.eup %9933  ;;  %9959 = vpow2.f32 %v8453_v49  ;;  %6049 = vmatprep.subr.mxu1 %v4832_v61 }
 0x430   : > { %v14367_v23 = vpop.eup %9935  ;;  %9961 = vpow2.f32 %v8452_v16  ;;  %v8403_v16 = vmul.f32 -1.442695, %v14378_v14 }
 0x431   : > { %v14374_v9 = vpop.eup %9937  ;;  %9963 = vpow2.f32 %v8443_v56 }
 0x432   : > { %v14381_v1 = vpop.eup %9939  ;;  %9965 = vpow2.f32 %v8442_v22 }
 0x433   : > { %v14388_v36 = vpop.eup %9941  ;;  %9967 = vpow2.f32 %v8433_v12 }
 0x434   : > { %v9944_v49 = vpop.eup %9943  ;;  %9969 = vpow2.f32 %v8432_v53  ;;  %v4831_v53 = vld [vmem:[#allocation8 + $0x640] sm:$0xff] }
 0x435   : > { %v9946_v3 = vpop.eup %9945  ;;  %9971 = vpow2.f32 %v8423_v59  ;;  %6050 = vmatpush2.msra.mxu1 %v4831_v53  ;;  %v3194_v37 = vadd.f32 1.0, %v9944_v49 }
 0x436   : > { %v9948_v56 = vpop.eup %9947  ;;  %9973 = vpow2.f32 %v8422_v27  ;;  %v4824_v27 = vld [vmem:[#allocation8 + $0x608] sm:$0xff]  ;;  %v3203_v24 = vadd.f32 1.0, %v9946_v3  ;;  %v4799_v3 = vld [vmem:[#allocation8 + $0x540] sm:$0xff] }
 0x437   : > { %v9950_v45 = vpop.eup %9949  ;;  %9975 = vpow2.f32 %v8413_v40  ;;  %v3204_v0 = vadd.f32 1.0, %v9948_v56  ;;  %6051 = vmatprep.subr.mxu1 %v4824_v27  ;;  %v4807_v56 = vld [vmem:[#allocation8 + $0x580] sm:$0xff] }
 0x438   : > { %v9952_v22 = vpop.eup %9951  ;;  %9977 = vpow2.f32 %v8412_v33  ;;  %v3213_v59 = vadd.f32 1.0, %v9950_v45  ;;  %6052 = vmatpush2.msra.mxu1 %v4823_v48  ;;  %v4792_v48 = vld [vmem:[#allocation8 + $0x508] sm:$0xff] }
 0x439   : > { %v9954_v12 = vpop.eup %9953  ;;  %9979 = vpow2.f32 %v8403_v16  ;;  %v3214_v17 = vadd.f32 1.0, %v9952_v22  ;;  %v4816_v16 = vld [vmem:[#allocation8 + $0x5c8] sm:$0xff]  ;;  %v4815_v22 = vld [vmem:[#allocation8 + $0x5c0] sm:$0xff] }
 0x43a   : > { %v9956_v50 = vpop.eup %9955  ;;  %9981 = vpow2.f32 %v8402_v29  ;;  %v3223_v35 = vadd.f32 1.0, %v9954_v12  ;;  %6053 = vmatprep.subr.mxu1 %v4816_v16  ;;  %v4808_v29 = vld [vmem:[#allocation8 + $0x588] sm:$0xff]  ;;  %v4791_v16 = vld [vmem:[#allocation8 + $0x500] sm:$0xff] }
 0x43b   : > { %v9958_v63 = vpop.eup %9957  ;;  %9983 = vrcp.f32 %v3214_v17  ;;  %v3224_v40 = vadd.f32 1.0, %v9956_v50  ;;  %6054 = vmatpush2.msra.mxu1 %v4815_v22  ;;  %v4800_v17 = vld [vmem:[#allocation8 + $0x548] sm:$0xff] }
 0x43c   : > { %v9960_v33 = vpop.eup %9959  ;;  %9985 = vrcp.f32 %v3223_v35  ;;  %v3193_v12 = vadd.f32 1.0, %v9958_v63  ;;  %6055 = vmatprep.subr.mxu1 %v4808_v29  ;;  %v4784_v22 = vld [vmem:[#allocation8 + $0x4c8] sm:$0xff] }
 0x43d   : > { %v9962_v61 = vpop.eup %9961  ;;  %9987 = vrcp.f32 %v3224_v40  ;;  %v3184_v50 = vadd.f32 1.0, %v9960_v33  ;;  %6056 = vmatpush2.msra.mxu1 %v4807_v56 }
 0x43e   : > { %v9964_v45 = vpop.eup %9963  ;;  %9989 = vrcp.f32 %v3213_v59  ;;  %v3183_v27 = vadd.f32 1.0, %v9962_v61  ;;  %6057 = vmatprep.subr.mxu1 %v4800_v17 }
 0x43f   : > { %v9966_v53 = vpop.eup %9965  ;;  %9991 = vrcp.f32 %v3204_v0  ;;  %v3174_v40 = vadd.f32 1.0, %v9964_v45  ;;  %6058 = vmatpush2.msra.mxu1 %v4799_v3  ;;  %v4783_v0 = vld [vmem:[#allocation8 + $0x4c0] sm:$0xff] }
 0x440   : > { %v9968_v35 = vpop.eup %9967  ;;  %9993 = vrcp.f32 %v3203_v24  ;;  %v3173_v59 = vadd.f32 1.0, %v9966_v53  ;;  %6059 = vmatprep.subr.mxu1 %v4792_v48  ;;  %v4776_v24 = vld [vmem:[#allocation8 + $0x488] sm:$0xff] }
 0x441   : > { %v9970_v49 = vpop.eup %9969  ;;  %9995 = vrcp.f32 %v3194_v37  ;;  %v3164_v33 = vadd.f32 1.0, %v9968_v35  ;;  %6060 = vmatpush2.msra.mxu1 %v4791_v16  ;;  %v4775_v37 = vld [vmem:[#allocation8 + $0x480] sm:$0xff] }
 0x442   : > { %v9972_v63 = vpop.eup %9971  ;;  %9997 = vrcp.f32 %v3193_v12  ;;  %v3163_v61 = vadd.f32 1.0, %v9970_v49  ;;  %6061 = vmatprep.subr.mxu1 %v4784_v22  ;;  %v4768_v12 = vld [vmem:[#allocation8 + $0x448] sm:$0xff] }
 0x443   : > { %v9974_v38 = vpop.eup %9973  ;;  %9999 = vrcp.f32 %v3184_v50  ;;  %v3154_v45 = vadd.f32 1.0, %v9972_v63  ;;  %6062 = vmatpush2.msra.mxu1 %v4783_v0  ;;  %v4767_v50 = vld [vmem:[#allocation8 + $0x440] sm:$0xff] }
 0x444   : > { %v9976_v29 = vpop.eup %9975  ;;  %10001 = vrcp.f32 %v3183_v27  ;;  %v3153_v53 = vadd.f32 1.0, %v9974_v38  ;;  %6063 = vmatprep.subr.mxu1 %v4776_v24  ;;  %v4760_v27 = vld [vmem:[#allocation8 + $0x408] sm:$0xff]  ;;  %v3123_v24 = vadd.f32 1.0, %v14381_v1 }
 0x445   : > { %v9978_v56 = vpop.eup %9977  ;;  %10003 = vrcp.f32 %v3174_v40  ;;  %v3144_v35 = vadd.f32 1.0, %v9976_v29  ;;  %6064 = vmatpush2.msra.mxu1 %v4775_v37  ;;  %v4759_v40 = vld [vmem:[#allocation8 + $0x400] sm:$0xff]  ;;  %v3114_v37 = vadd.f32 1.0, %v14374_v9 }
 0x446   : > { %v9980_v17 = vpop.eup %9979  ;;  %10005 = vrcp.f32 %v3173_v59  ;;  %v3143_v49 = vadd.f32 1.0, %v9978_v56  ;;  %6065 = vmatprep.subr.mxu1 %v4768_v12  ;;  %v5264_v59 = vld [vmem:[#allocation8 + $0x13c8] sm:$0xff]  ;;  %v3104_v12 = vadd.f32 1.0, %v14360_v4  ;;  %v3093_v4 = vadd.f32 1.0, %v14339_v39 }
 0x447   : > { %v9982_v3 = vpop.eup %9981  ;;  %10007 = vrcp.f32 %v3164_v33  ;;  %v3134_v63 = vadd.f32 1.0, %v9980_v17  ;;  %6066 = vmatpush2.msra.mxu1 %v4767_v50  ;;  %v3124_v33 = vadd.f32 1.0, %v14388_v36  ;;  %v3074_v39 = vadd.f32 1.0, %v14316_v34 }
 0x448   : > { %v9984_v48 = vpop.eup %9983  ;;  %10009 = vrcp.f32 %v3163_v61  ;;  %v3133_v38 = vadd.f32 1.0, %v9982_v3  ;;  %6067 = vmatprep.subr.mxu1 %v4760_v27  ;;  %v3103_v3 = vadd.f32 1.0, %v14353_v28  ;;  %v3084_v28 = vadd.f32 1.0, %v14332_v5 }
 0x449   : > { %v9986_v16 = vpop.eup %9985  ;;  %10011 = vrcp.f32 %v3154_v45  ;;  %6068 = vmatpush2.msra.mxu1 %v4759_v40  ;;  %v4174_v17 = vmul.f32 %v9984_v48, %v14284_v62  ;;  %v3073_v5 = vadd.f32 1.0, %v14308_v44 }
 0x44a   : > { %v9988_v22 = vpop.eup %9987  ;;  %10013 = vrcp.f32 %v3153_v53  ;;  %v4183_v56 = vmul.f32 %v9986_v16, %v14289_v8  ;;  %6147 = vmatprep.subr.mxu1 %v5264_v59  ;;  %v3113_v53 = vadd.f32 1.0, %v14367_v23  ;;  %v3094_v23 = vadd.f32 1.0, %v14346_v46 }
 0x44b   : > { %v9990_v0 = vpop.eup %9989  ;;  %10015 = vrcp.f32 %v3144_v35  ;;  %v4184_v29 = vmul.f32 %v9988_v22, %v14294_v55  ;;  %v3083_v46 = vadd.f32 1.0, %v14324_v47 }
 0x44c   : > { %v9992_v61 = vpop.eup %9991  ;;  %10017 = vrcp.f32 %v3143_v49  ;;  %v4173_v55 = vmul.f32 %v9990_v0, %v14279_v20 }
 0x44d   : > { %v9994_v45 = vpop.eup %9993  ;;  %10019 = vrcp.f32 %v3134_v63  ;;  %4501 = vmatprep.subr.mxu0 %v4184_v29  ;;  %v4164_v8 = vmul.f32 %v9992_v61, %v14273_v30 }
 0x44e   : > { %v9996_v36 = vpop.eup %9995  ;;  %10021 = vrcp.f32 %v3133_v38  ;;  %4502 = vmatpush2.msra.mxu0 %v4183_v56  ;;  %v4163_v62 = vmul.f32 %v9994_v45, %v14267_v21 }
 0x44f   : > { %v9998_v1 = vpop.eup %9997  ;;  %10023 = vrcp.f32 %v3124_v33  ;;  %4503 = vmatprep.subr.mxu0 %v4174_v17  ;;  %v4154_v20 = vmul.f32 %v9996_v36, %v14261_v25 }
 0x450   : > { %v10000_v9 = vpop.eup %9999  ;;  %10025 = vrcp.f32 %v3123_v24  ;;  %4504 = vmatpush2.msra.mxu0 %v4173_v55  ;;  %v4153_v30 = vmul.f32 %v9998_v1, %v14299_v51  ;;  %v15895_v55 = vld [vmem:[#allocation94_spill] sm:$0xff] }
 0x451   : > { %v10002_v35 = vpop.eup %10001  ;;  %10027 = vrcp.f32 %v3114_v37  ;;  %4505 = vmatprep.subr.mxu0 %v4164_v8  ;;  %v4144_v21 = vmul.f32 %v10000_v9, %v14305_v31  ;;  %v5008_v9 = vld [vmem:[#allocation8 + $0xbc8] sm:$0xff] }
 0x452   : > { %v10004_v50 = vpop.eup %10003  ;;  %10029 = vrcp.f32 %v3113_v53  ;;  %4506 = vmatpush2.msra.mxu0 %v4163_v62  ;;  %v4143_v25 = vmul.f32 %v10002_v35, %v14313_v52  ;;  %v4999_v62 = vld [vmem:[#allocation8 + $0xb80] sm:$0xff] }
 0x453   : > { %v10006_v48 = vpop.eup %10005  ;;  %10031 = vrcp.f32 %v3104_v12  ;;  %4507 = vmatprep.subr.mxu0 %v4154_v20  ;;  %v4134_v51 = vmul.f32 %v10004_v50, %v14321_v13  ;;  %v4991_v35 = vld [vmem:[#allocation8 + $0xb40] sm:$0xff]  ;;  %v4976_v50 = vld [vmem:[#allocation8 + $0xac8] sm:$0xff] }
 0x454   : > { %v10008_v49 = vpop.eup %10007  ;;  %10033 = vrcp.f32 %v3103_v3  ;;  %4508 = vmatpush2.msra.mxu0 %v4153_v30  ;;  %v4133_v31 = vmul.f32 %v10006_v48, %v14329_v43  ;;  %v5000_v3 = vld [vmem:[#allocation8 + $0xb88] sm:$0xff]  ;;  %v4983_v20 = vld [vmem:[#allocation8 + $0xb00] sm:$0xff] }
 0x455   : > { %v10010_v27 = vpop.eup %10009  ;;  %10035 = vrcp.f32 %v3094_v23  ;;  %4509 = vmatprep.subr.mxu0 %v4144_v21  ;;  %v4124_v47 = vmul.f32 %v10008_v49, %v14336_v41  ;;  %v4984_v23 = vld [vmem:[#allocation8 + $0xb08] sm:$0xff]  ;;  %v4967_v48 = vld [vmem:[#allocation8 + $0xa80] sm:$0xff] }
 0x456   : > { %v10012_v16 = vpop.eup %10011  ;;  %10037 = vrcp.f32 %v3093_v4  ;;  %4510 = vmatpush2.msra.mxu0 %v4143_v25  ;;  %v4123_v34 = vmul.f32 %v10010_v27, %v14343_v42  ;;  %v4975_v4 = vld [vmem:[#allocation8 + $0xac0] sm:$0xff]  ;;  %v4968_v30 = vld [vmem:[#allocation8 + $0xa88] sm:$0xff] }
 0x457   : > { %v10014_v63 = vpop.eup %10013  ;;  %10039 = vrcp.f32 %v3084_v28  ;;  %4511 = vmatprep.subr.mxu0 %v4134_v51  ;;  %v4114_v13 = vmul.f32 %v10012_v16, %v14350_v57  ;;  %v4960_v28 = vld [vmem:[#allocation8 + $0xa48] sm:$0xff]  ;;  %v4959_v21 = vld [vmem:[#allocation8 + $0xa40] sm:$0xff] }
 0x458   : > { %v10016_v52 = vpop.eup %10015  ;;  %10041 = vrcp.f32 %v3083_v46  ;;  %4512 = vmatpush2.msra.mxu0 %v4133_v31  ;;  %v4113_v43 = vmul.f32 %v10014_v63, %v14357_v7  ;;  %v4952_v49 = vld [vmem:[#allocation8 + $0xa08] sm:$0xff]  ;;  %v4951_v46 = vld [vmem:[#allocation8 + $0xa00] sm:$0xff] }
 0x459   : > { %v10018_v40 = vpop.eup %10017  ;;  %10043 = vrcp.f32 %v3074_v39  ;;  %4513 = vmatprep.subr.mxu0 %v4124_v47  ;;  %v4104_v38 = vmul.f32 %v10016_v52, %v14364_v18  ;;  %v4944_v25 = vld [vmem:[#allocation8 + $0x9c8] sm:$0xff]  ;;  %v4943_v27 = vld [vmem:[#allocation8 + $0x9c0] sm:$0xff] }
 0x45a   : > { %v10020_v44 = vpop.eup %10019  ;;  %10045 = vrcp.f32 %v3073_v5  ;;  %4514 = vmatpush2.msra.mxu0 %v4123_v34  ;;  %v4103_v59 = vmul.f32 %v10018_v40, %v14371_v26  ;;  %v4936_v39 = vld [vmem:[#allocation8 + $0x988] sm:$0xff]  ;;  %v4935_v51 = vld [vmem:[#allocation8 + $0x980] sm:$0xff] }
 0x45b   : > { %v10022_v22 = vpop.eup %10021  ;;  %4515 = vmatprep.subr.mxu0 %v4114_v13  ;;  %v4094_v0 = vmul.f32 %v10020_v44, %v14378_v14  ;;  %v4928_v16 = vld [vmem:[#allocation8 + $0x948] sm:$0xff]  ;;  %v4927_v5 = vld [vmem:[#allocation8 + $0x940] sm:$0xff] }
 0x45c   : > { %v10024_v41 = vpop.eup %10023  ;;  %4516 = vmatpush2.msra.mxu0 %v4113_v43  ;;  %v4093_v57 = vmul.f32 %v10022_v22, %v14385_v19  ;;  %v4920_v31 = vld [vmem:[#allocation8 + $0x908] sm:$0xff]  ;;  %v4919_v63 = vld [vmem:[#allocation8 + $0x900] sm:$0xff] }
 0x45d   : > { %v10026_v42 = vpop.eup %10025  ;;  %4517 = vmatprep.subr.mxu0 %v4104_v38  ;;  %v4084_v7 = vmul.f32 %v10024_v41, %v14255_v60  ;;  %v4912_v47 = vld [vmem:[#allocation8 + $0x8c8] sm:$0xff]  ;;  %v4911_v52 = vld [vmem:[#allocation8 + $0x8c0] sm:$0xff] }
 0x45e   : > { %v10028_v33 = vpop.eup %10027  ;;  %4518 = vmatpush2.msra.mxu0 %v4103_v59  ;;  %v4083_v18 = vmul.f32 %v10026_v42, %v14249_v11  ;;  %v4904_v34 = vld [vmem:[#allocation8 + $0x888] sm:$0xff]  ;;  %v4903_v40 = vld [vmem:[#allocation8 + $0x880] sm:$0xff] }
 0x45f   : > { %v10030_v29 = vpop.eup %10029  ;;  %4519 = vmatprep.subr.mxu0 %v4094_v0  ;;  %v4074_v26 = vmul.f32 %v10028_v33, %v14243_v54  ;;  %v4896_v13 = vld [vmem:[#allocation8 + $0x848] sm:$0xff]  ;;  %v4895_v44 = vld [vmem:[#allocation8 + $0x840] sm:$0xff] }
 0x460   : > { %v10032_v61 = vpop.eup %10031  ;;  %4520 = vmatpush2.msra.mxu0 %v4093_v57  ;;  %v4073_v14 = vmul.f32 %v10030_v29, %v14237_v15  ;;  %v4888_v43 = vld [vmem:[#allocation8 + $0x808] sm:$0xff]  ;;  %v4887_v22 = vld [vmem:[#allocation8 + $0x800] sm:$0xff] }
 0x461   : > { %v10034_v24 = vpop.eup %10033  ;;  %4521 = vmatprep.subr.mxu0 %v4084_v7  ;;  %v4064_v19 = vmul.f32 %v10032_v61, %v14231_v32  ;;  %v15896_v32 = vld [vmem:[#allocation113_spill] sm:$0xff]  ;;  %v5136_v38 = vld [vmem:[#allocation8 + $0xfc8] sm:$0xff]  ;;  %v5135_v41 = vld [vmem:[#allocation8 + $0xfc0] sm:$0xff] }
 0x462   : > { %v10036_v56 = vpop.eup %10035  ;;  %4522 = vmatpush2.msra.mxu0 %v4083_v18  ;;  %v4063_v60 = vmul.f32 %v10034_v24, %v14225_v2  ;;  %v15897_v2 = vld [vmem:[#allocation175_spill] sm:$0xff] }
 0x463   : > { %v10038_v45 = vpop.eup %10037  ;;  %4523 = vmatprep.subr.mxu0 %v4074_v26  ;;  %v4054_v11 = vmul.f32 %v10036_v56, %v14219_v58  ;;  %v5007_v58 = vld [vmem:[#allocation8 + $0xbc0] sm:$0xff]  ;;  %v5128_v59 = vld [vmem:[#allocation8 + $0xf88] sm:$0xff] }
 0x464   : > { %v10040_v37 = vpop.eup %10039  ;;  %4524 = vmatpush2.msra.mxu0 %v4073_v14  ;;  %v4053_v54 = vmul.f32 %v10038_v45, %v14213_v6  ;;  %v15898_v6 = vmov 0.00390625   ;;  %v5127_v42 = vld [vmem:[#allocation8 + $0xf80] sm:$0xff]  ;;  %v5120_v0 = vld [vmem:[#allocation8 + $0xf48] sm:$0xff] }
 0x465   : > { %v10042_v17 = vpop.eup %10041  ;;  %4525 = vmatprep.subr.mxu0 %v4064_v19  ;;  %v4044_v15 = vmul.f32 %v10040_v37, %v14205_v10  ;;  %v4992_v10 = vld [vmem:[#allocation8 + $0xb48] sm:$0xff]  ;;  %v5119_v33 = vld [vmem:[#allocation8 + $0xf40] sm:$0xff] }
 0x466   : > { %v10044_v36 = vpop.eup %10043  ;;  %4526 = vmatpush2.msra.mxu0 %v4063_v60  ;;  %v4043_v1 = vmul.f32 %v10042_v17, %v15895_v55  ;;  %v5112_v57 = vld [vmem:[#allocation8 + $0xf08] sm:$0xff]  ;;  %v5111_v29 = vld [vmem:[#allocation8 + $0xf00] sm:$0xff]  ;;  %v4251_v17 = vpop.f32.mrf.mxu1 }
 0x467   : > { %v10046_v53 = vpop.eup %10045  ;;  %4527 = vmatprep.subr.mxu0 %v4054_v11  ;;  %v4034_v12 = vmul.f32 %v10044_v36, %v15896_v32  ;;  %v5104_v7 = vld [vmem:[#allocation8 + $0xec8] sm:$0xff]  ;;  %v5103_v61 = vld [vmem:[#allocation8 + $0xec0] sm:$0xff] }
 0x468   : > { %4528 = vmatpush2.msra.mxu0 %v4053_v54  ;;  %v4033_v8 = vmul.f32 %v10046_v53, %v15897_v2  ;;  %v5096_v18 = vld [vmem:[#allocation8 + $0xe88] sm:$0xff]  ;;  %v5095_v24 = vld [vmem:[#allocation8 + $0xe80] sm:$0xff]  ;;  %v10310_v2 = vmov 1966171168  }
 0x469   : > { %4529 = vmatprep.subr.mxu0 %v4044_v15  ;;  %v5088_v26 = vld [vmem:[#allocation8 + $0xe48] sm:$0xff]  ;;  %v5087_v56 = vld [vmem:[#allocation8 + $0xe40] sm:$0xff]  ;;  %v4253_v15 = vpop.f32.mrf.mxu1 }
 0x46a   : > { %4530 = vmatpush2.msra.mxu0 %v4043_v1  ;;  %v5080_v14 = vld [vmem:[#allocation8 + $0xe08] sm:$0xff]  ;;  %v5079_v45 = vld [vmem:[#allocation8 + $0xe00] sm:$0xff] }
 0x46b   : > { %4531 = vmatprep.subr.mxu0 %v4034_v12  ;;  %v5072_v19 = vld [vmem:[#allocation8 + $0xdc8] sm:$0xff]  ;;  %v5071_v37 = vld [vmem:[#allocation8 + $0xdc0] sm:$0xff]  ;;  %v4322_v32 = vpop.f32.mrf.mxu1 }
 0x46c   : > { %4532 = vmatpush2.msra.mxu0 %v4033_v8  ;;  %v5064_v60 = vld [vmem:[#allocation8 + $0xd88] sm:$0xff]  ;;  %v5063_v11 = vld [vmem:[#allocation8 + $0xd80] sm:$0xff]  ;;  %v4557_v8 = vunpack.c.l.s4 %v10310_v2 }
 0x46d   : > { %4534 = vmatmul.mubr.f32.vlgmr.msra.gmra.mxu0 %v15898_v6  ;;  %6076 = vmatprep.subr.mxu0 %v5008_v9  ;;  %v5056_v36 = vld [vmem:[#allocation8 + $0xd48] sm:$0xff]  ;;  %v5055_v54 = vld [vmem:[#allocation8 + $0xd40] sm:$0xff]  ;;  %v4324_v6 = vpop.f32.mrf.mxu1 }
 0x46e   : > { %6077 = vmatpush1.msra.mxu0 %v5007_v58  ;;  %v5048_v53 = vld [vmem:[#allocation8 + $0xd08] sm:$0xff]  ;;  %v5047_v55 = vld [vmem:[#allocation8 + $0xd00] sm:$0xff] }
 0x46f   : > { %6078 = vmatprep.subr.mxu0 %v5000_v3  ;;  %v5040_v1 = vld [vmem:[#allocation8 + $0xcc8] sm:$0xff]  ;;  %v5039_v12 = vld [vmem:[#allocation8 + $0xcc0] sm:$0xff] }
 0x470   : > { %6079 = vmatpush1.msra.mxu0 %v4999_v62  ;;  %v5032_v9 = vld [vmem:[#allocation8 + $0xc88] sm:$0xff]  ;;  %v5031_v58 = vld [vmem:[#allocation8 + $0xc80] sm:$0xff] }
 0x471   : > { %6080 = vmatprep.subr.mxu0 %v4992_v10  ;;  %v5024_v3 = vld [vmem:[#allocation8 + $0xc48] sm:$0xff]  ;;  %v5023_v62 = vld [vmem:[#allocation8 + $0xc40] sm:$0xff]  ;;  %v4558_v10 = vunpack.c.0.s8 %v4557_v8 }
 0x472   : > { %6081 = vmatpush1.msra.mxu0 %v4991_v35  ;;  %v5016_v35 = vld [vmem:[#allocation8 + $0xc08] sm:$0xff]  ;;  %v5223_v8 = vld [vmem:[#allocation8 + $0x1280] sm:$0xff] }
 0x473   : > { %6082 = vmatprep.subr.mxu0 %v4984_v23  ;;  %v5015_v23 = vld [vmem:[#allocation8 + $0xc00] sm:$0xff]  ;;  %v5480_v2 = vld [vmem:[#allocation8 + $0x1a88] sm:$0xff] }
 0x474   : > { %6083 = vmatpush1.msra.mxu0 %v4983_v20  ;;  %v4553_v20 = vcombine.low %v4322_v32, %v4324_v6  ;;  %v5487_v32 = vld [vmem:[#allocation8 + $0x1ac0] sm:$0xff] }
 0x475   : > { %6084 = vmatprep.subr.mxu0 %v4976_v50  ;;  %v5520_v50 = vld [vmem:[#allocation8 + $0x1bc8] sm:$0xff]  ;;  %v5215_v6 = vld [vmem:[#allocation8 + $0x1240] sm:$0xff] }
 0x476   : > { %6085 = vmatpush1.msra.mxu0 %v4975_v4  ;;  %v4552_v4 = vcombine.low %v4251_v17, %v4253_v15  ;;  %v5503_v17 = vld [vmem:[#allocation8 + $0x1b40] sm:$0xff]  ;;  %v5232_v15 = vld [vmem:[#allocation8 + $0x12c8] sm:$0xff] }
 0x477   : > { %6086 = vmatprep.subr.mxu0 %v4968_v30  ;;  %v15899_v30 = vld [vmem:[#allocation38_spill] sm:$0xff] }
 0x478   : > { %6087 = vmatpush1.msra.mxu0 %v4967_v48  ;;  %v14440_v48 = vsub.s32 %v4558_v10, %v15899_v30  ;;  %v5208_v10 = vld [vmem:[#allocation8 + $0x1208] sm:$0xff]  ;;  %v5199_v30 = vld [vmem:[#allocation8 + $0x11c0] sm:$0xff] }
 0x479   : > { %6088 = vmatprep.subr.mxu0 %v4960_v28 }
 0x47a   : > { %6089 = vmatpush1.msra.mxu0 %v4959_v21 }
 0x47b   : > { %6090 = vmatprep.subr.mxu0 %v4952_v49  ;;  %v15900_v49 = vlaneseq }
 0x47c   : > { %6091 = vmatpush1.msra.mxu0 %v4951_v46  ;;  %v4769_v46 = vld [vmem:[#allocation8 + $0x450] sm:$0xff] }
 0x47d   : > { %6092 = vmatprep.subr.mxu0 %v4944_v25  ;;  %vm14443_vm2 = vcmp.lt.s32.totalorder %v15900_v49, 256  ;;  %v4569_v25 = vrot.slane %v4553_v20, %v14440_v48  ;;  %v5463_v20 = vld [vmem:[#allocation8 + $0x1a00] sm:$0xff]  ;;  %v5448_v49 = vld [vmem:[#allocation8 + $0x1988] sm:$0xff] }
 0x47e   : > { %6093 = vmatpush1.msra.mxu0 %v4943_v27 }
 0x47f   : > { %6094 = vmatprep.subr.mxu0 %v4936_v39  ;;  %v15903_v39 = vmov 0.0  }
 0x480   : > { %6095 = vmatpush1.msra.mxu0 %v4935_v51  ;;  %393 = vst.msk [vmem:[#allocation2 + $0x8] sm:$0x3] %vm14443_vm2, %v15903_v39  ;;  %v5184_v39 = vld [vmem:[#allocation8 + $0x1148] sm:$0xff] }
 0x481   : > { %6096 = vmatprep.subr.mxu0 %v4928_v16 }
 0x482   : > { %6097 = vmatpush1.msra.mxu0 %v4927_v5  ;;  %v4562_v5 = vrot.slane %v4552_v4, %v14440_v48  ;;  %v5456_v4 = vld [vmem:[#allocation8 + $0x19c8] sm:$0xff] }
 0x483   : > { %6098 = vmatprep.subr.mxu0 %v4920_v31 }
 0x484   : > { %6099 = vmatpush1.msra.mxu0 %v4919_v63 }
 0x485   : > { %6100 = vmatprep.subr.mxu0 %v4912_v47  ;;  %v4584_v47 = vcombine.low %v4562_v5, %v4569_v25  ;;  %v5191_v25 = vld [vmem:[#allocation8 + $0x1180] sm:$0xff] }
 0x486   : > { %6101 = vmatpush1.msra.mxu0 %v4911_v52  ;;  %v5439_v5 = vld [vmem:[#allocation8 + $0x1940] sm:$0xff] }
 0x487   : > { %6102 = vmatprep.subr.mxu0 %v4904_v34 }
 0x488   : > { %6103 = vmatpush1.msra.mxu0 %v4903_v40  ;;  %v4592_v40 = vrot.slane %v4584_v47, %v14440_v48  ;;  %v5175_v47 = vld [vmem:[#allocation8 + $0x1100] sm:$0xff] }
 0x489   : > { %6104 = vmatprep.subr.mxu0 %v4896_v13 }
 0x48a   : > { %6105 = vmatpush1.msra.mxu0 %v4895_v44 }
 0x48b   : > { %6106 = vmatprep.subr.mxu0 %v4888_v43  ;;  %v15904_v43 = vld [vmem:[#allocation41_spill] sm:$0xff] }
 0x48c   : > { %6107 = vmatpush1.msra.mxu0 %v4887_v22 }
 0x48d   : > { %6108 = vmatprep.subr.mxu0 %v5136_v38  ;;  %v15905_v38 = vld [vmem:[#allocation42_spill] sm:$0xff] }
 0x48e   : > { %6109 = vmatpush2.msra.mxu0 %v5135_v41 }
 0x48f   : > { %6110 = vmatprep.subr.mxu0 %v5128_v59  ;;  %v15906_v59 = vld [vmem:[#allocation39_spill] sm:$0xff] }
 0x490   : > { %6111 = vmatpush2.msra.mxu0 %v5127_v42 }
 0x491   : > { %6112 = vmatprep.subr.mxu0 %v5120_v0  ;;  %v15907_v0 = vld [vmem:[#allocation40_spill] sm:$0xff] }
 0x492   : > { %6113 = vmatpush2.msra.mxu0 %v5119_v33 }
 0x493   : > { %6114 = vmatprep.subr.mxu0 %v5112_v57  ;;  %v5263_v57 = vld [vmem:[#allocation8 + $0x13c0] sm:$0xff] }
 0x494   : > { %6115 = vmatpush2.msra.mxu0 %v5111_v29  ;;  %v5519_v29 = vld [vmem:[#allocation8 + $0x1bc0] sm:$0xff] }
 0x495   : > { %6116 = vmatprep.subr.mxu0 %v5104_v7  ;;  %v5256_v7 = vld [vmem:[#allocation8 + $0x1388] sm:$0xff] }
 0x496   : > { %6117 = vmatpush2.msra.mxu0 %v5103_v61  ;;  %v15908_v61 = vld [vmem:[#allocation201_spill] sm:$0xff] }
 0x497   : > { %6118 = vmatprep.subr.mxu0 %v5096_v18 }
 0x498   : > { %6119 = vmatpush2.msra.mxu0 %v5095_v24  ;;  %v5512_v24 = vld [vmem:[#allocation8 + $0x1b88] sm:$0xff] }
 0x499   : > { %6120 = vmatprep.subr.mxu0 %v5088_v26  ;;  %v15909_v26 = vld [vmem:[#allocation203_spill] sm:$0xff] }
 0x49a   : > { %6121 = vmatpush2.msra.mxu0 %v5087_v56 }
 0x49b   : > { %6122 = vmatprep.subr.mxu0 %v5080_v14  ;;  %v5255_v14 = vld [vmem:[#allocation8 + $0x1380] sm:$0xff] }
 0x49c   : > { %6123 = vmatpush2.msra.mxu0 %v5079_v45  ;;  %v5511_v45 = vld [vmem:[#allocation8 + $0x1b80] sm:$0xff] }
 0x49d   : > { %6124 = vmatprep.subr.mxu0 %v5072_v19  ;;  %v5248_v19 = vld [vmem:[#allocation8 + $0x1348] sm:$0xff] }
 0x49e   : > { %6125 = vmatpush2.msra.mxu0 %v5071_v37  ;;  %v5504_v37 = vld [vmem:[#allocation8 + $0x1b48] sm:$0xff] }
 0x49f   : > { %6126 = vmatprep.subr.mxu0 %v5064_v60  ;;  %v5247_v60 = vld [vmem:[#allocation8 + $0x1340] sm:$0xff] }
 0x4a0   : > { %6127 = vmatpush2.msra.mxu0 %v5063_v11  ;;  %v5240_v11 = vld [vmem:[#allocation8 + $0x1308] sm:$0xff] }
 0x4a1   : > { %6128 = vmatprep.subr.mxu0 %v5056_v36  ;;  %v5496_v36 = vld [vmem:[#allocation8 + $0x1b08] sm:$0xff] }
 0x4a2   : > { %6129 = vmatpush2.msra.mxu0 %v5055_v54  ;;  %v5239_v54 = vld [vmem:[#allocation8 + $0x1300] sm:$0xff] }
 0x4a3   : > { %6130 = vmatprep.subr.mxu0 %v5048_v53  ;;  %v5495_v53 = vld [vmem:[#allocation8 + $0x1b00] sm:$0xff] }
 0x4a4   : > { %6131 = vmatpush2.msra.mxu0 %v5047_v55  ;;  %v5488_v55 = vld [vmem:[#allocation8 + $0x1ac8] sm:$0xff] }
 0x4a5   : > { %6132 = vmatprep.subr.mxu0 %v5040_v1  ;;  %v5231_v1 = vld [vmem:[#allocation8 + $0x12c0] sm:$0xff] }
 0x4a6   : > { %6133 = vmatpush2.msra.mxu0 %v5039_v12  ;;  %v5224_v12 = vld [vmem:[#allocation8 + $0x1288] sm:$0xff] }
 0x4a7   : > { %6134 = vmatprep.subr.mxu0 %v5032_v9  ;;  %v5479_v9 = vld [vmem:[#allocation8 + $0x1a80] sm:$0xff] }
 0x4a8   : > { %6135 = vmatpush2.msra.mxu0 %v5031_v58  ;;  %v5216_v58 = vld [vmem:[#allocation8 + $0x1248] sm:$0xff] }
 0x4a9   : > { %6136 = vmatprep.subr.mxu0 %v5024_v3  ;;  %v5472_v3 = vld [vmem:[#allocation8 + $0x1a48] sm:$0xff] }
 0x4aa   : > { %6137 = vmatpush2.msra.mxu0 %v5023_v62  ;;  %v5471_v62 = vld [vmem:[#allocation8 + $0x1a40] sm:$0xff] }
 0x4ab   : > { %6138 = vmatprep.subr.mxu0 %v5016_v35  ;;  %v5464_v35 = vld [vmem:[#allocation8 + $0x1a08] sm:$0xff] }
 0x4ac   : > { %6139 = vmatpush2.msra.mxu0 %v5015_v23  ;;  %v5207_v23 = vld [vmem:[#allocation8 + $0x1200] sm:$0xff] }
 0x4ad   : > { %v4393_v28 = vpop.f32.mrf.mxu0  ;;  %6218 = vmatprep.subr.mxu0 %v5520_v50  ;;  %v5200_v50 = vld [vmem:[#allocation8 + $0x11c8] sm:$0xff] }
 0x4ae   : > { %v4464_v21 = vpop.f32.mrf.mxu1 }
 0x4af   : > { %v4395_v27 = vpop.f32.mrf.mxu0 }
 0x4b0   : > { %v4554_v51 = vcombine.low %v4393_v28, %v4395_v27  ;;  %v4466_v16 = vpop.f32.mrf.mxu1  ;;  %v5455_v28 = vld [vmem:[#allocation8 + $0x19c0] sm:$0xff] }
 0x4b1   : > { %v4555_v31 = vcombine.low %v4464_v21, %v4466_v16  ;;  %v5192_v21 = vld [vmem:[#allocation8 + $0x1188] sm:$0xff]  ;;  %v5447_v27 = vld [vmem:[#allocation8 + $0x1980] sm:$0xff] }
 0x4b2   : > { %v4576_v63 = vrot.slane %v4554_v51, %v14440_v48  ;;  %v5440_v51 = vld [vmem:[#allocation8 + $0x1948] sm:$0xff]  ;;  %v5183_v16 = vld [vmem:[#allocation8 + $0x1140] sm:$0xff] }
 0x4b3   : > { %v4583_v52 = vrot.slane %v4555_v31, %v14440_v48  ;;  %v5176_v31 = vld [vmem:[#allocation8 + $0x1108] sm:$0xff] }
 0x4b5   : > { %v4585_v34 = vcombine.low %v4576_v63, %v4583_v52  ;;  %v5432_v63 = vld [vmem:[#allocation8 + $0x1908] sm:$0xff]  ;;  %v5431_v52 = vld [vmem:[#allocation8 + $0x1900] sm:$0xff] }
 0x4b7   : > { %v4599_v13 = vrot.slane %v4585_v34, %v14440_v48  ;;  %v5168_v34 = vld [vmem:[#allocation8 + $0x10c8] sm:$0xff] }
 0x4b9   : > { %v14456_v44 = vcombine.low %v4592_v40, %v4599_v13  ;;  %v5424_v40 = vld [vmem:[#allocation8 + $0x18c8] sm:$0xff]  ;;  %v5167_v13 = vld [vmem:[#allocation8 + $0x10c0] sm:$0xff] }
 0x4bb   : > { %v14460_v22 = vrot.slane %v14456_v44, %v15904_v43  ;;  %v14464_v41 = vrot.slane %v14456_v44, %v15905_v38  ;;  %v14468_v42 = vrot.slane %v14456_v44, %v15906_v59  ;;  %v14472_v33 = vrot.slane %v14456_v44, %v15907_v0 }
 0x4bc   : > { %v14480_v18 = vrot.slane %v14456_v44, %v15908_v61  ;;  %v14484_v56 = vrot.slane %v14456_v44, %v15909_v26 }
 0x4bd   : > { %6069 = vmatprep.mubr.f32.mxu1 %v14460_v22  ;;  %6140 = vmatprep.mubr.f32.mxu0 %v14464_v41 }
 0x4be   : > { %6070 = vmatmul.mubr.f32.vlgmr.msra.gmra.mxu1 %v14468_v42  ;;  %6141 = vmatmul.mubr.f32.vlgmr.msra.gmra.mxu0 %v14472_v33 }
 0x4bf   : > { %6148 = vmatpush1.msra.mxu1 %v5263_v57  ;;  %6219 = vmatpush1.msra.mxu0 %v5519_v29  ;;  %v5423_v57 = vld [vmem:[#allocation8 + $0x18c0] sm:$0xff]  ;;  %v5160_v29 = vld [vmem:[#allocation8 + $0x1088] sm:$0xff] }
 0x4c0   : > { %6149 = vmatprep.subr.mxu1 %v5256_v7  ;;  %6211 = vmatprep.mubr.f32.mxu1 %v14480_v18  ;;  %v5416_v7 = vld [vmem:[#allocation8 + $0x1888] sm:$0xff] }
 0x4c1   : > { %6220 = vmatprep.subr.mxu0 %v5512_v24  ;;  %6282 = vmatprep.mubr.f32.mxu0 %v14484_v56  ;;  %v5159_v24 = vld [vmem:[#allocation8 + $0x1080] sm:$0xff] }
 0x4c2   : > { %6150 = vmatpush1.msra.mxu1 %v5255_v14  ;;  %6221 = vmatpush1.msra.mxu0 %v5511_v45  ;;  %v5415_v14 = vld [vmem:[#allocation8 + $0x1880] sm:$0xff]  ;;  %v5152_v45 = vld [vmem:[#allocation8 + $0x1048] sm:$0xff] }
 0x4c3   : > { %6151 = vmatprep.subr.mxu1 %v5248_v19  ;;  %6222 = vmatprep.subr.mxu0 %v5504_v37  ;;  %v5408_v19 = vld [vmem:[#allocation8 + $0x1848] sm:$0xff]  ;;  %v5151_v37 = vld [vmem:[#allocation8 + $0x1040] sm:$0xff] }
 0x4c4   : > { %6152 = vmatpush1.msra.mxu1 %v5247_v60  ;;  %6223 = vmatpush1.msra.mxu0 %v5503_v17  ;;  %v5407_v60 = vld [vmem:[#allocation8 + $0x1840] sm:$0xff]  ;;  %v5144_v17 = vld [vmem:[#allocation8 + $0x1008] sm:$0xff] }
 0x4c5   : > { %6153 = vmatprep.subr.mxu1 %v5240_v11  ;;  %6224 = vmatprep.subr.mxu0 %v5496_v36  ;;  %v5400_v11 = vld [vmem:[#allocation8 + $0x1808] sm:$0xff]  ;;  %v5143_v36 = vld [vmem:[#allocation8 + $0x1000] sm:$0xff] }
 0x4c6   : > { %6154 = vmatpush1.msra.mxu1 %v5239_v54  ;;  %6225 = vmatpush1.msra.mxu0 %v5495_v53  ;;  %v5399_v54 = vld [vmem:[#allocation8 + $0x1800] sm:$0xff]  ;;  %v5392_v53 = vld [vmem:[#allocation8 + $0x17c8] sm:$0xff] }
 0x4c7   : > { %6155 = vmatprep.subr.mxu1 %v5232_v15  ;;  %6226 = vmatprep.subr.mxu0 %v5488_v55  ;;  %v5648_v15 = vld [vmem:[#allocation8 + $0x1fc8] sm:$0xff]  ;;  %v5391_v55 = vld [vmem:[#allocation8 + $0x17c0] sm:$0xff] }
 0x4c8   : > { %6156 = vmatpush1.msra.mxu1 %v5231_v1  ;;  %6227 = vmatpush1.msra.mxu0 %v5487_v32  ;;  %v5647_v1 = vld [vmem:[#allocation8 + $0x1fc0] sm:$0xff]  ;;  %v5384_v32 = vld [vmem:[#allocation8 + $0x1788] sm:$0xff] }
 0x4c9   : > { %6157 = vmatprep.subr.mxu1 %v5224_v12  ;;  %6228 = vmatprep.subr.mxu0 %v5480_v2  ;;  %v5640_v12 = vld [vmem:[#allocation8 + $0x1f88] sm:$0xff]  ;;  %v5383_v2 = vld [vmem:[#allocation8 + $0x1780] sm:$0xff] }
 0x4ca   : > { %6158 = vmatpush1.msra.mxu1 %v5223_v8  ;;  %6229 = vmatpush1.msra.mxu0 %v5479_v9  ;;  %v5639_v8 = vld [vmem:[#allocation8 + $0x1f80] sm:$0xff]  ;;  %v5376_v9 = vld [vmem:[#allocation8 + $0x1748] sm:$0xff] }
 0x4cb   : > { %6159 = vmatprep.subr.mxu1 %v5216_v58  ;;  %6230 = vmatprep.subr.mxu0 %v5472_v3  ;;  %v5632_v58 = vld [vmem:[#allocation8 + $0x1f48] sm:$0xff]  ;;  %v5375_v3 = vld [vmem:[#allocation8 + $0x1740] sm:$0xff] }
 0x4cc   : > { %6160 = vmatpush1.msra.mxu1 %v5215_v6  ;;  %6231 = vmatpush1.msra.mxu0 %v5471_v62  ;;  %v5631_v6 = vld [vmem:[#allocation8 + $0x1f40] sm:$0xff]  ;;  %v5368_v62 = vld [vmem:[#allocation8 + $0x1708] sm:$0xff] }
 0x4cd   : > { %6161 = vmatprep.subr.mxu1 %v5208_v10  ;;  %6232 = vmatprep.subr.mxu0 %v5464_v35  ;;  %v5624_v10 = vld [vmem:[#allocation8 + $0x1f08] sm:$0xff]  ;;  %v5367_v35 = vld [vmem:[#allocation8 + $0x1700] sm:$0xff] }
 0x4ce   : > { %6162 = vmatpush1.msra.mxu1 %v5207_v23  ;;  %6233 = vmatpush1.msra.mxu0 %v5463_v20  ;;  %v5623_v23 = vld [vmem:[#allocation8 + $0x1f00] sm:$0xff]  ;;  %v5360_v20 = vld [vmem:[#allocation8 + $0x16c8] sm:$0xff] }
 0x4cf   : > { %6163 = vmatprep.subr.mxu1 %v5200_v50  ;;  %6234 = vmatprep.subr.mxu0 %v5456_v4  ;;  %v5616_v50 = vld [vmem:[#allocation8 + $0x1ec8] sm:$0xff]  ;;  %v5359_v4 = vld [vmem:[#allocation8 + $0x16c0] sm:$0xff] }
 0x4d0   : > { %6164 = vmatpush1.msra.mxu1 %v5199_v30  ;;  %6235 = vmatpush1.msra.mxu0 %v5455_v28  ;;  %v5615_v30 = vld [vmem:[#allocation8 + $0x1ec0] sm:$0xff]  ;;  %v5352_v28 = vld [vmem:[#allocation8 + $0x1688] sm:$0xff] }
 0x4d1   : > { %6165 = vmatprep.subr.mxu1 %v5192_v21  ;;  %6236 = vmatprep.subr.mxu0 %v5448_v49  ;;  %v5608_v21 = vld [vmem:[#allocation8 + $0x1e88] sm:$0xff]  ;;  %v5351_v49 = vld [vmem:[#allocation8 + $0x1680] sm:$0xff] }
 0x4d2   : > { %6166 = vmatpush1.msra.mxu1 %v5191_v25  ;;  %6237 = vmatpush1.msra.mxu0 %v5447_v27  ;;  %v5607_v25 = vld [vmem:[#allocation8 + $0x1e80] sm:$0xff]  ;;  %v5344_v27 = vld [vmem:[#allocation8 + $0x1648] sm:$0xff] }
 0x4d3   : > { %6167 = vmatprep.subr.mxu1 %v5184_v39  ;;  %6238 = vmatprep.subr.mxu0 %v5440_v51  ;;  %v5600_v39 = vld [vmem:[#allocation8 + $0x1e48] sm:$0xff]  ;;  %v5343_v51 = vld [vmem:[#allocation8 + $0x1640] sm:$0xff] }
 0x4d4   : > { %6168 = vmatpush1.msra.mxu1 %v5183_v16  ;;  %6239 = vmatpush1.msra.mxu0 %v5439_v5  ;;  %v5599_v16 = vld [vmem:[#allocation8 + $0x1e40] sm:$0xff]  ;;  %v5336_v5 = vld [vmem:[#allocation8 + $0x1608] sm:$0xff] }
 0x4d5   : > { %6169 = vmatprep.subr.mxu1 %v5176_v31  ;;  %6240 = vmatprep.subr.mxu0 %v5432_v63  ;;  %v5592_v31 = vld [vmem:[#allocation8 + $0x1e08] sm:$0xff]  ;;  %v5335_v63 = vld [vmem:[#allocation8 + $0x1600] sm:$0xff] }
 0x4d6   : > { %6170 = vmatpush1.msra.mxu1 %v5175_v47  ;;  %6241 = vmatpush1.msra.mxu0 %v5431_v52  ;;  %v5591_v47 = vld [vmem:[#allocation8 + $0x1e00] sm:$0xff]  ;;  %v5328_v52 = vld [vmem:[#allocation8 + $0x15c8] sm:$0xff] }
 0x4d7   : > { %6171 = vmatprep.subr.mxu1 %v5168_v34  ;;  %6242 = vmatprep.subr.mxu0 %v5424_v40  ;;  %v5584_v34 = vld [vmem:[#allocation8 + $0x1dc8] sm:$0xff]  ;;  %v5327_v40 = vld [vmem:[#allocation8 + $0x15c0] sm:$0xff] }
 0x4d8   : > { %6172 = vmatpush1.msra.mxu1 %v5167_v13  ;;  %6243 = vmatpush1.msra.mxu0 %v5423_v57  ;;  %v5583_v13 = vld [vmem:[#allocation8 + $0x1dc0] sm:$0xff]  ;;  %v5320_v57 = vld [vmem:[#allocation8 + $0x1588] sm:$0xff] }
 0x4d9   : > { %6173 = vmatprep.subr.mxu1 %v5160_v29  ;;  %6244 = vmatprep.subr.mxu0 %v5416_v7  ;;  %v5576_v29 = vld [vmem:[#allocation8 + $0x1d88] sm:$0xff]  ;;  %v5319_v7 = vld [vmem:[#allocation8 + $0x1580] sm:$0xff] }
 0x4da   : > { %6174 = vmatpush1.msra.mxu1 %v5159_v24  ;;  %6245 = vmatpush1.msra.mxu0 %v5415_v14  ;;  %v5575_v24 = vld [vmem:[#allocation8 + $0x1d80] sm:$0xff]  ;;  %v5312_v14 = vld [vmem:[#allocation8 + $0x1548] sm:$0xff] }
 0x4db   : > { %6175 = vmatprep.subr.mxu1 %v5152_v45  ;;  %6246 = vmatprep.subr.mxu0 %v5408_v19  ;;  %v5568_v45 = vld [vmem:[#allocation8 + $0x1d48] sm:$0xff]  ;;  %v5311_v19 = vld [vmem:[#allocation8 + $0x1540] sm:$0xff] }
 0x4dc   : > { %6176 = vmatpush1.msra.mxu1 %v5151_v37  ;;  %6247 = vmatpush1.msra.mxu0 %v5407_v60  ;;  %v5567_v37 = vld [vmem:[#allocation8 + $0x1d40] sm:$0xff]  ;;  %v5304_v60 = vld [vmem:[#allocation8 + $0x1508] sm:$0xff] }
 0x4dd   : > { %6177 = vmatprep.subr.mxu1 %v5144_v17  ;;  %6248 = vmatprep.subr.mxu0 %v5400_v11  ;;  %v5560_v17 = vld [vmem:[#allocation8 + $0x1d08] sm:$0xff]  ;;  %v5303_v11 = vld [vmem:[#allocation8 + $0x1500] sm:$0xff] }
 0x4de   : > { %6178 = vmatpush1.msra.mxu1 %v5143_v36  ;;  %6249 = vmatpush1.msra.mxu0 %v5399_v54  ;;  %v5559_v36 = vld [vmem:[#allocation8 + $0x1d00] sm:$0xff]  ;;  %v5296_v54 = vld [vmem:[#allocation8 + $0x14c8] sm:$0xff] }
 0x4df   : > { %6179 = vmatprep.subr.mxu1 %v5392_v53  ;;  %6250 = vmatprep.subr.mxu0 %v5648_v15  ;;  %v5552_v53 = vld [vmem:[#allocation8 + $0x1cc8] sm:$0xff]  ;;  %v5295_v15 = vld [vmem:[#allocation8 + $0x14c0] sm:$0xff] }
 0x4e0   : > { %6180 = vmatpush2.msra.mxu1 %v5391_v55  ;;  %6251 = vmatpush2.msra.mxu0 %v5647_v1  ;;  %v5551_v55 = vld [vmem:[#allocation8 + $0x1cc0] sm:$0xff]  ;;  %v5288_v1 = vld [vmem:[#allocation8 + $0x1488] sm:$0xff] }
 0x4e1   : > { %6181 = vmatprep.subr.mxu1 %v5384_v32  ;;  %6252 = vmatprep.subr.mxu0 %v5640_v12  ;;  %v5544_v32 = vld [vmem:[#allocation8 + $0x1c88] sm:$0xff]  ;;  %v5287_v12 = vld [vmem:[#allocation8 + $0x1480] sm:$0xff] }
 0x4e2   : > { %6182 = vmatpush2.msra.mxu1 %v5383_v2  ;;  %6253 = vmatpush2.msra.mxu0 %v5639_v8  ;;  %v5543_v2 = vld [vmem:[#allocation8 + $0x1c80] sm:$0xff]  ;;  %v5280_v8 = vld [vmem:[#allocation8 + $0x1448] sm:$0xff] }
 0x4e3   : > { %6183 = vmatprep.subr.mxu1 %v5376_v9  ;;  %6254 = vmatprep.subr.mxu0 %v5632_v58  ;;  %v5536_v9 = vld [vmem:[#allocation8 + $0x1c48] sm:$0xff]  ;;  %v5279_v58 = vld [vmem:[#allocation8 + $0x1440] sm:$0xff] }
 0x4e4   : > { %6184 = vmatpush2.msra.mxu1 %v5375_v3  ;;  %6255 = vmatpush2.msra.mxu0 %v5631_v6  ;;  %v5535_v3 = vld [vmem:[#allocation8 + $0x1c40] sm:$0xff]  ;;  %v5272_v6 = vld [vmem:[#allocation8 + $0x1408] sm:$0xff] }
 0x4e5   : > { %6185 = vmatprep.subr.mxu1 %v5368_v62  ;;  %6256 = vmatprep.subr.mxu0 %v5624_v10  ;;  %v5528_v62 = vld [vmem:[#allocation8 + $0x1c08] sm:$0xff]  ;;  %v5271_v10 = vld [vmem:[#allocation8 + $0x1400] sm:$0xff] }
 0x4e6   : > { %6186 = vmatpush2.msra.mxu1 %v5367_v35  ;;  %6257 = vmatpush2.msra.mxu0 %v5623_v23  ;;  %v5527_v35 = vld [vmem:[#allocation8 + $0x1c00] sm:$0xff] }
 0x4e7   : > { %6187 = vmatprep.subr.mxu1 %v5360_v20  ;;  %6258 = vmatprep.subr.mxu0 %v5616_v50  ;;  %v15910_v23 = vld [vmem:[#allocation199_spill] sm:$0xff]  ;;  %v15911_v50 = vld [vmem:[#allocation200_spill] sm:$0xff] }
 0x4e8   : > { %6188 = vmatpush2.msra.mxu1 %v5359_v4  ;;  %6259 = vmatpush2.msra.mxu0 %v5615_v30  ;;  %v14490_v20 = vrot.slane %v14456_v44, %v15910_v23  ;;  %v14494_v4 = vrot.slane %v14456_v44, %v15911_v50  ;;  %v5776_v30 = vld [vmem:[#allocation8 + $0x23c8] sm:$0xff] }
 0x4e9   : > { %6189 = vmatprep.subr.mxu1 %v5352_v28  ;;  %6260 = vmatprep.subr.mxu0 %v5608_v21  ;;  %v4754_v28 = vld [vmem:[#allocation8 + $0x3d8] sm:$0xff]  ;;  %v5775_v21 = vld [vmem:[#allocation8 + $0x23c0] sm:$0xff]  ;;  %v5760_v44 = vld [vmem:[#allocation8 + $0x2348] sm:$0xff] }
 0x4ea   : > { %6190 = vmatpush2.msra.mxu1 %v5351_v49  ;;  %6261 = vmatpush2.msra.mxu0 %v5607_v25  ;;  %v4753_v49 = vld [vmem:[#allocation8 + $0x3d0] sm:$0xff]  ;;  %v5768_v25 = vld [vmem:[#allocation8 + $0x2388] sm:$0xff] }
 0x4eb   : > { %6191 = vmatprep.subr.mxu1 %v5344_v27  ;;  %6262 = vmatprep.subr.mxu0 %v5600_v39  ;;  %v4746_v27 = vld [vmem:[#allocation8 + $0x398] sm:$0xff]  ;;  %v5767_v39 = vld [vmem:[#allocation8 + $0x2380] sm:$0xff] }
 0x4ec   : > { %6192 = vmatpush2.msra.mxu1 %v5343_v51  ;;  %6263 = vmatpush2.msra.mxu0 %v5599_v16  ;;  %v4745_v51 = vld [vmem:[#allocation8 + $0x390] sm:$0xff]  ;;  %v4738_v16 = vld [vmem:[#allocation8 + $0x358] sm:$0xff] }
 0x4ed   : > { %6193 = vmatprep.subr.mxu1 %v5336_v5  ;;  %6264 = vmatprep.subr.mxu0 %v5592_v31  ;;  %v5759_v5 = vld [vmem:[#allocation8 + $0x2340] sm:$0xff]  ;;  %v4737_v31 = vld [vmem:[#allocation8 + $0x350] sm:$0xff] }
 0x4ee   : > { %6194 = vmatpush2.msra.mxu1 %v5335_v63  ;;  %6265 = vmatpush2.msra.mxu0 %v5591_v47  ;;  %v5752_v63 = vld [vmem:[#allocation8 + $0x2308] sm:$0xff]  ;;  %v4730_v47 = vld [vmem:[#allocation8 + $0x318] sm:$0xff] }
 0x4ef   : > { %6195 = vmatprep.subr.mxu1 %v5328_v52  ;;  %6266 = vmatprep.subr.mxu0 %v5584_v34  ;;  %v5751_v52 = vld [vmem:[#allocation8 + $0x2300] sm:$0xff]  ;;  %v4729_v34 = vld [vmem:[#allocation8 + $0x310] sm:$0xff] }
 0x4f0   : > { %6196 = vmatpush2.msra.mxu1 %v5327_v40  ;;  %6267 = vmatpush2.msra.mxu0 %v5583_v13  ;;  %v5744_v40 = vld [vmem:[#allocation8 + $0x22c8] sm:$0xff]  ;;  %v4722_v13 = vld [vmem:[#allocation8 + $0x2d8] sm:$0xff] }
 0x4f1   : > { %6197 = vmatprep.subr.mxu1 %v5320_v57  ;;  %6268 = vmatprep.subr.mxu0 %v5576_v29  ;;  %v5743_v57 = vld [vmem:[#allocation8 + $0x22c0] sm:$0xff]  ;;  %v4721_v29 = vld [vmem:[#allocation8 + $0x2d0] sm:$0xff] }
 0x4f2   : > { %6198 = vmatpush2.msra.mxu1 %v5319_v7  ;;  %6269 = vmatpush2.msra.mxu0 %v5575_v24  ;;  %v5736_v7 = vld [vmem:[#allocation8 + $0x2288] sm:$0xff]  ;;  %v4714_v24 = vld [vmem:[#allocation8 + $0x298] sm:$0xff] }
 0x4f3   : > { %6199 = vmatprep.subr.mxu1 %v5312_v14  ;;  %6270 = vmatprep.subr.mxu0 %v5568_v45  ;;  %v5735_v14 = vld [vmem:[#allocation8 + $0x2280] sm:$0xff]  ;;  %v4713_v45 = vld [vmem:[#allocation8 + $0x290] sm:$0xff] }
 0x4f4   : > { %6200 = vmatpush2.msra.mxu1 %v5311_v19  ;;  %6271 = vmatpush2.msra.mxu0 %v5567_v37  ;;  %v5728_v19 = vld [vmem:[#allocation8 + $0x2248] sm:$0xff]  ;;  %v4706_v37 = vld [vmem:[#allocation8 + $0x258] sm:$0xff] }
 0x4f5   : > { %6201 = vmatprep.subr.mxu1 %v5304_v60  ;;  %6272 = vmatprep.subr.mxu0 %v5560_v17  ;;  %v5727_v60 = vld [vmem:[#allocation8 + $0x2240] sm:$0xff]  ;;  %v4705_v17 = vld [vmem:[#allocation8 + $0x250] sm:$0xff] }
 0x4f6   : > { %6202 = vmatpush2.msra.mxu1 %v5303_v11  ;;  %6273 = vmatpush2.msra.mxu0 %v5559_v36  ;;  %v5720_v11 = vld [vmem:[#allocation8 + $0x2208] sm:$0xff]  ;;  %v4698_v36 = vld [vmem:[#allocation8 + $0x218] sm:$0xff] }
 0x4f7   : > { %6203 = vmatprep.subr.mxu1 %v5296_v54  ;;  %6274 = vmatprep.subr.mxu0 %v5552_v53  ;;  %v5719_v54 = vld [vmem:[#allocation8 + $0x2200] sm:$0xff]  ;;  %v4697_v53 = vld [vmem:[#allocation8 + $0x210] sm:$0xff] }
 0x4f8   : > { %6204 = vmatpush2.msra.mxu1 %v5295_v15  ;;  %6275 = vmatpush2.msra.mxu0 %v5551_v55  ;;  %v5712_v15 = vld [vmem:[#allocation8 + $0x21c8] sm:$0xff]  ;;  %v4690_v55 = vld [vmem:[#allocation8 + $0x1d8] sm:$0xff] }
 0x4f9   : > { %6205 = vmatprep.subr.mxu1 %v5288_v1  ;;  %6276 = vmatprep.subr.mxu0 %v5544_v32  ;;  %v5711_v1 = vld [vmem:[#allocation8 + $0x21c0] sm:$0xff]  ;;  %v4689_v32 = vld [vmem:[#allocation8 + $0x1d0] sm:$0xff] }
 0x4fa   : > { %6206 = vmatpush2.msra.mxu1 %v5287_v12  ;;  %6277 = vmatpush2.msra.mxu0 %v5543_v2  ;;  %v5704_v12 = vld [vmem:[#allocation8 + $0x2188] sm:$0xff]  ;;  %v4682_v2 = vld [vmem:[#allocation8 + $0x198] sm:$0xff] }
 0x4fb   : > { %6207 = vmatprep.subr.mxu1 %v5280_v8  ;;  %6278 = vmatprep.subr.mxu0 %v5536_v9  ;;  %v5703_v8 = vld [vmem:[#allocation8 + $0x2180] sm:$0xff]  ;;  %v4681_v9 = vld [vmem:[#allocation8 + $0x190] sm:$0xff] }
 0x4fc   : > { %6208 = vmatpush2.msra.mxu1 %v5279_v58  ;;  %6279 = vmatpush2.msra.mxu0 %v5535_v3  ;;  %v5696_v58 = vld [vmem:[#allocation8 + $0x2148] sm:$0xff]  ;;  %v4674_v3 = vld [vmem:[#allocation8 + $0x158] sm:$0xff] }
 0x4fd   : > { %6209 = vmatprep.subr.mxu1 %v5272_v6  ;;  %6280 = vmatprep.subr.mxu0 %v5528_v62  ;;  %v5695_v6 = vld [vmem:[#allocation8 + $0x2140] sm:$0xff]  ;;  %v4673_v62 = vld [vmem:[#allocation8 + $0x150] sm:$0xff] }
 0x4fe   : > { %6210 = vmatpush2.msra.mxu1 %v5271_v10  ;;  %6281 = vmatpush2.msra.mxu0 %v5527_v35  ;;  %v5688_v10 = vld [vmem:[#allocation8 + $0x2108] sm:$0xff]  ;;  %v4666_v35 = vld [vmem:[#allocation8 + $0x118] sm:$0xff] }
 0x4ff   : > { %6212 = vmatmul.mubr.f32.vlgmr.msra.gmra.mxu1 %v14490_v20  ;;  %6283 = vmatmul.mubr.f32.vlgmr.msra.gmra.mxu0 %v14494_v4 }
 0x500   : > { %6289 = vmatprep.subr.mxu1 %v5776_v30  ;;  %6360 = vmatprep.subr.mxu0 %v4754_v28  ;;  %v5687_v30 = vld [vmem:[#allocation8 + $0x2100] sm:$0xff]  ;;  %v4665_v28 = vld [vmem:[#allocation8 + $0x110] sm:$0xff] }
 0x501   : > { %6290 = vmatpush1.msra.mxu1 %v5775_v21  ;;  %6361 = vmatpush1.msra.mxu0 %v4753_v49  ;;  %v5680_v21 = vld [vmem:[#allocation8 + $0x20c8] sm:$0xff]  ;;  %v4658_v49 = vld [vmem:[#allocation8 + $0xd8] sm:$0xff] }
 0x502   : > { %6424 = vmatprep.mubr.f32.mxu0 %v14460_v22  ;;  %6291 = vmatprep.subr.mxu1 %v5768_v25  ;;  %v5679_v25 = vld [vmem:[#allocation8 + $0x20c0] sm:$0xff] }
 0x503   : > { %6362 = vmatprep.subr.mxu0 %v4746_v27  ;;  %6292 = vmatpush1.msra.mxu1 %v5767_v39  ;;  %v4657_v27 = vld [vmem:[#allocation8 + $0xd0] sm:$0xff]  ;;  %v5672_v39 = vld [vmem:[#allocation8 + $0x2088] sm:$0xff] }
 0x504   : > { %6363 = vmatpush1.msra.mxu0 %v4745_v51  ;;  %6293 = vmatprep.subr.mxu1 %v5760_v44  ;;  %v4650_v51 = vld [vmem:[#allocation8 + $0x98] sm:$0xff]  ;;  %v5671_v44 = vld [vmem:[#allocation8 + $0x2080] sm:$0xff] }
 0x505   : > { %6364 = vmatprep.subr.mxu0 %v4738_v16  ;;  %6294 = vmatpush1.msra.mxu1 %v5759_v5  ;;  %v4649_v16 = vld [vmem:[#allocation8 + $0x90] sm:$0xff]  ;;  %v5664_v5 = vld [vmem:[#allocation8 + $0x2048] sm:$0xff] }
 0x506   : > { %6365 = vmatpush1.msra.mxu0 %v4737_v31  ;;  %6295 = vmatprep.subr.mxu1 %v5752_v63  ;;  %v4642_v31 = vld [vmem:[#allocation8 + $0x58] sm:$0xff]  ;;  %v5663_v63 = vld [vmem:[#allocation8 + $0x2040] sm:$0xff] }
 0x507   : > { %6366 = vmatprep.subr.mxu0 %v4730_v47  ;;  %6296 = vmatpush1.msra.mxu1 %v5751_v52  ;;  %v4641_v47 = vld [vmem:[#allocation8 + $0x50] sm:$0xff]  ;;  %v5656_v52 = vld [vmem:[#allocation8 + $0x2008] sm:$0xff] }
 0x508   : > { %6367 = vmatpush1.msra.mxu0 %v4729_v34  ;;  %6297 = vmatprep.subr.mxu1 %v5744_v40  ;;  %v4634_v34 = vld [vmem:[#allocation8 + $0x18] sm:$0xff]  ;;  %v5655_v40 = vld [vmem:[#allocation8 + $0x2000] sm:$0xff] }
 0x509   : > { %6368 = vmatprep.subr.mxu0 %v4722_v13  ;;  %6298 = vmatpush1.msra.mxu1 %v5743_v57  ;;  %v4633_v13 = vld [vmem:[#allocation8 + $0x10] sm:$0xff]  ;;  %v5904_v57 = vld [vmem:[#allocation8 + $0x27c8] sm:$0xff] }
 0x50a   : > { %6369 = vmatpush1.msra.mxu0 %v4721_v29  ;;  %6299 = vmatprep.subr.mxu1 %v5736_v7  ;;  %v4882_v29 = vld [vmem:[#allocation8 + $0x7d8] sm:$0xff]  ;;  %v5903_v7 = vld [vmem:[#allocation8 + $0x27c0] sm:$0xff] }
 0x50b   : > { %6370 = vmatprep.subr.mxu0 %v4714_v24  ;;  %6300 = vmatpush1.msra.mxu1 %v5735_v14  ;;  %v4881_v24 = vld [vmem:[#allocation8 + $0x7d0] sm:$0xff]  ;;  %v5896_v14 = vld [vmem:[#allocation8 + $0x2788] sm:$0xff] }
 0x50c   : > { %6371 = vmatpush1.msra.mxu0 %v4713_v45  ;;  %6301 = vmatprep.subr.mxu1 %v5728_v19  ;;  %v4874_v45 = vld [vmem:[#allocation8 + $0x798] sm:$0xff]  ;;  %v5895_v19 = vld [vmem:[#allocation8 + $0x2780] sm:$0xff] }
 0x50d   : > { %6372 = vmatprep.subr.mxu0 %v4706_v37  ;;  %6302 = vmatpush1.msra.mxu1 %v5727_v60  ;;  %v4873_v37 = vld [vmem:[#allocation8 + $0x790] sm:$0xff]  ;;  %v5888_v60 = vld [vmem:[#allocation8 + $0x2748] sm:$0xff] }
 0x50e   : > { %6373 = vmatpush1.msra.mxu0 %v4705_v17  ;;  %6303 = vmatprep.subr.mxu1 %v5720_v11  ;;  %v4866_v17 = vld [vmem:[#allocation8 + $0x758] sm:$0xff]  ;;  %v5887_v11 = vld [vmem:[#allocation8 + $0x2740] sm:$0xff] }
 0x50f   : > { %6374 = vmatprep.subr.mxu0 %v4698_v36  ;;  %6304 = vmatpush1.msra.mxu1 %v5719_v54  ;;  %v4865_v36 = vld [vmem:[#allocation8 + $0x750] sm:$0xff]  ;;  %v5880_v54 = vld [vmem:[#allocation8 + $0x2708] sm:$0xff] }
 0x510   : > { %6375 = vmatpush1.msra.mxu0 %v4697_v53  ;;  %6305 = vmatprep.subr.mxu1 %v5712_v15  ;;  %v4858_v53 = vld [vmem:[#allocation8 + $0x718] sm:$0xff]  ;;  %v5879_v15 = vld [vmem:[#allocation8 + $0x2700] sm:$0xff] }
 0x511   : > { %6376 = vmatprep.subr.mxu0 %v4690_v55  ;;  %6306 = vmatpush1.msra.mxu1 %v5711_v1  ;;  %v4857_v55 = vld [vmem:[#allocation8 + $0x710] sm:$0xff]  ;;  %v5872_v1 = vld [vmem:[#allocation8 + $0x26c8] sm:$0xff] }
 0x512   : > { %6377 = vmatpush1.msra.mxu0 %v4689_v32  ;;  %6307 = vmatprep.subr.mxu1 %v5704_v12  ;;  %v4850_v32 = vld [vmem:[#allocation8 + $0x6d8] sm:$0xff]  ;;  %v5871_v12 = vld [vmem:[#allocation8 + $0x26c0] sm:$0xff] }
 0x513   : > { %6378 = vmatprep.subr.mxu0 %v4682_v2  ;;  %6308 = vmatpush1.msra.mxu1 %v5703_v8  ;;  %v4849_v2 = vld [vmem:[#allocation8 + $0x6d0] sm:$0xff]  ;;  %v5864_v8 = vld [vmem:[#allocation8 + $0x2688] sm:$0xff] }
 0x514   : > { %6379 = vmatpush1.msra.mxu0 %v4681_v9  ;;  %6309 = vmatprep.subr.mxu1 %v5696_v58  ;;  %v4842_v9 = vld [vmem:[#allocation8 + $0x698] sm:$0xff]  ;;  %v5863_v58 = vld [vmem:[#allocation8 + $0x2680] sm:$0xff] }
 0x515   : > { %6380 = vmatprep.subr.mxu0 %v4674_v3  ;;  %6310 = vmatpush1.msra.mxu1 %v5695_v6  ;;  %v4841_v3 = vld [vmem:[#allocation8 + $0x690] sm:$0xff]  ;;  %v5856_v6 = vld [vmem:[#allocation8 + $0x2648] sm:$0xff] }
 0x516   : > { %6381 = vmatpush1.msra.mxu0 %v4673_v62  ;;  %6311 = vmatprep.subr.mxu1 %v5688_v10  ;;  %v4834_v62 = vld [vmem:[#allocation8 + $0x658] sm:$0xff]  ;;  %v5855_v10 = vld [vmem:[#allocation8 + $0x2640] sm:$0xff] }
 0x517   : > { %6382 = vmatprep.subr.mxu0 %v4666_v35  ;;  %6312 = vmatpush1.msra.mxu1 %v5687_v30  ;;  %v4833_v35 = vld [vmem:[#allocation8 + $0x650] sm:$0xff]  ;;  %v5848_v30 = vld [vmem:[#allocation8 + $0x2608] sm:$0xff] }
 0x518   : > { %6383 = vmatpush1.msra.mxu0 %v4665_v28  ;;  %6313 = vmatprep.subr.mxu1 %v5680_v21  ;;  %v4826_v21 = vld [vmem:[#allocation8 + $0x618] sm:$0xff] }
 0x519   : > { %6384 = vmatprep.subr.mxu0 %v4658_v49  ;;  %6314 = vmatpush1.msra.mxu1 %v5679_v25  ;;  %v5847_v49 = vld [vmem:[#allocation8 + $0x2600] sm:$0xff]  ;;  %v4825_v25 = vld [vmem:[#allocation8 + $0x610] sm:$0xff] }
 0x51a   : > { %6385 = vmatpush1.msra.mxu0 %v4657_v27  ;;  %6315 = vmatprep.subr.mxu1 %v5672_v39  ;;  %v5840_v27 = vld [vmem:[#allocation8 + $0x25c8] sm:$0xff] }
 0x51b   : > { %6386 = vmatprep.subr.mxu0 %v4650_v51  ;;  %6316 = vmatpush1.msra.mxu1 %v5671_v44  ;;  %v4818_v51 = vld [vmem:[#allocation8 + $0x5d8] sm:$0xff]  ;;  %v5839_v44 = vld [vmem:[#allocation8 + $0x25c0] sm:$0xff] }
 0x51c   : > { %6387 = vmatpush1.msra.mxu0 %v4649_v16  ;;  %6317 = vmatprep.subr.mxu1 %v5664_v5  ;;  %v4817_v5 = vld [vmem:[#allocation8 + $0x5d0] sm:$0xff] }
 0x51d   : > { %6388 = vmatprep.subr.mxu0 %v4642_v31  ;;  %6318 = vmatpush1.msra.mxu1 %v5663_v63  ;;  %v5832_v31 = vld [vmem:[#allocation8 + $0x2588] sm:$0xff]  ;;  %v4810_v63 = vld [vmem:[#allocation8 + $0x598] sm:$0xff] }
 0x51e   : > { %6389 = vmatpush1.msra.mxu0 %v4641_v47  ;;  %6319 = vmatprep.subr.mxu1 %v5656_v52  ;;  %v5831_v47 = vld [vmem:[#allocation8 + $0x2580] sm:$0xff] }
 0x51f   : > { %6390 = vmatprep.subr.mxu0 %v4634_v34  ;;  %6320 = vmatpush1.msra.mxu1 %v5655_v40  ;;  %v4809_v34 = vld [vmem:[#allocation8 + $0x590] sm:$0xff]  ;;  %v5824_v40 = vld [vmem:[#allocation8 + $0x2548] sm:$0xff] }
 0x520   : > { %6391 = vmatpush1.msra.mxu0 %v4633_v13  ;;  %6321 = vmatprep.subr.mxu1 %v5904_v57  ;;  %v4541_v13 = vld [vmem:[#allocation2 + $0x8] sm:$0x3]  ;;  %v4802_v57 = vld [vmem:[#allocation8 + $0x558] sm:$0xff] }
 0x521   : > { %6392 = vmatprep.subr.mxu0 %v4882_v29  ;;  %6322 = vmatpush2.msra.mxu1 %v5903_v7  ;;  %v5823_v29 = vld [vmem:[#allocation8 + $0x2540] sm:$0xff] }
 0x522   : > { %6393 = vmatpush2.msra.mxu0 %v4881_v24  ;;  %6323 = vmatprep.subr.mxu1 %v5896_v14  ;;  %v4801_v24 = vld [vmem:[#allocation8 + $0x550] sm:$0xff]  ;;  %v5816_v14 = vld [vmem:[#allocation8 + $0x2508] sm:$0xff] }
 0x523   : > { %6394 = vmatprep.subr.mxu0 %v4874_v45  ;;  %6324 = vmatpush2.msra.mxu1 %v5895_v19  ;;  %v4794_v45 = vld [vmem:[#allocation8 + $0x518] sm:$0xff]  ;;  %v5815_v19 = vld [vmem:[#allocation8 + $0x2500] sm:$0xff] }
 0x524   : > { %6395 = vmatpush2.msra.mxu0 %v4873_v37  ;;  %6325 = vmatprep.subr.mxu1 %v5888_v60  ;;  %v4793_v60 = vld [vmem:[#allocation8 + $0x510] sm:$0xff] }
 0x525   : > { %6396 = vmatprep.subr.mxu0 %v4866_v17  ;;  %6326 = vmatpush2.msra.mxu1 %v5887_v11  ;;  %v5808_v17 = vld [vmem:[#allocation8 + $0x24c8] sm:$0xff]  ;;  %v4786_v11 = vld [vmem:[#allocation8 + $0x4d8] sm:$0xff] }
 0x526   : > { %6397 = vmatpush2.msra.mxu0 %v4865_v36  ;;  %6327 = vmatprep.subr.mxu1 %v5880_v54  ;;  %v5807_v36 = vld [vmem:[#allocation8 + $0x24c0] sm:$0xff]  ;;  %v5800_v54 = vld [vmem:[#allocation8 + $0x2488] sm:$0xff] }
 0x527   : > { %6398 = vmatprep.subr.mxu0 %v4858_v53  ;;  %6328 = vmatpush2.msra.mxu1 %v5879_v15  ;;  %v4778_v53 = vld [vmem:[#allocation8 + $0x498] sm:$0xff]  ;;  %v5799_v15 = vld [vmem:[#allocation8 + $0x2480] sm:$0xff] }
 0x528   : > { %6399 = vmatpush2.msra.mxu0 %v4857_v55  ;;  %6329 = vmatprep.subr.mxu1 %v5872_v1  ;;  %v4777_v55 = vld [vmem:[#allocation8 + $0x490] sm:$0xff]  ;;  %v5792_v1 = vld [vmem:[#allocation8 + $0x2448] sm:$0xff] }
 0x529   : > { %6400 = vmatprep.subr.mxu0 %v4850_v32  ;;  %6330 = vmatpush2.msra.mxu1 %v5871_v12  ;;  %v4770_v32 = vld [vmem:[#allocation8 + $0x458] sm:$0xff]  ;;  %v5791_v12 = vld [vmem:[#allocation8 + $0x2440] sm:$0xff] }
 0x52a   : > { %6401 = vmatpush2.msra.mxu0 %v4849_v2  ;;  %6331 = vmatprep.subr.mxu1 %v5864_v8  ;;  %v5784_v2 = vld [vmem:[#allocation8 + $0x2408] sm:$0xff]  ;;  %v4762_v8 = vld [vmem:[#allocation8 + $0x418] sm:$0xff] }
 0x52b   : > { %6402 = vmatprep.subr.mxu0 %v4842_v9  ;;  %6332 = vmatpush2.msra.mxu1 %v5863_v58  ;;  %v5783_v9 = vld [vmem:[#allocation8 + $0x2400] sm:$0xff]  ;;  %v4761_v58 = vld [vmem:[#allocation8 + $0x410] sm:$0xff] }
 0x52c   : > { %6403 = vmatpush2.msra.mxu0 %v4841_v3  ;;  %6333 = vmatprep.subr.mxu1 %v5856_v6  ;;  %v5010_v3 = vld [vmem:[#allocation8 + $0xbd8] sm:$0xff] }
 0x52d   : > { %v4535_v28 = vpop.f32.mrf.mxu0  ;;  %6404 = vmatprep.subr.mxu0 %v4834_v62  ;;  %6334 = vmatpush2.msra.mxu1 %v5855_v10 }
 0x52e   : > { %6405 = vmatpush2.msra.mxu0 %v4833_v35  ;;  %6335 = vmatprep.subr.mxu1 %v5848_v30  ;;  %v5266_v35 = vld [vmem:[#allocation8 + $0x13d8] sm:$0xff]  ;;  %v5009_v30 = vld [vmem:[#allocation8 + $0xbd0] sm:$0xff] }
 0x52f   : > { %v4537_v39 = vpop.f32.mrf.mxu0  ;;  %6406 = vmatprep.subr.mxu0 %v4826_v21  ;;  %6336 = vmatpush2.msra.mxu1 %v5847_v49  ;;  %v5002_v21 = vld [vmem:[#allocation8 + $0xb98] sm:$0xff] }
 0x530   : > { %v4601_v16 = vcombine.low %v4535_v28, %v4537_v39  ;;  %6407 = vmatpush2.msra.mxu0 %v4825_v25  ;;  %6337 = vmatprep.subr.mxu1 %v5840_v27  ;;  %v5265_v28 = vld [vmem:[#allocation8 + $0x13d0] sm:$0xff]  ;;  %v5258_v49 = vld [vmem:[#allocation8 + $0x1398] sm:$0xff] }
 0x531   : > { %6408 = vmatprep.subr.mxu0 %v4818_v51  ;;  %6338 = vmatpush2.msra.mxu1 %v5839_v44  ;;  %v5001_v25 = vld [vmem:[#allocation8 + $0xb90] sm:$0xff]  ;;  %v4994_v39 = vld [vmem:[#allocation8 + $0xb58] sm:$0xff] }
 0x532   : > { %v4608_v52 = vrot.slane %v4601_v16, %v14440_v48  ;;  %6409 = vmatpush2.msra.mxu0 %v4817_v5  ;;  %6339 = vmatprep.subr.mxu1 %v5832_v31  ;;  %v5257_v27 = vld [vmem:[#allocation8 + $0x1390] sm:$0xff]  ;;  %v5250_v51 = vld [vmem:[#allocation8 + $0x1358] sm:$0xff] }
 0x533   : > { %6410 = vmatprep.subr.mxu0 %v4810_v63  ;;  %6340 = vmatpush2.msra.mxu1 %v5831_v47  ;;  %v4993_v44 = vld [vmem:[#allocation8 + $0xb50] sm:$0xff]  ;;  %v4986_v5 = vld [vmem:[#allocation8 + $0xb18] sm:$0xff] }
 0x534   : > { %v4615_v7 = vrot.slane %v4608_v52, %v14440_v48  ;;  %6411 = vmatpush2.msra.mxu0 %v4809_v34  ;;  %6341 = vmatprep.subr.mxu1 %v5824_v40  ;;  %v4785_v48 = vld [vmem:[#allocation8 + $0x4d0] sm:$0xff]  ;;  %v5242_v31 = vld [vmem:[#allocation8 + $0x1318] sm:$0xff] }
 0x535   : > { %6412 = vmatprep.subr.mxu0 %v4802_v57  ;;  %6342 = vmatpush2.msra.mxu1 %v5823_v29  ;;  %v5249_v16 = vld [vmem:[#allocation8 + $0x1350] sm:$0xff]  ;;  %v4978_v52 = vld [vmem:[#allocation8 + $0xad8] sm:$0xff] }
 0x536   : > { %v4619_v37 = vadd.f32 %v4615_v7, %v4541_v13  ;;  %6413 = vmatpush2.msra.mxu0 %v4801_v24  ;;  %6343 = vmatprep.subr.mxu1 %v5816_v14  ;;  %v4985_v63 = vld [vmem:[#allocation8 + $0xb10] sm:$0xff]  ;;  %v5234_v34 = vld [vmem:[#allocation8 + $0x12d8] sm:$0xff] }
 0x537   : > { %6414 = vmatprep.subr.mxu0 %v4794_v45  ;;  %6344 = vmatpush2.msra.mxu1 %v5815_v19  ;;  %v5241_v47 = vld [vmem:[#allocation8 + $0x1310] sm:$0xff]  ;;  %v4970_v57 = vld [vmem:[#allocation8 + $0xa98] sm:$0xff] }
 0x538   : > { %4625 = vst.msk [vmem:[#allocation2 + $0x8] sm:$0x3] %vm14443_vm2, %v4619_v37  ;;  %6415 = vmatpush2.msra.mxu0 %v4793_v60  ;;  %6345 = vmatprep.subr.mxu1 %v5808_v17  ;;  %v4977_v40 = vld [vmem:[#allocation8 + $0xad0] sm:$0xff]  ;;  %v5226_v29 = vld [vmem:[#allocation8 + $0x1298] sm:$0xff] }
 0x539   : > { %6416 = vmatprep.subr.mxu0 %v4786_v11  ;;  %6346 = vmatpush2.msra.mxu1 %v5807_v36  ;;  %v5233_v13 = vld [vmem:[#allocation8 + $0x12d0] sm:$0xff]  ;;  %v4962_v14 = vld [vmem:[#allocation8 + $0xa58] sm:$0xff] }
 0x53a   : > { %6417 = vmatpush2.msra.mxu0 %v4785_v48  ;;  %6347 = vmatprep.subr.mxu1 %v5800_v54  ;;  %v4969_v7 = vld [vmem:[#allocation8 + $0xa90] sm:$0xff]  ;;  %v5218_v45 = vld [vmem:[#allocation8 + $0x1258] sm:$0xff] }
 0x53b   : > { %6418 = vmatprep.subr.mxu0 %v4778_v53  ;;  %6348 = vmatpush2.msra.mxu1 %v5799_v15  ;;  %v5225_v24 = vld [vmem:[#allocation8 + $0x1290] sm:$0xff]  ;;  %v4954_v60 = vld [vmem:[#allocation8 + $0xa18] sm:$0xff] }
 0x53c   : > { %6419 = vmatpush2.msra.mxu0 %v4777_v55  ;;  %6349 = vmatprep.subr.mxu1 %v5792_v1  ;;  %v4961_v19 = vld [vmem:[#allocation8 + $0xa50] sm:$0xff]  ;;  %v5210_v17 = vld [vmem:[#allocation8 + $0x1218] sm:$0xff] }
 0x53d   : > { %6420 = vmatprep.subr.mxu0 %v4770_v32  ;;  %6350 = vmatpush2.msra.mxu1 %v5791_v12  ;;  %v5217_v37 = vld [vmem:[#allocation8 + $0x1250] sm:$0xff]  ;;  %v4946_v48 = vld [vmem:[#allocation8 + $0x9d8] sm:$0xff] }
 0x53e   : > { %6421 = vmatpush2.msra.mxu0 %v4769_v46  ;;  %6351 = vmatprep.subr.mxu1 %v5784_v2  ;;  %v4953_v11 = vld [vmem:[#allocation8 + $0xa10] sm:$0xff]  ;;  %v5202_v54 = vld [vmem:[#allocation8 + $0x11d8] sm:$0xff] }
 0x53f   : > { %v4630_v6 = vld [vmem:[#allocation2 + $0x8] sm:$0x3]  ;;  %6422 = vmatprep.subr.mxu0 %v4762_v8  ;;  %6352 = vmatpush2.msra.mxu1 %v5783_v9  ;;  %v5209_v36 = vld [vmem:[#allocation8 + $0x1210] sm:$0xff]  ;;  %v4938_v55 = vld [vmem:[#allocation8 + $0x998] sm:$0xff] }
 0x540   : > { %v14504_v62 = vrot.slane %v4630_v6, %v15906_v59  ;;  %v14507_v10 = vrot.slane %v4630_v6, %v15904_v43  ;;  %6423 = vmatpush2.msra.mxu0 %v4761_v58  ;;  %6431 = vmatprep.subr.mxu1 %v5010_v3  ;;  %v4945_v53 = vld [vmem:[#allocation8 + $0x9d0] sm:$0xff]  ;;  %v5194_v1 = vld [vmem:[#allocation8 + $0x1198] sm:$0xff] }
 0x541   : > { %6425 = vmatmul.mubr.f32.vlgmr.msra.gmra.mxu0 %v14468_v42  ;;  %6502 = vmatprep.subr.mxu0 %v5266_v35  ;;  %v5201_v15 = vld [vmem:[#allocation8 + $0x11d0] sm:$0xff]  ;;  %v4930_v46 = vld [vmem:[#allocation8 + $0x958] sm:$0xff] }
 0x542   : > { %6353 = vmatprep.mubr.f32.mxu1 %v14507_v10  ;;  %6503 = vmatpush1.msra.mxu0 %v5265_v28  ;;  %v4937_v32 = vld [vmem:[#allocation8 + $0x990] sm:$0xff]  ;;  %v5186_v2 = vld [vmem:[#allocation8 + $0x1158] sm:$0xff] }
 0x543   : > { %6354 = vmatmul.mubr.f32.vlgmr.msra.gmra.mxu1 %v14504_v62  ;;  %6566 = vmatprep.mubr.f32.mxu0 %v14480_v18  ;;  %v5193_v12 = vld [vmem:[#allocation8 + $0x1190] sm:$0xff]  ;;  %v4922_v58 = vld [vmem:[#allocation8 + $0x918] sm:$0xff] }
 0x544   : > { %6432 = vmatpush1.msra.mxu1 %v5009_v30  ;;  %6495 = vmatprep.mubr.f32.mxu1 %v14464_v41  ;;  %v4929_v8 = vld [vmem:[#allocation8 + $0x950] sm:$0xff]  ;;  %v5178_v3 = vld [vmem:[#allocation8 + $0x1118] sm:$0xff] }
 0x545   : > { %6433 = vmatprep.subr.mxu1 %v5002_v21  ;;  %6504 = vmatprep.subr.mxu0 %v5258_v49  ;;  %v5185_v9 = vld [vmem:[#allocation8 + $0x1150] sm:$0xff]  ;;  %v4914_v30 = vld [vmem:[#allocation8 + $0x8d8] sm:$0xff] }
 0x546   : > { %6434 = vmatpush1.msra.mxu1 %v5001_v25  ;;  %6505 = vmatpush1.msra.mxu0 %v5257_v27  ;;  %v4921_v6 = vld [vmem:[#allocation8 + $0x910] sm:$0xff]  ;;  %v5170_v28 = vld [vmem:[#allocation8 + $0x10d8] sm:$0xff] }
 0x547   : > { %6435 = vmatprep.subr.mxu1 %v4994_v39  ;;  %6506 = vmatprep.subr.mxu0 %v5250_v51  ;;  %v5177_v35 = vld [vmem:[#allocation8 + $0x1110] sm:$0xff]  ;;  %v4906_v25 = vld [vmem:[#allocation8 + $0x898] sm:$0xff] }
 0x548   : > { %6436 = vmatpush1.msra.mxu1 %v4993_v44  ;;  %6507 = vmatpush1.msra.mxu0 %v5249_v16  ;;  %v4913_v21 = vld [vmem:[#allocation8 + $0x8d0] sm:$0xff]  ;;  %v5162_v27 = vld [vmem:[#allocation8 + $0x1098] sm:$0xff] }
 0x549   : > { %6437 = vmatprep.subr.mxu1 %v4986_v5  ;;  %6508 = vmatprep.subr.mxu0 %v5242_v31  ;;  %v5169_v49 = vld [vmem:[#allocation8 + $0x10d0] sm:$0xff]  ;;  %v4898_v44 = vld [vmem:[#allocation8 + $0x858] sm:$0xff] }
 0x54a   : > { %6438 = vmatpush1.msra.mxu1 %v4985_v63  ;;  %6509 = vmatpush1.msra.mxu0 %v5241_v47  ;;  %v4905_v39 = vld [vmem:[#allocation8 + $0x890] sm:$0xff]  ;;  %v5154_v16 = vld [vmem:[#allocation8 + $0x1058] sm:$0xff] }
 0x54b   : > { %6439 = vmatprep.subr.mxu1 %v4978_v52  ;;  %6510 = vmatprep.subr.mxu0 %v5234_v34  ;;  %v5161_v51 = vld [vmem:[#allocation8 + $0x1090] sm:$0xff]  ;;  %v4890_v63 = vld [vmem:[#allocation8 + $0x818] sm:$0xff] }
 0x54c   : > { %6440 = vmatpush1.msra.mxu1 %v4977_v40  ;;  %6511 = vmatpush1.msra.mxu0 %v5233_v13  ;;  %v4897_v5 = vld [vmem:[#allocation8 + $0x850] sm:$0xff]  ;;  %v5146_v47 = vld [vmem:[#allocation8 + $0x1018] sm:$0xff] }
 0x54d   : > { %6441 = vmatprep.subr.mxu1 %v4970_v57  ;;  %6512 = vmatprep.subr.mxu0 %v5226_v29  ;;  %v5153_v31 = vld [vmem:[#allocation8 + $0x1050] sm:$0xff]  ;;  %v5138_v40 = vld [vmem:[#allocation8 + $0xfd8] sm:$0xff] }
 0x54e   : > { %6442 = vmatpush1.msra.mxu1 %v4969_v7  ;;  %6513 = vmatpush1.msra.mxu0 %v5225_v24  ;;  %v4889_v52 = vld [vmem:[#allocation8 + $0x810] sm:$0xff]  ;;  %v5394_v13 = vld [vmem:[#allocation8 + $0x17d8] sm:$0xff] }
 0x54f   : > { %6443 = vmatprep.subr.mxu1 %v4962_v14  ;;  %6514 = vmatprep.subr.mxu0 %v5218_v45  ;;  %v5145_v34 = vld [vmem:[#allocation8 + $0x1010] sm:$0xff]  ;;  %v5130_v7 = vld [vmem:[#allocation8 + $0xf98] sm:$0xff] }
 0x550   : > { %6444 = vmatpush1.msra.mxu1 %v4961_v19  ;;  %6515 = vmatpush1.msra.mxu0 %v5217_v37  ;;  %v5137_v57 = vld [vmem:[#allocation8 + $0xfd0] sm:$0xff]  ;;  %v5386_v24 = vld [vmem:[#allocation8 + $0x1798] sm:$0xff] }
 0x551   : > { %6445 = vmatprep.subr.mxu1 %v4954_v60  ;;  %6516 = vmatprep.subr.mxu0 %v5210_v17  ;;  %v5393_v29 = vld [vmem:[#allocation8 + $0x17d0] sm:$0xff]  ;;  %v5122_v19 = vld [vmem:[#allocation8 + $0xf58] sm:$0xff] }
 0x552   : > { %6446 = vmatpush1.msra.mxu1 %v4953_v11  ;;  %6517 = vmatpush1.msra.mxu0 %v5209_v36  ;;  %v5129_v14 = vld [vmem:[#allocation8 + $0xf90] sm:$0xff]  ;;  %v5378_v37 = vld [vmem:[#allocation8 + $0x1758] sm:$0xff] }
 0x553   : > { %6447 = vmatprep.subr.mxu1 %v4946_v48  ;;  %6518 = vmatprep.subr.mxu0 %v5202_v54  ;;  %v5385_v45 = vld [vmem:[#allocation8 + $0x1790] sm:$0xff]  ;;  %v5114_v11 = vld [vmem:[#allocation8 + $0xf18] sm:$0xff] }
 0x554   : > { %6448 = vmatpush1.msra.mxu1 %v4945_v53  ;;  %6519 = vmatpush1.msra.mxu0 %v5201_v15  ;;  %v5121_v60 = vld [vmem:[#allocation8 + $0xf50] sm:$0xff]  ;;  %v5370_v36 = vld [vmem:[#allocation8 + $0x1718] sm:$0xff] }
 0x555   : > { %6449 = vmatprep.subr.mxu1 %v4938_v55  ;;  %6520 = vmatprep.subr.mxu0 %v5194_v1  ;;  %v5377_v17 = vld [vmem:[#allocation8 + $0x1750] sm:$0xff]  ;;  %v5106_v53 = vld [vmem:[#allocation8 + $0xed8] sm:$0xff] }
 0x556   : > { %6450 = vmatpush1.msra.mxu1 %v4937_v32  ;;  %6521 = vmatpush1.msra.mxu0 %v5193_v12  ;;  %v5113_v48 = vld [vmem:[#allocation8 + $0xf10] sm:$0xff]  ;;  %v5362_v15 = vld [vmem:[#allocation8 + $0x16d8] sm:$0xff] }
 0x557   : > { %6451 = vmatprep.subr.mxu1 %v4930_v46  ;;  %6522 = vmatprep.subr.mxu0 %v5186_v2  ;;  %v5369_v54 = vld [vmem:[#allocation8 + $0x1710] sm:$0xff]  ;;  %v5098_v32 = vld [vmem:[#allocation8 + $0xe98] sm:$0xff] }
 0x558   : > { %6452 = vmatpush1.msra.mxu1 %v4929_v8  ;;  %6523 = vmatpush1.msra.mxu0 %v5185_v9  ;;  %v5105_v55 = vld [vmem:[#allocation8 + $0xed0] sm:$0xff]  ;;  %v5354_v12 = vld [vmem:[#allocation8 + $0x1698] sm:$0xff] }
 0x559   : > { %6453 = vmatprep.subr.mxu1 %v4922_v58  ;;  %6524 = vmatprep.subr.mxu0 %v5178_v3  ;;  %v5361_v1 = vld [vmem:[#allocation8 + $0x16d0] sm:$0xff]  ;;  %v5090_v8 = vld [vmem:[#allocation8 + $0xe58] sm:$0xff] }
 0x55a   : > { %6454 = vmatpush1.msra.mxu1 %v4921_v6  ;;  %6525 = vmatpush1.msra.mxu0 %v5177_v35  ;;  %v5097_v46 = vld [vmem:[#allocation8 + $0xe90] sm:$0xff]  ;;  %v5346_v9 = vld [vmem:[#allocation8 + $0x1658] sm:$0xff] }
 0x55b   : > { %6455 = vmatprep.subr.mxu1 %v4914_v30  ;;  %6526 = vmatprep.subr.mxu0 %v5170_v28  ;;  %v5353_v2 = vld [vmem:[#allocation8 + $0x1690] sm:$0xff]  ;;  %v5082_v6 = vld [vmem:[#allocation8 + $0xe18] sm:$0xff] }
 0x55c   : > { %6456 = vmatpush1.msra.mxu1 %v4913_v21  ;;  %6527 = vmatpush1.msra.mxu0 %v5169_v49  ;;  %v5089_v58 = vld [vmem:[#allocation8 + $0xe50] sm:$0xff]  ;;  %v5338_v35 = vld [vmem:[#allocation8 + $0x1618] sm:$0xff] }
 0x55d   : > { %6457 = vmatprep.subr.mxu1 %v4906_v25  ;;  %6528 = vmatprep.subr.mxu0 %v5162_v27  ;;  %v5345_v3 = vld [vmem:[#allocation8 + $0x1650] sm:$0xff]  ;;  %v5074_v21 = vld [vmem:[#allocation8 + $0xdd8] sm:$0xff] }
 0x55e   : > { %6458 = vmatpush1.msra.mxu1 %v4905_v39  ;;  %6529 = vmatpush1.msra.mxu0 %v5161_v51  ;;  %v5081_v30 = vld [vmem:[#allocation8 + $0xe10] sm:$0xff]  ;;  %v5330_v49 = vld [vmem:[#allocation8 + $0x15d8] sm:$0xff] }
 0x55f   : > { %6459 = vmatprep.subr.mxu1 %v4898_v44  ;;  %6530 = vmatprep.subr.mxu0 %v5154_v16  ;;  %v5337_v28 = vld [vmem:[#allocation8 + $0x1610] sm:$0xff]  ;;  %v5066_v39 = vld [vmem:[#allocation8 + $0xd98] sm:$0xff] }
 0x560   : > { %6460 = vmatpush1.msra.mxu1 %v4897_v5  ;;  %6531 = vmatpush1.msra.mxu0 %v5153_v31  ;;  %v5073_v25 = vld [vmem:[#allocation8 + $0xdd0] sm:$0xff]  ;;  %v5322_v51 = vld [vmem:[#allocation8 + $0x1598] sm:$0xff] }
 0x561   : > { %6461 = vmatprep.subr.mxu1 %v4890_v63  ;;  %6532 = vmatprep.subr.mxu0 %v5146_v47  ;;  %v5329_v27 = vld [vmem:[#allocation8 + $0x15d0] sm:$0xff]  ;;  %v5058_v5 = vld [vmem:[#allocation8 + $0xd58] sm:$0xff] }
 0x562   : > { %6462 = vmatpush1.msra.mxu1 %v4889_v52  ;;  %6533 = vmatpush1.msra.mxu0 %v5145_v34  ;;  %v5065_v44 = vld [vmem:[#allocation8 + $0xd90] sm:$0xff]  ;;  %v5314_v31 = vld [vmem:[#allocation8 + $0x1558] sm:$0xff] }
 0x563   : > { %6463 = vmatprep.subr.mxu1 %v5138_v40  ;;  %6534 = vmatprep.subr.mxu0 %v5394_v13  ;;  %v5321_v16 = vld [vmem:[#allocation8 + $0x1590] sm:$0xff]  ;;  %v5050_v52 = vld [vmem:[#allocation8 + $0xd18] sm:$0xff] }
 0x564   : > { %6464 = vmatpush2.msra.mxu1 %v5137_v57  ;;  %6535 = vmatpush2.msra.mxu0 %v5393_v29  ;;  %v5057_v63 = vld [vmem:[#allocation8 + $0xd50] sm:$0xff]  ;;  %v5306_v34 = vld [vmem:[#allocation8 + $0x1518] sm:$0xff] }
 0x565   : > { %6465 = vmatprep.subr.mxu1 %v5130_v7  ;;  %6536 = vmatprep.subr.mxu0 %v5386_v24  ;;  %v5313_v47 = vld [vmem:[#allocation8 + $0x1550] sm:$0xff]  ;;  %v5042_v57 = vld [vmem:[#allocation8 + $0xcd8] sm:$0xff] }
 0x566   : > { %6466 = vmatpush2.msra.mxu1 %v5129_v14  ;;  %6537 = vmatpush2.msra.mxu0 %v5385_v45  ;;  %v5049_v40 = vld [vmem:[#allocation8 + $0xd10] sm:$0xff]  ;;  %v5298_v29 = vld [vmem:[#allocation8 + $0x14d8] sm:$0xff] }
 0x567   : > { %6467 = vmatprep.subr.mxu1 %v5122_v19  ;;  %6538 = vmatprep.subr.mxu0 %v5378_v37  ;;  %v5305_v13 = vld [vmem:[#allocation8 + $0x1510] sm:$0xff]  ;;  %v5034_v14 = vld [vmem:[#allocation8 + $0xc98] sm:$0xff] }
 0x568   : > { %6468 = vmatpush2.msra.mxu1 %v5121_v60  ;;  %6539 = vmatpush2.msra.mxu0 %v5377_v17  ;;  %v5041_v7 = vld [vmem:[#allocation8 + $0xcd0] sm:$0xff]  ;;  %v5290_v45 = vld [vmem:[#allocation8 + $0x1498] sm:$0xff] }
 0x569   : > { %6469 = vmatprep.subr.mxu1 %v5114_v11  ;;  %6540 = vmatprep.subr.mxu0 %v5370_v36  ;;  %v5297_v24 = vld [vmem:[#allocation8 + $0x14d0] sm:$0xff]  ;;  %v5026_v60 = vld [vmem:[#allocation8 + $0xc58] sm:$0xff] }
 0x56a   : > { %6470 = vmatpush2.msra.mxu1 %v5113_v48  ;;  %6541 = vmatpush2.msra.mxu0 %v5369_v54  ;;  %v5033_v19 = vld [vmem:[#allocation8 + $0xc90] sm:$0xff]  ;;  %v5282_v17 = vld [vmem:[#allocation8 + $0x1458] sm:$0xff] }
 0x56b   : > { %6471 = vmatprep.subr.mxu1 %v5106_v53  ;;  %6542 = vmatprep.subr.mxu0 %v5362_v15  ;;  %v5289_v37 = vld [vmem:[#allocation8 + $0x1490] sm:$0xff]  ;;  %v5018_v48 = vld [vmem:[#allocation8 + $0xc18] sm:$0xff] }
 0x56c   : > { %6472 = vmatpush2.msra.mxu1 %v5105_v55  ;;  %6543 = vmatpush2.msra.mxu0 %v5361_v1  ;;  %v5025_v11 = vld [vmem:[#allocation8 + $0xc50] sm:$0xff]  ;;  %v5274_v54 = vld [vmem:[#allocation8 + $0x1418] sm:$0xff] }
 0x56d   : > { %6473 = vmatprep.subr.mxu1 %v5098_v32  ;;  %6544 = vmatprep.subr.mxu0 %v5354_v12  ;;  %v5281_v36 = vld [vmem:[#allocation8 + $0x1450] sm:$0xff]  ;;  %v5522_v55 = vld [vmem:[#allocation8 + $0x1bd8] sm:$0xff] }
 0x56e   : > { %6474 = vmatpush2.msra.mxu1 %v5097_v46  ;;  %6545 = vmatpush2.msra.mxu0 %v5353_v2  ;;  %v5017_v53 = vld [vmem:[#allocation8 + $0xc10] sm:$0xff]  ;;  %v5778_v1 = vld [vmem:[#allocation8 + $0x23d8] sm:$0xff] }
 0x56f   : > { %6475 = vmatprep.subr.mxu1 %v5090_v8  ;;  %6546 = vmatprep.subr.mxu0 %v5346_v9  ;;  %v5273_v15 = vld [vmem:[#allocation8 + $0x1410] sm:$0xff]  ;;  %v5514_v46 = vld [vmem:[#allocation8 + $0x1b98] sm:$0xff] }
 0x570   : > { %6476 = vmatpush2.msra.mxu1 %v5089_v58  ;;  %6547 = vmatpush2.msra.mxu0 %v5345_v3  ;;  %v5521_v32 = vld [vmem:[#allocation8 + $0x1bd0] sm:$0xff]  ;;  %v5770_v2 = vld [vmem:[#allocation8 + $0x2398] sm:$0xff] }
 0x571   : > { %6477 = vmatprep.subr.mxu1 %v5082_v6  ;;  %6548 = vmatprep.subr.mxu0 %v5338_v35  ;;  %v5777_v12 = vld [vmem:[#allocation8 + $0x23d0] sm:$0xff]  ;;  %v5506_v58 = vld [vmem:[#allocation8 + $0x1b58] sm:$0xff] }
 0x572   : > { %6478 = vmatpush2.msra.mxu1 %v5081_v30  ;;  %6549 = vmatpush2.msra.mxu0 %v5337_v28  ;;  %v5513_v8 = vld [vmem:[#allocation8 + $0x1b90] sm:$0xff]  ;;  %v5762_v3 = vld [vmem:[#allocation8 + $0x2358] sm:$0xff] }
 0x573   : > { %6479 = vmatprep.subr.mxu1 %v5074_v21  ;;  %6550 = vmatprep.subr.mxu0 %v5330_v49  ;;  %v5769_v9 = vld [vmem:[#allocation8 + $0x2390] sm:$0xff]  ;;  %v5498_v30 = vld [vmem:[#allocation8 + $0x1b18] sm:$0xff] }
 0x574   : > { %6480 = vmatpush2.msra.mxu1 %v5073_v25  ;;  %6551 = vmatpush2.msra.mxu0 %v5329_v27  ;;  %v5505_v6 = vld [vmem:[#allocation8 + $0x1b50] sm:$0xff]  ;;  %v5754_v28 = vld [vmem:[#allocation8 + $0x2318] sm:$0xff] }
 0x575   : > { %6481 = vmatprep.subr.mxu1 %v5066_v39  ;;  %6552 = vmatprep.subr.mxu0 %v5322_v51  ;;  %v5761_v35 = vld [vmem:[#allocation8 + $0x2350] sm:$0xff]  ;;  %v5490_v25 = vld [vmem:[#allocation8 + $0x1ad8] sm:$0xff] }
 0x576   : > { %6482 = vmatpush2.msra.mxu1 %v5065_v44  ;;  %6553 = vmatpush2.msra.mxu0 %v5321_v16  ;;  %v5497_v21 = vld [vmem:[#allocation8 + $0x1b10] sm:$0xff]  ;;  %v5746_v27 = vld [vmem:[#allocation8 + $0x22d8] sm:$0xff] }
 0x577   : > { %6483 = vmatprep.subr.mxu1 %v5058_v5  ;;  %6554 = vmatprep.subr.mxu0 %v5314_v31  ;;  %v5753_v49 = vld [vmem:[#allocation8 + $0x2310] sm:$0xff]  ;;  %v5482_v44 = vld [vmem:[#allocation8 + $0x1a98] sm:$0xff] }
 0x578   : > { %6484 = vmatpush2.msra.mxu1 %v5057_v63  ;;  %6555 = vmatpush2.msra.mxu0 %v5313_v47  ;;  %v5489_v39 = vld [vmem:[#allocation8 + $0x1ad0] sm:$0xff]  ;;  %v5738_v16 = vld [vmem:[#allocation8 + $0x2298] sm:$0xff] }
 0x579   : > { %6485 = vmatprep.subr.mxu1 %v5050_v52  ;;  %6556 = vmatprep.subr.mxu0 %v5306_v34  ;;  %v5745_v51 = vld [vmem:[#allocation8 + $0x22d0] sm:$0xff]  ;;  %v5474_v63 = vld [vmem:[#allocation8 + $0x1a58] sm:$0xff] }
 0x57a   : > { %6486 = vmatpush2.msra.mxu1 %v5049_v40  ;;  %6557 = vmatpush2.msra.mxu0 %v5305_v13  ;;  %v5481_v5 = vld [vmem:[#allocation8 + $0x1a90] sm:$0xff]  ;;  %v5730_v47 = vld [vmem:[#allocation8 + $0x2258] sm:$0xff] }
 0x57b   : > { %6487 = vmatprep.subr.mxu1 %v5042_v57  ;;  %6558 = vmatprep.subr.mxu0 %v5298_v29  ;;  %v5737_v31 = vld [vmem:[#allocation8 + $0x2290] sm:$0xff]  ;;  %v5466_v40 = vld [vmem:[#allocation8 + $0x1a18] sm:$0xff] }
 0x57c   : > { %6488 = vmatpush2.msra.mxu1 %v5041_v7  ;;  %6559 = vmatpush2.msra.mxu0 %v5297_v24  ;;  %v5473_v52 = vld [vmem:[#allocation8 + $0x1a50] sm:$0xff]  ;;  %v5722_v13 = vld [vmem:[#allocation8 + $0x2218] sm:$0xff] }
 0x57d   : > { %6489 = vmatprep.subr.mxu1 %v5034_v14  ;;  %6560 = vmatprep.subr.mxu0 %v5290_v45  ;;  %v5729_v34 = vld [vmem:[#allocation8 + $0x2250] sm:$0xff]  ;;  %v5458_v7 = vld [vmem:[#allocation8 + $0x19d8] sm:$0xff] }
 0x57e   : > { %6490 = vmatpush2.msra.mxu1 %v5033_v19  ;;  %6561 = vmatpush2.msra.mxu0 %v5289_v37  ;;  %v5465_v57 = vld [vmem:[#allocation8 + $0x1a10] sm:$0xff]  ;;  %v5714_v24 = vld [vmem:[#allocation8 + $0x21d8] sm:$0xff] }
 0x57f   : > { %6491 = vmatprep.subr.mxu1 %v5026_v60  ;;  %6562 = vmatprep.subr.mxu0 %v5282_v17  ;;  %v5721_v29 = vld [vmem:[#allocation8 + $0x2210] sm:$0xff]  ;;  %v5450_v19 = vld [vmem:[#allocation8 + $0x1998] sm:$0xff] }
 0x580   : > { %6492 = vmatpush2.msra.mxu1 %v5025_v11  ;;  %6563 = vmatpush2.msra.mxu0 %v5281_v36  ;;  %v5457_v14 = vld [vmem:[#allocation8 + $0x19d0] sm:$0xff]  ;;  %v5706_v37 = vld [vmem:[#allocation8 + $0x2198] sm:$0xff] }
 0x581   : > { %6493 = vmatprep.subr.mxu1 %v5018_v48  ;;  %6564 = vmatprep.subr.mxu0 %v5274_v54  ;;  %v5713_v45 = vld [vmem:[#allocation8 + $0x21d0] sm:$0xff]  ;;  %v5442_v11 = vld [vmem:[#allocation8 + $0x1958] sm:$0xff] }
 0x582   : > { %6494 = vmatpush2.msra.mxu1 %v5017_v53  ;;  %6565 = vmatpush2.msra.mxu0 %v5273_v15  ;;  %v5449_v60 = vld [vmem:[#allocation8 + $0x1990] sm:$0xff]  ;;  %v5698_v36 = vld [vmem:[#allocation8 + $0x2158] sm:$0xff] }
 0x583   : > { %6496 = vmatmul.mubr.f32.vlgmr.msra.gmra.mxu1 %v14472_v33  ;;  %6567 = vmatmul.mubr.f32.vlgmr.msra.gmra.mxu0 %v14490_v20  ;;  %v5705_v17 = vld [vmem:[#allocation8 + $0x2190] sm:$0xff]  ;;  %v5434_v53 = vld [vmem:[#allocation8 + $0x1918] sm:$0xff] }
 0x584   : > { %6573 = vmatprep.subr.mxu1 %v5522_v55  ;;  %6644 = vmatprep.subr.mxu0 %v5778_v1  ;;  %v5441_v48 = vld [vmem:[#allocation8 + $0x1950] sm:$0xff]  ;;  %v5690_v15 = vld [vmem:[#allocation8 + $0x2118] sm:$0xff] }
 0x585   : > { %6574 = vmatpush1.msra.mxu1 %v5521_v32  ;;  %6637 = vmatprep.mubr.f32.mxu1 %v14484_v56  ;;  %v5697_v54 = vld [vmem:[#allocation8 + $0x2150] sm:$0xff]  ;;  %v5426_v32 = vld [vmem:[#allocation8 + $0x18d8] sm:$0xff] }
 0x586   : > { %6645 = vmatpush1.msra.mxu0 %v5777_v12  ;;  %6708 = vmatprep.mubr.f32.mxu0 %v14507_v10  ;;  %v5433_v55 = vld [vmem:[#allocation8 + $0x1910] sm:$0xff]  ;;  %v5682_v12 = vld [vmem:[#allocation8 + $0x20d8] sm:$0xff] }
 0x587   : > { %6575 = vmatprep.subr.mxu1 %v5514_v46  ;;  %6646 = vmatprep.subr.mxu0 %v5770_v2  ;;  %v5689_v1 = vld [vmem:[#allocation8 + $0x2110] sm:$0xff] }
 0x588   : > { %6576 = vmatpush1.msra.mxu1 %v5513_v8  ;;  %6647 = vmatpush1.msra.mxu0 %v5769_v9  ;;  %v5425_v46 = vld [vmem:[#allocation8 + $0x18d0] sm:$0xff]  ;;  %v5418_v8 = vld [vmem:[#allocation8 + $0x1898] sm:$0xff] }
 0x589   : > { %6577 = vmatprep.subr.mxu1 %v5506_v58  ;;  %6648 = vmatprep.subr.mxu0 %v5762_v3  ;;  %v5681_v2 = vld [vmem:[#allocation8 + $0x20d0] sm:$0xff]  ;;  %v5674_v9 = vld [vmem:[#allocation8 + $0x2098] sm:$0xff] }
 0x58a   : > { %6578 = vmatpush1.msra.mxu1 %v5505_v6  ;;  %6649 = vmatpush1.msra.mxu0 %v5761_v35  ;;  %v5417_v58 = vld [vmem:[#allocation8 + $0x1890] sm:$0xff]  ;;  %v5410_v6 = vld [vmem:[#allocation8 + $0x1858] sm:$0xff] }
 0x58b   : > { %6579 = vmatprep.subr.mxu1 %v5498_v30  ;;  %6650 = vmatprep.subr.mxu0 %v5754_v28  ;;  %v5673_v3 = vld [vmem:[#allocation8 + $0x2090] sm:$0xff]  ;;  %v5666_v35 = vld [vmem:[#allocation8 + $0x2058] sm:$0xff] }
 0x58c   : > { %6580 = vmatpush1.msra.mxu1 %v5497_v21  ;;  %6651 = vmatpush1.msra.mxu0 %v5753_v49  ;;  %v5409_v30 = vld [vmem:[#allocation8 + $0x1850] sm:$0xff]  ;;  %v5402_v21 = vld [vmem:[#allocation8 + $0x1818] sm:$0xff] }
 0x58d   : > { %6581 = vmatprep.subr.mxu1 %v5490_v25  ;;  %6652 = vmatprep.subr.mxu0 %v5746_v27  ;;  %v5665_v28 = vld [vmem:[#allocation8 + $0x2050] sm:$0xff]  ;;  %v5658_v49 = vld [vmem:[#allocation8 + $0x2018] sm:$0xff] }
 0x58e   : > { %6582 = vmatpush1.msra.mxu1 %v5489_v39  ;;  %6653 = vmatpush1.msra.mxu0 %v5745_v51  ;;  %v5401_v25 = vld [vmem:[#allocation8 + $0x1810] sm:$0xff]  ;;  %v5650_v39 = vld [vmem:[#allocation8 + $0x1fd8] sm:$0xff] }
 0x58f   : > { %6583 = vmatprep.subr.mxu1 %v5482_v44  ;;  %6654 = vmatprep.subr.mxu0 %v5738_v16  ;;  %v5657_v27 = vld [vmem:[#allocation8 + $0x2010] sm:$0xff]  ;;  %v5906_v51 = vld [vmem:[#allocation8 + $0x27d8] sm:$0xff] }
 0x590   : > { %6584 = vmatpush1.msra.mxu1 %v5481_v5  ;;  %6655 = vmatpush1.msra.mxu0 %v5737_v31  ;;  %v5649_v44 = vld [vmem:[#allocation8 + $0x1fd0] sm:$0xff]  ;;  %v5642_v5 = vld [vmem:[#allocation8 + $0x1f98] sm:$0xff] }
 0x591   : > { %6585 = vmatprep.subr.mxu1 %v5474_v63  ;;  %6656 = vmatprep.subr.mxu0 %v5730_v47  ;;  %v5905_v16 = vld [vmem:[#allocation8 + $0x27d0] sm:$0xff]  ;;  %v5898_v31 = vld [vmem:[#allocation8 + $0x2798] sm:$0xff] }
 0x592   : > { %6586 = vmatpush1.msra.mxu1 %v5473_v52  ;;  %6657 = vmatpush1.msra.mxu0 %v5729_v34  ;;  %v5641_v63 = vld [vmem:[#allocation8 + $0x1f90] sm:$0xff]  ;;  %v5634_v52 = vld [vmem:[#allocation8 + $0x1f58] sm:$0xff] }
 0x593   : > { %6587 = vmatprep.subr.mxu1 %v5466_v40  ;;  %6658 = vmatprep.subr.mxu0 %v5722_v13  ;;  %v5897_v47 = vld [vmem:[#allocation8 + $0x2790] sm:$0xff]  ;;  %v5890_v34 = vld [vmem:[#allocation8 + $0x2758] sm:$0xff] }
 0x594   : > { %6588 = vmatpush1.msra.mxu1 %v5465_v57  ;;  %6659 = vmatpush1.msra.mxu0 %v5721_v29  ;;  %v5633_v40 = vld [vmem:[#allocation8 + $0x1f50] sm:$0xff]  ;;  %v5626_v57 = vld [vmem:[#allocation8 + $0x1f18] sm:$0xff] }
 0x595   : > { %6589 = vmatprep.subr.mxu1 %v5458_v7  ;;  %6660 = vmatprep.subr.mxu0 %v5714_v24  ;;  %v5889_v13 = vld [vmem:[#allocation8 + $0x2750] sm:$0xff]  ;;  %v5882_v29 = vld [vmem:[#allocation8 + $0x2718] sm:$0xff] }
 0x596   : > { %6590 = vmatpush1.msra.mxu1 %v5457_v14  ;;  %6661 = vmatpush1.msra.mxu0 %v5713_v45  ;;  %v5625_v7 = vld [vmem:[#allocation8 + $0x1f10] sm:$0xff]  ;;  %v5618_v14 = vld [vmem:[#allocation8 + $0x1ed8] sm:$0xff] }
 0x597   : > { %6591 = vmatprep.subr.mxu1 %v5450_v19  ;;  %6662 = vmatprep.subr.mxu0 %v5706_v37  ;;  %v5881_v24 = vld [vmem:[#allocation8 + $0x2710] sm:$0xff]  ;;  %v5874_v45 = vld [vmem:[#allocation8 + $0x26d8] sm:$0xff] }
 0x598   : > { %6592 = vmatpush1.msra.mxu1 %v5449_v60  ;;  %6663 = vmatpush1.msra.mxu0 %v5705_v17  ;;  %v5617_v19 = vld [vmem:[#allocation8 + $0x1ed0] sm:$0xff]  ;;  %v5610_v60 = vld [vmem:[#allocation8 + $0x1e98] sm:$0xff] }
 0x599   : > { %6593 = vmatprep.subr.mxu1 %v5442_v11  ;;  %6664 = vmatprep.subr.mxu0 %v5698_v36  ;;  %v5873_v37 = vld [vmem:[#allocation8 + $0x26d0] sm:$0xff]  ;;  %v5866_v17 = vld [vmem:[#allocation8 + $0x2698] sm:$0xff] }
 0x59a   : > { %6594 = vmatpush1.msra.mxu1 %v5441_v48  ;;  %6665 = vmatpush1.msra.mxu0 %v5697_v54  ;;  %v5609_v11 = vld [vmem:[#allocation8 + $0x1e90] sm:$0xff]  ;;  %v5602_v48 = vld [vmem:[#allocation8 + $0x1e58] sm:$0xff] }
 0x59b   : > { %6595 = vmatprep.subr.mxu1 %v5434_v53  ;;  %6666 = vmatprep.subr.mxu0 %v5690_v15  ;;  %v5865_v36 = vld [vmem:[#allocation8 + $0x2690] sm:$0xff]  ;;  %v5858_v54 = vld [vmem:[#allocation8 + $0x2658] sm:$0xff] }
 0x59c   : > { %6596 = vmatpush1.msra.mxu1 %v5433_v55  ;;  %6667 = vmatpush1.msra.mxu0 %v5689_v1  ;;  %v5601_v53 = vld [vmem:[#allocation8 + $0x1e50] sm:$0xff]  ;;  %v5594_v55 = vld [vmem:[#allocation8 + $0x1e18] sm:$0xff] }
 0x59d   : > { %6597 = vmatprep.subr.mxu1 %v5426_v32  ;;  %6668 = vmatprep.subr.mxu0 %v5682_v12  ;;  %v5857_v15 = vld [vmem:[#allocation8 + $0x2650] sm:$0xff]  ;;  %v5850_v1 = vld [vmem:[#allocation8 + $0x2618] sm:$0xff] }
 0x59e   : > { %6598 = vmatpush1.msra.mxu1 %v5425_v46  ;;  %6669 = vmatpush1.msra.mxu0 %v5681_v2  ;;  %v5593_v32 = vld [vmem:[#allocation8 + $0x1e10] sm:$0xff]  ;;  %v5586_v46 = vld [vmem:[#allocation8 + $0x1dd8] sm:$0xff] }
 0x59f   : > { %6599 = vmatprep.subr.mxu1 %v5418_v8  ;;  %6670 = vmatprep.subr.mxu0 %v5674_v9  ;;  %v5849_v12 = vld [vmem:[#allocation8 + $0x2610] sm:$0xff]  ;;  %v5842_v2 = vld [vmem:[#allocation8 + $0x25d8] sm:$0xff] }
 0x5a0   : > { %6600 = vmatpush1.msra.mxu1 %v5417_v58  ;;  %6671 = vmatpush1.msra.mxu0 %v5673_v3  ;;  %v5585_v8 = vld [vmem:[#allocation8 + $0x1dd0] sm:$0xff]  ;;  %v5578_v58 = vld [vmem:[#allocation8 + $0x1d98] sm:$0xff] }
 0x5a1   : > { %6601 = vmatprep.subr.mxu1 %v5410_v6  ;;  %6672 = vmatprep.subr.mxu0 %v5666_v35  ;;  %v5841_v9 = vld [vmem:[#allocation8 + $0x25d0] sm:$0xff]  ;;  %v5834_v3 = vld [vmem:[#allocation8 + $0x2598] sm:$0xff] }
 0x5a2   : > { %6602 = vmatpush1.msra.mxu1 %v5409_v30  ;;  %6673 = vmatpush1.msra.mxu0 %v5665_v28  ;;  %v5577_v6 = vld [vmem:[#allocation8 + $0x1d90] sm:$0xff]  ;;  %v5570_v30 = vld [vmem:[#allocation8 + $0x1d58] sm:$0xff] }
 0x5a3   : > { %6603 = vmatprep.subr.mxu1 %v5402_v21  ;;  %6674 = vmatprep.subr.mxu0 %v5658_v49  ;;  %v5833_v35 = vld [vmem:[#allocation8 + $0x2590] sm:$0xff]  ;;  %v5826_v28 = vld [vmem:[#allocation8 + $0x2558] sm:$0xff] }
 0x5a4   : > { %6604 = vmatpush1.msra.mxu1 %v5401_v25  ;;  %6675 = vmatpush1.msra.mxu0 %v5657_v27  ;;  %v5569_v21 = vld [vmem:[#allocation8 + $0x1d50] sm:$0xff]  ;;  %v5562_v25 = vld [vmem:[#allocation8 + $0x1d18] sm:$0xff] }
 0x5a5   : > { %6605 = vmatprep.subr.mxu1 %v5650_v39  ;;  %6676 = vmatprep.subr.mxu0 %v5906_v51  ;;  %v5825_v49 = vld [vmem:[#allocation8 + $0x2550] sm:$0xff]  ;;  %v5818_v27 = vld [vmem:[#allocation8 + $0x2518] sm:$0xff] }
 0x5a6   : > { %6606 = vmatpush2.msra.mxu1 %v5649_v44  ;;  %6677 = vmatpush2.msra.mxu0 %v5905_v16  ;;  %v5561_v39 = vld [vmem:[#allocation8 + $0x1d10] sm:$0xff]  ;;  %v5554_v44 = vld [vmem:[#allocation8 + $0x1cd8] sm:$0xff] }
 0x5a7   : > { %6607 = vmatprep.subr.mxu1 %v5642_v5  ;;  %6678 = vmatprep.subr.mxu0 %v5898_v31  ;;  %v5817_v51 = vld [vmem:[#allocation8 + $0x2510] sm:$0xff]  ;;  %v5810_v16 = vld [vmem:[#allocation8 + $0x24d8] sm:$0xff] }
 0x5a8   : > { %6608 = vmatpush2.msra.mxu1 %v5641_v63  ;;  %6679 = vmatpush2.msra.mxu0 %v5897_v47  ;;  %v5553_v5 = vld [vmem:[#allocation8 + $0x1cd0] sm:$0xff]  ;;  %v5546_v63 = vld [vmem:[#allocation8 + $0x1c98] sm:$0xff] }
 0x5a9   : > { %6609 = vmatprep.subr.mxu1 %v5634_v52  ;;  %6680 = vmatprep.subr.mxu0 %v5890_v34  ;;  %v5809_v31 = vld [vmem:[#allocation8 + $0x24d0] sm:$0xff]  ;;  %v5802_v47 = vld [vmem:[#allocation8 + $0x2498] sm:$0xff] }
 0x5aa   : > { %6610 = vmatpush2.msra.mxu1 %v5633_v40  ;;  %6681 = vmatpush2.msra.mxu0 %v5889_v13  ;;  %v5545_v52 = vld [vmem:[#allocation8 + $0x1c90] sm:$0xff]  ;;  %v5538_v40 = vld [vmem:[#allocation8 + $0x1c58] sm:$0xff] }
 0x5ab   : > { %6611 = vmatprep.subr.mxu1 %v5626_v57  ;;  %6682 = vmatprep.subr.mxu0 %v5882_v29  ;;  %v5801_v34 = vld [vmem:[#allocation8 + $0x2490] sm:$0xff]  ;;  %v5794_v13 = vld [vmem:[#allocation8 + $0x2458] sm:$0xff] }
 0x5ac   : > { %6612 = vmatpush2.msra.mxu1 %v5625_v7  ;;  %6683 = vmatpush2.msra.mxu0 %v5881_v24  ;;  %v5537_v57 = vld [vmem:[#allocation8 + $0x1c50] sm:$0xff]  ;;  %v5530_v7 = vld [vmem:[#allocation8 + $0x1c18] sm:$0xff] }
 0x5ad   : > { %6613 = vmatprep.subr.mxu1 %v5618_v14  ;;  %6684 = vmatprep.subr.mxu0 %v5874_v45  ;;  %v5793_v29 = vld [vmem:[#allocation8 + $0x2450] sm:$0xff]  ;;  %v5786_v24 = vld [vmem:[#allocation8 + $0x2418] sm:$0xff] }
 0x5ae   : > { %6614 = vmatpush2.msra.mxu1 %v5617_v19  ;;  %6685 = vmatpush2.msra.mxu0 %v5873_v37  ;;  %v5529_v14 = vld [vmem:[#allocation8 + $0x1c10] sm:$0xff]  ;;  %v4756_v19 = vld [vmem:[#allocation8 + $0x3e8] sm:$0xff] }
 0x5af   : > { %6615 = vmatprep.subr.mxu1 %v5610_v60  ;;  %6686 = vmatprep.subr.mxu0 %v5866_v17  ;;  %v5785_v45 = vld [vmem:[#allocation8 + $0x2410] sm:$0xff]  ;;  %v5012_v37 = vld [vmem:[#allocation8 + $0xbe8] sm:$0xff]  ;;  %v4755_v60 = vld [vmem:[#allocation8 + $0x3e0] sm:$0xff] }
 0x5b0   : > { %6616 = vmatpush2.msra.mxu1 %v5609_v11  ;;  %6687 = vmatpush2.msra.mxu0 %v5865_v36  ;;  %v5011_v17 = vld [vmem:[#allocation8 + $0xbe0] sm:$0xff]  ;;  %v4748_v11 = vld [vmem:[#allocation8 + $0x3a8] sm:$0xff] }
 0x5b1   : > { %6617 = vmatprep.subr.mxu1 %v5602_v48  ;;  %6688 = vmatprep.subr.mxu0 %v5858_v54  ;;  %v5004_v36 = vld [vmem:[#allocation8 + $0xba8] sm:$0xff]  ;;  %v4747_v48 = vld [vmem:[#allocation8 + $0x3a0] sm:$0xff] }
 0x5b2   : > { %6618 = vmatpush2.msra.mxu1 %v5601_v53  ;;  %6689 = vmatpush2.msra.mxu0 %v5857_v15  ;;  %v5003_v54 = vld [vmem:[#allocation8 + $0xba0] sm:$0xff]  ;;  %v4740_v53 = vld [vmem:[#allocation8 + $0x368] sm:$0xff] }
 0x5b3   : > { %6619 = vmatprep.subr.mxu1 %v5594_v55  ;;  %6690 = vmatprep.subr.mxu0 %v5850_v1  ;;  %v4996_v15 = vld [vmem:[#allocation8 + $0xb68] sm:$0xff]  ;;  %v4739_v55 = vld [vmem:[#allocation8 + $0x360] sm:$0xff] }
 0x5b4   : > { %6620 = vmatpush2.msra.mxu1 %v5593_v32  ;;  %6691 = vmatpush2.msra.mxu0 %v5849_v12  ;;  %v4995_v1 = vld [vmem:[#allocation8 + $0xb60] sm:$0xff]  ;;  %v4732_v32 = vld [vmem:[#allocation8 + $0x328] sm:$0xff] }
 0x5b5   : > { %6621 = vmatprep.subr.mxu1 %v5586_v46  ;;  %6692 = vmatprep.subr.mxu0 %v5842_v2  ;;  %v4988_v12 = vld [vmem:[#allocation8 + $0xb28] sm:$0xff]  ;;  %v4731_v46 = vld [vmem:[#allocation8 + $0x320] sm:$0xff] }
 0x5b6   : > { %6622 = vmatpush2.msra.mxu1 %v5585_v8  ;;  %6693 = vmatpush2.msra.mxu0 %v5841_v9  ;;  %v4987_v2 = vld [vmem:[#allocation8 + $0xb20] sm:$0xff]  ;;  %v4724_v8 = vld [vmem:[#allocation8 + $0x2e8] sm:$0xff] }
 0x5b7   : > { %6623 = vmatprep.subr.mxu1 %v5578_v58  ;;  %6694 = vmatprep.subr.mxu0 %v5834_v3  ;;  %v4980_v9 = vld [vmem:[#allocation8 + $0xae8] sm:$0xff]  ;;  %v4723_v58 = vld [vmem:[#allocation8 + $0x2e0] sm:$0xff] }
 0x5b8   : > { %6624 = vmatpush2.msra.mxu1 %v5577_v6  ;;  %6695 = vmatpush2.msra.mxu0 %v5833_v35  ;;  %v4979_v3 = vld [vmem:[#allocation8 + $0xae0] sm:$0xff]  ;;  %v4716_v6 = vld [vmem:[#allocation8 + $0x2a8] sm:$0xff] }
 0x5b9   : > { %6625 = vmatprep.subr.mxu1 %v5570_v30  ;;  %6696 = vmatprep.subr.mxu0 %v5826_v28  ;;  %v4972_v35 = vld [vmem:[#allocation8 + $0xaa8] sm:$0xff]  ;;  %v4715_v30 = vld [vmem:[#allocation8 + $0x2a0] sm:$0xff] }
 0x5ba   : > { %6626 = vmatpush2.msra.mxu1 %v5569_v21  ;;  %6697 = vmatpush2.msra.mxu0 %v5825_v49  ;;  %v4971_v28 = vld [vmem:[#allocation8 + $0xaa0] sm:$0xff]  ;;  %v4708_v21 = vld [vmem:[#allocation8 + $0x268] sm:$0xff] }
 0x5bb   : > { %6627 = vmatprep.subr.mxu1 %v5562_v25  ;;  %6698 = vmatprep.subr.mxu0 %v5818_v27  ;;  %v4964_v49 = vld [vmem:[#allocation8 + $0xa68] sm:$0xff]  ;;  %v4707_v25 = vld [vmem:[#allocation8 + $0x260] sm:$0xff] }
 0x5bc   : > { %6628 = vmatpush2.msra.mxu1 %v5561_v39  ;;  %6699 = vmatpush2.msra.mxu0 %v5817_v51  ;;  %v4963_v27 = vld [vmem:[#allocation8 + $0xa60] sm:$0xff]  ;;  %v4700_v39 = vld [vmem:[#allocation8 + $0x228] sm:$0xff] }
 0x5bd   : > { %6629 = vmatprep.subr.mxu1 %v5554_v44  ;;  %6700 = vmatprep.subr.mxu0 %v5810_v16  ;;  %v4956_v51 = vld [vmem:[#allocation8 + $0xa28] sm:$0xff]  ;;  %v4699_v44 = vld [vmem:[#allocation8 + $0x220] sm:$0xff] }
 0x5be   : > { %6630 = vmatpush2.msra.mxu1 %v5553_v5  ;;  %6701 = vmatpush2.msra.mxu0 %v5809_v31  ;;  %v4955_v16 = vld [vmem:[#allocation8 + $0xa20] sm:$0xff]  ;;  %v4692_v5 = vld [vmem:[#allocation8 + $0x1e8] sm:$0xff] }
 0x5bf   : > { %6631 = vmatprep.subr.mxu1 %v5546_v63  ;;  %6702 = vmatprep.subr.mxu0 %v5802_v47  ;;  %v4948_v31 = vld [vmem:[#allocation8 + $0x9e8] sm:$0xff]  ;;  %v4691_v63 = vld [vmem:[#allocation8 + $0x1e0] sm:$0xff] }
 0x5c0   : > { %6632 = vmatpush2.msra.mxu1 %v5545_v52  ;;  %6703 = vmatpush2.msra.mxu0 %v5801_v34  ;;  %v4947_v47 = vld [vmem:[#allocation8 + $0x9e0] sm:$0xff]  ;;  %v4684_v52 = vld [vmem:[#allocation8 + $0x1a8] sm:$0xff] }
 0x5c1   : > { %6633 = vmatprep.subr.mxu1 %v5538_v40  ;;  %6704 = vmatprep.subr.mxu0 %v5794_v13  ;;  %v4940_v34 = vld [vmem:[#allocation8 + $0x9a8] sm:$0xff]  ;;  %v4683_v40 = vld [vmem:[#allocation8 + $0x1a0] sm:$0xff] }
 0x5c2   : > { %6634 = vmatpush2.msra.mxu1 %v5537_v57  ;;  %6705 = vmatpush2.msra.mxu0 %v5793_v29  ;;  %v4939_v13 = vld [vmem:[#allocation8 + $0x9a0] sm:$0xff]  ;;  %v4676_v57 = vld [vmem:[#allocation8 + $0x168] sm:$0xff] }
 0x5c3   : > { %6635 = vmatprep.subr.mxu1 %v5530_v7  ;;  %6706 = vmatprep.subr.mxu0 %v5786_v24  ;;  %v4932_v29 = vld [vmem:[#allocation8 + $0x968] sm:$0xff]  ;;  %v4675_v7 = vld [vmem:[#allocation8 + $0x160] sm:$0xff] }
 0x5c4   : > { %6636 = vmatpush2.msra.mxu1 %v5529_v14  ;;  %6707 = vmatpush2.msra.mxu0 %v5785_v45  ;;  %v4931_v24 = vld [vmem:[#allocation8 + $0x960] sm:$0xff]  ;;  %v4668_v14 = vld [vmem:[#allocation8 + $0x128] sm:$0xff] }
 0x5c5   : > { %6638 = vmatmul.mubr.f32.vlgmr.msra.gmra.mxu1 %v14494_v4  ;;  %6709 = vmatmul.mubr.f32.vlgmr.msra.gmra.mxu0 %v14504_v62  ;;  %v4924_v45 = vld [vmem:[#allocation8 + $0x928] sm:$0xff] }
 0x5c6   : > { %6715 = vmatprep.subr.mxu1 %v4756_v19  ;;  %6786 = vmatprep.subr.mxu0 %v5012_v37  ;;  %v4667_v19 = vld [vmem:[#allocation8 + $0x120] sm:$0xff] }
 0x5c7   : > { %6716 = vmatpush1.msra.mxu1 %v4755_v60  ;;  %6779 = vmatprep.mubr.f32.mxu1 %v14460_v22  ;;  %v4923_v37 = vld [vmem:[#allocation8 + $0x920] sm:$0xff]  ;;  %v4660_v60 = vld [vmem:[#allocation8 + $0xe8] sm:$0xff] }
 0x5c8   : > { %6787 = vmatpush1.msra.mxu0 %v5011_v17  ;;  %6850 = vmatprep.mubr.f32.mxu0 %v14464_v41  ;;  %v4916_v17 = vld [vmem:[#allocation8 + $0x8e8] sm:$0xff] }
 0x5c9   : > { %6717 = vmatprep.subr.mxu1 %v4748_v11  ;;  %6788 = vmatprep.subr.mxu0 %v5004_v36  ;;  %v4659_v11 = vld [vmem:[#allocation8 + $0xe0] sm:$0xff] }
 0x5ca   : > { %6718 = vmatpush1.msra.mxu1 %v4747_v48  ;;  %6789 = vmatpush1.msra.mxu0 %v5003_v54  ;;  %v4915_v36 = vld [vmem:[#allocation8 + $0x8e0] sm:$0xff]  ;;  %v4652_v48 = vld [vmem:[#allocation8 + $0xa8] sm:$0xff] }
 0x5cb   : > { %6719 = vmatprep.subr.mxu1 %v4740_v53  ;;  %6790 = vmatprep.subr.mxu0 %v4996_v15  ;;  %v4908_v54 = vld [vmem:[#allocation8 + $0x8a8] sm:$0xff]  ;;  %v4651_v53 = vld [vmem:[#allocation8 + $0xa0] sm:$0xff] }
 0x5cc   : > { %6720 = vmatpush1.msra.mxu1 %v4739_v55  ;;  %6791 = vmatpush1.msra.mxu0 %v4995_v1  ;;  %v4907_v15 = vld [vmem:[#allocation8 + $0x8a0] sm:$0xff]  ;;  %v4644_v55 = vld [vmem:[#allocation8 + $0x68] sm:$0xff] }
 0x5cd   : > { %6721 = vmatprep.subr.mxu1 %v4732_v32  ;;  %6792 = vmatprep.subr.mxu0 %v4988_v12  ;;  %v4900_v1 = vld [vmem:[#allocation8 + $0x868] sm:$0xff]  ;;  %v4643_v32 = vld [vmem:[#allocation8 + $0x60] sm:$0xff] }
 0x5ce   : > { %6722 = vmatpush1.msra.mxu1 %v4731_v46  ;;  %6793 = vmatpush1.msra.mxu0 %v4987_v2  ;;  %v4899_v12 = vld [vmem:[#allocation8 + $0x860] sm:$0xff]  ;;  %v4636_v46 = vld [vmem:[#allocation8 + $0x28] sm:$0xff] }
 0x5cf   : > { %6723 = vmatprep.subr.mxu1 %v4724_v8  ;;  %6794 = vmatprep.subr.mxu0 %v4980_v9  ;;  %v4892_v2 = vld [vmem:[#allocation8 + $0x828] sm:$0xff]  ;;  %v4635_v8 = vld [vmem:[#allocation8 + $0x20] sm:$0xff] }
 0x5d0   : > { %6724 = vmatpush1.msra.mxu1 %v4723_v58  ;;  %6795 = vmatpush1.msra.mxu0 %v4979_v3  ;;  %v4891_v9 = vld [vmem:[#allocation8 + $0x820] sm:$0xff]  ;;  %v4884_v58 = vld [vmem:[#allocation8 + $0x7e8] sm:$0xff] }
 0x5d1   : > { %6725 = vmatprep.subr.mxu1 %v4716_v6  ;;  %6796 = vmatprep.subr.mxu0 %v4972_v35  ;;  %v5140_v3 = vld [vmem:[#allocation8 + $0xfe8] sm:$0xff]  ;;  %v4883_v6 = vld [vmem:[#allocation8 + $0x7e0] sm:$0xff] }
 0x5d2   : > { %6726 = vmatpush1.msra.mxu1 %v4715_v30  ;;  %6797 = vmatpush1.msra.mxu0 %v4971_v28  ;;  %v5139_v35 = vld [vmem:[#allocation8 + $0xfe0] sm:$0xff]  ;;  %v4876_v30 = vld [vmem:[#allocation8 + $0x7a8] sm:$0xff] }
 0x5d3   : > { %6727 = vmatprep.subr.mxu1 %v4708_v21  ;;  %6798 = vmatprep.subr.mxu0 %v4964_v49  ;;  %v5132_v28 = vld [vmem:[#allocation8 + $0xfa8] sm:$0xff]  ;;  %v4875_v21 = vld [vmem:[#allocation8 + $0x7a0] sm:$0xff] }
 0x5d4   : > { %6728 = vmatpush1.msra.mxu1 %v4707_v25  ;;  %6799 = vmatpush1.msra.mxu0 %v4963_v27  ;;  %v5131_v49 = vld [vmem:[#allocation8 + $0xfa0] sm:$0xff]  ;;  %v4868_v25 = vld [vmem:[#allocation8 + $0x768] sm:$0xff] }
 0x5d5   : > { %6729 = vmatprep.subr.mxu1 %v4700_v39  ;;  %6800 = vmatprep.subr.mxu0 %v4956_v51  ;;  %v5124_v27 = vld [vmem:[#allocation8 + $0xf68] sm:$0xff]  ;;  %v4867_v39 = vld [vmem:[#allocation8 + $0x760] sm:$0xff] }
 0x5d6   : > { %6730 = vmatpush1.msra.mxu1 %v4699_v44  ;;  %6801 = vmatpush1.msra.mxu0 %v4955_v16  ;;  %v5123_v51 = vld [vmem:[#allocation8 + $0xf60] sm:$0xff]  ;;  %v4860_v44 = vld [vmem:[#allocation8 + $0x728] sm:$0xff] }
 0x5d7   : > { %6731 = vmatprep.subr.mxu1 %v4692_v5  ;;  %6802 = vmatprep.subr.mxu0 %v4948_v31  ;;  %v5116_v16 = vld [vmem:[#allocation8 + $0xf28] sm:$0xff]  ;;  %v4859_v5 = vld [vmem:[#allocation8 + $0x720] sm:$0xff] }
 0x5d8   : > { %6732 = vmatpush1.msra.mxu1 %v4691_v63  ;;  %6803 = vmatpush1.msra.mxu0 %v4947_v47  ;;  %v5115_v31 = vld [vmem:[#allocation8 + $0xf20] sm:$0xff]  ;;  %v4852_v63 = vld [vmem:[#allocation8 + $0x6e8] sm:$0xff] }
 0x5d9   : > { %6733 = vmatprep.subr.mxu1 %v4684_v52  ;;  %6804 = vmatprep.subr.mxu0 %v4940_v34  ;;  %v5108_v47 = vld [vmem:[#allocation8 + $0xee8] sm:$0xff]  ;;  %v4851_v52 = vld [vmem:[#allocation8 + $0x6e0] sm:$0xff] }
 0x5da   : > { %6734 = vmatpush1.msra.mxu1 %v4683_v40  ;;  %6805 = vmatpush1.msra.mxu0 %v4939_v13  ;;  %v5107_v34 = vld [vmem:[#allocation8 + $0xee0] sm:$0xff]  ;;  %v4844_v40 = vld [vmem:[#allocation8 + $0x6a8] sm:$0xff] }
 0x5db   : > { %6735 = vmatprep.subr.mxu1 %v4676_v57  ;;  %6806 = vmatprep.subr.mxu0 %v4932_v29  ;;  %v5100_v13 = vld [vmem:[#allocation8 + $0xea8] sm:$0xff]  ;;  %v4843_v57 = vld [vmem:[#allocation8 + $0x6a0] sm:$0xff] }
 0x5dc   : > { %6736 = vmatpush1.msra.mxu1 %v4675_v7  ;;  %6807 = vmatpush1.msra.mxu0 %v4931_v24  ;;  %v5099_v29 = vld [vmem:[#allocation8 + $0xea0] sm:$0xff]  ;;  %v4836_v7 = vld [vmem:[#allocation8 + $0x668] sm:$0xff] }
 0x5dd   : > { %6737 = vmatprep.subr.mxu1 %v4668_v14  ;;  %6808 = vmatprep.subr.mxu0 %v4924_v45  ;;  %v5092_v24 = vld [vmem:[#allocation8 + $0xe68] sm:$0xff]  ;;  %v4835_v14 = vld [vmem:[#allocation8 + $0x660] sm:$0xff] }
 0x5de   : > { %6738 = vmatpush1.msra.mxu1 %v4667_v19  ;;  %6809 = vmatpush1.msra.mxu0 %v4923_v37  ;;  %v5091_v45 = vld [vmem:[#allocation8 + $0xe60] sm:$0xff]  ;;  %v4828_v19 = vld [vmem:[#allocation8 + $0x628] sm:$0xff] }
 0x5df   : > { %6739 = vmatprep.subr.mxu1 %v4660_v60  ;;  %6810 = vmatprep.subr.mxu0 %v4916_v17  ;;  %v5084_v37 = vld [vmem:[#allocation8 + $0xe28] sm:$0xff]  ;;  %v4827_v60 = vld [vmem:[#allocation8 + $0x620] sm:$0xff] }
 0x5e0   : > { %6740 = vmatpush1.msra.mxu1 %v4659_v11  ;;  %6811 = vmatpush1.msra.mxu0 %v4915_v36  ;;  %v5083_v17 = vld [vmem:[#allocation8 + $0xe20] sm:$0xff]  ;;  %v4820_v11 = vld [vmem:[#allocation8 + $0x5e8] sm:$0xff] }
 0x5e1   : > { %6741 = vmatprep.subr.mxu1 %v4652_v48  ;;  %6812 = vmatprep.subr.mxu0 %v4908_v54  ;;  %v5076_v36 = vld [vmem:[#allocation8 + $0xde8] sm:$0xff]  ;;  %v4819_v48 = vld [vmem:[#allocation8 + $0x5e0] sm:$0xff] }
 0x5e2   : > { %6742 = vmatpush1.msra.mxu1 %v4651_v53  ;;  %6813 = vmatpush1.msra.mxu0 %v4907_v15  ;;  %v5075_v54 = vld [vmem:[#allocation8 + $0xde0] sm:$0xff]  ;;  %v4812_v53 = vld [vmem:[#allocation8 + $0x5a8] sm:$0xff] }
 0x5e3   : > { %6743 = vmatprep.subr.mxu1 %v4644_v55  ;;  %6814 = vmatprep.subr.mxu0 %v4900_v1  ;;  %v5068_v15 = vld [vmem:[#allocation8 + $0xda8] sm:$0xff]  ;;  %v4811_v55 = vld [vmem:[#allocation8 + $0x5a0] sm:$0xff] }
 0x5e4   : > { %6744 = vmatpush1.msra.mxu1 %v4643_v32  ;;  %6815 = vmatpush1.msra.mxu0 %v4899_v12  ;;  %v5067_v1 = vld [vmem:[#allocation8 + $0xda0] sm:$0xff]  ;;  %v4804_v32 = vld [vmem:[#allocation8 + $0x568] sm:$0xff] }
 0x5e5   : > { %6745 = vmatprep.subr.mxu1 %v4636_v46  ;;  %6816 = vmatprep.subr.mxu0 %v4892_v2  ;;  %v5060_v12 = vld [vmem:[#allocation8 + $0xd68] sm:$0xff]  ;;  %v4803_v46 = vld [vmem:[#allocation8 + $0x560] sm:$0xff] }
 0x5e6   : > { %6746 = vmatpush1.msra.mxu1 %v4635_v8  ;;  %6817 = vmatpush1.msra.mxu0 %v4891_v9  ;;  %v5059_v2 = vld [vmem:[#allocation8 + $0xd60] sm:$0xff]  ;;  %v4796_v8 = vld [vmem:[#allocation8 + $0x528] sm:$0xff] }
 0x5e7   : > { %6747 = vmatprep.subr.mxu1 %v4884_v58  ;;  %6818 = vmatprep.subr.mxu0 %v5140_v3  ;;  %v5052_v9 = vld [vmem:[#allocation8 + $0xd28] sm:$0xff]  ;;  %v4795_v58 = vld [vmem:[#allocation8 + $0x520] sm:$0xff] }
 0x5e8   : > { %6748 = vmatpush2.msra.mxu1 %v4883_v6  ;;  %6819 = vmatpush2.msra.mxu0 %v5139_v35  ;;  %v5051_v3 = vld [vmem:[#allocation8 + $0xd20] sm:$0xff]  ;;  %v4788_v6 = vld [vmem:[#allocation8 + $0x4e8] sm:$0xff] }
 0x5e9   : > { %6749 = vmatprep.subr.mxu1 %v4876_v30  ;;  %6820 = vmatprep.subr.mxu0 %v5132_v28  ;;  %v5044_v35 = vld [vmem:[#allocation8 + $0xce8] sm:$0xff]  ;;  %v4787_v30 = vld [vmem:[#allocation8 + $0x4e0] sm:$0xff] }
 0x5ea   : > { %6750 = vmatpush2.msra.mxu1 %v4875_v21  ;;  %6821 = vmatpush2.msra.mxu0 %v5131_v49  ;;  %v5043_v28 = vld [vmem:[#allocation8 + $0xce0] sm:$0xff]  ;;  %v4780_v21 = vld [vmem:[#allocation8 + $0x4a8] sm:$0xff] }
 0x5eb   : > { %6751 = vmatprep.subr.mxu1 %v4868_v25  ;;  %6822 = vmatprep.subr.mxu0 %v5124_v27  ;;  %v5036_v49 = vld [vmem:[#allocation8 + $0xca8] sm:$0xff]  ;;  %v4779_v25 = vld [vmem:[#allocation8 + $0x4a0] sm:$0xff] }
 0x5ec   : > { %6752 = vmatpush2.msra.mxu1 %v4867_v39  ;;  %6823 = vmatpush2.msra.mxu0 %v5123_v51  ;;  %v5035_v27 = vld [vmem:[#allocation8 + $0xca0] sm:$0xff]  ;;  %v4772_v39 = vld [vmem:[#allocation8 + $0x468] sm:$0xff] }
 0x5ed   : > { %6753 = vmatprep.subr.mxu1 %v4860_v44  ;;  %6824 = vmatprep.subr.mxu0 %v5116_v16  ;;  %v5028_v51 = vld [vmem:[#allocation8 + $0xc68] sm:$0xff]  ;;  %v4771_v44 = vld [vmem:[#allocation8 + $0x460] sm:$0xff] }
 0x5ee   : > { %6754 = vmatpush2.msra.mxu1 %v4859_v5  ;;  %6825 = vmatpush2.msra.mxu0 %v5115_v31  ;;  %v5027_v16 = vld [vmem:[#allocation8 + $0xc60] sm:$0xff]  ;;  %v4764_v5 = vld [vmem:[#allocation8 + $0x428] sm:$0xff] }
 0x5ef   : > { %6755 = vmatprep.subr.mxu1 %v4852_v63  ;;  %6826 = vmatprep.subr.mxu0 %v5108_v47  ;;  %v5020_v31 = vld [vmem:[#allocation8 + $0xc28] sm:$0xff]  ;;  %v4763_v63 = vld [vmem:[#allocation8 + $0x420] sm:$0xff] }
 0x5f0   : > { %6756 = vmatpush2.msra.mxu1 %v4851_v52  ;;  %6827 = vmatpush2.msra.mxu0 %v5107_v34  ;;  %v5019_v47 = vld [vmem:[#allocation8 + $0xc20] sm:$0xff]  ;;  %v5268_v52 = vld [vmem:[#allocation8 + $0x13e8] sm:$0xff] }
 0x5f1   : > { %6757 = vmatprep.subr.mxu1 %v4844_v40  ;;  %6828 = vmatprep.subr.mxu0 %v5100_v13  ;;  %v5524_v34 = vld [vmem:[#allocation8 + $0x1be8] sm:$0xff]  ;;  %v5267_v40 = vld [vmem:[#allocation8 + $0x13e0] sm:$0xff] }
 0x5f2   : > { %6758 = vmatpush2.msra.mxu1 %v4843_v57  ;;  %6829 = vmatpush2.msra.mxu0 %v5099_v29  ;;  %v5523_v13 = vld [vmem:[#allocation8 + $0x1be0] sm:$0xff]  ;;  %v5260_v57 = vld [vmem:[#allocation8 + $0x13a8] sm:$0xff] }
 0x5f3   : > { %6759 = vmatprep.subr.mxu1 %v4836_v7  ;;  %6830 = vmatprep.subr.mxu0 %v5092_v24  ;;  %v5516_v29 = vld [vmem:[#allocation8 + $0x1ba8] sm:$0xff]  ;;  %v5259_v7 = vld [vmem:[#allocation8 + $0x13a0] sm:$0xff] }
 0x5f4   : > { %6760 = vmatpush2.msra.mxu1 %v4835_v14  ;;  %6831 = vmatpush2.msra.mxu0 %v5091_v45  ;;  %v5515_v24 = vld [vmem:[#allocation8 + $0x1ba0] sm:$0xff]  ;;  %v5252_v14 = vld [vmem:[#allocation8 + $0x1368] sm:$0xff] }
 0x5f5   : > { %6761 = vmatprep.subr.mxu1 %v4828_v19  ;;  %6832 = vmatprep.subr.mxu0 %v5084_v37  ;;  %v5508_v45 = vld [vmem:[#allocation8 + $0x1b68] sm:$0xff]  ;;  %v5251_v19 = vld [vmem:[#allocation8 + $0x1360] sm:$0xff] }
 0x5f6   : > { %6762 = vmatpush2.msra.mxu1 %v4827_v60  ;;  %6833 = vmatpush2.msra.mxu0 %v5083_v17  ;;  %v5507_v37 = vld [vmem:[#allocation8 + $0x1b60] sm:$0xff]  ;;  %v5244_v60 = vld [vmem:[#allocation8 + $0x1328] sm:$0xff] }
 0x5f7   : > { %6763 = vmatprep.subr.mxu1 %v4820_v11  ;;  %6834 = vmatprep.subr.mxu0 %v5076_v36  ;;  %v5500_v17 = vld [vmem:[#allocation8 + $0x1b28] sm:$0xff]  ;;  %v5243_v11 = vld [vmem:[#allocation8 + $0x1320] sm:$0xff] }
 0x5f8   : > { %6764 = vmatpush2.msra.mxu1 %v4819_v48  ;;  %6835 = vmatpush2.msra.mxu0 %v5075_v54  ;;  %v5499_v36 = vld [vmem:[#allocation8 + $0x1b20] sm:$0xff]  ;;  %v5236_v48 = vld [vmem:[#allocation8 + $0x12e8] sm:$0xff] }
 0x5f9   : > { %6765 = vmatprep.subr.mxu1 %v4812_v53  ;;  %6836 = vmatprep.subr.mxu0 %v5068_v15  ;;  %v5492_v54 = vld [vmem:[#allocation8 + $0x1ae8] sm:$0xff]  ;;  %v5235_v53 = vld [vmem:[#allocation8 + $0x12e0] sm:$0xff] }
 0x5fa   : > { %6766 = vmatpush2.msra.mxu1 %v4811_v55  ;;  %6837 = vmatpush2.msra.mxu0 %v5067_v1  ;;  %v5491_v15 = vld [vmem:[#allocation8 + $0x1ae0] sm:$0xff]  ;;  %v5228_v55 = vld [vmem:[#allocation8 + $0x12a8] sm:$0xff] }
 0x5fb   : > { %6767 = vmatprep.subr.mxu1 %v4804_v32  ;;  %6838 = vmatprep.subr.mxu0 %v5060_v12  ;;  %v5484_v1 = vld [vmem:[#allocation8 + $0x1aa8] sm:$0xff]  ;;  %v5227_v32 = vld [vmem:[#allocation8 + $0x12a0] sm:$0xff] }
 0x5fc   : > { %6768 = vmatpush2.msra.mxu1 %v4803_v46  ;;  %6839 = vmatpush2.msra.mxu0 %v5059_v2  ;;  %v5483_v12 = vld [vmem:[#allocation8 + $0x1aa0] sm:$0xff]  ;;  %v5220_v46 = vld [vmem:[#allocation8 + $0x1268] sm:$0xff] }
 0x5fd   : > { %6769 = vmatprep.subr.mxu1 %v4796_v8  ;;  %6840 = vmatprep.subr.mxu0 %v5052_v9  ;;  %v5476_v2 = vld [vmem:[#allocation8 + $0x1a68] sm:$0xff]  ;;  %v5219_v8 = vld [vmem:[#allocation8 + $0x1260] sm:$0xff] }
 0x5fe   : > { %6770 = vmatpush2.msra.mxu1 %v4795_v58  ;;  %6841 = vmatpush2.msra.mxu0 %v5051_v3  ;;  %v5475_v9 = vld [vmem:[#allocation8 + $0x1a60] sm:$0xff]  ;;  %v5212_v58 = vld [vmem:[#allocation8 + $0x1228] sm:$0xff] }
 0x5ff   : > { %6771 = vmatprep.subr.mxu1 %v4788_v6  ;;  %6842 = vmatprep.subr.mxu0 %v5044_v35  ;;  %v5468_v3 = vld [vmem:[#allocation8 + $0x1a28] sm:$0xff]  ;;  %v5211_v6 = vld [vmem:[#allocation8 + $0x1220] sm:$0xff] }
 0x600   : > { %6772 = vmatpush2.msra.mxu1 %v4787_v30  ;;  %6843 = vmatpush2.msra.mxu0 %v5043_v28  ;;  %v5467_v35 = vld [vmem:[#allocation8 + $0x1a20] sm:$0xff]  ;;  %v5204_v30 = vld [vmem:[#allocation8 + $0x11e8] sm:$0xff] }
 0x601   : > { %6773 = vmatprep.subr.mxu1 %v4780_v21  ;;  %6844 = vmatprep.subr.mxu0 %v5036_v49  ;;  %v5460_v28 = vld [vmem:[#allocation8 + $0x19e8] sm:$0xff]  ;;  %v5203_v21 = vld [vmem:[#allocation8 + $0x11e0] sm:$0xff] }
 0x602   : > { %6774 = vmatpush2.msra.mxu1 %v4779_v25  ;;  %6845 = vmatpush2.msra.mxu0 %v5035_v27  ;;  %v5459_v49 = vld [vmem:[#allocation8 + $0x19e0] sm:$0xff]  ;;  %v5196_v25 = vld [vmem:[#allocation8 + $0x11a8] sm:$0xff] }
 0x603   : > { %6775 = vmatprep.subr.mxu1 %v4772_v39  ;;  %6846 = vmatprep.subr.mxu0 %v5028_v51  ;;  %v5452_v27 = vld [vmem:[#allocation8 + $0x19a8] sm:$0xff]  ;;  %v5195_v39 = vld [vmem:[#allocation8 + $0x11a0] sm:$0xff] }
 0x604   : > { %6776 = vmatpush2.msra.mxu1 %v4771_v44  ;;  %6847 = vmatpush2.msra.mxu0 %v5027_v16  ;;  %v5451_v51 = vld [vmem:[#allocation8 + $0x19a0] sm:$0xff]  ;;  %v5188_v44 = vld [vmem:[#allocation8 + $0x1168] sm:$0xff] }
 0x605   : > { %6777 = vmatprep.subr.mxu1 %v4764_v5  ;;  %6848 = vmatprep.subr.mxu0 %v5020_v31  ;;  %v5444_v16 = vld [vmem:[#allocation8 + $0x1968] sm:$0xff]  ;;  %v5187_v5 = vld [vmem:[#allocation8 + $0x1160] sm:$0xff] }
 0x606   : > { %6778 = vmatpush2.msra.mxu1 %v4763_v63  ;;  %6849 = vmatpush2.msra.mxu0 %v5019_v47  ;;  %v5443_v31 = vld [vmem:[#allocation8 + $0x1960] sm:$0xff]  ;;  %v5180_v63 = vld [vmem:[#allocation8 + $0x1128] sm:$0xff] }
 0x607   : > { %6780 = vmatmul.mubr.f32.vlgmr.msra.gmra.mxu1 %v14468_v42  ;;  %6851 = vmatmul.mubr.f32.vlgmr.msra.gmra.mxu0 %v14472_v33  ;;  %v5436_v47 = vld [vmem:[#allocation8 + $0x1928] sm:$0xff] }
 0x608   : > { %6857 = vmatprep.subr.mxu1 %v5268_v52  ;;  %6928 = vmatprep.subr.mxu0 %v5524_v34  ;;  %v5179_v52 = vld [vmem:[#allocation8 + $0x1120] sm:$0xff] }
 0x609   : > { %6858 = vmatpush1.msra.mxu1 %v5267_v40  ;;  %6921 = vmatprep.mubr.f32.mxu1 %v14480_v18  ;;  %v5435_v34 = vld [vmem:[#allocation8 + $0x1920] sm:$0xff]  ;;  %v5172_v40 = vld [vmem:[#allocation8 + $0x10e8] sm:$0xff] }
 0x60a   : > { %6929 = vmatpush1.msra.mxu0 %v5523_v13  ;;  %6992 = vmatprep.mubr.f32.mxu0 %v14484_v56  ;;  %v5428_v13 = vld [vmem:[#allocation8 + $0x18e8] sm:$0xff] }
 0x60b   : > { %6859 = vmatprep.subr.mxu1 %v5260_v57  ;;  %6930 = vmatprep.subr.mxu0 %v5516_v29  ;;  %v5171_v57 = vld [vmem:[#allocation8 + $0x10e0] sm:$0xff] }
 0x60c   : > { %6860 = vmatpush1.msra.mxu1 %v5259_v7  ;;  %6931 = vmatpush1.msra.mxu0 %v5515_v24  ;;  %v5427_v29 = vld [vmem:[#allocation8 + $0x18e0] sm:$0xff]  ;;  %v5164_v7 = vld [vmem:[#allocation8 + $0x10a8] sm:$0xff] }
 0x60d   : > { %6861 = vmatprep.subr.mxu1 %v5252_v14  ;;  %6932 = vmatprep.subr.mxu0 %v5508_v45  ;;  %v5420_v24 = vld [vmem:[#allocation8 + $0x18a8] sm:$0xff]  ;;  %v5163_v14 = vld [vmem:[#allocation8 + $0x10a0] sm:$0xff] }
 0x60e   : > { %6862 = vmatpush1.msra.mxu1 %v5251_v19  ;;  %6933 = vmatpush1.msra.mxu0 %v5507_v37  ;;  %v5419_v45 = vld [vmem:[#allocation8 + $0x18a0] sm:$0xff]  ;;  %v5156_v19 = vld [vmem:[#allocation8 + $0x1068] sm:$0xff] }
 0x60f   : > { %6863 = vmatprep.subr.mxu1 %v5244_v60  ;;  %6934 = vmatprep.subr.mxu0 %v5500_v17  ;;  %v5412_v37 = vld [vmem:[#allocation8 + $0x1868] sm:$0xff]  ;;  %v5155_v60 = vld [vmem:[#allocation8 + $0x1060] sm:$0xff] }
 0x610   : > { %6864 = vmatpush1.msra.mxu1 %v5243_v11  ;;  %6935 = vmatpush1.msra.mxu0 %v5499_v36  ;;  %v5411_v17 = vld [vmem:[#allocation8 + $0x1860] sm:$0xff]  ;;  %v5148_v11 = vld [vmem:[#allocation8 + $0x1028] sm:$0xff] }
 0x611   : > { %6865 = vmatprep.subr.mxu1 %v5236_v48  ;;  %6936 = vmatprep.subr.mxu0 %v5492_v54  ;;  %v5404_v36 = vld [vmem:[#allocation8 + $0x1828] sm:$0xff]  ;;  %v5147_v48 = vld [vmem:[#allocation8 + $0x1020] sm:$0xff] }
 0x612   : > { %6866 = vmatpush1.msra.mxu1 %v5235_v53  ;;  %6937 = vmatpush1.msra.mxu0 %v5491_v15  ;;  %v5403_v54 = vld [vmem:[#allocation8 + $0x1820] sm:$0xff]  ;;  %v5396_v53 = vld [vmem:[#allocation8 + $0x17e8] sm:$0xff] }
 0x613   : > { %6867 = vmatprep.subr.mxu1 %v5228_v55  ;;  %6938 = vmatprep.subr.mxu0 %v5484_v1  ;;  %v5652_v15 = vld [vmem:[#allocation8 + $0x1fe8] sm:$0xff]  ;;  %v5395_v55 = vld [vmem:[#allocation8 + $0x17e0] sm:$0xff] }
 0x614   : > { %6868 = vmatpush1.msra.mxu1 %v5227_v32  ;;  %6939 = vmatpush1.msra.mxu0 %v5483_v12  ;;  %v5651_v1 = vld [vmem:[#allocation8 + $0x1fe0] sm:$0xff]  ;;  %v5388_v32 = vld [vmem:[#allocation8 + $0x17a8] sm:$0xff] }
 0x615   : > { %6869 = vmatprep.subr.mxu1 %v5220_v46  ;;  %6940 = vmatprep.subr.mxu0 %v5476_v2  ;;  %v5644_v12 = vld [vmem:[#allocation8 + $0x1fa8] sm:$0xff]  ;;  %v5387_v46 = vld [vmem:[#allocation8 + $0x17a0] sm:$0xff] }
 0x616   : > { %6870 = vmatpush1.msra.mxu1 %v5219_v8  ;;  %6941 = vmatpush1.msra.mxu0 %v5475_v9  ;;  %v5643_v2 = vld [vmem:[#allocation8 + $0x1fa0] sm:$0xff]  ;;  %v5380_v8 = vld [vmem:[#allocation8 + $0x1768] sm:$0xff] }
 0x617   : > { %6871 = vmatprep.subr.mxu1 %v5212_v58  ;;  %6942 = vmatprep.subr.mxu0 %v5468_v3  ;;  %v5636_v9 = vld [vmem:[#allocation8 + $0x1f68] sm:$0xff]  ;;  %v5379_v58 = vld [vmem:[#allocation8 + $0x1760] sm:$0xff] }
 0x618   : > { %6872 = vmatpush1.msra.mxu1 %v5211_v6  ;;  %6943 = vmatpush1.msra.mxu0 %v5467_v35  ;;  %v5635_v3 = vld [vmem:[#allocation8 + $0x1f60] sm:$0xff]  ;;  %v5372_v6 = vld [vmem:[#allocation8 + $0x1728] sm:$0xff] }
 0x619   : > { %6873 = vmatprep.subr.mxu1 %v5204_v30  ;;  %6944 = vmatprep.subr.mxu0 %v5460_v28  ;;  %v5628_v35 = vld [vmem:[#allocation8 + $0x1f28] sm:$0xff]  ;;  %v5371_v30 = vld [vmem:[#allocation8 + $0x1720] sm:$0xff] }
 0x61a   : > { %6874 = vmatpush1.msra.mxu1 %v5203_v21  ;;  %6945 = vmatpush1.msra.mxu0 %v5459_v49  ;;  %v5627_v28 = vld [vmem:[#allocation8 + $0x1f20] sm:$0xff]  ;;  %v5364_v21 = vld [vmem:[#allocation8 + $0x16e8] sm:$0xff] }
 0x61b   : > { %6875 = vmatprep.subr.mxu1 %v5196_v25  ;;  %6946 = vmatprep.subr.mxu0 %v5452_v27  ;;  %v5620_v49 = vld [vmem:[#allocation8 + $0x1ee8] sm:$0xff]  ;;  %v5363_v25 = vld [vmem:[#allocation8 + $0x16e0] sm:$0xff] }
 0x61c   : > { %6876 = vmatpush1.msra.mxu1 %v5195_v39  ;;  %6947 = vmatpush1.msra.mxu0 %v5451_v51  ;;  %v5619_v27 = vld [vmem:[#allocation8 + $0x1ee0] sm:$0xff]  ;;  %v5356_v39 = vld [vmem:[#allocation8 + $0x16a8] sm:$0xff] }
 0x61d   : > { %6877 = vmatprep.subr.mxu1 %v5188_v44  ;;  %6948 = vmatprep.subr.mxu0 %v5444_v16  ;;  %v5612_v51 = vld [vmem:[#allocation8 + $0x1ea8] sm:$0xff]  ;;  %v5355_v44 = vld [vmem:[#allocation8 + $0x16a0] sm:$0xff] }
 0x61e   : > { %6878 = vmatpush1.msra.mxu1 %v5187_v5  ;;  %6949 = vmatpush1.msra.mxu0 %v5443_v31  ;;  %v5611_v16 = vld [vmem:[#allocation8 + $0x1ea0] sm:$0xff]  ;;  %v5348_v5 = vld [vmem:[#allocation8 + $0x1668] sm:$0xff] }
 0x61f   : > { %6879 = vmatprep.subr.mxu1 %v5180_v63  ;;  %6950 = vmatprep.subr.mxu0 %v5436_v47  ;;  %v5604_v31 = vld [vmem:[#allocation8 + $0x1e68] sm:$0xff]  ;;  %v5347_v63 = vld [vmem:[#allocation8 + $0x1660] sm:$0xff] }
 0x620   : > { %6880 = vmatpush1.msra.mxu1 %v5179_v52  ;;  %6951 = vmatpush1.msra.mxu0 %v5435_v34  ;;  %v5603_v47 = vld [vmem:[#allocation8 + $0x1e60] sm:$0xff]  ;;  %v5340_v52 = vld [vmem:[#allocation8 + $0x1628] sm:$0xff] }
 0x621   : > { %6881 = vmatprep.subr.mxu1 %v5172_v40  ;;  %6952 = vmatprep.subr.mxu0 %v5428_v13  ;;  %v5596_v34 = vld [vmem:[#allocation8 + $0x1e28] sm:$0xff]  ;;  %v5339_v40 = vld [vmem:[#allocation8 + $0x1620] sm:$0xff] }
 0x622   : > { %6882 = vmatpush1.msra.mxu1 %v5171_v57  ;;  %6953 = vmatpush1.msra.mxu0 %v5427_v29  ;;  %v5595_v13 = vld [vmem:[#allocation8 + $0x1e20] sm:$0xff]  ;;  %v5332_v57 = vld [vmem:[#allocation8 + $0x15e8] sm:$0xff] }
 0x623   : > { %6883 = vmatprep.subr.mxu1 %v5164_v7  ;;  %6954 = vmatprep.subr.mxu0 %v5420_v24  ;;  %v5588_v29 = vld [vmem:[#allocation8 + $0x1de8] sm:$0xff]  ;;  %v5331_v7 = vld [vmem:[#allocation8 + $0x15e0] sm:$0xff] }
 0x624   : > { %6884 = vmatpush1.msra.mxu1 %v5163_v14  ;;  %6955 = vmatpush1.msra.mxu0 %v5419_v45  ;;  %v5587_v24 = vld [vmem:[#allocation8 + $0x1de0] sm:$0xff]  ;;  %v5324_v14 = vld [vmem:[#allocation8 + $0x15a8] sm:$0xff] }
 0x625   : > { %6885 = vmatprep.subr.mxu1 %v5156_v19  ;;  %6956 = vmatprep.subr.mxu0 %v5412_v37  ;;  %v5580_v45 = vld [vmem:[#allocation8 + $0x1da8] sm:$0xff]  ;;  %v5323_v19 = vld [vmem:[#allocation8 + $0x15a0] sm:$0xff] }
 0x626   : > { %6886 = vmatpush1.msra.mxu1 %v5155_v60  ;;  %6957 = vmatpush1.msra.mxu0 %v5411_v17  ;;  %v5579_v37 = vld [vmem:[#allocation8 + $0x1da0] sm:$0xff]  ;;  %v5316_v60 = vld [vmem:[#allocation8 + $0x1568] sm:$0xff] }
 0x627   : > { %6887 = vmatprep.subr.mxu1 %v5148_v11  ;;  %6958 = vmatprep.subr.mxu0 %v5404_v36  ;;  %v5572_v17 = vld [vmem:[#allocation8 + $0x1d68] sm:$0xff]  ;;  %v5315_v11 = vld [vmem:[#allocation8 + $0x1560] sm:$0xff] }
 0x628   : > { %6888 = vmatpush1.msra.mxu1 %v5147_v48  ;;  %6959 = vmatpush1.msra.mxu0 %v5403_v54  ;;  %v5571_v36 = vld [vmem:[#allocation8 + $0x1d60] sm:$0xff]  ;;  %v5308_v48 = vld [vmem:[#allocation8 + $0x1528] sm:$0xff] }
 0x629   : > { %6889 = vmatprep.subr.mxu1 %v5396_v53  ;;  %6960 = vmatprep.subr.mxu0 %v5652_v15  ;;  %v5564_v54 = vld [vmem:[#allocation8 + $0x1d28] sm:$0xff]  ;;  %v5307_v53 = vld [vmem:[#allocation8 + $0x1520] sm:$0xff] }
 0x62a   : > { %6890 = vmatpush2.msra.mxu1 %v5395_v55  ;;  %6961 = vmatpush2.msra.mxu0 %v5651_v1  ;;  %v5563_v15 = vld [vmem:[#allocation8 + $0x1d20] sm:$0xff]  ;;  %v5300_v55 = vld [vmem:[#allocation8 + $0x14e8] sm:$0xff] }
 0x62b   : > { %6891 = vmatprep.subr.mxu1 %v5388_v32  ;;  %6962 = vmatprep.subr.mxu0 %v5644_v12  ;;  %v5556_v1 = vld [vmem:[#allocation8 + $0x1ce8] sm:$0xff]  ;;  %v5299_v32 = vld [vmem:[#allocation8 + $0x14e0] sm:$0xff] }
 0x62c   : > { %6892 = vmatpush2.msra.mxu1 %v5387_v46  ;;  %6963 = vmatpush2.msra.mxu0 %v5643_v2  ;;  %v5555_v12 = vld [vmem:[#allocation8 + $0x1ce0] sm:$0xff]  ;;  %v5292_v46 = vld [vmem:[#allocation8 + $0x14a8] sm:$0xff] }
 0x62d   : > { %6893 = vmatprep.subr.mxu1 %v5380_v8  ;;  %6964 = vmatprep.subr.mxu0 %v5636_v9  ;;  %v5548_v2 = vld [vmem:[#allocation8 + $0x1ca8] sm:$0xff]  ;;  %v5291_v8 = vld [vmem:[#allocation8 + $0x14a0] sm:$0xff] }
 0x62e   : > { %6894 = vmatpush2.msra.mxu1 %v5379_v58  ;;  %6965 = vmatpush2.msra.mxu0 %v5635_v3  ;;  %v5547_v9 = vld [vmem:[#allocation8 + $0x1ca0] sm:$0xff]  ;;  %v5284_v58 = vld [vmem:[#allocation8 + $0x1468] sm:$0xff] }
 0x62f   : > { %6895 = vmatprep.subr.mxu1 %v5372_v6  ;;  %6966 = vmatprep.subr.mxu0 %v5628_v35  ;;  %v5540_v3 = vld [vmem:[#allocation8 + $0x1c68] sm:$0xff]  ;;  %v5283_v6 = vld [vmem:[#allocation8 + $0x1460] sm:$0xff] }
 0x630   : > { %6896 = vmatpush2.msra.mxu1 %v5371_v30  ;;  %6967 = vmatpush2.msra.mxu0 %v5627_v28  ;;  %v5539_v35 = vld [vmem:[#allocation8 + $0x1c60] sm:$0xff]  ;;  %v5276_v30 = vld [vmem:[#allocation8 + $0x1428] sm:$0xff] }
 0x631   : > { %6897 = vmatprep.subr.mxu1 %v5364_v21  ;;  %6968 = vmatprep.subr.mxu0 %v5620_v49  ;;  %v5532_v28 = vld [vmem:[#allocation8 + $0x1c28] sm:$0xff]  ;;  %v5275_v21 = vld [vmem:[#allocation8 + $0x1420] sm:$0xff] }
 0x632   : > { %6898 = vmatpush2.msra.mxu1 %v5363_v25  ;;  %6969 = vmatpush2.msra.mxu0 %v5619_v27  ;;  %v5531_v49 = vld [vmem:[#allocation8 + $0x1c20] sm:$0xff]  ;;  %v5780_v25 = vld [vmem:[#allocation8 + $0x23e8] sm:$0xff]  ;;  %v4758_v27 = vld [vmem:[#allocation8 + $0x3f8] sm:$0xff] }
 0x633   : > { %6899 = vmatprep.subr.mxu1 %v5356_v39  ;;  %6970 = vmatprep.subr.mxu0 %v5612_v51  ;;  %v5779_v39 = vld [vmem:[#allocation8 + $0x23e0] sm:$0xff]  ;;  %v4757_v51 = vld [vmem:[#allocation8 + $0x3f0] sm:$0xff] }
 0x634   : > { %6900 = vmatpush2.msra.mxu1 %v5355_v44  ;;  %6971 = vmatpush2.msra.mxu0 %v5611_v16  ;;  %v5772_v44 = vld [vmem:[#allocation8 + $0x23a8] sm:$0xff]  ;;  %v4750_v16 = vld [vmem:[#allocation8 + $0x3b8] sm:$0xff] }
 0x635   : > { %6901 = vmatprep.subr.mxu1 %v5348_v5  ;;  %6972 = vmatprep.subr.mxu0 %v5604_v31  ;;  %v5771_v5 = vld [vmem:[#allocation8 + $0x23a0] sm:$0xff]  ;;  %v4749_v31 = vld [vmem:[#allocation8 + $0x3b0] sm:$0xff] }
 0x636   : > { %6902 = vmatpush2.msra.mxu1 %v5347_v63  ;;  %6973 = vmatpush2.msra.mxu0 %v5603_v47  ;;  %v5764_v63 = vld [vmem:[#allocation8 + $0x2368] sm:$0xff]  ;;  %v4742_v47 = vld [vmem:[#allocation8 + $0x378] sm:$0xff] }
 0x637   : > { %6903 = vmatprep.subr.mxu1 %v5340_v52  ;;  %6974 = vmatprep.subr.mxu0 %v5596_v34  ;;  %v5763_v52 = vld [vmem:[#allocation8 + $0x2360] sm:$0xff]  ;;  %v4741_v34 = vld [vmem:[#allocation8 + $0x370] sm:$0xff] }
 0x638   : > { %6904 = vmatpush2.msra.mxu1 %v5339_v40  ;;  %6975 = vmatpush2.msra.mxu0 %v5595_v13  ;;  %v5756_v40 = vld [vmem:[#allocation8 + $0x2328] sm:$0xff]  ;;  %v4734_v13 = vld [vmem:[#allocation8 + $0x338] sm:$0xff] }
 0x639   : > { %6905 = vmatprep.subr.mxu1 %v5332_v57  ;;  %6976 = vmatprep.subr.mxu0 %v5588_v29  ;;  %v5755_v57 = vld [vmem:[#allocation8 + $0x2320] sm:$0xff]  ;;  %v4733_v29 = vld [vmem:[#allocation8 + $0x330] sm:$0xff] }
 0x63a   : > { %6906 = vmatpush2.msra.mxu1 %v5331_v7  ;;  %6977 = vmatpush2.msra.mxu0 %v5587_v24  ;;  %v5748_v7 = vld [vmem:[#allocation8 + $0x22e8] sm:$0xff]  ;;  %v4726_v24 = vld [vmem:[#allocation8 + $0x2f8] sm:$0xff] }
 0x63b   : > { %6907 = vmatprep.subr.mxu1 %v5324_v14  ;;  %6978 = vmatprep.subr.mxu0 %v5580_v45  ;;  %v4725_v14 = vld [vmem:[#allocation8 + $0x2f0] sm:$0xff]  ;;  %v5740_v45 = vld [vmem:[#allocation8 + $0x22a8] sm:$0xff] }
 0x63c   : > { %6908 = vmatpush2.msra.mxu1 %v5323_v19  ;;  %6979 = vmatpush2.msra.mxu0 %v5579_v37  ;;  %v4718_v19 = vld [vmem:[#allocation8 + $0x2b8] sm:$0xff]  ;;  %v5739_v37 = vld [vmem:[#allocation8 + $0x22a0] sm:$0xff] }
 0x63d   : > { %6909 = vmatprep.subr.mxu1 %v5316_v60  ;;  %6980 = vmatprep.subr.mxu0 %v5572_v17  ;;  %v4717_v60 = vld [vmem:[#allocation8 + $0x2b0] sm:$0xff]  ;;  %v5732_v17 = vld [vmem:[#allocation8 + $0x2268] sm:$0xff] }
 0x63e   : > { %6910 = vmatpush2.msra.mxu1 %v5315_v11  ;;  %6981 = vmatpush2.msra.mxu0 %v5571_v36  ;;  %v4710_v11 = vld [vmem:[#allocation8 + $0x278] sm:$0xff]  ;;  %v5731_v36 = vld [vmem:[#allocation8 + $0x2260] sm:$0xff] }
 0x63f   : > { %6911 = vmatprep.subr.mxu1 %v5308_v48  ;;  %6982 = vmatprep.subr.mxu0 %v5564_v54  ;;  %v4709_v48 = vld [vmem:[#allocation8 + $0x270] sm:$0xff]  ;;  %v5724_v54 = vld [vmem:[#allocation8 + $0x2228] sm:$0xff] }
 0x640   : > { %6912 = vmatpush2.msra.mxu1 %v5307_v53  ;;  %6983 = vmatpush2.msra.mxu0 %v5563_v15  ;;  %v4702_v53 = vld [vmem:[#allocation8 + $0x238] sm:$0xff]  ;;  %v5723_v15 = vld [vmem:[#allocation8 + $0x2220] sm:$0xff] }
 0x641   : > { %6913 = vmatprep.subr.mxu1 %v5300_v55  ;;  %6984 = vmatprep.subr.mxu0 %v5556_v1  ;;  %v4701_v55 = vld [vmem:[#allocation8 + $0x230] sm:$0xff]  ;;  %v5716_v1 = vld [vmem:[#allocation8 + $0x21e8] sm:$0xff] }
 0x642   : > { %6914 = vmatpush2.msra.mxu1 %v5299_v32  ;;  %6985 = vmatpush2.msra.mxu0 %v5555_v12  ;;  %v4694_v32 = vld [vmem:[#allocation8 + $0x1f8] sm:$0xff]  ;;  %v5715_v12 = vld [vmem:[#allocation8 + $0x21e0] sm:$0xff] }
 0x643   : > { %6915 = vmatprep.subr.mxu1 %v5292_v46  ;;  %6986 = vmatprep.subr.mxu0 %v5548_v2  ;;  %v4693_v46 = vld [vmem:[#allocation8 + $0x1f0] sm:$0xff]  ;;  %v5708_v2 = vld [vmem:[#allocation8 + $0x21a8] sm:$0xff] }
 0x644   : > { %6916 = vmatpush2.msra.mxu1 %v5291_v8  ;;  %6987 = vmatpush2.msra.mxu0 %v5547_v9  ;;  %v4686_v8 = vld [vmem:[#allocation8 + $0x1b8] sm:$0xff]  ;;  %v5707_v9 = vld [vmem:[#allocation8 + $0x21a0] sm:$0xff] }
 0x645   : > { %6917 = vmatprep.subr.mxu1 %v5284_v58  ;;  %6988 = vmatprep.subr.mxu0 %v5540_v3  ;;  %v4685_v58 = vld [vmem:[#allocation8 + $0x1b0] sm:$0xff]  ;;  %v5700_v3 = vld [vmem:[#allocation8 + $0x2168] sm:$0xff] }
 0x646   : > { %6918 = vmatpush2.msra.mxu1 %v5283_v6  ;;  %6989 = vmatpush2.msra.mxu0 %v5539_v35  ;;  %v4678_v6 = vld [vmem:[#allocation8 + $0x178] sm:$0xff]  ;;  %v5699_v35 = vld [vmem:[#allocation8 + $0x2160] sm:$0xff] }
 0x647   : > { %6919 = vmatprep.subr.mxu1 %v5276_v30  ;;  %6990 = vmatprep.subr.mxu0 %v5532_v28  ;;  %v4677_v30 = vld [vmem:[#allocation8 + $0x170] sm:$0xff]  ;;  %v5692_v28 = vld [vmem:[#allocation8 + $0x2128] sm:$0xff] }
 0x648   : > { %6920 = vmatpush2.msra.mxu1 %v5275_v21  ;;  %6991 = vmatpush2.msra.mxu0 %v5531_v49  ;;  %v4670_v21 = vld [vmem:[#allocation8 + $0x138] sm:$0xff]  ;;  %v5691_v49 = vld [vmem:[#allocation8 + $0x2120] sm:$0xff] }
 0x649   : > { %6922 = vmatmul.mubr.f32.vlgmr.msra.gmra.mxu1 %v14490_v20  ;;  %6993 = vmatmul.mubr.f32.vlgmr.msra.gmra.mxu0 %v14494_v4 }
 0x64a   : > { %6999 = vmatprep.subr.mxu1 %v5780_v25  ;;  %7070 = vmatprep.subr.mxu0 %v4758_v27  ;;  %v4669_v25 = vld [vmem:[#allocation8 + $0x130] sm:$0xff]  ;;  %v5684_v27 = vld [vmem:[#allocation8 + $0x20e8] sm:$0xff] }
 0x64b   : > { %7000 = vmatpush1.msra.mxu1 %v5779_v39  ;;  %7063 = vmatprep.mubr.f32.mxu1 %v14507_v10  ;;  %v4662_v39 = vld [vmem:[#allocation8 + $0xf8] sm:$0xff] }
 0x64c   : > { %7071 = vmatpush1.msra.mxu0 %v4757_v51  ;;  %7134 = vmatprep.mubr.f32.mxu0 %v14460_v22  ;;  %v5747_v22 = vld [vmem:[#allocation8 + $0x22e0] sm:$0xff] }
 0x64d   : > { %7001 = vmatprep.subr.mxu1 %v5772_v44  ;;  %7072 = vmatprep.subr.mxu0 %v4750_v16  ;;  %v5683_v51 = vld [vmem:[#allocation8 + $0x20e0] sm:$0xff]  ;;  %v4661_v44 = vld [vmem:[#allocation8 + $0xf0] sm:$0xff]  ;;  %v5676_v16 = vld [vmem:[#allocation8 + $0x20a8] sm:$0xff] }
 0x64e   : > { %7002 = vmatpush1.msra.mxu1 %v5771_v5  ;;  %7073 = vmatpush1.msra.mxu0 %v4749_v31  ;;  %v4654_v5 = vld [vmem:[#allocation8 + $0xb8] sm:$0xff]  ;;  %v5675_v31 = vld [vmem:[#allocation8 + $0x20a0] sm:$0xff] }
 0x64f   : > { %7003 = vmatprep.subr.mxu1 %v5764_v63  ;;  %7074 = vmatprep.subr.mxu0 %v4742_v47  ;;  %v4653_v63 = vld [vmem:[#allocation8 + $0xb0] sm:$0xff]  ;;  %v5668_v47 = vld [vmem:[#allocation8 + $0x2068] sm:$0xff] }
 0x650   : > { %7004 = vmatpush1.msra.mxu1 %v5763_v52  ;;  %7075 = vmatpush1.msra.mxu0 %v4741_v34  ;;  %v4646_v52 = vld [vmem:[#allocation8 + $0x78] sm:$0xff]  ;;  %v5667_v34 = vld [vmem:[#allocation8 + $0x2060] sm:$0xff] }
 0x651   : > { %7005 = vmatprep.subr.mxu1 %v5756_v40  ;;  %7076 = vmatprep.subr.mxu0 %v4734_v13  ;;  %v4645_v40 = vld [vmem:[#allocation8 + $0x70] sm:$0xff]  ;;  %v5660_v13 = vld [vmem:[#allocation8 + $0x2028] sm:$0xff] }
 0x652   : > { %7006 = vmatpush1.msra.mxu1 %v5755_v57  ;;  %7077 = vmatpush1.msra.mxu0 %v4733_v29  ;;  %v4638_v57 = vld [vmem:[#allocation8 + $0x38] sm:$0xff]  ;;  %v5659_v29 = vld [vmem:[#allocation8 + $0x2020] sm:$0xff] }
 0x653   : > { %7007 = vmatprep.subr.mxu1 %v5748_v7  ;;  %7078 = vmatprep.subr.mxu0 %v4726_v24  ;;  %v4637_v7 = vld [vmem:[#allocation8 + $0x30] sm:$0xff]  ;;  %v5908_v24 = vld [vmem:[#allocation8 + $0x27e8] sm:$0xff] }
 0x654   : > { %7008 = vmatpush1.msra.mxu1 %v5747_v22  ;;  %7079 = vmatpush1.msra.mxu0 %v4725_v14  ;;  %v4886_v22 = vld [vmem:[#allocation8 + $0x7f8] sm:$0xff]  ;;  %v5907_v14 = vld [vmem:[#allocation8 + $0x27e0] sm:$0xff] }
 0x655   : > { %7009 = vmatprep.subr.mxu1 %v5740_v45  ;;  %7080 = vmatprep.subr.mxu0 %v4718_v19  ;;  %v4885_v45 = vld [vmem:[#allocation8 + $0x7f0] sm:$0xff]  ;;  %v5900_v19 = vld [vmem:[#allocation8 + $0x27a8] sm:$0xff] }
 0x656   : > { %7010 = vmatpush1.msra.mxu1 %v5739_v37  ;;  %7081 = vmatpush1.msra.mxu0 %v4717_v60  ;;  %v4878_v37 = vld [vmem:[#allocation8 + $0x7b8] sm:$0xff]  ;;  %v5899_v60 = vld [vmem:[#allocation8 + $0x27a0] sm:$0xff] }
 0x657   : > { %7011 = vmatprep.subr.mxu1 %v5732_v17  ;;  %7082 = vmatprep.subr.mxu0 %v4710_v11  ;;  %v4877_v17 = vld [vmem:[#allocation8 + $0x7b0] sm:$0xff]  ;;  %v5892_v11 = vld [vmem:[#allocation8 + $0x2768] sm:$0xff] }
 0x658   : > { %7012 = vmatpush1.msra.mxu1 %v5731_v36  ;;  %7083 = vmatpush1.msra.mxu0 %v4709_v48  ;;  %v4870_v36 = vld [vmem:[#allocation8 + $0x778] sm:$0xff]  ;;  %v5891_v48 = vld [vmem:[#allocation8 + $0x2760] sm:$0xff] }
 0x659   : > { %7013 = vmatprep.subr.mxu1 %v5724_v54  ;;  %7084 = vmatprep.subr.mxu0 %v4702_v53  ;;  %v4869_v54 = vld [vmem:[#allocation8 + $0x770] sm:$0xff]  ;;  %v5884_v53 = vld [vmem:[#allocation8 + $0x2728] sm:$0xff] }
 0x65a   : > { %7014 = vmatpush1.msra.mxu1 %v5723_v15  ;;  %7085 = vmatpush1.msra.mxu0 %v4701_v55  ;;  %v4862_v15 = vld [vmem:[#allocation8 + $0x738] sm:$0xff]  ;;  %v5883_v55 = vld [vmem:[#allocation8 + $0x2720] sm:$0xff] }
 0x65b   : > { %7015 = vmatprep.subr.mxu1 %v5716_v1  ;;  %7086 = vmatprep.subr.mxu0 %v4694_v32  ;;  %v4861_v1 = vld [vmem:[#allocation8 + $0x730] sm:$0xff]  ;;  %v5876_v32 = vld [vmem:[#allocation8 + $0x26e8] sm:$0xff] }
 0x65c   : > { %7016 = vmatpush1.msra.mxu1 %v5715_v12  ;;  %7087 = vmatpush1.msra.mxu0 %v4693_v46  ;;  %v4854_v12 = vld [vmem:[#allocation8 + $0x6f8] sm:$0xff]  ;;  %v5875_v46 = vld [vmem:[#allocation8 + $0x26e0] sm:$0xff] }
 0x65d   : > { %7017 = vmatprep.subr.mxu1 %v5708_v2  ;;  %7088 = vmatprep.subr.mxu0 %v4686_v8  ;;  %v4853_v2 = vld [vmem:[#allocation8 + $0x6f0] sm:$0xff]  ;;  %v5868_v8 = vld [vmem:[#allocation8 + $0x26a8] sm:$0xff] }
 0x65e   : > { %7018 = vmatpush1.msra.mxu1 %v5707_v9  ;;  %7089 = vmatpush1.msra.mxu0 %v4685_v58  ;;  %v4846_v9 = vld [vmem:[#allocation8 + $0x6b8] sm:$0xff]  ;;  %v5867_v58 = vld [vmem:[#allocation8 + $0x26a0] sm:$0xff] }
 0x65f   : > { %7019 = vmatprep.subr.mxu1 %v5700_v3  ;;  %7090 = vmatprep.subr.mxu0 %v4678_v6  ;;  %v4845_v3 = vld [vmem:[#allocation8 + $0x6b0] sm:$0xff]  ;;  %v5860_v6 = vld [vmem:[#allocation8 + $0x2668] sm:$0xff] }
 0x660   : > { %7020 = vmatpush1.msra.mxu1 %v5699_v35  ;;  %7091 = vmatpush1.msra.mxu0 %v4677_v30  ;;  %v4838_v35 = vld [vmem:[#allocation8 + $0x678] sm:$0xff]  ;;  %v5859_v30 = vld [vmem:[#allocation8 + $0x2660] sm:$0xff] }
 0x661   : > { %7021 = vmatprep.subr.mxu1 %v5692_v28  ;;  %7092 = vmatprep.subr.mxu0 %v4670_v21  ;;  %v4837_v28 = vld [vmem:[#allocation8 + $0x670] sm:$0xff]  ;;  %v5852_v21 = vld [vmem:[#allocation8 + $0x2628] sm:$0xff] }
 0x662   : > { %7022 = vmatpush1.msra.mxu1 %v5691_v49  ;;  %7093 = vmatpush1.msra.mxu0 %v4669_v25  ;;  %v4830_v49 = vld [vmem:[#allocation8 + $0x638] sm:$0xff]  ;;  %v5851_v25 = vld [vmem:[#allocation8 + $0x2620] sm:$0xff] }
 0x663   : > { %7023 = vmatprep.subr.mxu1 %v5684_v27  ;;  %7094 = vmatprep.subr.mxu0 %v4662_v39  ;;  %v4829_v27 = vld [vmem:[#allocation8 + $0x630] sm:$0xff]  ;;  %v5844_v39 = vld [vmem:[#allocation8 + $0x25e8] sm:$0xff] }
 0x664   : > { %7024 = vmatpush1.msra.mxu1 %v5683_v51  ;;  %7095 = vmatpush1.msra.mxu0 %v4661_v44  ;;  %v4822_v51 = vld [vmem:[#allocation8 + $0x5f8] sm:$0xff]  ;;  %v5843_v44 = vld [vmem:[#allocation8 + $0x25e0] sm:$0xff] }
 0x665   : > { %7025 = vmatprep.subr.mxu1 %v5676_v16  ;;  %7096 = vmatprep.subr.mxu0 %v4654_v5  ;;  %v4821_v16 = vld [vmem:[#allocation8 + $0x5f0] sm:$0xff]  ;;  %v5836_v5 = vld [vmem:[#allocation8 + $0x25a8] sm:$0xff] }
 0x666   : > { %7026 = vmatpush1.msra.mxu1 %v5675_v31  ;;  %7097 = vmatpush1.msra.mxu0 %v4653_v63  ;;  %v4814_v31 = vld [vmem:[#allocation8 + $0x5b8] sm:$0xff]  ;;  %v5835_v63 = vld [vmem:[#allocation8 + $0x25a0] sm:$0xff] }
 0x667   : > { %7027 = vmatprep.subr.mxu1 %v5668_v47  ;;  %7098 = vmatprep.subr.mxu0 %v4646_v52  ;;  %v4813_v47 = vld [vmem:[#allocation8 + $0x5b0] sm:$0xff]  ;;  %v5828_v52 = vld [vmem:[#allocation8 + $0x2568] sm:$0xff] }
 0x668   : > { %7028 = vmatpush1.msra.mxu1 %v5667_v34  ;;  %7099 = vmatpush1.msra.mxu0 %v4645_v40  ;;  %v4806_v34 = vld [vmem:[#allocation8 + $0x578] sm:$0xff]  ;;  %v5827_v40 = vld [vmem:[#allocation8 + $0x2560] sm:$0xff] }
 0x669   : > { %7029 = vmatprep.subr.mxu1 %v5660_v13  ;;  %7100 = vmatprep.subr.mxu0 %v4638_v57  ;;  %v4805_v13 = vld [vmem:[#allocation8 + $0x570] sm:$0xff]  ;;  %v5820_v57 = vld [vmem:[#allocation8 + $0x2528] sm:$0xff] }
 0x66a   : > { %7030 = vmatpush1.msra.mxu1 %v5659_v29  ;;  %7101 = vmatpush1.msra.mxu0 %v4637_v7  ;;  %v4798_v29 = vld [vmem:[#allocation8 + $0x538] sm:$0xff]  ;;  %v5819_v7 = vld [vmem:[#allocation8 + $0x2520] sm:$0xff] }
 0x66b   : > { %7031 = vmatprep.subr.mxu1 %v5908_v24  ;;  %7102 = vmatprep.subr.mxu0 %v4886_v22  ;;  %v4797_v24 = vld [vmem:[#allocation8 + $0x530] sm:$0xff]  ;;  %v5812_v22 = vld [vmem:[#allocation8 + $0x24e8] sm:$0xff] }
 0x66c   : > { %7032 = vmatpush2.msra.mxu1 %v5907_v14  ;;  %7103 = vmatpush2.msra.mxu0 %v4885_v45  ;;  %v4790_v14 = vld [vmem:[#allocation8 + $0x4f8] sm:$0xff]  ;;  %v5811_v45 = vld [vmem:[#allocation8 + $0x24e0] sm:$0xff] }
 0x66d   : > { %7033 = vmatprep.subr.mxu1 %v5900_v19  ;;  %7104 = vmatprep.subr.mxu0 %v4878_v37  ;;  %v4789_v19 = vld [vmem:[#allocation8 + $0x4f0] sm:$0xff]  ;;  %v5804_v37 = vld [vmem:[#allocation8 + $0x24a8] sm:$0xff] }
 0x66e   : > { %7034 = vmatpush2.msra.mxu1 %v5899_v60  ;;  %7105 = vmatpush2.msra.mxu0 %v4877_v17  ;;  %v4782_v60 = vld [vmem:[#allocation8 + $0x4b8] sm:$0xff]  ;;  %v5803_v17 = vld [vmem:[#allocation8 + $0x24a0] sm:$0xff] }
 0x66f   : > { %7035 = vmatprep.subr.mxu1 %v5892_v11  ;;  %7106 = vmatprep.subr.mxu0 %v4870_v36  ;;  %v4781_v11 = vld [vmem:[#allocation8 + $0x4b0] sm:$0xff]  ;;  %v5796_v36 = vld [vmem:[#allocation8 + $0x2468] sm:$0xff] }
 0x670   : > { %7036 = vmatpush2.msra.mxu1 %v5891_v48  ;;  %7107 = vmatpush2.msra.mxu0 %v4869_v54  ;;  %v4774_v48 = vld [vmem:[#allocation8 + $0x478] sm:$0xff]  ;;  %v5795_v54 = vld [vmem:[#allocation8 + $0x2460] sm:$0xff] }
 0x671   : > { %7037 = vmatprep.subr.mxu1 %v5884_v53  ;;  %7108 = vmatprep.subr.mxu0 %v4862_v15  ;;  %v4773_v53 = vld [vmem:[#allocation8 + $0x470] sm:$0xff]  ;;  %v5788_v15 = vld [vmem:[#allocation8 + $0x2428] sm:$0xff] }
 0x672   : > { %7038 = vmatpush2.msra.mxu1 %v5883_v55  ;;  %7109 = vmatpush2.msra.mxu0 %v4861_v1  ;;  %v4766_v55 = vld [vmem:[#allocation8 + $0x438] sm:$0xff]  ;;  %v5787_v1 = vld [vmem:[#allocation8 + $0x2420] sm:$0xff] }
 0x673   : > { %7039 = vmatprep.subr.mxu1 %v5876_v32  ;;  %7110 = vmatprep.subr.mxu0 %v4854_v12  ;;  %v4765_v32 = vld [vmem:[#allocation8 + $0x430] sm:$0xff]  ;;  %v5014_v12 = vld [vmem:[#allocation8 + $0xbf8] sm:$0xff] }
 0x674   : > { %7040 = vmatpush2.msra.mxu1 %v5875_v46  ;;  %7111 = vmatpush2.msra.mxu0 %v4853_v2  ;;  %v5270_v46 = vld [vmem:[#allocation8 + $0x13f8] sm:$0xff]  ;;  %v5013_v2 = vld [vmem:[#allocation8 + $0xbf0] sm:$0xff] }
 0x675   : > { %7041 = vmatprep.subr.mxu1 %v5868_v8  ;;  %7112 = vmatprep.subr.mxu0 %v4846_v9  ;;  %v5269_v8 = vld [vmem:[#allocation8 + $0x13f0] sm:$0xff]  ;;  %v5006_v9 = vld [vmem:[#allocation8 + $0xbb8] sm:$0xff] }
 0x676   : > { %7042 = vmatpush2.msra.mxu1 %v5867_v58  ;;  %7113 = vmatpush2.msra.mxu0 %v4845_v3  ;;  %v5262_v58 = vld [vmem:[#allocation8 + $0x13b8] sm:$0xff]  ;;  %v5005_v3 = vld [vmem:[#allocation8 + $0xbb0] sm:$0xff] }
 0x677   : > { %7043 = vmatprep.subr.mxu1 %v5860_v6  ;;  %7114 = vmatprep.subr.mxu0 %v4838_v35  ;;  %v5261_v6 = vld [vmem:[#allocation8 + $0x13b0] sm:$0xff]  ;;  %v4998_v35 = vld [vmem:[#allocation8 + $0xb78] sm:$0xff] }
 0x678   : > { %7044 = vmatpush2.msra.mxu1 %v5859_v30  ;;  %7115 = vmatpush2.msra.mxu0 %v4837_v28  ;;  %v5254_v30 = vld [vmem:[#allocation8 + $0x1378] sm:$0xff]  ;;  %v4997_v28 = vld [vmem:[#allocation8 + $0xb70] sm:$0xff] }
 0x679   : > { %7045 = vmatprep.subr.mxu1 %v5852_v21  ;;  %7116 = vmatprep.subr.mxu0 %v4830_v49  ;;  %v5253_v21 = vld [vmem:[#allocation8 + $0x1370] sm:$0xff]  ;;  %v5246_v49 = vld [vmem:[#allocation8 + $0x1338] sm:$0xff] }
 0x67a   : > { %7046 = vmatpush2.msra.mxu1 %v5851_v25  ;;  %7117 = vmatpush2.msra.mxu0 %v4829_v27  ;;  %v4989_v25 = vld [vmem:[#allocation8 + $0xb30] sm:$0xff] }
 0x67b   : > { %7047 = vmatprep.subr.mxu1 %v5844_v39  ;;  %7118 = vmatprep.subr.mxu0 %v4822_v51  ;;  %v5245_v27 = vld [vmem:[#allocation8 + $0x1330] sm:$0xff]  ;;  %v5238_v39 = vld [vmem:[#allocation8 + $0x12f8] sm:$0xff] }
 0x67c   : > { %7048 = vmatpush2.msra.mxu1 %v5843_v44  ;;  %7119 = vmatpush2.msra.mxu0 %v4821_v16  ;;  %v5237_v51 = vld [vmem:[#allocation8 + $0x12f0] sm:$0xff]  ;;  %v4974_v44 = vld [vmem:[#allocation8 + $0xab8] sm:$0xff] }
 0x67d   : > { %7049 = vmatprep.subr.mxu1 %v5836_v5  ;;  %7120 = vmatprep.subr.mxu0 %v4814_v31  ;;  %v5230_v16 = vld [vmem:[#allocation8 + $0x12b8] sm:$0xff]  ;;  %v4973_v5 = vld [vmem:[#allocation8 + $0xab0] sm:$0xff] }
 0x67e   : > { %7050 = vmatpush2.msra.mxu1 %v5835_v63  ;;  %7121 = vmatpush2.msra.mxu0 %v4813_v47  ;;  %v5229_v31 = vld [vmem:[#allocation8 + $0x12b0] sm:$0xff]  ;;  %v4966_v63 = vld [vmem:[#allocation8 + $0xa78] sm:$0xff] }
 0x67f   : > { %7051 = vmatprep.subr.mxu1 %v5828_v52  ;;  %7122 = vmatprep.subr.mxu0 %v4806_v34  ;;  %v5222_v47 = vld [vmem:[#allocation8 + $0x1278] sm:$0xff]  ;;  %v4965_v52 = vld [vmem:[#allocation8 + $0xa70] sm:$0xff] }
 0x680   : > { %7052 = vmatpush2.msra.mxu1 %v5827_v40  ;;  %7123 = vmatpush2.msra.mxu0 %v4805_v13  ;;  %v5221_v34 = vld [vmem:[#allocation8 + $0x1270] sm:$0xff]  ;;  %v4958_v40 = vld [vmem:[#allocation8 + $0xa38] sm:$0xff] }
 0x681   : > { %7053 = vmatprep.subr.mxu1 %v5820_v57  ;;  %7124 = vmatprep.subr.mxu0 %v4798_v29  ;;  %v5214_v13 = vld [vmem:[#allocation8 + $0x1238] sm:$0xff]  ;;  %v4957_v57 = vld [vmem:[#allocation8 + $0xa30] sm:$0xff] }
 0x682   : > { %7054 = vmatpush2.msra.mxu1 %v5819_v7  ;;  %7125 = vmatpush2.msra.mxu0 %v4797_v24  ;;  %v5213_v29 = vld [vmem:[#allocation8 + $0x1230] sm:$0xff]  ;;  %v4950_v7 = vld [vmem:[#allocation8 + $0x9f8] sm:$0xff] }
 0x683   : > { %7055 = vmatprep.subr.mxu1 %v5812_v22  ;;  %7126 = vmatprep.subr.mxu0 %v4790_v14  ;;  %v5206_v24 = vld [vmem:[#allocation8 + $0x11f8] sm:$0xff]  ;;  %v4949_v22 = vld [vmem:[#allocation8 + $0x9f0] sm:$0xff] }
 0x684   : > { %7056 = vmatpush2.msra.mxu1 %v5811_v45  ;;  %7127 = vmatpush2.msra.mxu0 %v4789_v19  ;;  %v5205_v14 = vld [vmem:[#allocation8 + $0x11f0] sm:$0xff]  ;;  %v4942_v45 = vld [vmem:[#allocation8 + $0x9b8] sm:$0xff] }
 0x685   : > { %7057 = vmatprep.subr.mxu1 %v5804_v37  ;;  %7128 = vmatprep.subr.mxu0 %v4782_v60  ;;  %v5198_v19 = vld [vmem:[#allocation8 + $0x11b8] sm:$0xff]  ;;  %v4941_v37 = vld [vmem:[#allocation8 + $0x9b0] sm:$0xff] }
 0x686   : > { %7058 = vmatpush2.msra.mxu1 %v5803_v17  ;;  %7129 = vmatpush2.msra.mxu0 %v4781_v11  ;;  %v5197_v60 = vld [vmem:[#allocation8 + $0x11b0] sm:$0xff]  ;;  %v4934_v17 = vld [vmem:[#allocation8 + $0x978] sm:$0xff] }
 0x687   : > { %7059 = vmatprep.subr.mxu1 %v5796_v36  ;;  %7130 = vmatprep.subr.mxu0 %v4774_v48  ;;  %v5190_v11 = vld [vmem:[#allocation8 + $0x1178] sm:$0xff]  ;;  %v4933_v36 = vld [vmem:[#allocation8 + $0x970] sm:$0xff] }
 0x688   : > { %7060 = vmatpush2.msra.mxu1 %v5795_v54  ;;  %7131 = vmatpush2.msra.mxu0 %v4773_v53  ;;  %v5189_v48 = vld [vmem:[#allocation8 + $0x1170] sm:$0xff]  ;;  %v4926_v54 = vld [vmem:[#allocation8 + $0x938] sm:$0xff] }
 0x689   : > { %7061 = vmatprep.subr.mxu1 %v5788_v15  ;;  %7132 = vmatprep.subr.mxu0 %v4766_v55  ;;  %v5182_v53 = vld [vmem:[#allocation8 + $0x1138] sm:$0xff]  ;;  %v4925_v15 = vld [vmem:[#allocation8 + $0x930] sm:$0xff] }
 0x68a   : > { %7062 = vmatpush2.msra.mxu1 %v5787_v1  ;;  %7133 = vmatpush2.msra.mxu0 %v4765_v32  ;;  %v5181_v55 = vld [vmem:[#allocation8 + $0x1130] sm:$0xff]  ;;  %v4918_v1 = vld [vmem:[#allocation8 + $0x8f8] sm:$0xff] }
 0x68b   : > { %7064 = vmatmul.mubr.f32.vlgmr.msra.gmra.mxu1 %v14504_v62  ;;  %7135 = vmatmul.mubr.f32.vlgmr.msra.gmra.mxu0 %v14468_v42  ;;  %v4990_v42 = vld [vmem:[#allocation8 + $0xb38] sm:$0xff] }
 0x68c   : > { %7141 = vmatprep.subr.mxu1 %v5014_v12  ;;  %7212 = vmatprep.subr.mxu0 %v5270_v46  ;;  %v5174_v32 = vld [vmem:[#allocation8 + $0x10f8] sm:$0xff]  ;;  %v4917_v12 = vld [vmem:[#allocation8 + $0x8f0] sm:$0xff] }
 0x68d   : > { %7142 = vmatpush1.msra.mxu1 %v5013_v2  ;;  %7205 = vmatprep.mubr.f32.mxu1 %v14464_v41  ;;  %v4982_v41 = vld [vmem:[#allocation8 + $0xaf8] sm:$0xff]  ;;  %v5173_v46 = vld [vmem:[#allocation8 + $0x10f0] sm:$0xff] }
 0x68e   : > { %7213 = vmatpush1.msra.mxu0 %v5269_v8  ;;  %7276 = vmatprep.mubr.f32.mxu0 %v14480_v18  ;;  %v4981_v18 = vld [vmem:[#allocation8 + $0xaf0] sm:$0xff]  ;;  %v4910_v2 = vld [vmem:[#allocation8 + $0x8b8] sm:$0xff] }
 0x68f   : > { %7143 = vmatprep.subr.mxu1 %v5006_v9  ;;  %7214 = vmatprep.subr.mxu0 %v5262_v58  ;;  %v5166_v8 = vld [vmem:[#allocation8 + $0x10b8] sm:$0xff]  ;;  %v4909_v9 = vld [vmem:[#allocation8 + $0x8b0] sm:$0xff] }
 0x690   : > { %7144 = vmatpush1.msra.mxu1 %v5005_v3  ;;  %7215 = vmatpush1.msra.mxu0 %v5261_v6  ;;  %v5165_v58 = vld [vmem:[#allocation8 + $0x10b0] sm:$0xff]  ;;  %v4902_v3 = vld [vmem:[#allocation8 + $0x878] sm:$0xff] }
 0x691   : > { %7145 = vmatprep.subr.mxu1 %v4998_v35  ;;  %7216 = vmatprep.subr.mxu0 %v5254_v30  ;;  %v5158_v6 = vld [vmem:[#allocation8 + $0x1078] sm:$0xff]  ;;  %v4901_v35 = vld [vmem:[#allocation8 + $0x870] sm:$0xff] }
 0x692   : > { %7146 = vmatpush1.msra.mxu1 %v4997_v28  ;;  %7217 = vmatpush1.msra.mxu0 %v5253_v21  ;;  %v5157_v30 = vld [vmem:[#allocation8 + $0x1070] sm:$0xff]  ;;  %v4894_v28 = vld [vmem:[#allocation8 + $0x838] sm:$0xff] }
 0x693   : > { %7147 = vmatprep.subr.mxu1 %v4990_v42  ;;  %7218 = vmatprep.subr.mxu0 %v5246_v49  ;;  %v5150_v21 = vld [vmem:[#allocation8 + $0x1038] sm:$0xff]  ;;  %v4893_v42 = vld [vmem:[#allocation8 + $0x830] sm:$0xff] }
 0x694   : > { %7148 = vmatpush1.msra.mxu1 %v4989_v25  ;;  %7219 = vmatpush1.msra.mxu0 %v5245_v27  ;;  %v5149_v49 = vld [vmem:[#allocation8 + $0x1030] sm:$0xff]  ;;  %v5142_v25 = vld [vmem:[#allocation8 + $0xff8] sm:$0xff] }
 0x695   : > { %7149 = vmatprep.subr.mxu1 %v4982_v41  ;;  %7220 = vmatprep.subr.mxu0 %v5238_v39  ;;  %v5398_v27 = vld [vmem:[#allocation8 + $0x17f8] sm:$0xff]  ;;  %v5141_v41 = vld [vmem:[#allocation8 + $0xff0] sm:$0xff] }
 0x696   : > { %7150 = vmatpush1.msra.mxu1 %v4981_v18  ;;  %7221 = vmatpush1.msra.mxu0 %v5237_v51  ;;  %v5397_v39 = vld [vmem:[#allocation8 + $0x17f0] sm:$0xff]  ;;  %v5134_v18 = vld [vmem:[#allocation8 + $0xfb8] sm:$0xff] }
 0x697   : > { %7151 = vmatprep.subr.mxu1 %v4974_v44  ;;  %7222 = vmatprep.subr.mxu0 %v5230_v16  ;;  %v5390_v51 = vld [vmem:[#allocation8 + $0x17b8] sm:$0xff]  ;;  %v5133_v44 = vld [vmem:[#allocation8 + $0xfb0] sm:$0xff] }
 0x698   : > { %7152 = vmatpush1.msra.mxu1 %v4973_v5  ;;  %7223 = vmatpush1.msra.mxu0 %v5229_v31  ;;  %v5389_v16 = vld [vmem:[#allocation8 + $0x17b0] sm:$0xff]  ;;  %v5126_v5 = vld [vmem:[#allocation8 + $0xf78] sm:$0xff] }
 0x699   : > { %7153 = vmatprep.subr.mxu1 %v4966_v63  ;;  %7224 = vmatprep.subr.mxu0 %v5222_v47  ;;  %v5382_v31 = vld [vmem:[#allocation8 + $0x1778] sm:$0xff]  ;;  %v5125_v63 = vld [vmem:[#allocation8 + $0xf70] sm:$0xff] }
 0x69a   : > { %7154 = vmatpush1.msra.mxu1 %v4965_v52  ;;  %7225 = vmatpush1.msra.mxu0 %v5221_v34  ;;  %v5381_v47 = vld [vmem:[#allocation8 + $0x1770] sm:$0xff]  ;;  %v5118_v52 = vld [vmem:[#allocation8 + $0xf38] sm:$0xff] }
 0x69b   : > { %7155 = vmatprep.subr.mxu1 %v4958_v40  ;;  %7226 = vmatprep.subr.mxu0 %v5214_v13  ;;  %v5374_v34 = vld [vmem:[#allocation8 + $0x1738] sm:$0xff]  ;;  %v5117_v40 = vld [vmem:[#allocation8 + $0xf30] sm:$0xff] }
 0x69c   : > { %7156 = vmatpush1.msra.mxu1 %v4957_v57  ;;  %7227 = vmatpush1.msra.mxu0 %v5213_v29  ;;  %v5373_v13 = vld [vmem:[#allocation8 + $0x1730] sm:$0xff]  ;;  %v5110_v57 = vld [vmem:[#allocation8 + $0xef8] sm:$0xff] }
 0x69d   : > { %7157 = vmatprep.subr.mxu1 %v4950_v7  ;;  %7228 = vmatprep.subr.mxu0 %v5206_v24  ;;  %v5366_v29 = vld [vmem:[#allocation8 + $0x16f8] sm:$0xff]  ;;  %v5109_v7 = vld [vmem:[#allocation8 + $0xef0] sm:$0xff] }
 0x69e   : > { %7158 = vmatpush1.msra.mxu1 %v4949_v22  ;;  %7229 = vmatpush1.msra.mxu0 %v5205_v14  ;;  %v5365_v24 = vld [vmem:[#allocation8 + $0x16f0] sm:$0xff]  ;;  %v5102_v22 = vld [vmem:[#allocation8 + $0xeb8] sm:$0xff] }
 0x69f   : > { %7159 = vmatprep.subr.mxu1 %v4942_v45  ;;  %7230 = vmatprep.subr.mxu0 %v5198_v19  ;;  %v5358_v14 = vld [vmem:[#allocation8 + $0x16b8] sm:$0xff]  ;;  %v5101_v45 = vld [vmem:[#allocation8 + $0xeb0] sm:$0xff] }
 0x6a0   : > { %7160 = vmatpush1.msra.mxu1 %v4941_v37  ;;  %7231 = vmatpush1.msra.mxu0 %v5197_v60  ;;  %v5357_v19 = vld [vmem:[#allocation8 + $0x16b0] sm:$0xff]  ;;  %v5094_v37 = vld [vmem:[#allocation8 + $0xe78] sm:$0xff] }
 0x6a1   : > { %7161 = vmatprep.subr.mxu1 %v4934_v17  ;;  %7232 = vmatprep.subr.mxu0 %v5190_v11  ;;  %v5350_v60 = vld [vmem:[#allocation8 + $0x1678] sm:$0xff]  ;;  %v5093_v17 = vld [vmem:[#allocation8 + $0xe70] sm:$0xff] }
 0x6a2   : > { %7162 = vmatpush1.msra.mxu1 %v4933_v36  ;;  %7233 = vmatpush1.msra.mxu0 %v5189_v48  ;;  %v5349_v11 = vld [vmem:[#allocation8 + $0x1670] sm:$0xff]  ;;  %v5086_v36 = vld [vmem:[#allocation8 + $0xe38] sm:$0xff] }
 0x6a3   : > { %7163 = vmatprep.subr.mxu1 %v4926_v54  ;;  %7234 = vmatprep.subr.mxu0 %v5182_v53  ;;  %v5342_v48 = vld [vmem:[#allocation8 + $0x1638] sm:$0xff]  ;;  %v5085_v54 = vld [vmem:[#allocation8 + $0xe30] sm:$0xff] }
 0x6a4   : > { %7164 = vmatpush1.msra.mxu1 %v4925_v15  ;;  %7235 = vmatpush1.msra.mxu0 %v5181_v55  ;;  %v5341_v53 = vld [vmem:[#allocation8 + $0x1630] sm:$0xff]  ;;  %v5078_v15 = vld [vmem:[#allocation8 + $0xdf8] sm:$0xff] }
 0x6a5   : > { %7165 = vmatprep.subr.mxu1 %v4918_v1  ;;  %7236 = vmatprep.subr.mxu0 %v5174_v32  ;;  %v5334_v55 = vld [vmem:[#allocation8 + $0x15f8] sm:$0xff]  ;;  %v5077_v1 = vld [vmem:[#allocation8 + $0xdf0] sm:$0xff] }
 0x6a6   : > { %7166 = vmatpush1.msra.mxu1 %v4917_v12  ;;  %7237 = vmatpush1.msra.mxu0 %v5173_v46  ;;  %v5333_v32 = vld [vmem:[#allocation8 + $0x15f0] sm:$0xff]  ;;  %v5070_v12 = vld [vmem:[#allocation8 + $0xdb8] sm:$0xff] }
 0x6a7   : > { %7167 = vmatprep.subr.mxu1 %v4910_v2  ;;  %7238 = vmatprep.subr.mxu0 %v5166_v8  ;;  %v5326_v46 = vld [vmem:[#allocation8 + $0x15b8] sm:$0xff]  ;;  %v5069_v2 = vld [vmem:[#allocation8 + $0xdb0] sm:$0xff] }
 0x6a8   : > { %7168 = vmatpush1.msra.mxu1 %v4909_v9  ;;  %7239 = vmatpush1.msra.mxu0 %v5165_v58  ;;  %v5325_v8 = vld [vmem:[#allocation8 + $0x15b0] sm:$0xff]  ;;  %v5062_v9 = vld [vmem:[#allocation8 + $0xd78] sm:$0xff] }
 0x6a9   : > { %7169 = vmatprep.subr.mxu1 %v4902_v3  ;;  %7240 = vmatprep.subr.mxu0 %v5158_v6  ;;  %v5318_v58 = vld [vmem:[#allocation8 + $0x1578] sm:$0xff]  ;;  %v5061_v3 = vld [vmem:[#allocation8 + $0xd70] sm:$0xff] }
 0x6aa   : > { %7170 = vmatpush1.msra.mxu1 %v4901_v35  ;;  %7241 = vmatpush1.msra.mxu0 %v5157_v30  ;;  %v5317_v6 = vld [vmem:[#allocation8 + $0x1570] sm:$0xff]  ;;  %v5054_v35 = vld [vmem:[#allocation8 + $0xd38] sm:$0xff] }
 0x6ab   : > { %7171 = vmatprep.subr.mxu1 %v4894_v28  ;;  %7242 = vmatprep.subr.mxu0 %v5150_v21  ;;  %v5310_v30 = vld [vmem:[#allocation8 + $0x1538] sm:$0xff]  ;;  %v5053_v28 = vld [vmem:[#allocation8 + $0xd30] sm:$0xff] }
 0x6ac   : > { %7172 = vmatpush1.msra.mxu1 %v4893_v42  ;;  %7243 = vmatpush1.msra.mxu0 %v5149_v49  ;;  %v5309_v21 = vld [vmem:[#allocation8 + $0x1530] sm:$0xff]  ;;  %v5046_v42 = vld [vmem:[#allocation8 + $0xcf8] sm:$0xff] }
 0x6ad   : > { %7173 = vmatprep.subr.mxu1 %v5142_v25  ;;  %7244 = vmatprep.subr.mxu0 %v5398_v27  ;;  %v5302_v49 = vld [vmem:[#allocation8 + $0x14f8] sm:$0xff]  ;;  %v5045_v25 = vld [vmem:[#allocation8 + $0xcf0] sm:$0xff] }
 0x6ae   : > { %7174 = vmatpush2.msra.mxu1 %v5141_v41  ;;  %7245 = vmatpush2.msra.mxu0 %v5397_v39  ;;  %v5301_v27 = vld [vmem:[#allocation8 + $0x14f0] sm:$0xff]  ;;  %v5038_v41 = vld [vmem:[#allocation8 + $0xcb8] sm:$0xff] }
 0x6af   : > { %7175 = vmatprep.subr.mxu1 %v5134_v18  ;;  %7246 = vmatprep.subr.mxu0 %v5390_v51  ;;  %v5294_v39 = vld [vmem:[#allocation8 + $0x14b8] sm:$0xff]  ;;  %v5037_v18 = vld [vmem:[#allocation8 + $0xcb0] sm:$0xff] }
 0x6b0   : > { %7176 = vmatpush2.msra.mxu1 %v5133_v44  ;;  %7247 = vmatpush2.msra.mxu0 %v5389_v16  ;;  %v5293_v51 = vld [vmem:[#allocation8 + $0x14b0] sm:$0xff]  ;;  %v5030_v44 = vld [vmem:[#allocation8 + $0xc78] sm:$0xff] }
 0x6b1   : > { %7177 = vmatprep.subr.mxu1 %v5126_v5  ;;  %7248 = vmatprep.subr.mxu0 %v5382_v31  ;;  %v5286_v16 = vld [vmem:[#allocation8 + $0x1478] sm:$0xff]  ;;  %v5029_v5 = vld [vmem:[#allocation8 + $0xc70] sm:$0xff] }
 0x6b2   : > { %7178 = vmatpush2.msra.mxu1 %v5125_v63  ;;  %7249 = vmatpush2.msra.mxu0 %v5381_v47  ;;  %v5285_v31 = vld [vmem:[#allocation8 + $0x1470] sm:$0xff]  ;;  %v5022_v63 = vld [vmem:[#allocation8 + $0xc38] sm:$0xff] }
 0x6b3   : > { %7179 = vmatprep.subr.mxu1 %v5118_v52  ;;  %7250 = vmatprep.subr.mxu0 %v5374_v34  ;;  %v5278_v47 = vld [vmem:[#allocation8 + $0x1438] sm:$0xff]  ;;  %v5021_v52 = vld [vmem:[#allocation8 + $0xc30] sm:$0xff] }
 0x6b4   : > { %7180 = vmatpush2.msra.mxu1 %v5117_v40  ;;  %7251 = vmatpush2.msra.mxu0 %v5373_v13  ;;  %v5277_v34 = vld [vmem:[#allocation8 + $0x1430] sm:$0xff]  ;;  %v5526_v40 = vld [vmem:[#allocation8 + $0x1bf8] sm:$0xff] }
 0x6b5   : > { %7181 = vmatprep.subr.mxu1 %v5110_v57  ;;  %7252 = vmatprep.subr.mxu0 %v5366_v29  ;;  %v5782_v13 = vld [vmem:[#allocation8 + $0x23f8] sm:$0xff]  ;;  %v5525_v57 = vld [vmem:[#allocation8 + $0x1bf0] sm:$0xff] }
 0x6b6   : > { %7182 = vmatpush2.msra.mxu1 %v5109_v7  ;;  %7253 = vmatpush2.msra.mxu0 %v5365_v24  ;;  %v5781_v29 = vld [vmem:[#allocation8 + $0x23f0] sm:$0xff]  ;;  %v5518_v7 = vld [vmem:[#allocation8 + $0x1bb8] sm:$0xff] }
 0x6b7   : > { %7183 = vmatprep.subr.mxu1 %v5102_v22  ;;  %7254 = vmatprep.subr.mxu0 %v5358_v14  ;;  %v5774_v24 = vld [vmem:[#allocation8 + $0x23b8] sm:$0xff]  ;;  %v5517_v22 = vld [vmem:[#allocation8 + $0x1bb0] sm:$0xff] }
 0x6b8   : > { %7184 = vmatpush2.msra.mxu1 %v5101_v45  ;;  %7255 = vmatpush2.msra.mxu0 %v5357_v19  ;;  %v5773_v14 = vld [vmem:[#allocation8 + $0x23b0] sm:$0xff]  ;;  %v5510_v45 = vld [vmem:[#allocation8 + $0x1b78] sm:$0xff] }
 0x6b9   : > { %7185 = vmatprep.subr.mxu1 %v5094_v37  ;;  %7256 = vmatprep.subr.mxu0 %v5350_v60  ;;  %v5766_v19 = vld [vmem:[#allocation8 + $0x2378] sm:$0xff]  ;;  %v5765_v37 = vld [vmem:[#allocation8 + $0x2370] sm:$0xff] }
 0x6ba   : > { %7186 = vmatpush2.msra.mxu1 %v5093_v17  ;;  %7257 = vmatpush2.msra.mxu0 %v5349_v11  ;;  %v5758_v60 = vld [vmem:[#allocation8 + $0x2338] sm:$0xff]  ;;  %v5501_v17 = vld [vmem:[#allocation8 + $0x1b30] sm:$0xff] }
 0x6bb   : > { %7187 = vmatprep.subr.mxu1 %v5086_v36  ;;  %7258 = vmatprep.subr.mxu0 %v5342_v48  ;;  %v5757_v11 = vld [vmem:[#allocation8 + $0x2330] sm:$0xff]  ;;  %v5750_v36 = vld [vmem:[#allocation8 + $0x22f8] sm:$0xff] }
 0x6bc   : > { %7188 = vmatpush2.msra.mxu1 %v5085_v54  ;;  %7259 = vmatpush2.msra.mxu0 %v5341_v53  ;;  %v5749_v48 = vld [vmem:[#allocation8 + $0x22f0] sm:$0xff]  ;;  %v5486_v54 = vld [vmem:[#allocation8 + $0x1ab8] sm:$0xff] }
 0x6bd   : > { %7189 = vmatprep.subr.mxu1 %v5078_v15  ;;  %7260 = vmatprep.subr.mxu0 %v5334_v55  ;;  %v5742_v53 = vld [vmem:[#allocation8 + $0x22b8] sm:$0xff]  ;;  %v5485_v15 = vld [vmem:[#allocation8 + $0x1ab0] sm:$0xff] }
 0x6be   : > { %7190 = vmatpush2.msra.mxu1 %v5077_v1  ;;  %7261 = vmatpush2.msra.mxu0 %v5333_v32  ;;  %v5741_v55 = vld [vmem:[#allocation8 + $0x22b0] sm:$0xff]  ;;  %v5478_v1 = vld [vmem:[#allocation8 + $0x1a78] sm:$0xff] }
 0x6bf   : > { %7191 = vmatprep.subr.mxu1 %v5070_v12  ;;  %7262 = vmatprep.subr.mxu0 %v5326_v46  ;;  %v5734_v32 = vld [vmem:[#allocation8 + $0x2278] sm:$0xff]  ;;  %v5477_v12 = vld [vmem:[#allocation8 + $0x1a70] sm:$0xff] }
 0x6c0   : > { %7192 = vmatpush2.msra.mxu1 %v5069_v2  ;;  %7263 = vmatpush2.msra.mxu0 %v5325_v8  ;;  %v5733_v46 = vld [vmem:[#allocation8 + $0x2270] sm:$0xff]  ;;  %v5470_v2 = vld [vmem:[#allocation8 + $0x1a38] sm:$0xff] }
 0x6c1   : > { %7193 = vmatprep.subr.mxu1 %v5062_v9  ;;  %7264 = vmatprep.subr.mxu0 %v5318_v58  ;;  %v5726_v8 = vld [vmem:[#allocation8 + $0x2238] sm:$0xff]  ;;  %v5469_v9 = vld [vmem:[#allocation8 + $0x1a30] sm:$0xff] }
 0x6c2   : > { %7194 = vmatpush2.msra.mxu1 %v5061_v3  ;;  %7265 = vmatpush2.msra.mxu0 %v5317_v6  ;;  %v5725_v58 = vld [vmem:[#allocation8 + $0x2230] sm:$0xff]  ;;  %v5462_v3 = vld [vmem:[#allocation8 + $0x19f8] sm:$0xff] }
 0x6c3   : > { %7195 = vmatprep.subr.mxu1 %v5054_v35  ;;  %7266 = vmatprep.subr.mxu0 %v5310_v30  ;;  %v5718_v6 = vld [vmem:[#allocation8 + $0x21f8] sm:$0xff]  ;;  %v5461_v35 = vld [vmem:[#allocation8 + $0x19f0] sm:$0xff] }
 0x6c4   : > { %7196 = vmatpush2.msra.mxu1 %v5053_v28  ;;  %7267 = vmatpush2.msra.mxu0 %v5309_v21  ;;  %v5717_v30 = vld [vmem:[#allocation8 + $0x21f0] sm:$0xff]  ;;  %v5454_v28 = vld [vmem:[#allocation8 + $0x19b8] sm:$0xff] }
 0x6c5   : > { %7197 = vmatprep.subr.mxu1 %v5046_v42  ;;  %7268 = vmatprep.subr.mxu0 %v5302_v49  ;;  %v5710_v21 = vld [vmem:[#allocation8 + $0x21b8] sm:$0xff]  ;;  %v5453_v42 = vld [vmem:[#allocation8 + $0x19b0] sm:$0xff] }
 0x6c6   : > { %7198 = vmatpush2.msra.mxu1 %v5045_v25  ;;  %7269 = vmatpush2.msra.mxu0 %v5301_v27  ;;  %v5709_v49 = vld [vmem:[#allocation8 + $0x21b0] sm:$0xff]  ;;  %v5446_v25 = vld [vmem:[#allocation8 + $0x1978] sm:$0xff] }
 0x6c7   : > { %7199 = vmatprep.subr.mxu1 %v5038_v41  ;;  %7270 = vmatprep.subr.mxu0 %v5294_v39  ;;  %v5702_v27 = vld [vmem:[#allocation8 + $0x2178] sm:$0xff]  ;;  %v5445_v41 = vld [vmem:[#allocation8 + $0x1970] sm:$0xff] }
 0x6c8   : > { %7200 = vmatpush2.msra.mxu1 %v5037_v18  ;;  %7271 = vmatpush2.msra.mxu0 %v5293_v51  ;;  %v5701_v39 = vld [vmem:[#allocation8 + $0x2170] sm:$0xff]  ;;  %v5438_v18 = vld [vmem:[#allocation8 + $0x1938] sm:$0xff] }
 0x6c9   : > { %7201 = vmatprep.subr.mxu1 %v5030_v44  ;;  %7272 = vmatprep.subr.mxu0 %v5286_v16  ;;  %v5694_v51 = vld [vmem:[#allocation8 + $0x2138] sm:$0xff]  ;;  %v5437_v44 = vld [vmem:[#allocation8 + $0x1930] sm:$0xff] }
 0x6ca   : > { %7202 = vmatpush2.msra.mxu1 %v5029_v5  ;;  %7273 = vmatpush2.msra.mxu0 %v5285_v31  ;;  %v5693_v16 = vld [vmem:[#allocation8 + $0x2130] sm:$0xff]  ;;  %v5430_v5 = vld [vmem:[#allocation8 + $0x18f8] sm:$0xff] }
 0x6cb   : > { %7203 = vmatprep.subr.mxu1 %v5022_v63  ;;  %7274 = vmatprep.subr.mxu0 %v5278_v47  ;;  %v5686_v31 = vld [vmem:[#allocation8 + $0x20f8] sm:$0xff]  ;;  %v5429_v63 = vld [vmem:[#allocation8 + $0x18f0] sm:$0xff] }
 0x6cc   : > { %7204 = vmatpush2.msra.mxu1 %v5021_v52  ;;  %7275 = vmatpush2.msra.mxu0 %v5277_v34  ;;  %v5685_v47 = vld [vmem:[#allocation8 + $0x20f0] sm:$0xff]  ;;  %v5422_v52 = vld [vmem:[#allocation8 + $0x18b8] sm:$0xff] }
 0x6cd   : > { %7206 = vmatmul.mubr.f32.vlgmr.msra.gmra.mxu1 %v14472_v33  ;;  %7277 = vmatmul.mubr.f32.vlgmr.msra.gmra.mxu0 %v14490_v20  ;;  %v5509_v33 = vld [vmem:[#allocation8 + $0x1b70] sm:$0xff]  ;;  %v5502_v20 = vld [vmem:[#allocation8 + $0x1b38] sm:$0xff] }
 0x6ce   : > { %7283 = vmatprep.subr.mxu1 %v5526_v40  ;;  %7354 = vmatprep.subr.mxu0 %v5782_v13  ;;  %v5678_v34 = vld [vmem:[#allocation8 + $0x20b8] sm:$0xff]  ;;  %v5421_v40 = vld [vmem:[#allocation8 + $0x18b0] sm:$0xff] }
 0x6cf   : > { %7284 = vmatpush1.msra.mxu1 %v5525_v57  ;;  %7347 = vmatprep.mubr.f32.mxu1 %v14484_v56  ;;  %v5494_v56 = vld [vmem:[#allocation8 + $0x1af8] sm:$0xff]  ;;  %v5677_v13 = vld [vmem:[#allocation8 + $0x20b0] sm:$0xff] }
 0x6d0   : > { %7355 = vmatpush1.msra.mxu0 %v5781_v29  ;;  %7418 = vmatprep.mubr.f32.mxu0 %v14507_v10  ;;  %v5493_v10 = vld [vmem:[#allocation8 + $0x1af0] sm:$0xff]  ;;  %v5414_v57 = vld [vmem:[#allocation8 + $0x1878] sm:$0xff] }
 0x6d1   : > { %7285 = vmatprep.subr.mxu1 %v5518_v7  ;;  %7356 = vmatprep.subr.mxu0 %v5774_v24  ;;  %v5670_v29 = vld [vmem:[#allocation8 + $0x2078] sm:$0xff]  ;;  %v5413_v7 = vld [vmem:[#allocation8 + $0x1870] sm:$0xff] }
 0x6d2   : > { %7286 = vmatpush1.msra.mxu1 %v5517_v22  ;;  %7357 = vmatpush1.msra.mxu0 %v5773_v14  ;;  %v5669_v24 = vld [vmem:[#allocation8 + $0x2070] sm:$0xff]  ;;  %v5406_v22 = vld [vmem:[#allocation8 + $0x1838] sm:$0xff] }
 0x6d3   : > { %7287 = vmatprep.subr.mxu1 %v5510_v45  ;;  %7358 = vmatprep.subr.mxu0 %v5766_v19  ;;  %v5662_v14 = vld [vmem:[#allocation8 + $0x2038] sm:$0xff]  ;;  %v5405_v45 = vld [vmem:[#allocation8 + $0x1830] sm:$0xff] }
 0x6d4   : > { %7288 = vmatpush1.msra.mxu1 %v5509_v33  ;;  %7359 = vmatpush1.msra.mxu0 %v5765_v37  ;;  %v5661_v19 = vld [vmem:[#allocation8 + $0x2030] sm:$0xff]  ;;  %v5654_v33 = vld [vmem:[#allocation8 + $0x1ff8] sm:$0xff] }
 0x6d5   : > { %7289 = vmatprep.subr.mxu1 %v5502_v20  ;;  %7360 = vmatprep.subr.mxu0 %v5758_v60  ;;  %v5910_v37 = vld [vmem:[#allocation8 + $0x27f8] sm:$0xff]  ;;  %v5653_v20 = vld [vmem:[#allocation8 + $0x1ff0] sm:$0xff] }
 0x6d6   : > { %7290 = vmatpush1.msra.mxu1 %v5501_v17  ;;  %7361 = vmatpush1.msra.mxu0 %v5757_v11  ;;  %v5909_v60 = vld [vmem:[#allocation8 + $0x27f0] sm:$0xff]  ;;  %v5646_v17 = vld [vmem:[#allocation8 + $0x1fb8] sm:$0xff] }
 0x6d7   : > { %7291 = vmatprep.subr.mxu1 %v5494_v56  ;;  %7362 = vmatprep.subr.mxu0 %v5750_v36  ;;  %v5902_v11 = vld [vmem:[#allocation8 + $0x27b8] sm:$0xff]  ;;  %v5645_v56 = vld [vmem:[#allocation8 + $0x1fb0] sm:$0xff] }
 0x6d8   : > { %7292 = vmatpush1.msra.mxu1 %v5493_v10  ;;  %7363 = vmatpush1.msra.mxu0 %v5749_v48  ;;  %v5901_v36 = vld [vmem:[#allocation8 + $0x27b0] sm:$0xff]  ;;  %v5638_v10 = vld [vmem:[#allocation8 + $0x1f78] sm:$0xff] }
 0x6d9   : > { %7293 = vmatprep.subr.mxu1 %v5486_v54  ;;  %7364 = vmatprep.subr.mxu0 %v5742_v53  ;;  %v5894_v48 = vld [vmem:[#allocation8 + $0x2778] sm:$0xff]  ;;  %v5637_v54 = vld [vmem:[#allocation8 + $0x1f70] sm:$0xff] }
 0x6da   : > { %7294 = vmatpush1.msra.mxu1 %v5485_v15  ;;  %7365 = vmatpush1.msra.mxu0 %v5741_v55  ;;  %v5893_v53 = vld [vmem:[#allocation8 + $0x2770] sm:$0xff]  ;;  %v5630_v15 = vld [vmem:[#allocation8 + $0x1f38] sm:$0xff] }
 0x6db   : > { %7295 = vmatprep.subr.mxu1 %v5478_v1  ;;  %7366 = vmatprep.subr.mxu0 %v5734_v32  ;;  %v5886_v55 = vld [vmem:[#allocation8 + $0x2738] sm:$0xff]  ;;  %v5629_v1 = vld [vmem:[#allocation8 + $0x1f30] sm:$0xff] }
 0x6dc   : > { %7296 = vmatpush1.msra.mxu1 %v5477_v12  ;;  %7367 = vmatpush1.msra.mxu0 %v5733_v46  ;;  %v5885_v32 = vld [vmem:[#allocation8 + $0x2730] sm:$0xff]  ;;  %v5622_v12 = vld [vmem:[#allocation8 + $0x1ef8] sm:$0xff] }
 0x6dd   : > { %7297 = vmatprep.subr.mxu1 %v5470_v2  ;;  %7368 = vmatprep.subr.mxu0 %v5726_v8  ;;  %v5878_v46 = vld [vmem:[#allocation8 + $0x26f8] sm:$0xff]  ;;  %v5621_v2 = vld [vmem:[#allocation8 + $0x1ef0] sm:$0xff] }
 0x6de   : > { %7298 = vmatpush1.msra.mxu1 %v5469_v9  ;;  %7369 = vmatpush1.msra.mxu0 %v5725_v58  ;;  %v5877_v8 = vld [vmem:[#allocation8 + $0x26f0] sm:$0xff]  ;;  %v5614_v9 = vld [vmem:[#allocation8 + $0x1eb8] sm:$0xff] }
 0x6df   : > { %7299 = vmatprep.subr.mxu1 %v5462_v3  ;;  %7370 = vmatprep.subr.mxu0 %v5718_v6  ;;  %v5870_v58 = vld [vmem:[#allocation8 + $0x26b8] sm:$0xff]  ;;  %v14538_v3 = vpop.f32.mrf.mxu1  ;;  %v5613_v6 = vld [vmem:[#allocation8 + $0x1eb0] sm:$0xff] }
 0x6e0   : > { %7300 = vmatpush1.msra.mxu1 %v5461_v35  ;;  %7371 = vmatpush1.msra.mxu0 %v5717_v30  ;;  %v5869_v35 = vld [vmem:[#allocation8 + $0x26b0] sm:$0xff]  ;;  %v5606_v30 = vld [vmem:[#allocation8 + $0x1e78] sm:$0xff] }
 0x6e1   : > { %7301 = vmatprep.subr.mxu1 %v5454_v28  ;;  %7372 = vmatprep.subr.mxu0 %v5710_v21  ;;  %v5862_v28 = vld [vmem:[#allocation8 + $0x2678] sm:$0xff]  ;;  %v14540_v21 = vld [vmem:[#allocation9] sm:$0xff] }
 0x6e2   : > { %7302 = vmatpush1.msra.mxu1 %v5453_v42  ;;  %7373 = vmatpush1.msra.mxu0 %v5709_v49  ;;  %v5605_v42 = vld [vmem:[#allocation8 + $0x1e70] sm:$0xff] }
 0x6e3   : > { %7303 = vmatprep.subr.mxu1 %v5446_v25  ;;  %7374 = vmatprep.subr.mxu0 %v5702_v27  ;;  %v5861_v49 = vld [vmem:[#allocation8 + $0x2670] sm:$0xff]  ;;  %v5972_v25 = vrot.slane %v14540_v21, %v15904_v43  ;;  %v5598_v27 = vld [vmem:[#allocation8 + $0x1e38] sm:$0xff] }
 0x6e4   : > { %7304 = vmatpush1.msra.mxu1 %v5445_v41  ;;  %7375 = vmatpush1.msra.mxu0 %v5701_v39  ;;  %v5854_v41 = vld [vmem:[#allocation8 + $0x2638] sm:$0xff]  ;;  %v6073_v39 = vpop.f32.mrf.mxu1  ;;  %v5589_v43 = vld [vmem:[#allocation8 + $0x1df0] sm:$0xff] }
 0x6e5   : > { %7305 = vmatprep.subr.mxu1 %v5438_v18  ;;  %7376 = vmatprep.subr.mxu0 %v5694_v51  ;;  %v5597_v18 = vld [vmem:[#allocation8 + $0x1e30] sm:$0xff] }
 0x6e6   : > { %7306 = vmatpush1.msra.mxu1 %v5437_v44  ;;  %7377 = vmatpush1.msra.mxu0 %v5693_v16  ;;  %v5853_v51 = vld [vmem:[#allocation8 + $0x2630] sm:$0xff]  ;;  %v5590_v44 = vld [vmem:[#allocation8 + $0x1df8] sm:$0xff] }
 0x6e7   : > { %7307 = vmatprep.subr.mxu1 %v5430_v5  ;;  %7378 = vmatprep.subr.mxu0 %v5686_v31  ;;  %v5846_v16 = vld [vmem:[#allocation8 + $0x25f8] sm:$0xff]  ;;  %v14544_v5 = vpop.f32.mrf.mxu0  ;;  %v14546_v31 = vpop.f32.mrf.mxu1 }
 0x6e8   : > { %7308 = vmatpush1.msra.mxu1 %v5429_v63  ;;  %7379 = vmatpush1.msra.mxu0 %v5685_v47  ;;  %v5845_v63 = vld [vmem:[#allocation8 + $0x25f0] sm:$0xff]  ;;  %v6074_v47 = vadd.f32 %v6073_v39, %v5972_v25  ;;  %v7448_v25 = vld [vmem:[#allocation11 + $0x78] sm:$0xff] }
 0x6e9   : > { %7309 = vmatprep.subr.mxu1 %v5422_v52  ;;  %7380 = vmatprep.subr.mxu0 %v5678_v34  ;;  %v5582_v52 = vld [vmem:[#allocation8 + $0x1db8] sm:$0xff]  ;;  %v7512_v39 = vld [vmem:[#allocation11 + $0x278] sm:$0xff] }
 0x6ea   : > { %7310 = vmatpush1.msra.mxu1 %v5421_v40  ;;  %7381 = vmatpush1.msra.mxu0 %v5677_v13  ;;  %v5838_v34 = vld [vmem:[#allocation8 + $0x25b8] sm:$0xff]  ;;  %v5581_v40 = vld [vmem:[#allocation8 + $0x1db0] sm:$0xff] }
 0x6eb   : > { %7311 = vmatprep.subr.mxu1 %v5414_v57  ;;  %7382 = vmatprep.subr.mxu0 %v5670_v29  ;;  %v5837_v13 = vld [vmem:[#allocation8 + $0x25b0] sm:$0xff]  ;;  %v5574_v57 = vld [vmem:[#allocation8 + $0x1d78] sm:$0xff] }
 0x6ec   : > { %7312 = vmatpush1.msra.mxu1 %v5413_v7  ;;  %7383 = vmatpush1.msra.mxu0 %v5669_v24  ;;  %v5830_v29 = vld [vmem:[#allocation8 + $0x2578] sm:$0xff]  ;;  %v6144_v7 = vpop.f32.mrf.mxu0  ;;  %v6215_v24 = vpop.f32.mrf.mxu1 }
 0x6ed   : > { %7313 = vmatprep.subr.mxu1 %v5406_v22  ;;  %7384 = vmatprep.subr.mxu0 %v5662_v14  ;;  %v5573_v22 = vld [vmem:[#allocation8 + $0x1d70] sm:$0xff] }
 0x6ee   : > { %7314 = vmatpush1.msra.mxu1 %v5405_v45  ;;  %7385 = vmatpush1.msra.mxu0 %v5661_v19  ;;  %v5829_v14 = vld [vmem:[#allocation8 + $0x2570] sm:$0xff]  ;;  %v6145_v45 = vadd.f32 %v6144_v7, %v6074_v47  ;;  %v5566_v19 = vld [vmem:[#allocation8 + $0x1d38] sm:$0xff]  ;;  %v7461_v47 = vld [vmem:[#allocation11 + $0xe0] sm:$0xff] }
 0x6ef   : > { %7315 = vmatprep.subr.mxu1 %v5654_v33  ;;  %7386 = vmatprep.subr.mxu0 %v5910_v37  ;;  %v5822_v33 = vld [vmem:[#allocation8 + $0x2538] sm:$0xff]  ;;  %v14548_v37 = vpop.f32.mrf.mxu0  ;;  %v7508_v7 = vld [vmem:[#allocation11 + $0x258] sm:$0xff] }
 0x6f0   : > { %7316 = vmatpush2.msra.mxu1 %v5653_v20  ;;  %7387 = vmatpush2.msra.mxu0 %v5909_v60  ;;  %v14550_v20 = vpop.f32.mrf.mxu1  ;;  %v5565_v60 = vld [vmem:[#allocation8 + $0x1d30] sm:$0xff] }
 0x6f1   : > { %7317 = vmatprep.subr.mxu1 %v5646_v17  ;;  %7388 = vmatprep.subr.mxu0 %v5902_v11  ;;  %v5821_v17 = vld [vmem:[#allocation8 + $0x2530] sm:$0xff]  ;;  %v6216_v11 = vadd.f32 %v6215_v24, %v6145_v45 }
 0x6f2   : > { %7318 = vmatpush2.msra.mxu1 %v5645_v56  ;;  %7389 = vmatpush2.msra.mxu0 %v5901_v36  ;;  %v5558_v56 = vld [vmem:[#allocation8 + $0x1cf8] sm:$0xff]  ;;  %v7458_v45 = vld [vmem:[#allocation11 + $0xc8] sm:$0xff] }
 0x6f3   : > { %7319 = vmatprep.subr.mxu1 %v5638_v10  ;;  %7390 = vmatprep.subr.mxu0 %v5894_v48  ;;  %v5814_v36 = vld [vmem:[#allocation8 + $0x24f8] sm:$0xff]  ;;  %v5557_v10 = vld [vmem:[#allocation8 + $0x1cf0] sm:$0xff] }
 0x6f4   : > { %7320 = vmatpush2.msra.mxu1 %v5637_v54  ;;  %7391 = vmatpush2.msra.mxu0 %v5893_v53  ;;  %v5813_v48 = vld [vmem:[#allocation8 + $0x24f0] sm:$0xff]  ;;  %v5550_v54 = vld [vmem:[#allocation8 + $0x1cb8] sm:$0xff] }
 0x6f5   : > { %7321 = vmatprep.subr.mxu1 %v5630_v15  ;;  %7392 = vmatprep.subr.mxu0 %v5886_v55  ;;  %v5806_v53 = vld [vmem:[#allocation8 + $0x24b8] sm:$0xff]  ;;  %v6286_v15 = vpop.f32.mrf.mxu0  ;;  %v6357_v55 = vpop.f32.mrf.mxu1 }
 0x6f6   : > { %7322 = vmatpush2.msra.mxu1 %v5629_v1  ;;  %7393 = vmatpush2.msra.mxu0 %v5885_v32  ;;  %v5549_v1 = vld [vmem:[#allocation8 + $0x1cb0] sm:$0xff] }
 0x6f7   : > { %7323 = vmatprep.subr.mxu1 %v5622_v12  ;;  %7394 = vmatprep.subr.mxu0 %v5878_v46  ;;  %v5805_v32 = vld [vmem:[#allocation8 + $0x24b0] sm:$0xff]  ;;  %v6287_v12 = vadd.f32 %v6286_v15, %v6216_v11  ;;  %v5542_v46 = vld [vmem:[#allocation8 + $0x1c78] sm:$0xff]  ;;  %v14554_v24 = vpop.f32.mrf.mxu0  ;;  %v7505_v15 = vld [vmem:[#allocation11 + $0x240] sm:$0xff] }
 0x6f8   : > { %7324 = vmatpush2.msra.mxu1 %v5621_v2  ;;  %7395 = vmatpush2.msra.mxu0 %v5877_v8  ;;  %v5798_v2 = vld [vmem:[#allocation8 + $0x2478] sm:$0xff]  ;;  %v5541_v8 = vld [vmem:[#allocation8 + $0x1c70] sm:$0xff] }
 0x6f9   : > { %7325 = vmatprep.subr.mxu1 %v5614_v9  ;;  %7396 = vmatprep.subr.mxu0 %v5870_v58  ;;  %v5797_v9 = vld [vmem:[#allocation8 + $0x2470] sm:$0xff]  ;;  %v6358_v58 = vadd.f32 %v6357_v55, %v6287_v12 }
 0x6fa   : > { %7326 = vmatpush2.msra.mxu1 %v5613_v6  ;;  %7397 = vmatpush2.msra.mxu0 %v5869_v35  ;;  %v5534_v6 = vld [vmem:[#allocation8 + $0x1c38] sm:$0xff]  ;;  %v7522_v11 = vld [vmem:[#allocation11 + $0x2c8] sm:$0xff] }
 0x6fb   : > { %7327 = vmatprep.subr.mxu1 %v5606_v30  ;;  %7398 = vmatprep.subr.mxu0 %v5862_v28  ;;  %v5790_v35 = vld [vmem:[#allocation8 + $0x2438] sm:$0xff]  ;;  %v5533_v30 = vld [vmem:[#allocation8 + $0x1c30] sm:$0xff] }
 0x6fc   : > { %7328 = vmatpush2.msra.mxu1 %v5605_v42  ;;  %7399 = vmatpush2.msra.mxu0 %v5861_v49  ;;  %v5789_v28 = vld [vmem:[#allocation8 + $0x2430] sm:$0xff]  ;;  %v7464_v42 = vld [vmem:[#allocation11 + $0xf8] sm:$0xff]  ;;  %v7426_v49 = vmax.f32 %v6358_v58, 0.0  ;;  %v7439_v58 = vld [vmem:[#allocation11 + $0x30] sm:$0xff] }
 0x6fd   : > { %7329 = vmatprep.subr.mxu1 %v5598_v27  ;;  %7400 = vmatprep.subr.mxu0 %v5854_v41  ;;  %v7528_v27 = vld [vmem:[#allocation11 + $0x2f8] sm:$0xff]  ;;  %v7463_v41 = vld [vmem:[#allocation11 + $0xf0] sm:$0xff] }
 0x6fe   : > { %7330 = vmatpush2.msra.mxu1 %v5597_v18  ;;  %7401 = vmatpush2.msra.mxu0 %v5853_v51  ;;  %v7447_v18 = vld [vmem:[#allocation11 + $0x70] sm:$0xff] }
 0x6ff   : > { %7331 = vmatprep.subr.mxu1 %v5590_v44  ;;  %7402 = vmatprep.subr.mxu0 %v5846_v16  ;;  %v7527_v51 = vld [vmem:[#allocation11 + $0x2f0] sm:$0xff]  ;;  %v7462_v44 = vld [vmem:[#allocation11 + $0xe8] sm:$0xff] }
 0x700   : > { %7332 = vmatpush2.msra.mxu1 %v5589_v43  ;;  %7403 = vmatpush2.msra.mxu0 %v5845_v63  ;;  %v7511_v16 = vld [vmem:[#allocation11 + $0x270] sm:$0xff]  ;;  %v7446_v43 = vld [vmem:[#allocation11 + $0x68] sm:$0xff] }
 0x701   : > { %7333 = vmatprep.subr.mxu1 %v5582_v52  ;;  %7404 = vmatprep.subr.mxu0 %v5838_v34  ;;  %v7526_v63 = vld [vmem:[#allocation11 + $0x2e8] sm:$0xff]  ;;  %v7525_v52 = vld [vmem:[#allocation11 + $0x2e0] sm:$0xff]  ;;  %v7460_v34 = vld [vmem:[#allocation11 + $0xd8] sm:$0xff] }
 0x702   : > { %7334 = vmatpush2.msra.mxu1 %v5581_v40  ;;  %7405 = vmatpush2.msra.mxu0 %v5837_v13  ;;  %v7509_v40 = vld [vmem:[#allocation11 + $0x260] sm:$0xff]  ;;  %v7444_v13 = vld [vmem:[#allocation11 + $0x58] sm:$0xff] }
 0x703   : > { %7335 = vmatprep.subr.mxu1 %v5574_v57  ;;  %7406 = vmatprep.subr.mxu0 %v5830_v29  ;;  %v7524_v57 = vld [vmem:[#allocation11 + $0x2d8] sm:$0xff]  ;;  %v7459_v29 = vld [vmem:[#allocation11 + $0xd0] sm:$0xff] }
 0x704   : > { %7336 = vmatpush2.msra.mxu1 %v5573_v22  ;;  %7407 = vmatpush2.msra.mxu0 %v5829_v14  ;;  %v7443_v22 = vld [vmem:[#allocation11 + $0x50] sm:$0xff] }
 0x705   : > { %7337 = vmatprep.subr.mxu1 %v5566_v19  ;;  %7408 = vmatprep.subr.mxu0 %v5822_v33  ;;  %v7523_v14 = vld [vmem:[#allocation11 + $0x2d0] sm:$0xff]  ;;  %v5968_v33 = vrot.slane %v14540_v21, %v15906_v59  ;;  %v7456_v59 = vld [vmem:[#allocation11 + $0xb8] sm:$0xff] }
 0x706   : > { %7338 = vmatpush2.msra.mxu1 %v5565_v60  ;;  %7409 = vmatpush2.msra.mxu0 %v5821_v17  ;;  %v7507_v19 = vld [vmem:[#allocation11 + $0x250] sm:$0xff]  ;;  %v14558_v60 = vpop.f32.mrf.mxu1  ;;  %v7442_v17 = vld [vmem:[#allocation11 + $0x48] sm:$0xff] }
 0x707   : > { %7339 = vmatprep.subr.mxu1 %v5558_v56  ;;  %7410 = vmatprep.subr.mxu0 %v5814_v36  ;;  %v5980_v56 = vrot.slane %v14540_v21, %v15905_v38  ;;  %v7457_v36 = vld [vmem:[#allocation11 + $0xc0] sm:$0xff]  ;;  %v6072_v55 = vadd.f32 %v14538_v3, %v5968_v33  ;;  %v7520_v38 = vld [vmem:[#allocation11 + $0x2b8] sm:$0xff]  ;;  %v7454_v3 = vld [vmem:[#allocation11 + $0xa8] sm:$0xff] }
 0x708   : > { %7340 = vmatpush2.msra.mxu1 %v5557_v10  ;;  %7411 = vmatpush2.msra.mxu0 %v5813_v48  ;;  %v7506_v10 = vld [vmem:[#allocation11 + $0x248] sm:$0xff]  ;;  %v6428_v48 = vpop.f32.mrf.mxu0  ;;  %v7449_v33 = vld [vmem:[#allocation11 + $0x80] sm:$0xff] }
 0x709   : > { %7341 = vmatprep.subr.mxu1 %v5550_v54  ;;  %7412 = vmatprep.subr.mxu0 %v5806_v53  ;;  %v7441_v54 = vld [vmem:[#allocation11 + $0x40] sm:$0xff]  ;;  %v6429_v12 = vadd.f32 %v6428_v48, %v5980_v56  ;;  %v7496_v56 = vld [vmem:[#allocation11 + $0x1f8] sm:$0xff]  ;;  %v7495_v48 = vld [vmem:[#allocation11 + $0x1f0] sm:$0xff] }
 0x70a   : > { %7342 = vmatpush2.msra.mxu1 %v5549_v1  ;;  %7413 = vmatpush2.msra.mxu0 %v5805_v32  ;;  %v7521_v53 = vld [vmem:[#allocation11 + $0x2c0] sm:$0xff]  ;;  %v6499_v1 = vpop.f32.mrf.mxu1  ;;  %v7440_v32 = vld [vmem:[#allocation11 + $0x38] sm:$0xff] }
 0x70b   : > { %7343 = vmatprep.subr.mxu1 %v5542_v46  ;;  %7414 = vmatprep.subr.mxu0 %v5798_v2  ;;  %v7455_v46 = vld [vmem:[#allocation11 + $0xb0] sm:$0xff]  ;;  %v7504_v2 = vld [vmem:[#allocation11 + $0x238] sm:$0xff] }
 0x70c   : > { %7344 = vmatpush2.msra.mxu1 %v5541_v8  ;;  %7415 = vmatpush2.msra.mxu0 %v5797_v9  ;;  %v14563_v8 = vpop.f32.mrf.mxu0  ;;  %v14565_v9 = vpop.f32.mrf.mxu1 }
 0x70d   : > { %7345 = vmatprep.subr.mxu1 %v5534_v6  ;;  %7416 = vmatprep.subr.mxu0 %v5790_v35  ;;  %v7519_v6 = vld [vmem:[#allocation11 + $0x2b0] sm:$0xff]  ;;  %v6500_v35 = vadd.f32 %v6499_v1, %v6429_v12  ;;  %v7477_v1 = vld [vmem:[#allocation11 + $0x160] sm:$0xff] }
 0x70e   : > { %7346 = vmatpush2.msra.mxu1 %v5533_v30  ;;  %7417 = vmatpush2.msra.mxu0 %v5789_v28  ;;  %v7503_v30 = vld [vmem:[#allocation11 + $0x230] sm:$0xff]  ;;  %v6143_v28 = vadd.f32 %v14544_v5, %v6072_v55  ;;  %v7501_v5 = vld [vmem:[#allocation11 + $0x220] sm:$0xff] }
 0x70f   : > { %7348 = vmatmul.mubr.f32.vlgmr.msra.gmra.mxu1 %v14494_v4  ;;  %7419 = vmatmul.mubr.f32.vlgmr.msra.gmra.mxu0 %v14504_v62  ;;  %v7510_v4 = vld [vmem:[#allocation11 + $0x268] sm:$0xff]  ;;  %v7445_v62 = vld [vmem:[#allocation11 + $0x60] sm:$0xff]  ;;  %v7491_v12 = vld [vmem:[#allocation11 + $0x1d0] sm:$0xff] }
 0x710   : > { %8498 = vmatprep.subr.mxu1 %v7464_v42  ;;  %7626 = vmatprep.mubr.f32.mxu1 %v7426_v49  ;;  %v7438_v42 = vld [vmem:[#allocation11 + $0x28] sm:$0xff]  ;;  %v7493_v55 = vld [vmem:[#allocation11 + $0x1e0] sm:$0xff] }
 0x711   : > { %8499 = vmatpush3.msra.mxu1 %v7448_v25  ;;  %8568 = vmatprep.subr.mxu0 %v7528_v27  ;;  %v7518_v49 = vld [vmem:[#allocation11 + $0x2a8] sm:$0xff]  ;;  %v7453_v25 = vld [vmem:[#allocation11 + $0xa0] sm:$0xff] }
 0x712   : > { %8500 = vmatprep.subr.mxu1 %v7463_v41  ;;  %8569 = vmatpush3.msra.mxu0 %v7512_v39  ;;  %v7502_v27 = vld [vmem:[#allocation11 + $0x228] sm:$0xff]  ;;  %v6214_v41 = vadd.f32 %v14546_v31, %v6143_v28  ;;  %v6570_v39 = vpop.f32.mrf.mxu0  ;;  %v7451_v31 = vld [vmem:[#allocation11 + $0x90] sm:$0xff]  ;;  %v5984_v28 = vrot.slane %v14540_v21, %v15910_v23 }
 0x713   : > { %8501 = vmatpush3.msra.mxu1 %v7447_v18  ;;  %8570 = vmatprep.subr.mxu0 %v7527_v51  ;;  %v6641_v18 = vpop.f32.mrf.mxu1  ;;  %v7437_v51 = vld [vmem:[#allocation11 + $0x20] sm:$0xff]  ;;  %v7486_v23 = vld [vmem:[#allocation11 + $0x1a8] sm:$0xff] }
 0x714   : > { %8502 = vmatprep.subr.mxu1 %v7462_v44  ;;  %8571 = vmatpush3.msra.mxu0 %v7511_v16  ;;  %v7517_v44 = vld [vmem:[#allocation11 + $0x2a0] sm:$0xff]  ;;  %v6571_v16 = vadd.f32 %v6570_v39, %v6500_v35 }
 0x715   : > { %8503 = vmatpush3.msra.mxu1 %v7446_v43  ;;  %8572 = vmatprep.subr.mxu0 %v7526_v63  ;;  %v7452_v43 = vld [vmem:[#allocation11 + $0x98] sm:$0xff]  ;;  %v14569_v63 = vpop.f32.mrf.mxu0  ;;  %v6781_v35 = vpop.f32.mrf.mxu1 }
 0x716   : > { %8504 = vmatprep.subr.mxu1 %v7461_v47  ;;  %8573 = vmatpush3.msra.mxu0 %v7510_v4  ;;  %v7436_v47 = vld [vmem:[#allocation11 + $0x18] sm:$0xff] }
 0x717   : > { %8505 = vmatpush3.msra.mxu1 %v7445_v62  ;;  %8574 = vmatprep.subr.mxu0 %v7525_v52  ;;  %v7516_v4 = vld [vmem:[#allocation11 + $0x298] sm:$0xff]  ;;  %v6642_v62 = vadd.f32 %v6641_v18, %v6571_v16  ;;  %v7471_v18 = vld [vmem:[#allocation11 + $0x130] sm:$0xff] }
 0x718   : > { %8506 = vmatprep.subr.mxu1 %v7460_v34  ;;  %8575 = vmatpush3.msra.mxu0 %v7509_v40  ;;  %v7500_v52 = vld [vmem:[#allocation11 + $0x218] sm:$0xff]  ;;  %v6285_v34 = vadd.f32 %v14548_v37, %v6214_v41  ;;  %v7435_v40 = vld [vmem:[#allocation11 + $0x10] sm:$0xff]  ;;  %v7498_v37 = vld [vmem:[#allocation11 + $0x208] sm:$0xff] }
 0x719   : > { %8507 = vmatpush3.msra.mxu1 %v7444_v13  ;;  %8576 = vmatprep.subr.mxu0 %v7524_v57  ;;  %v7515_v13 = vld [vmem:[#allocation11 + $0x290] sm:$0xff]  ;;  %v7450_v57 = vld [vmem:[#allocation11 + $0x88] sm:$0xff] }
 0x71a   : > { %8508 = vmatprep.subr.mxu1 %v7459_v29  ;;  %8577 = vmatpush3.msra.mxu0 %v7508_v7  ;;  %v7499_v29 = vld [vmem:[#allocation11 + $0x210] sm:$0xff]  ;;  %v6356_v7 = vadd.f32 %v14550_v20, %v6285_v34  ;;  %v7480_v20 = vld [vmem:[#allocation11 + $0x178] sm:$0xff] }
 0x71b   : > { %8509 = vmatpush3.msra.mxu1 %v7443_v22  ;;  %8578 = vmatprep.subr.mxu0 %v7523_v14  ;;  %v6712_v22 = vpop.f32.mrf.mxu0  ;;  %v7434_v14 = vld [vmem:[#allocation11 + $0x8] sm:$0xff]  ;;  %v7487_v41 = vld [vmem:[#allocation11 + $0x1b0] sm:$0xff] }
 0x71c   : > { %8510 = vmatprep.subr.mxu1 %v7458_v45  ;;  %8579 = vmatpush3.msra.mxu0 %v7507_v19  ;;  %v7514_v45 = vld [vmem:[#allocation11 + $0x288] sm:$0xff]  ;;  %v6713_v19 = vadd.f32 %v6712_v22, %v6642_v62  ;;  %v7467_v22 = vld [vmem:[#allocation11 + $0x110] sm:$0xff] }
 0x71d   : > { %8511 = vmatpush3.msra.mxu1 %v7442_v17  ;;  %8580 = vmatprep.subr.mxu0 %v7522_v11  ;;  %v7433_v17 = vld [vmem:[#allocation11] sm:$0xff] }
 0x71e   : > { %8512 = vmatprep.subr.mxu1 %v7457_v36  ;;  %8581 = vmatpush3.msra.mxu0 %v7506_v10  ;;  %v7513_v11 = vld [vmem:[#allocation11 + $0x280] sm:$0xff]  ;;  %v7425_v36 = vmax.f32 %v6356_v7, 0.0  ;;  %v7428_v10 = vmax.f32 %v6713_v19, 0.0 }
 0x71f   : > { %8513 = vmatpush3.msra.mxu1 %v7441_v54  ;;  %8582 = vmatprep.subr.mxu0 %v7521_v53  ;;  %v7497_v54 = vld [vmem:[#allocation11 + $0x200] sm:$0xff]  ;;  %v7479_v53 = vld [vmem:[#allocation11 + $0x170] sm:$0xff] }
 0x720   : > { %8514 = vmatprep.subr.mxu1 %v7456_v59  ;;  %8583 = vmatpush3.msra.mxu0 %v7505_v15  ;;  %v7494_v59 = vld [vmem:[#allocation11 + $0x1e8] sm:$0xff] }
 0x721   : > { %8515 = vmatpush3.msra.mxu1 %v7440_v32  ;;  %8584 = vmatprep.subr.mxu0 %v7520_v38  ;;  %v7478_v15 = vld [vmem:[#allocation11 + $0x168] sm:$0xff]  ;;  %v7492_v32 = vld [vmem:[#allocation11 + $0x1d8] sm:$0xff] }
 0x722   : > { %8516 = vmatprep.subr.mxu1 %v7455_v46  ;;  %8585 = vmatpush3.msra.mxu0 %v7504_v2  ;;  %v7476_v38 = vld [vmem:[#allocation11 + $0x158] sm:$0xff]  ;;  %v7475_v46 = vld [vmem:[#allocation11 + $0x150] sm:$0xff]  ;;  %v7490_v2 = vld [vmem:[#allocation11 + $0x1c8] sm:$0xff] }
 0x723   : > { %8517 = vmatpush3.msra.mxu1 %v7439_v58  ;;  %8586 = vmatprep.subr.mxu0 %v7519_v6  ;;  %v5976_v58 = vrot.slane %v14540_v21, %v15907_v0  ;;  %v7474_v6 = vld [vmem:[#allocation11 + $0x148] sm:$0xff]  ;;  %v6783_v0 = vpop.f32.mrf.mxu1 }
 0x724   : > { %8518 = vmatprep.subr.mxu1 %v7454_v3  ;;  %8587 = vmatpush3.msra.mxu0 %v7503_v30  ;;  %v7489_v3 = vld [vmem:[#allocation11 + $0x1c0] sm:$0xff] }
 0x725   : > { %8519 = vmatpush3.msra.mxu1 %v7438_v42  ;;  %8588 = vmatprep.subr.mxu0 %v7518_v49  ;;  %v7473_v30 = vld [vmem:[#allocation11 + $0x140] sm:$0xff]  ;;  %v7488_v42 = vld [vmem:[#allocation11 + $0x1b8] sm:$0xff]  ;;  %v6427_v49 = vadd.f32 %v14554_v24, %v5976_v58  ;;  %v6923_v16 = vpop.f32.mrf.mxu1  ;;  %v7470_v24 = vld [vmem:[#allocation11 + $0x128] sm:$0xff] }
 0x726   : > { %8520 = vmatprep.subr.mxu1 %v7453_v25  ;;  %8589 = vmatpush3.msra.mxu0 %v7502_v27  ;;  %v5988_v25 = vrot.slane %v14540_v21, %v15908_v61  ;;  %v7472_v27 = vld [vmem:[#allocation11 + $0x138] sm:$0xff]  ;;  %v7539_v58 = vld [vmem:[#allocation11 + $0x350] sm:$0xff] }
 0x727   : > { %8521 = vmatpush3.msra.mxu1 %v7437_v51  ;;  %8590 = vmatprep.subr.mxu0 %v7517_v44  ;;  %v6498_v39 = vadd.f32 %v14558_v60, %v6427_v49  ;;  %v6782_v51 = vadd.f32 %v6781_v35, %v5984_v28  ;;  %v6852_v44 = vpop.f32.mrf.mxu0  ;;  %v7484_v60 = vld [vmem:[#allocation11 + $0x198] sm:$0xff]  ;;  %v7538_v35 = vld [vmem:[#allocation11 + $0x348] sm:$0xff]  ;;  %v7551_v49 = vld [vmem:[#allocation11 + $0x3b0] sm:$0xff] }
 0x728   : > { %8522 = vmatprep.subr.mxu1 %v7452_v43  ;;  %8591 = vmatpush3.msra.mxu0 %v7501_v5  ;;  %v6784_v43 = vadd.f32 %v6783_v0, %v5988_v25  ;;  %v7485_v5 = vld [vmem:[#allocation11 + $0x1a0] sm:$0xff]  ;;  %v7552_v28 = vld [vmem:[#allocation11 + $0x3b8] sm:$0xff]  ;;  %v7535_v25 = vld [vmem:[#allocation11 + $0x330] sm:$0xff] }
 0x729   : > { %8523 = vmatpush3.msra.mxu1 %v7436_v47  ;;  %8592 = vmatprep.subr.mxu0 %v7516_v4  ;;  %v6569_v61 = vadd.f32 %v14563_v8, %v6498_v39  ;;  %v7469_v47 = vld [vmem:[#allocation11 + $0x120] sm:$0xff]  ;;  %v6853_v4 = vadd.f32 %v6852_v44, %v6782_v51  ;;  %v6854_v62 = vpop.f32.mrf.mxu0  ;;  %v7482_v8 = vld [vmem:[#allocation11 + $0x188] sm:$0xff]  ;;  %v7532_v51 = vld [vmem:[#allocation11 + $0x318] sm:$0xff] }
 0x72a   : > { %8524 = vmatprep.subr.mxu1 %v7451_v31  ;;  %8593 = vmatpush3.msra.mxu0 %v7500_v52  ;;  %v6925_v31 = vpop.f32.mrf.mxu1  ;;  %v6855_v34 = vadd.f32 %v6854_v62, %v6784_v43  ;;  %v7534_v0 = vld [vmem:[#allocation11 + $0x328] sm:$0xff]  ;;  %v7533_v39 = vld [vmem:[#allocation11 + $0x320] sm:$0xff]  ;;  %v7547_v44 = vld [vmem:[#allocation11 + $0x390] sm:$0xff]  ;;  %v5996_v62 = vrot.slane %v14540_v21, %v15909_v26 }
 0x72b   : > { %8525 = vmatpush3.msra.mxu1 %v7435_v40  ;;  %8594 = vmatprep.subr.mxu0 %v7515_v13  ;;  %v6640_v52 = vadd.f32 %v14565_v9, %v6569_v61  ;;  %v7468_v40 = vld [vmem:[#allocation11 + $0x118] sm:$0xff]  ;;  %v6924_v13 = vadd.f32 %v6923_v16, %v6853_v4  ;;  %v7481_v9 = vld [vmem:[#allocation11 + $0x180] sm:$0xff]  ;;  %v7531_v16 = vld [vmem:[#allocation11 + $0x310] sm:$0xff] }
 0x72c   : > { %8526 = vmatprep.subr.mxu1 %v7450_v57  ;;  %8595 = vmatpush3.msra.mxu0 %v7499_v29  ;;  %v6994_v57 = vpop.f32.mrf.mxu0  ;;  %v7483_v29 = vld [vmem:[#allocation11 + $0x190] sm:$0xff]  ;;  %v6926_v7 = vadd.f32 %v6925_v31, %v6855_v34  ;;  %v7530_v43 = vld [vmem:[#allocation11 + $0x308] sm:$0xff] }
 0x72d   : > { %8527 = vmatpush3.msra.mxu1 %v7434_v14  ;;  %8596 = vmatprep.subr.mxu0 %v7514_v45  ;;  %v6711_v14 = vadd.f32 %v14569_v63, %v6640_v52  ;;  %v7466_v45 = vld [vmem:[#allocation11 + $0x108] sm:$0xff]  ;;  %v6995_v19 = vadd.f32 %v6994_v57, %v6924_v13  ;;  %v7559_v63 = vld [vmem:[#allocation11 + $0x3f0] sm:$0xff] }
 0x72e   : > { %8528 = vmatprep.subr.mxu1 %v7449_v33  ;;  %8597 = vmatpush3.msra.mxu0 %v7498_v37  ;;  %v6996_v33 = vpop.f32.mrf.mxu0 }
 0x72f   : > { %8529 = vmatpush3.msra.mxu1 %v7433_v17  ;;  %8598 = vmatprep.subr.mxu0 %v7513_v11  ;;  %v6997_v17 = vadd.f32 %v6996_v33, %v6926_v7  ;;  %v7465_v11 = vld [vmem:[#allocation11 + $0x100] sm:$0xff] }
 0x730   : > { %7627 = vmatmul.mubr.f32.vlgmr.msra.gmra.mxu1 %v7425_v36  ;;  %8533 = vmatprep.subr.mxu1 %v7496_v56 }
 0x731   : > { %8534 = vmatpush3.msra.mxu1 %v7480_v20  ;;  %7696 = vmatprep.mubr.f32.mxu1 %v7428_v10  ;;  %v7560_v20 = vld [vmem:[#allocation11 + $0x3f8] sm:$0xff]  ;;  %v7427_v10 = vmax.f32 %v6711_v14, 0.0 }
 0x732   : > { %8535 = vmatprep.subr.mxu1 %v7495_v48  ;;  %8599 = vmatpush3.msra.mxu0 %v7497_v54  ;;  %v7544_v54 = vld [vmem:[#allocation11 + $0x378] sm:$0xff] }
 0x733   : > { %8536 = vmatpush3.msra.mxu1 %v7479_v53 }
 0x734   : > { %8537 = vmatprep.subr.mxu1 %v7494_v59  ;;  %v7543_v59 = vld [vmem:[#allocation11 + $0x370] sm:$0xff] }
 0x735   : > { %8538 = vmatpush3.msra.mxu1 %v7478_v15 }
 0x736   : > { %8539 = vmatprep.subr.mxu1 %v7493_v55  ;;  %v7558_v55 = vld [vmem:[#allocation11 + $0x3e8] sm:$0xff] }
 0x737   : > { %8540 = vmatpush3.msra.mxu1 %v7477_v1  ;;  %v7542_v1 = vld [vmem:[#allocation11 + $0x368] sm:$0xff] }
 0x738   : > { %8541 = vmatprep.subr.mxu1 %v7492_v32  ;;  %v7557_v32 = vld [vmem:[#allocation11 + $0x3e0] sm:$0xff] }
 0x739   : > { %8542 = vmatpush3.msra.mxu1 %v7476_v38  ;;  %v7541_v38 = vld [vmem:[#allocation11 + $0x360] sm:$0xff] }
 0x73a   : > { %8543 = vmatprep.subr.mxu1 %v7491_v12  ;;  %v7556_v12 = vld [vmem:[#allocation11 + $0x3d8] sm:$0xff] }
 0x73b   : > { %8544 = vmatpush3.msra.mxu1 %v7475_v46  ;;  %v7540_v46 = vld [vmem:[#allocation11 + $0x358] sm:$0xff] }
 0x73c   : > { %8545 = vmatprep.subr.mxu1 %v7490_v2  ;;  %v7555_v2 = vld [vmem:[#allocation11 + $0x3d0] sm:$0xff] }
 0x73d   : > { %8546 = vmatpush3.msra.mxu1 %v7474_v6  ;;  %v7554_v6 = vld [vmem:[#allocation11 + $0x3c8] sm:$0xff] }
 0x73e   : > { %8547 = vmatprep.subr.mxu1 %v7489_v3  ;;  %v7553_v3 = vld [vmem:[#allocation11 + $0x3c0] sm:$0xff] }
 0x73f   : > { %8548 = vmatpush3.msra.mxu1 %v7473_v30  ;;  %v7537_v30 = vld [vmem:[#allocation11 + $0x340] sm:$0xff] }
 0x740   : > { %8549 = vmatprep.subr.mxu1 %v7488_v42  ;;  %v7536_v42 = vld [vmem:[#allocation11 + $0x338] sm:$0xff] }
 0x741   : > { %8550 = vmatpush3.msra.mxu1 %v7472_v27  ;;  %v7550_v27 = vld [vmem:[#allocation11 + $0x3a8] sm:$0xff] }
 0x742   : > { %8551 = vmatprep.subr.mxu1 %v7487_v41  ;;  %v7549_v41 = vld [vmem:[#allocation11 + $0x3a0] sm:$0xff] }
 0x743   : > { %8552 = vmatpush3.msra.mxu1 %v7471_v18  ;;  %v7548_v18 = vld [vmem:[#allocation11 + $0x398] sm:$0xff] }
 0x744   : > { %8553 = vmatprep.subr.mxu1 %v7486_v23  ;;  %v7546_v23 = vld [vmem:[#allocation11 + $0x388] sm:$0xff] }
 0x745   : > { %8554 = vmatpush3.msra.mxu1 %v7470_v24  ;;  %v7545_v24 = vld [vmem:[#allocation11 + $0x380] sm:$0xff] }
 0x746   : > { %8555 = vmatprep.subr.mxu1 %v7485_v5  ;;  %v7529_v5 = vld [vmem:[#allocation11 + $0x300] sm:$0xff] }
 0x747   : > { %8556 = vmatpush3.msra.mxu1 %v7469_v47  ;;  %v5992_v47 = vrot.slane %v14540_v21, %v15911_v50 }
 0x748   : > { %8557 = vmatprep.subr.mxu1 %v7484_v60 }
 0x749   : > { %8558 = vmatpush3.msra.mxu1 %v7468_v40 }
 0x74a   : > { %8559 = vmatprep.subr.mxu1 %v7483_v29 }
 0x74b   : > { %8560 = vmatpush3.msra.mxu1 %v7467_v22  ;;  %v7065_v37 = vpop.f32.mrf.mxu1  ;;  %v7136_v61 = vpop.f32.mrf.mxu0 }
 0x74c   : > { %8561 = vmatprep.subr.mxu1 %v7482_v8  ;;  %v7066_v56 = vadd.f32 %v7065_v37, %v6995_v19  ;;  %v7137_v60 = vadd.f32 %v7136_v61, %v5992_v47 }
 0x74d   : > { %8562 = vmatpush3.msra.mxu1 %v7466_v45  ;;  %v7067_v36 = vpop.f32.mrf.mxu1  ;;  %v7138_v31 = vpop.f32.mrf.mxu0 }
 0x74e   : > { %8563 = vmatprep.subr.mxu1 %v7481_v9  ;;  %v7068_v48 = vadd.f32 %v7067_v36, %v6997_v17  ;;  %v7429_v15 = vmax.f32 %v7066_v56, 0.0  ;;  %v7139_v40 = vadd.f32 %v7138_v31, %v5996_v62 }
 0x74f   : > { %8564 = vmatpush3.msra.mxu1 %v7465_v11 }
 0x750   : > { %7697 = vmatmul.mubr.f32.vlgmr.msra.gmra.mxu1 %v7427_v10  ;;  %v7430_v53 = vmax.f32 %v7068_v48, 0.0  ;;  %8603 = vmatprep.subr.mxu1 %v7560_v20  ;;  %v7561_v48 = vld [vmem:[#allocation12] sm:$0x1] }
 0x751   : > { %8604 = vmatpush3.msra.mxu1 %v7544_v54 }
 0x752   : > { %7766 = vmatprep.mubr.f32.mxu0 %v7430_v53  ;;  %8605 = vmatprep.subr.mxu1 %v7559_v63 }
 0x753   : > { %7767 = vmatmul.mubr.f32.vlgmr.msra.gmra.mxu0 %v7429_v15  ;;  %8606 = vmatpush3.msra.mxu1 %v7543_v59 }
 0x754   : > { %8607 = vmatprep.subr.mxu1 %v7558_v55 }
 0x755   : > { %8608 = vmatpush3.msra.mxu1 %v7542_v1 }
 0x756   : > { %8609 = vmatprep.subr.mxu1 %v7557_v32 }
 0x757   : > { %8610 = vmatpush3.msra.mxu1 %v7541_v38 }
 0x758   : > { %8611 = vmatprep.subr.mxu1 %v7556_v12 }
 0x759   : > { %8612 = vmatpush3.msra.mxu1 %v7540_v46 }
 0x75a   : > { %8613 = vmatprep.subr.mxu1 %v7555_v2 }
 0x75b   : > { %8614 = vmatpush3.msra.mxu1 %v7539_v58 }
 0x75c   : > { %8615 = vmatprep.subr.mxu1 %v7554_v6 }
 0x75d   : > { %8616 = vmatpush3.msra.mxu1 %v7538_v35 }
 0x75e   : > { %8617 = vmatprep.subr.mxu1 %v7553_v3 }
 0x75f   : > { %8618 = vmatpush3.msra.mxu1 %v7537_v30 }
 0x760   : > { %8619 = vmatprep.subr.mxu1 %v7552_v28 }
 0x761   : > { %8620 = vmatpush3.msra.mxu1 %v7536_v42 }
 0x762   : > { %8621 = vmatprep.subr.mxu1 %v7551_v49 }
 0x763   : > { %8622 = vmatpush3.msra.mxu1 %v7535_v25 }
 0x764   : > { %8623 = vmatprep.subr.mxu1 %v7550_v27 }
 0x765   : > { %8624 = vmatpush3.msra.mxu1 %v7534_v0 }
 0x766   : > { %8625 = vmatprep.subr.mxu1 %v7549_v41 }
 0x767   : > { %8626 = vmatpush3.msra.mxu1 %v7533_v39 }
 0x768   : > { %8627 = vmatprep.subr.mxu1 %v7548_v18 }
 0x769   : > { %8628 = vmatpush3.msra.mxu1 %v7532_v51 }
 0x76a   : > { %8629 = vmatprep.subr.mxu1 %v7547_v44 }
 0x76b   : > { %8630 = vmatpush3.msra.mxu1 %v7531_v16 }
 0x76c   : > { %8631 = vmatprep.subr.mxu1 %v7546_v23 }
 0x76d   : > { %8632 = vmatpush3.msra.mxu1 %v7530_v43 }
 0x76e   : > { %8633 = vmatprep.subr.mxu1 %v7545_v24 }
 0x76f   : > { %8634 = vmatpush3.msra.mxu1 %v7529_v5 }
 0x78d   : > { %v7207_v4 = vpop.f32.mrf.mxu1  ;;  %v7278_v52 = vpop.f32.mrf.mxu0 }
 0x78e   : > { %v7208_v13 = vadd.f32 %v7207_v4, %v7137_v60 }
 0x78f   : > { %v7209_v34 = vpop.f32.mrf.mxu1  ;;  %v7280_v29 = vpop.f32.mrf.mxu0 }
 0x790   : > { %v7210_v57 = vadd.f32 %v7209_v34, %v7139_v40  ;;  %v7279_v7 = vadd.f32 %v7278_v52, %v7208_v13 }
 0x792   : > { %v7281_v14 = vadd.f32 %v7280_v29, %v7210_v57 }
 0x7cf   : > { %v7349_v22 = vpop.f32.mrf.mxu1  ;;  %v7420_v8 = vpop.f32.mrf.mxu0 }
 0x7d0   : > { %v7350_v45 = vadd.f32 %v7349_v22, %v7279_v7 }
 0x7d1   : > { %v7351_v19 = vpop.f32.mrf.mxu1  ;;  %v7422_v9 = vpop.f32.mrf.mxu0 }
 0x7d2   : > { %v7352_v33 = vadd.f32 %v7351_v19, %v7281_v14  ;;  %v7421_v50 = vadd.f32 %v7420_v8, %v7350_v45 }
 0x7d4   : > { %v7423_v37 = vadd.f32 %v7422_v9, %v7352_v33  ;;  %v7431_v21 = vmax.f32 %v7421_v50, 0.0 }
 0x7d6   : > { %v7432_v26 = vmax.f32 %v7423_v37, 0.0 }
 0x7d8   : > { %7836 = vmatprep.mubr.f32.mxu1 %v7432_v26 }
 0x7d9   : > { %7837 = vmatmul.mubr.f32.vlgmr.msra.gmra.mxu1 %v7431_v21 }
 0x7f0   : > { %v8530_v17 = vpop.f32.mrf.mxu1 }
 0x7f2   : > { %v8531_v11 = vpop.f32.mrf.mxu1 }
 0x7f3   : > { %v8532_v10 = vadd.f32 %v8531_v11, %v8530_v17 }
 0x7f5   : > { %v7629_v53 = vadd.f32 %v8532_v10, %v7561_v48 }
 0x810   : > { %v8565_v56 = vpop.f32.mrf.mxu1 }
 0x812   : > { %v8566_v20 = vpop.f32.mrf.mxu1 }
 0x813   : > { %v8600_v36 = vpop.f32.mrf.mxu0  ;;  %v8567_v63 = vadd.f32 %v8566_v20, %v8565_v56 }
 0x815   : > { %v8601_v54 = vpop.f32.mrf.mxu0  ;;  %v7699_v55 = vadd.f32 %v8567_v63, %v7629_v53 }
 0x816   : > { %v8602_v59 = vadd.f32 %v8601_v54, %v8600_v36 }
 0x818   : > { %v7769_v32 = vadd.f32 %v8602_v59, %v7699_v55 }
 0x899   : > { %v8635_v15 = vpop.f32.mrf.mxu1 }
 0x89b   : > { %v8636_v1 = vpop.f32.mrf.mxu1 }
 0x89c   : > { %v8637_v38 = vadd.f32 %v8636_v1, %v8635_v15 }
 0x89e   : > { %v7839_v12 = vadd.f32 %v8637_v38, %v7769_v32 }
 0x8a0   : > { %7842 = vst [vmem:[%s373_s20] sm:$0x1] %v7839_v12 }
 0x8a1   : > { %10217 = shalt.err (!%p10214_p3)
}
 0x8a2   : > { %s10218_s2 = scalar_lea.hbm %s7854_s19, 16  ;;  %s10222_s22 = scalar_lea.hbm %s14634_s7, 32 }
 0x8a3   : > { %p10219_p8 = scmp.ne.s32.totalorder %s7854_s19, %s10218_s2  ;;  %p10223_p4 = scmp.lt.s32.totalorder %s7854_s19, %s14634_s7 }
 0x8a4   : > { %p10224_p10 = scmp.lt.s32.totalorder %s10222_s22, %s10218_s2 }
 0x8a5   : > { %p10220_p5 = pnand %p10219_p8, %p15912_p6 }
 0x8a6   : > { %p10225_p13 = por %p10224_p10, %p10223_p4 }
 0x8a7   : > { %p10221_p11 = pneg %p10220_p5 }
 0x8a9   : > { %p10226_p0 = pnand %p10225_p13, %p10221_p11 }
 0x8ab   : > { %10229 = shalt.err (!%p10226_p0)
}
 0x8ac   : > { %8662 = dma.vmem_to_hbm [thread:$0]  (%p15912_p6), %s7857_s18, 16, %s7854_s19, %s7844_s8  }
 0x8ad PF: > { %p8699_p7 = scmp.ge.s32.totalorder %s10296_s29, 2  ;;  %s7868_s20 = sand.u32 1, %s10276_s24  }
 0x8ae   : > { %p15913_p9 = scmp.ne.s32.totalorder %s14888_s13, 0  ;;  %s7869_s30 = scalar_lea.sflag [#allocation5], %s7868_s20 }
 0x8b0   : > { %p8684_p12 = pnand %p8699_p7, %p15913_p9 }
 0x8b2   : > { %p8685_p1 = pneg %p8684_p12 }
 0x8b4   : > { %10271 = dma.done.wait (%p8685_p1), %s7869_s30, 16  }
 0x8b5   : > { %10273 = vsyncadd (%p8685_p1), %s7869_s30, 4294967280  ;;  %s24_s29 = sadd.s32 1, %s10296_s29   ;;  %s15914_s24 = smov %s10280_s25 }
 0x8b6   : > { %p21_p2 = scmp.ge.s32.totalorder %s24_s29, 4   ;;  %s15915_s25 = smov %s10284_s26 }
 0x8b7   : > { %s15916_s26 = smov %s10405_s14  ;;  %s15917_s27 = smov %s10292_s28 }
 0x8b8   : > { %s15918_s28 = smov %s15920_s9  ;;  %23 = sbr.rel (!%p21_p2) target bundleno = 11 (0xb), region = 116 }
 0x8bd   :  { %7873 = vsyncpa [#allocation4], 1 }
 0x8be   :  { %7875 = vsyncpa [#allocation4 + $0x1], 1 }
 0x8bf   :  { %7876 = vsyncpa [#allocation7], 1 }
 0x8c0   :  { %7877 = vsyncpa [#allocation10], 1 }
 0x8c1   :  { %7878 = vsyncpa [#allocation13], 1 }
 0x8c2   :  { %7879 = vsyncpa [#allocation5], 1 }
 0x8c3   :  { %7881 = vsyncpa [#allocation5 + $0x1], 1 }

</bundles_post_ra>
